<compile_context>
chip_gen: v7x
topology: tpu7x:2x2x1
jax: 0.10.0
libtpu: 0.0.40
codegen_flags: <defaults>
</compile_context>

<pallas_src>
import jax
import jax.numpy as jnp
from jax.experimental import pallas as pl
from jax.experimental.pallas import tpu as pltpu


_VMEM_LIMIT = 48 * 1024 * 1024

# Architecture-fixed spatial geometry: the Linear head expects nf4*28*28
# features (28x28 after two stride-2 layers), which forces 112x112 inputs.
_H0 = 112   # layer0 output spatial size (== input size)
_H1 = 56    # layer1 output spatial size
_H2 = 28    # layer2/3/4 output spatial size

# Physical VMEM activation-buffer geometry.  Data always starts at column 8 so
# every repeated row-group store is (8,128)-tile aligned; left/right zero pad
# is part of the same aligned store.  Physical col = semantic padded col + COL0.
_A0_H, _A0_W, _A0_ROW0, _A0_COL0 = _H0 + 4, 128, 1, 7   # after F.pad(1,3,1,3)
_A1_H, _A1_W, _A1_ROW0, _A1_COL0 = _H1 + 4, 72, 1, 7    # after F.pad(1,3,1,3)
_A2_H, _A2_W, _A2_ROW0, _A2_COL0 = _H2 + 4, 40, 2, 6    # 'same' pad 2
_DW_W = 32   # padded width of the 28-wide depthwise scratch buffers

# Row-group sizes for the pointwise matmuls: M = R * W ~= 224 per jnp.dot.
_R0, _R1, _R2 = 2, 4, 7


def _rup128(c):
    return ((c + 127) // 128) * 128


# ------------------------------ fused kernel --------------------------------

def _fused_kernel(xs_ref, w0_ref, t0_ref,
                  dw1_ref, pw1_ref, t1_ref,
                  dw2_ref, pw2_ref, t2_ref,
                  dw3_ref, pw3_ref, t3_ref,
                  dw4_ref, pw4_ref, t4_ref,
                  wl_ref, bl_ref,
                  o_ref,
                  a0, d1, a1, d2, a2, d3, a3, d4):
    f32 = jnp.float32
    C = a0.shape[-1]
    K0 = xs_ref.shape[-1]

    # ---- zero the top/bottom spatial padding rows + scratch pad columns ----
    a0[0:_A0_ROW0] = jnp.zeros((_A0_ROW0, _A0_W, C), f32)
    a0[_A0_ROW0 + _H0:_A0_H] = jnp.zeros((_A0_H - _A0_ROW0 - _H0, _A0_W, C), f32)
    a1[0:_A1_ROW0] = jnp.zeros((_A1_ROW0, _A1_W, C), f32)
    a1[_A1_ROW0 + _H1:_A1_H] = jnp.zeros((_A1_H - _A1_ROW0 - _H1, _A1_W, C), f32)
    for buf in (a2, a3):
        buf[0:_A2_ROW0] = jnp.zeros((_A2_ROW0, _A2_W, C), f32)
        buf[_A2_ROW0 + _H2:_A2_H] = jnp.zeros((_A2_H - _A2_ROW0 - _H2, _A2_W, C), f32)
    for buf in (d2, d3, d4):
        buf[:, _H2:_DW_W, :] = jnp.zeros((_H2, _DW_W - _H2, C), f32)

    # ------------------------------ helpers ---------------------------------
    def depthwise_s2(src, dw, dst, ho, wo, col0):
        """Depthwise 5x5, stride 2, VALID over the pre-padded src buffer."""
        def row(i, c):
            acc = jnp.zeros((wo, C), f32)
            for dy in range(5):
                r = 2 * i + dy
                # Deinterleave the row once: 2 strided reads per (row, dy)
                # instead of 5, then cheap static slices for dx.
                ev = src[r, pl.ds(col0, wo + 2, 2), :]       # semantic even cols
                od = src[r, pl.ds(col0 + 1, wo + 1, 2), :]   # semantic odd cols
                segs = (ev[0:wo], od[0:wo], ev[1:wo + 1], od[1:wo + 1],
                        ev[2:wo + 2])
                for dx in range(5):
                    acc = acc + segs[dx] * dw[5 * dy + dx]
            dst[i, 0:wo, :] = acc
            return c
        jax.lax.fori_loop(0, ho, row, 0)

    def depthwise_s1(src, dw, dst, ho, wo, col0):
        """Depthwise 5x5, stride 1 ('same' via the pre-padded src buffer)."""
        def row(i, c):
            acc = jnp.zeros((wo, C), f32)
            for dy in range(5):
                r = i + dy
                for dx in range(5):
                    seg = src[r, col0 + dx:col0 + dx + wo, :]
                    acc = acc + seg * dw[5 * dy + dx]
            dst[i, 0:wo, :] = acc
            return c
        jax.lax.fori_loop(0, ho, row, 0)

    def pointwise_store(dacc, pw, t, out, r_rows, wd, wo, n_groups,
                        row0, lpad, rpad):
        """Row-grouped 1x1 conv (+ folded-BN shift + ReLU), stored pre-padded."""
        zl = jnp.zeros((r_rows, lpad, C), f32)
        zr = jnp.zeros((r_rows, rpad, C), f32)

        def group(g, c):
            d = dacc[pl.ds(g * r_rows, r_rows)]                  # (R, wd, C)
            y = jnp.dot(d.reshape(r_rows * wd, C), pw[...],
                        preferred_element_type=f32)
            y = jnp.maximum(y + t[...], 0.0)
            y = y.reshape(r_rows, wd, C)[:, 0:wo, :]
            out[pl.ds(row0 + g * r_rows, r_rows)] = jnp.concatenate(
                [zl, y, zr], axis=1)
            return c
        jax.lax.fori_loop(0, n_groups, group, 0)

    # ---- layer0: dense 5x5 conv (im2col, K=75) + folded BN + ReLU ----------
    zl0 = jnp.zeros((_R0, 8, C), f32)
    zr0 = jnp.zeros((_R0, _A0_W - 8 - _H0, C), f32)

    def l0_group(g, c):
        patches = xs_ref[pl.ds(g * _R0, _R0)]                    # (R0, 112, 75)
        y = jnp.dot(patches.reshape(_R0 * _H0, K0), w0_ref[...],
                    preferred_element_type=f32)
        y = jnp.maximum(y + t0_ref[...], 0.0).reshape(_R0, _H0, C)
        a0[pl.ds(_A0_ROW0 + g * _R0, _R0)] = jnp.concatenate([zl0, y, zr0],
                                                             axis=1)
        return c
    jax.lax.fori_loop(0, _H0 // _R0, l0_group, 0)

    # ---- layer1: depthwise s=2 + pointwise + BN + ReLU ----------------------
    depthwise_s2(a0, dw1_ref, d1, _H1, _H1, _A0_COL0)
    pointwise_store(d1, pw1_ref, t1_ref, a1, _R1, _H1, _H1, _H1 // _R1,
                    _A1_ROW0, 8, _A1_W - 8 - _H1)

    # ---- layer2: depthwise s=2 + pointwise + BN + ReLU ----------------------
    depthwise_s2(a1, dw2_ref, d2, _H2, _H2, _A1_COL0)
    pointwise_store(d2, pw2_ref, t2_ref, a2, _R2, _DW_W, _H2, _H2 // _R2,
                    _A2_ROW0, 8, _A2_W - 8 - _H2)

    # ---- layer3: depthwise s=1 'same' + pointwise + BN + ReLU ---------------
    depthwise_s1(a2, dw3_ref, d3, _H2, _H2, _A2_COL0)
    pointwise_store(d3, pw3_ref, t3_ref, a3, _R2, _DW_W, _H2, _H2 // _R2,
                    _A2_ROW0, 8, _A2_W - 8 - _H2)

    # ---- layer4: depthwise s=1 'same' + pointwise + BN + ReLU + Linear head -
    depthwise_s1(a3, dw4_ref, d4, _H2, _H2, _A2_COL0)

    def head_group(g, acc_vec):
        d = d4[pl.ds(g * _R2, _R2)]                               # (R2, 32, C)
        y = jnp.dot(d.reshape(_R2 * _DW_W, C), pw4_ref[...],
                    preferred_element_type=f32)
        y = jnp.maximum(y + t4_ref[...], 0.0)
        y = y.reshape(_R2, _DW_W, C)[:, 0:_H2, :]
        return acc_vec + jnp.sum(y * wl_ref[pl.ds(g * _R2, _R2)], axis=0)

    acc_vec = jax.lax.fori_loop(0, _H2 // _R2, head_group,
                                jnp.zeros((_H2, C), jnp.float32))
    o_ref[...] = jnp.sum(acc_vec).reshape(1, 1) + bl_ref[...]


# -------------------------------- wrapper ------------------------------------

def _weight_spec(shape):
    zeros = (0,) * len(shape)
    return pl.BlockSpec(shape, lambda n, _z=zeros: _z)


def fused_forward(xs, p):
    N, H, W, K = xs.shape
    assert H == _H0 and W == _H0, "architecture requires 112x112 inputs"
    C = p['w0'].shape[-1]
    assert all(p[k].shape[-1] == C for k in ('t0', 'pw1', 'pw2', 'pw3', 'pw4')), \
        "all (padded) channel counts must match"

    in_arrays = (xs, p['w0'], p['t0'],
                 p['dw1'], p['pw1'], p['t1'],
                 p['dw2'], p['pw2'], p['t2'],
                 p['dw3'], p['pw3'], p['t3'],
                 p['dw4'], p['pw4'], p['t4'],
                 p['wl'], p['bl'])
    in_specs = [pl.BlockSpec((None, H, W, K), lambda n: (n, 0, 0, 0))]
    in_specs += [_weight_spec(a.shape) for a in in_arrays[1:]]

    grid_spec = pltpu.PrefetchScalarGridSpec(
        num_scalar_prefetch=0,
        grid=(N,),
        in_specs=in_specs,
        out_specs=pl.BlockSpec((None, 1, 1), lambda n: (n, 0, 0)),
        scratch_shapes=[
            pltpu.VMEM((_A0_H, _A0_W, C), jnp.float32),   # a0 (padded l0 out)
            pltpu.VMEM((_H1, _H1, C), jnp.float32),       # d1 (l1 depthwise)
            pltpu.VMEM((_A1_H, _A1_W, C), jnp.float32),   # a1 (padded l1 out)
            pltpu.VMEM((_H2, _DW_W, C), jnp.float32),     # d2
            pltpu.VMEM((_A2_H, _A2_W, C), jnp.float32),   # a2 (padded l2 out)
            pltpu.VMEM((_H2, _DW_W, C), jnp.float32),     # d3
            pltpu.VMEM((_A2_H, _A2_W, C), jnp.float32),   # a3 (padded l3 out)
            pltpu.VMEM((_H2, _DW_W, C), jnp.float32),     # d4
        ],
    )
    return pl.pallas_call(
        _fused_kernel,
        out_shape=jax.ShapeDtypeStruct((N, 1, 1), jnp.float32),
        grid_spec=grid_spec,
        compiler_params=pltpu.CompilerParams(
            dimension_semantics=("parallel",),
            vmem_limit_bytes=_VMEM_LIMIT),
    )(*in_arrays)


# ------------------------------ parameters -----------------------------------

def init_params(key, nf):
    keys = iter(jax.random.split(key, 64))

    def nrm(shape, s=0.1):
        return s * jax.random.normal(next(keys), shape, jnp.float32)

    def uni(shape, lo=0.5, hi=1.5):
        return jax.random.uniform(next(keys), shape, jnp.float32, lo, hi)

    def fold_bn(bias, c, eps=1e-5):
        gamma, beta, mean, var = uni((c,)), nrm((c,)), nrm((c,)), uni((c,))
        scale = gamma / jnp.sqrt(var + eps)
        shift = (bias - mean) * scale + beta
        return scale, shift

    p = {}
    c0 = nf[0]
    c0p = _rup128(c0)
    # layer0: torch weight (C0,3,5,5) -> (5,5,3,C0) -> (75, C0); BN scale folded.
    w0 = nrm((5, 5, 3, c0)).reshape(75, c0)
    b0 = nrm((c0,))
    s0, t0 = fold_bn(b0, c0)
    w0 = w0 * s0[None, :]
    p['w0'] = jnp.pad(w0, ((0, 0), (0, c0p - c0)))
    p['t0'] = jnp.pad(t0, (0, c0p - c0)).reshape(1, c0p)

    prev, prevp = c0, c0p
    for li in range(1, 5):
        c = nf[li]
        cp = _rup128(c)
        dw = nrm((25, 1, prev))            # torch (prev,1,5,5) -> (5,5,1,prev) -> (25,1,prev)
        p[f'dw{li}'] = jnp.pad(dw, ((0, 0), (0, 0), (0, prevp - prev)))
        pw = nrm((prev, c))                # torch (c, prev, 1, 1) -> (prev, c)
        bias = nrm((c,))
        s, t = fold_bn(bias, c)
        p[f'pw{li}'] = jnp.pad(pw * s[None, :], ((0, prevp - prev), (0, cp - c)))
        p[f't{li}'] = jnp.pad(t, (0, cp - c)).reshape(1, cp)
        prev, prevp = c, cp

    # Linear head over the (H, W, C) flatten order (the model permutes to NHWC
    # before Flatten).  For real checkpoints: reshape torch (1, C*784) ->
    # (28, 28, C) in that same (h, w, c) order.
    wl = nrm((28, 28, nf[4]), s=0.05)
    p['wl'] = jnp.pad(wl, ((0, 0), (0, 0), (0, prevp - nf[4])))
    p['bl'] = nrm((1, 1), s=0.05)
    return p


# -------------------------------- forward ------------------------------------

@jax.jit
def compact_model_forward(x_nchw, p):
    x = jnp.transpose(x_nchw, (0, 2, 3, 1))                     # NCHW -> NHWC
    N, H, W, _ = x.shape
    # 'same' pad (2,2,2,2) for layer0, then full 5x5x3 im2col (K=75, ordering
    # dy,dx,c) so layer0 is one well-fed MXU matmul per row group in the kernel.
    xp = jnp.pad(x, ((0, 0), (2, 2), (2, 2), (0, 0)))
    xs = jnp.concatenate(
        [xp[:, dy:dy + H, dx:dx + W, :] for dy in range(5) for dx in range(5)],
        axis=-1)                                                # (N, H, W, 75)
    out = fused_forward(xs, p)
    return out.reshape(N, 1)


if __name__ == "__main__":
    # nums_filters reduced from [100]*5 to keep the demo small (channels are
    # zero-padded to 128 lanes inside the kernel either way).
    nums_filters = [8, 8, 8, 8, 8]
    key = jax.random.PRNGKey(0)
    kx, kp = jax.random.split(key)
    # Spatial size 112 is forced by the architecture: the Linear head expects
    # nums_filters[4] * 28 * 28 features (28x28 after two stride-2 layers).
    x = jax.random.normal(kx, (2, 3, 112, 112), jnp.float32)    # NCHW like PyTorch
    params = init_params(kp, nums_filters)

    y = compact_model_forward(x, params)
    y = jax.block_until_ready(y)

    assert y.shape == (2, 1), y.shape
    assert bool(jnp.all(jnp.isfinite(y)))
    print("KERNEL_OK")
</pallas_src>

<mosaic_0001>
module attributes {stable_mosaic.version = 11 : i64} {
  func.func @_fused_kernel(%arg0: i32, %arg1: memref<1x112x112x75xf32, #tpu.memory_space<vmem>>, %arg2: memref<75x128xf32, #tpu.memory_space<vmem>>, %arg3: memref<1x128xf32, #tpu.memory_space<vmem>>, %arg4: memref<25x1x128xf32, #tpu.memory_space<vmem>>, %arg5: memref<128x128xf32, #tpu.memory_space<vmem>>, %arg6: memref<1x128xf32, #tpu.memory_space<vmem>>, %arg7: memref<25x1x128xf32, #tpu.memory_space<vmem>>, %arg8: memref<128x128xf32, #tpu.memory_space<vmem>>, %arg9: memref<1x128xf32, #tpu.memory_space<vmem>>, %arg10: memref<25x1x128xf32, #tpu.memory_space<vmem>>, %arg11: memref<128x128xf32, #tpu.memory_space<vmem>>, %arg12: memref<1x128xf32, #tpu.memory_space<vmem>>, %arg13: memref<25x1x128xf32, #tpu.memory_space<vmem>>, %arg14: memref<128x128xf32, #tpu.memory_space<vmem>>, %arg15: memref<1x128xf32, #tpu.memory_space<vmem>>, %arg16: memref<28x28x128xf32, #tpu.memory_space<vmem>>, %arg17: memref<1x1xf32, #tpu.memory_space<vmem>>, %arg18: memref<1x1x1xf32, #tpu.memory_space<vmem>>, %arg19: memref<116x128x128xf32, #tpu.memory_space<vmem>>, %arg20: memref<56x56x128xf32, #tpu.memory_space<vmem>>, %arg21: memref<60x72x128xf32, #tpu.memory_space<vmem>>, %arg22: memref<28x32x128xf32, #tpu.memory_space<vmem>>, %arg23: memref<32x40x128xf32, #tpu.memory_space<vmem>>, %arg24: memref<28x32x128xf32, #tpu.memory_space<vmem>>, %arg25: memref<32x40x128xf32, #tpu.memory_space<vmem>>, %arg26: memref<28x32x128xf32, #tpu.memory_space<vmem>>) attributes {dimension_semantics = [#tpu.dimension_semantics<parallel>], iteration_bounds = array<i64: 2>, scalar_prefetch = 0 : i64, scratch_operands = 8 : i64, tpu.core_type = #tpu.core_type<tc>, window_params = [{transform_indices = @transform_0, window_bounds = array<i64: 1, 112, 112, 75>}, {pipeline_mode = #tpu.pipeline_mode<synchronous>, transform_indices = @transform_1, window_bounds = array<i64: 75, 128>}, {pipeline_mode = #tpu.pipeline_mode<synchronous>, transform_indices = @transform_2, window_bounds = array<i64: 1, 128>}, {pipeline_mode = #tpu.pipeline_mode<synchronous>, transform_indices = @transform_3, window_bounds = array<i64: 25, 1, 128>}, {pipeline_mode = #tpu.pipeline_mode<synchronous>, transform_indices = @transform_4, window_bounds = array<i64: 128, 128>}, {pipeline_mode = #tpu.pipeline_mode<synchronous>, transform_indices = @transform_5, window_bounds = array<i64: 1, 128>}, {pipeline_mode = #tpu.pipeline_mode<synchronous>, transform_indices = @transform_6, window_bounds = array<i64: 25, 1, 128>}, {pipeline_mode = #tpu.pipeline_mode<synchronous>, transform_indices = @transform_7, window_bounds = array<i64: 128, 128>}, {pipeline_mode = #tpu.pipeline_mode<synchronous>, transform_indices = @transform_8, window_bounds = array<i64: 1, 128>}, {pipeline_mode = #tpu.pipeline_mode<synchronous>, transform_indices = @transform_9, window_bounds = array<i64: 25, 1, 128>}, {pipeline_mode = #tpu.pipeline_mode<synchronous>, transform_indices = @transform_10, window_bounds = array<i64: 128, 128>}, {pipeline_mode = #tpu.pipeline_mode<synchronous>, transform_indices = @transform_11, window_bounds = array<i64: 1, 128>}, {pipeline_mode = #tpu.pipeline_mode<synchronous>, transform_indices = @transform_12, window_bounds = array<i64: 25, 1, 128>}, {pipeline_mode = #tpu.pipeline_mode<synchronous>, transform_indices = @transform_13, window_bounds = array<i64: 128, 128>}, {pipeline_mode = #tpu.pipeline_mode<synchronous>, transform_indices = @transform_14, window_bounds = array<i64: 1, 128>}, {pipeline_mode = #tpu.pipeline_mode<synchronous>, transform_indices = @transform_15, window_bounds = array<i64: 28, 28, 128>}, {pipeline_mode = #tpu.pipeline_mode<synchronous>, transform_indices = @transform_16, window_bounds = array<i64: 1, 1>}, {transform_indices = @transform_17, window_bounds = array<i64: 1, 1, 1>}]} {
    %cst = arith.constant 0.000000e+00 : f32
    %0 = vector.broadcast %cst : f32 to vector<1x128x128xf32>
    %c0 = arith.constant 0 : index
    %c0_0 = arith.constant 0 : index
    %c0_1 = arith.constant 0 : index
    %1 = vector.load %arg19[%c0, %c0_0, %c0_1] : memref<116x128x128xf32, #tpu.memory_space<vmem>>, vector<1x128x128xf32>
    tpu.vector_store %arg19[%c0, %c0_0, %c0_1], %0 {strides = array<i32>} : memref<116x128x128xf32, #tpu.memory_space<vmem>>, vector<1x128x128xf32>,
    %cst_2 = arith.constant 0.000000e+00 : f32
    %2 = vector.broadcast %cst_2 : f32 to vector<3x128x128xf32>
    %c113 = arith.constant 113 : index
    %c0_3 = arith.constant 0 : index
    %c0_4 = arith.constant 0 : index
    %3 = vector.load %arg19[%c113, %c0_3, %c0_4] : memref<116x128x128xf32, #tpu.memory_space<vmem>>, vector<3x128x128xf32>
    tpu.vector_store %arg19[%c113, %c0_3, %c0_4], %2 {strides = array<i32>} : memref<116x128x128xf32, #tpu.memory_space<vmem>>, vector<3x128x128xf32>,
    %cst_5 = arith.constant 0.000000e+00 : f32
    %4 = vector.broadcast %cst_5 : f32 to vector<1x72x128xf32>
    %c0_6 = arith.constant 0 : index
    %c0_7 = arith.constant 0 : index
    %c0_8 = arith.constant 0 : index
    %5 = vector.load %arg21[%c0_6, %c0_7, %c0_8] : memref<60x72x128xf32, #tpu.memory_space<vmem>>, vector<1x72x128xf32>
    tpu.vector_store %arg21[%c0_6, %c0_7, %c0_8], %4 {strides = array<i32>} : memref<60x72x128xf32, #tpu.memory_space<vmem>>, vector<1x72x128xf32>,
    %cst_9 = arith.constant 0.000000e+00 : f32
    %6 = vector.broadcast %cst_9 : f32 to vector<3x72x128xf32>
    %c57 = arith.constant 57 : index
    %c0_10 = arith.constant 0 : index
    %c0_11 = arith.constant 0 : index
    %7 = vector.load %arg21[%c57, %c0_10, %c0_11] : memref<60x72x128xf32, #tpu.memory_space<vmem>>, vector<3x72x128xf32>
    tpu.vector_store %arg21[%c57, %c0_10, %c0_11], %6 {strides = array<i32>} : memref<60x72x128xf32, #tpu.memory_space<vmem>>, vector<3x72x128xf32>,
    %cst_12 = arith.constant 0.000000e+00 : f32
    %8 = vector.broadcast %cst_12 : f32 to vector<2x40x128xf32>
    %c0_13 = arith.constant 0 : index
    %c0_14 = arith.constant 0 : index
    %c0_15 = arith.constant 0 : index
    %9 = vector.load %arg23[%c0_13, %c0_14, %c0_15] : memref<32x40x128xf32, #tpu.memory_space<vmem>>, vector<2x40x128xf32>
    tpu.vector_store %arg23[%c0_13, %c0_14, %c0_15], %8 {strides = array<i32>} : memref<32x40x128xf32, #tpu.memory_space<vmem>>, vector<2x40x128xf32>,
    %cst_16 = arith.constant 0.000000e+00 : f32
    %10 = vector.broadcast %cst_16 : f32 to vector<2x40x128xf32>
    %c30 = arith.constant 30 : index
    %c0_17 = arith.constant 0 : index
    %c0_18 = arith.constant 0 : index
    %11 = vector.load %arg23[%c30, %c0_17, %c0_18] : memref<32x40x128xf32, #tpu.memory_space<vmem>>, vector<2x40x128xf32>
    tpu.vector_store %arg23[%c30, %c0_17, %c0_18], %10 {strides = array<i32>} : memref<32x40x128xf32, #tpu.memory_space<vmem>>, vector<2x40x128xf32>,
    %cst_19 = arith.constant 0.000000e+00 : f32
    %12 = vector.broadcast %cst_19 : f32 to vector<2x40x128xf32>
    %c0_20 = arith.constant 0 : index
    %c0_21 = arith.constant 0 : index
    %c0_22 = arith.constant 0 : index
    %13 = vector.load %arg25[%c0_20, %c0_21, %c0_22] : memref<32x40x128xf32, #tpu.memory_space<vmem>>, vector<2x40x128xf32>
    tpu.vector_store %arg25[%c0_20, %c0_21, %c0_22], %12 {strides = array<i32>} : memref<32x40x128xf32, #tpu.memory_space<vmem>>, vector<2x40x128xf32>,
    %cst_23 = arith.constant 0.000000e+00 : f32
    %14 = vector.broadcast %cst_23 : f32 to vector<2x40x128xf32>
    %c30_24 = arith.constant 30 : index
    %c0_25 = arith.constant 0 : index
    %c0_26 = arith.constant 0 : index
    %15 = vector.load %arg25[%c30_24, %c0_25, %c0_26] : memref<32x40x128xf32, #tpu.memory_space<vmem>>, vector<2x40x128xf32>
    tpu.vector_store %arg25[%c30_24, %c0_25, %c0_26], %14 {strides = array<i32>} : memref<32x40x128xf32, #tpu.memory_space<vmem>>, vector<2x40x128xf32>,
    %cst_27 = arith.constant 0.000000e+00 : f32
    %16 = vector.broadcast %cst_27 : f32 to vector<28x4x128xf32>
    %c0_28 = arith.constant 0 : index
    %c28 = arith.constant 28 : index
    %c0_29 = arith.constant 0 : index
    %17 = vector.load %arg22[%c0_28, %c28, %c0_29] : memref<28x32x128xf32, #tpu.memory_space<vmem>>, vector<28x4x128xf32>
    tpu.vector_store %arg22[%c0_28, %c28, %c0_29], %16 {strides = array<i32>} : memref<28x32x128xf32, #tpu.memory_space<vmem>>, vector<28x4x128xf32>,
    %cst_30 = arith.constant 0.000000e+00 : f32
    %18 = vector.broadcast %cst_30 : f32 to vector<28x4x128xf32>
    %c0_31 = arith.constant 0 : index
    %c28_32 = arith.constant 28 : index
    %c0_33 = arith.constant 0 : index
    %19 = vector.load %arg24[%c0_31, %c28_32, %c0_33] : memref<28x32x128xf32, #tpu.memory_space<vmem>>, vector<28x4x128xf32>
    tpu.vector_store %arg24[%c0_31, %c28_32, %c0_33], %18 {strides = array<i32>} : memref<28x32x128xf32, #tpu.memory_space<vmem>>, vector<28x4x128xf32>,
    %cst_34 = arith.constant 0.000000e+00 : f32
    %20 = vector.broadcast %cst_34 : f32 to vector<28x4x128xf32>
    %c0_35 = arith.constant 0 : index
    %c28_36 = arith.constant 28 : index
    %c0_37 = arith.constant 0 : index
    %21 = vector.load %arg26[%c0_35, %c28_36, %c0_37] : memref<28x32x128xf32, #tpu.memory_space<vmem>>, vector<28x4x128xf32>
    tpu.vector_store %arg26[%c0_35, %c28_36, %c0_37], %20 {strides = array<i32>} : memref<28x32x128xf32, #tpu.memory_space<vmem>>, vector<28x4x128xf32>,
    %cst_38 = arith.constant 0.000000e+00 : f32
    %22 = vector.broadcast %cst_38 : f32 to vector<2x8x128xf32>
    %cst_39 = arith.constant 0.000000e+00 : f32
    %23 = vector.broadcast %cst_39 : f32 to vector<2x8x128xf32>
    %c0_i32 = arith.constant 0 : i32
    %c56_i32 = arith.constant 56 : i32
    %24 = arith.addi %c0_i32, %c56_i32 : i32
    %c1_i32 = arith.constant 1 : i32
    scf.for %arg27 = %c0_i32 to %24 step %c1_i32  : i32 {
      %c2_i32 = arith.constant 2 : i32
      %51 = arith.muli %arg27, %c2_i32 : i32
      %c0_83 = arith.constant 0 : index
      %52 = arith.index_cast %51 : i32 to index
      %c0_84 = arith.constant 0 : index
      %c0_85 = arith.constant 0 : index
      %53 = vector.load %arg1[%c0_83, %52, %c0_84, %c0_85] : memref<1x112x112x75xf32, #tpu.memory_space<vmem>>, vector<1x2x112x75xf32>
      %54 = vector.shape_cast %53 : vector<1x2x112x75xf32> to vector<2x112x75xf32>
      %55 = vector.shape_cast %54 : vector<2x112x75xf32> to vector<224x75xf32>
      %c0_86 = arith.constant 0 : index
      %c0_87 = arith.constant 0 : index
      %56 = vector.load %arg2[%c0_86, %c0_87] : memref<75x128xf32, #tpu.memory_space<vmem>>, vector<75x128xf32>
      %cst_88 = arith.constant dense<0.000000e+00> : vector<224x128xf32>
      %57 = tpu.matmul %55, %56, %cst_88 {dimension_numbers = #tpu.dot_dimension_numbers<[1], [0], [0], [1], [0, 0, 1, 1], [], []>} : vector<224x75xf32>, vector<75x128xf32>, vector<224x128xf32> -> vector<224x128xf32>
      %c0_89 = arith.constant 0 : index
      %c0_90 = arith.constant 0 : index
      %58 = vector.load %arg3[%c0_89, %c0_90] : memref<1x128xf32, #tpu.memory_space<vmem>>, vector<1x128xf32>
      %59 = vector.broadcast %58 : vector<1x128xf32> to vector<224x128xf32>
      %60 = arith.addf %57, %59 : vector<224x128xf32>
      %cst_91 = arith.constant 0.000000e+00 : f32
      %61 = vector.broadcast %cst_91 : f32 to vector<224x128xf32>
      %62 = arith.maximumf %60, %61 : vector<224x128xf32>
      %63 = vector.shape_cast %62 : vector<224x128xf32> to vector<2x112x128xf32>
      %64 = tpu.concatenate %22, %63, %23 in 1 : vector<2x8x128xf32>, vector<2x112x128xf32>, vector<2x8x128xf32> -> vector<2x128x128xf32>
      %c2_i32_92 = arith.constant 2 : i32
      %65 = arith.muli %arg27, %c2_i32_92 : i32
      %c1_i32_93 = arith.constant 1 : i32
      %66 = arith.addi %c1_i32_93, %65 : i32
      %67 = arith.index_cast %66 : i32 to index
      %c0_94 = arith.constant 0 : index
      %c0_95 = arith.constant 0 : index
      %68 = vector.load %arg19[%67, %c0_94, %c0_95] : memref<116x128x128xf32, #tpu.memory_space<vmem>>, vector<2x128x128xf32>
      tpu.vector_store %arg19[%67, %c0_94, %c0_95], %64 {strides = array<i32>} : memref<116x128x128xf32, #tpu.memory_space<vmem>>, vector<2x128x128xf32>,
    }
    %c56_i32_40 = arith.constant 56 : i32
    %c0_i32_41 = arith.constant 0 : i32
    %c56_i32_42 = arith.constant 56 : i32
    %25 = arith.addi %c0_i32_41, %c56_i32_42 : i32
    %c1_i32_43 = arith.constant 1 : i32
    scf.for %arg27 = %c0_i32_41 to %25 step %c1_i32_43  : i32 {
      %cst_83 = arith.constant 0.000000e+00 : f32
      %51 = vector.broadcast %cst_83 : f32 to vector<56x128xf32>
      %c2_i32 = arith.constant 2 : i32
      %52 = arith.muli %c2_i32, %arg27 : i32
      %c0_i32_84 = arith.constant 0 : i32
      %53 = arith.addi %52, %c0_i32_84 : i32
      %54 = arith.index_cast %53 : i32 to index
      %c7 = arith.constant 7 : index
      %c0_85 = arith.constant 0 : index
      %55 = tpu.strided_load %arg19[%54, %c7, %c0_85] {strides = array<i32: 1, 2, 1>} : memref<116x128x128xf32, #tpu.memory_space<vmem>>, vector<1x58x128xf32>
      %56 = vector.shape_cast %55 : vector<1x58x128xf32> to vector<58x128xf32>
      %57 = arith.index_cast %53 : i32 to index
      %c8 = arith.constant 8 : index
      %c0_86 = arith.constant 0 : index
      %58 = tpu.strided_load %arg19[%57, %c8, %c0_86] {strides = array<i32: 1, 2, 1>} : memref<116x128x128xf32, #tpu.memory_space<vmem>>, vector<1x57x128xf32>
      %59 = vector.shape_cast %58 : vector<1x57x128xf32> to vector<57x128xf32>
      %60 = vector.extract_strided_slice %56 {offsets = [0, 0], sizes = [56, 128], strides = [1, 1]} : vector<58x128xf32> to vector<56x128xf32>
      %61 = vector.extract_strided_slice %59 {offsets = [0, 0], sizes = [56, 128], strides = [1, 1]} : vector<57x128xf32> to vector<56x128xf32>
      %62 = vector.extract_strided_slice %56 {offsets = [1, 0], sizes = [56, 128], strides = [1, 1]} : vector<58x128xf32> to vector<56x128xf32>
      %63 = vector.extract_strided_slice %59 {offsets = [1, 0], sizes = [56, 128], strides = [1, 1]} : vector<57x128xf32> to vector<56x128xf32>
      %64 = vector.extract_strided_slice %56 {offsets = [2, 0], sizes = [56, 128], strides = [1, 1]} : vector<58x128xf32> to vector<56x128xf32>
      %c0_87 = arith.constant 0 : index
      %c0_88 = arith.constant 0 : index
      %c0_89 = arith.constant 0 : index
      %65 = vector.load %arg4[%c0_87, %c0_88, %c0_89] : memref<25x1x128xf32, #tpu.memory_space<vmem>>, vector<1x1x128xf32>
      %66 = vector.shape_cast %65 : vector<1x1x128xf32> to vector<1x128xf32>
      %67 = vector.broadcast %66 : vector<1x128xf32> to vector<56x128xf32>
      %68 = arith.mulf %60, %67 : vector<56x128xf32>
      %69 = arith.addf %51, %68 : vector<56x128xf32>
      %c1 = arith.constant 1 : index
      %c0_90 = arith.constant 0 : index
      %c0_91 = arith.constant 0 : index
      %70 = vector.load %arg4[%c1, %c0_90, %c0_91] : memref<25x1x128xf32, #tpu.memory_space<vmem>>, vector<1x1x128xf32>
      %71 = vector.shape_cast %70 : vector<1x1x128xf32> to vector<1x128xf32>
      %72 = vector.broadcast %71 : vector<1x128xf32> to vector<56x128xf32>
      %73 = arith.mulf %61, %72 : vector<56x128xf32>
      %74 = arith.addf %69, %73 : vector<56x128xf32>
      %c2 = arith.constant 2 : index
      %c0_92 = arith.constant 0 : index
      %c0_93 = arith.constant 0 : index
      %75 = vector.load %arg4[%c2, %c0_92, %c0_93] : memref<25x1x128xf32, #tpu.memory_space<vmem>>, vector<1x1x128xf32>
      %76 = vector.shape_cast %75 : vector<1x1x128xf32> to vector<1x128xf32>
      %77 = vector.broadcast %76 : vector<1x128xf32> to vector<56x128xf32>
      %78 = arith.mulf %62, %77 : vector<56x128xf32>
      %79 = arith.addf %74, %78 : vector<56x128xf32>
      %c3 = arith.constant 3 : index
      %c0_94 = arith.constant 0 : index
      %c0_95 = arith.constant 0 : index
      %80 = vector.load %arg4[%c3, %c0_94, %c0_95] : memref<25x1x128xf32, #tpu.memory_space<vmem>>, vector<1x1x128xf32>
      %81 = vector.shape_cast %80 : vector<1x1x128xf32> to vector<1x128xf32>
      %82 = vector.broadcast %81 : vector<1x128xf32> to vector<56x128xf32>
      %83 = arith.mulf %63, %82 : vector<56x128xf32>
      %84 = arith.addf %79, %83 : vector<56x128xf32>
      %c4 = arith.constant 4 : index
      %c0_96 = arith.constant 0 : index
      %c0_97 = arith.constant 0 : index
      %85 = vector.load %arg4[%c4, %c0_96, %c0_97] : memref<25x1x128xf32, #tpu.memory_space<vmem>>, vector<1x1x128xf32>
      %86 = vector.shape_cast %85 : vector<1x1x128xf32> to vector<1x128xf32>
      %87 = vector.broadcast %86 : vector<1x128xf32> to vector<56x128xf32>
      %88 = arith.mulf %64, %87 : vector<56x128xf32>
      %89 = arith.addf %84, %88 : vector<56x128xf32>
      %c2_i32_98 = arith.constant 2 : i32
      %90 = arith.muli %c2_i32_98, %arg27 : i32
      %c1_i32_99 = arith.constant 1 : i32
      %91 = arith.addi %90, %c1_i32_99 : i32
      %92 = arith.index_cast %91 : i32 to index
      %c7_100 = arith.constant 7 : index
      %c0_101 = arith.constant 0 : index
      %93 = tpu.strided_load %arg19[%92, %c7_100, %c0_101] {strides = array<i32: 1, 2, 1>} : memref<116x128x128xf32, #tpu.memory_space<vmem>>, vector<1x58x128xf32>
      %94 = vector.shape_cast %93 : vector<1x58x128xf32> to vector<58x128xf32>
      %95 = arith.index_cast %91 : i32 to index
      %c8_102 = arith.constant 8 : index
      %c0_103 = arith.constant 0 : index
      %96 = tpu.strided_load %arg19[%95, %c8_102, %c0_103] {strides = array<i32: 1, 2, 1>} : memref<116x128x128xf32, #tpu.memory_space<vmem>>, vector<1x57x128xf32>
      %97 = vector.shape_cast %96 : vector<1x57x128xf32> to vector<57x128xf32>
      %98 = vector.extract_strided_slice %94 {offsets = [0, 0], sizes = [56, 128], strides = [1, 1]} : vector<58x128xf32> to vector<56x128xf32>
      %99 = vector.extract_strided_slice %97 {offsets = [0, 0], sizes = [56, 128], strides = [1, 1]} : vector<57x128xf32> to vector<56x128xf32>
      %100 = vector.extract_strided_slice %94 {offsets = [1, 0], sizes = [56, 128], strides = [1, 1]} : vector<58x128xf32> to vector<56x128xf32>
      %101 = vector.extract_strided_slice %97 {offsets = [1, 0], sizes = [56, 128], strides = [1, 1]} : vector<57x128xf32> to vector<56x128xf32>
      %102 = vector.extract_strided_slice %94 {offsets = [2, 0], sizes = [56, 128], strides = [1, 1]} : vector<58x128xf32> to vector<56x128xf32>
      %c5 = arith.constant 5 : index
      %c0_104 = arith.constant 0 : index
      %c0_105 = arith.constant 0 : index
      %103 = vector.load %arg4[%c5, %c0_104, %c0_105] : memref<25x1x128xf32, #tpu.memory_space<vmem>>, vector<1x1x128xf32>
      %104 = vector.shape_cast %103 : vector<1x1x128xf32> to vector<1x128xf32>
      %105 = vector.broadcast %104 : vector<1x128xf32> to vector<56x128xf32>
      %106 = arith.mulf %98, %105 : vector<56x128xf32>
      %107 = arith.addf %89, %106 : vector<56x128xf32>
      %c6 = arith.constant 6 : index
      %c0_106 = arith.constant 0 : index
      %c0_107 = arith.constant 0 : index
      %108 = vector.load %arg4[%c6, %c0_106, %c0_107] : memref<25x1x128xf32, #tpu.memory_space<vmem>>, vector<1x1x128xf32>
      %109 = vector.shape_cast %108 : vector<1x1x128xf32> to vector<1x128xf32>
      %110 = vector.broadcast %109 : vector<1x128xf32> to vector<56x128xf32>
      %111 = arith.mulf %99, %110 : vector<56x128xf32>
      %112 = arith.addf %107, %111 : vector<56x128xf32>
      %c7_108 = arith.constant 7 : index
      %c0_109 = arith.constant 0 : index
      %c0_110 = arith.constant 0 : index
      %113 = vector.load %arg4[%c7_108, %c0_109, %c0_110] : memref<25x1x128xf32, #tpu.memory_space<vmem>>, vector<1x1x128xf32>
      %114 = vector.shape_cast %113 : vector<1x1x128xf32> to vector<1x128xf32>
      %115 = vector.broadcast %114 : vector<1x128xf32> to vector<56x128xf32>
      %116 = arith.mulf %100, %115 : vector<56x128xf32>
      %117 = arith.addf %112, %116 : vector<56x128xf32>
      %c8_111 = arith.constant 8 : index
      %c0_112 = arith.constant 0 : index
      %c0_113 = arith.constant 0 : index
      %118 = vector.load %arg4[%c8_111, %c0_112, %c0_113] : memref<25x1x128xf32, #tpu.memory_space<vmem>>, vector<1x1x128xf32>
      %119 = vector.shape_cast %118 : vector<1x1x128xf32> to vector<1x128xf32>
      %120 = vector.broadcast %119 : vector<1x128xf32> to vector<56x128xf32>
      %121 = arith.mulf %101, %120 : vector<56x128xf32>
      %122 = arith.addf %117, %121 : vector<56x128xf32>
      %c9 = arith.constant 9 : index
      %c0_114 = arith.constant 0 : index
      %c0_115 = arith.constant 0 : index
      %123 = vector.load %arg4[%c9, %c0_114, %c0_115] : memref<25x1x128xf32, #tpu.memory_space<vmem>>, vector<1x1x128xf32>
      %124 = vector.shape_cast %123 : vector<1x1x128xf32> to vector<1x128xf32>
      %125 = vector.broadcast %124 : vector<1x128xf32> to vector<56x128xf32>
      %126 = arith.mulf %102, %125 : vector<56x128xf32>
      %127 = arith.addf %122, %126 : vector<56x128xf32>
      %c2_i32_116 = arith.constant 2 : i32
      %128 = arith.muli %c2_i32_116, %arg27 : i32
      %c2_i32_117 = arith.constant 2 : i32
      %129 = arith.addi %128, %c2_i32_117 : i32
      %130 = arith.index_cast %129 : i32 to index
      %c7_118 = arith.constant 7 : index
      %c0_119 = arith.constant 0 : index
      %131 = tpu.strided_load %arg19[%130, %c7_118, %c0_119] {strides = array<i32: 1, 2, 1>} : memref<116x128x128xf32, #tpu.memory_space<vmem>>, vector<1x58x128xf32>
      %132 = vector.shape_cast %131 : vector<1x58x128xf32> to vector<58x128xf32>
      %133 = arith.index_cast %129 : i32 to index
      %c8_120 = arith.constant 8 : index
      %c0_121 = arith.constant 0 : index
      %134 = tpu.strided_load %arg19[%133, %c8_120, %c0_121] {strides = array<i32: 1, 2, 1>} : memref<116x128x128xf32, #tpu.memory_space<vmem>>, vector<1x57x128xf32>
      %135 = vector.shape_cast %134 : vector<1x57x128xf32> to vector<57x128xf32>
      %136 = vector.extract_strided_slice %132 {offsets = [0, 0], sizes = [56, 128], strides = [1, 1]} : vector<58x128xf32> to vector<56x128xf32>
      %137 = vector.extract_strided_slice %135 {offsets = [0, 0], sizes = [56, 128], strides = [1, 1]} : vector<57x128xf32> to vector<56x128xf32>
      %138 = vector.extract_strided_slice %132 {offsets = [1, 0], sizes = [56, 128], strides = [1, 1]} : vector<58x128xf32> to vector<56x128xf32>
      %139 = vector.extract_strided_slice %135 {offsets = [1, 0], sizes = [56, 128], strides = [1, 1]} : vector<57x128xf32> to vector<56x128xf32>
      %140 = vector.extract_strided_slice %132 {offsets = [2, 0], sizes = [56, 128], strides = [1, 1]} : vector<58x128xf32> to vector<56x128xf32>
      %c10 = arith.constant 10 : index
      %c0_122 = arith.constant 0 : index
      %c0_123 = arith.constant 0 : index
      %141 = vector.load %arg4[%c10, %c0_122, %c0_123] : memref<25x1x128xf32, #tpu.memory_space<vmem>>, vector<1x1x128xf32>
      %142 = vector.shape_cast %141 : vector<1x1x128xf32> to vector<1x128xf32>
      %143 = vector.broadcast %142 : vector<1x128xf32> to vector<56x128xf32>
      %144 = arith.mulf %136, %143 : vector<56x128xf32>
      %145 = arith.addf %127, %144 : vector<56x128xf32>
      %c11 = arith.constant 11 : index
      %c0_124 = arith.constant 0 : index
      %c0_125 = arith.constant 0 : index
      %146 = vector.load %arg4[%c11, %c0_124, %c0_125] : memref<25x1x128xf32, #tpu.memory_space<vmem>>, vector<1x1x128xf32>
      %147 = vector.shape_cast %146 : vector<1x1x128xf32> to vector<1x128xf32>
      %148 = vector.broadcast %147 : vector<1x128xf32> to vector<56x128xf32>
      %149 = arith.mulf %137, %148 : vector<56x128xf32>
      %150 = arith.addf %145, %149 : vector<56x128xf32>
      %c12 = arith.constant 12 : index
      %c0_126 = arith.constant 0 : index
      %c0_127 = arith.constant 0 : index
      %151 = vector.load %arg4[%c12, %c0_126, %c0_127] : memref<25x1x128xf32, #tpu.memory_space<vmem>>, vector<1x1x128xf32>
      %152 = vector.shape_cast %151 : vector<1x1x128xf32> to vector<1x128xf32>
      %153 = vector.broadcast %152 : vector<1x128xf32> to vector<56x128xf32>
      %154 = arith.mulf %138, %153 : vector<56x128xf32>
      %155 = arith.addf %150, %154 : vector<56x128xf32>
      %c13 = arith.constant 13 : index
      %c0_128 = arith.constant 0 : index
      %c0_129 = arith.constant 0 : index
      %156 = vector.load %arg4[%c13, %c0_128, %c0_129] : memref<25x1x128xf32, #tpu.memory_space<vmem>>, vector<1x1x128xf32>
      %157 = vector.shape_cast %156 : vector<1x1x128xf32> to vector<1x128xf32>
      %158 = vector.broadcast %157 : vector<1x128xf32> to vector<56x128xf32>
      %159 = arith.mulf %139, %158 : vector<56x128xf32>
      %160 = arith.addf %155, %159 : vector<56x128xf32>
      %c14 = arith.constant 14 : index
      %c0_130 = arith.constant 0 : index
      %c0_131 = arith.constant 0 : index
      %161 = vector.load %arg4[%c14, %c0_130, %c0_131] : memref<25x1x128xf32, #tpu.memory_space<vmem>>, vector<1x1x128xf32>
      %162 = vector.shape_cast %161 : vector<1x1x128xf32> to vector<1x128xf32>
      %163 = vector.broadcast %162 : vector<1x128xf32> to vector<56x128xf32>
      %164 = arith.mulf %140, %163 : vector<56x128xf32>
      %165 = arith.addf %160, %164 : vector<56x128xf32>
      %c2_i32_132 = arith.constant 2 : i32
      %166 = arith.muli %c2_i32_132, %arg27 : i32
      %c3_i32 = arith.constant 3 : i32
      %167 = arith.addi %166, %c3_i32 : i32
      %168 = arith.index_cast %167 : i32 to index
      %c7_133 = arith.constant 7 : index
      %c0_134 = arith.constant 0 : index
      %169 = tpu.strided_load %arg19[%168, %c7_133, %c0_134] {strides = array<i32: 1, 2, 1>} : memref<116x128x128xf32, #tpu.memory_space<vmem>>, vector<1x58x128xf32>
      %170 = vector.shape_cast %169 : vector<1x58x128xf32> to vector<58x128xf32>
      %171 = arith.index_cast %167 : i32 to index
      %c8_135 = arith.constant 8 : index
      %c0_136 = arith.constant 0 : index
      %172 = tpu.strided_load %arg19[%171, %c8_135, %c0_136] {strides = array<i32: 1, 2, 1>} : memref<116x128x128xf32, #tpu.memory_space<vmem>>, vector<1x57x128xf32>
      %173 = vector.shape_cast %172 : vector<1x57x128xf32> to vector<57x128xf32>
      %174 = vector.extract_strided_slice %170 {offsets = [0, 0], sizes = [56, 128], strides = [1, 1]} : vector<58x128xf32> to vector<56x128xf32>
      %175 = vector.extract_strided_slice %173 {offsets = [0, 0], sizes = [56, 128], strides = [1, 1]} : vector<57x128xf32> to vector<56x128xf32>
      %176 = vector.extract_strided_slice %170 {offsets = [1, 0], sizes = [56, 128], strides = [1, 1]} : vector<58x128xf32> to vector<56x128xf32>
      %177 = vector.extract_strided_slice %173 {offsets = [1, 0], sizes = [56, 128], strides = [1, 1]} : vector<57x128xf32> to vector<56x128xf32>
      %178 = vector.extract_strided_slice %170 {offsets = [2, 0], sizes = [56, 128], strides = [1, 1]} : vector<58x128xf32> to vector<56x128xf32>
      %c15 = arith.constant 15 : index
      %c0_137 = arith.constant 0 : index
      %c0_138 = arith.constant 0 : index
      %179 = vector.load %arg4[%c15, %c0_137, %c0_138] : memref<25x1x128xf32, #tpu.memory_space<vmem>>, vector<1x1x128xf32>
      %180 = vector.shape_cast %179 : vector<1x1x128xf32> to vector<1x128xf32>
      %181 = vector.broadcast %180 : vector<1x128xf32> to vector<56x128xf32>
      %182 = arith.mulf %174, %181 : vector<56x128xf32>
      %183 = arith.addf %165, %182 : vector<56x128xf32>
      %c16 = arith.constant 16 : index
      %c0_139 = arith.constant 0 : index
      %c0_140 = arith.constant 0 : index
      %184 = vector.load %arg4[%c16, %c0_139, %c0_140] : memref<25x1x128xf32, #tpu.memory_space<vmem>>, vector<1x1x128xf32>
      %185 = vector.shape_cast %184 : vector<1x1x128xf32> to vector<1x128xf32>
      %186 = vector.broadcast %185 : vector<1x128xf32> to vector<56x128xf32>
      %187 = arith.mulf %175, %186 : vector<56x128xf32>
      %188 = arith.addf %183, %187 : vector<56x128xf32>
      %c17 = arith.constant 17 : index
      %c0_141 = arith.constant 0 : index
      %c0_142 = arith.constant 0 : index
      %189 = vector.load %arg4[%c17, %c0_141, %c0_142] : memref<25x1x128xf32, #tpu.memory_space<vmem>>, vector<1x1x128xf32>
      %190 = vector.shape_cast %189 : vector<1x1x128xf32> to vector<1x128xf32>
      %191 = vector.broadcast %190 : vector<1x128xf32> to vector<56x128xf32>
      %192 = arith.mulf %176, %191 : vector<56x128xf32>
      %193 = arith.addf %188, %192 : vector<56x128xf32>
      %c18 = arith.constant 18 : index
      %c0_143 = arith.constant 0 : index
      %c0_144 = arith.constant 0 : index
      %194 = vector.load %arg4[%c18, %c0_143, %c0_144] : memref<25x1x128xf32, #tpu.memory_space<vmem>>, vector<1x1x128xf32>
      %195 = vector.shape_cast %194 : vector<1x1x128xf32> to vector<1x128xf32>
      %196 = vector.broadcast %195 : vector<1x128xf32> to vector<56x128xf32>
      %197 = arith.mulf %177, %196 : vector<56x128xf32>
      %198 = arith.addf %193, %197 : vector<56x128xf32>
      %c19 = arith.constant 19 : index
      %c0_145 = arith.constant 0 : index
      %c0_146 = arith.constant 0 : index
      %199 = vector.load %arg4[%c19, %c0_145, %c0_146] : memref<25x1x128xf32, #tpu.memory_space<vmem>>, vector<1x1x128xf32>
      %200 = vector.shape_cast %199 : vector<1x1x128xf32> to vector<1x128xf32>
      %201 = vector.broadcast %200 : vector<1x128xf32> to vector<56x128xf32>
      %202 = arith.mulf %178, %201 : vector<56x128xf32>
      %203 = arith.addf %198, %202 : vector<56x128xf32>
      %c2_i32_147 = arith.constant 2 : i32
      %204 = arith.muli %c2_i32_147, %arg27 : i32
      %c4_i32_148 = arith.constant 4 : i32
      %205 = arith.addi %204, %c4_i32_148 : i32
      %206 = arith.index_cast %205 : i32 to index
      %c7_149 = arith.constant 7 : index
      %c0_150 = arith.constant 0 : index
      %207 = tpu.strided_load %arg19[%206, %c7_149, %c0_150] {strides = array<i32: 1, 2, 1>} : memref<116x128x128xf32, #tpu.memory_space<vmem>>, vector<1x58x128xf32>
      %208 = vector.shape_cast %207 : vector<1x58x128xf32> to vector<58x128xf32>
      %209 = arith.index_cast %205 : i32 to index
      %c8_151 = arith.constant 8 : index
      %c0_152 = arith.constant 0 : index
      %210 = tpu.strided_load %arg19[%209, %c8_151, %c0_152] {strides = array<i32: 1, 2, 1>} : memref<116x128x128xf32, #tpu.memory_space<vmem>>, vector<1x57x128xf32>
      %211 = vector.shape_cast %210 : vector<1x57x128xf32> to vector<57x128xf32>
      %212 = vector.extract_strided_slice %208 {offsets = [0, 0], sizes = [56, 128], strides = [1, 1]} : vector<58x128xf32> to vector<56x128xf32>
      %213 = vector.extract_strided_slice %211 {offsets = [0, 0], sizes = [56, 128], strides = [1, 1]} : vector<57x128xf32> to vector<56x128xf32>
      %214 = vector.extract_strided_slice %208 {offsets = [1, 0], sizes = [56, 128], strides = [1, 1]} : vector<58x128xf32> to vector<56x128xf32>
      %215 = vector.extract_strided_slice %211 {offsets = [1, 0], sizes = [56, 128], strides = [1, 1]} : vector<57x128xf32> to vector<56x128xf32>
      %216 = vector.extract_strided_slice %208 {offsets = [2, 0], sizes = [56, 128], strides = [1, 1]} : vector<58x128xf32> to vector<56x128xf32>
      %c20 = arith.constant 20 : index
      %c0_153 = arith.constant 0 : index
      %c0_154 = arith.constant 0 : index
      %217 = vector.load %arg4[%c20, %c0_153, %c0_154] : memref<25x1x128xf32, #tpu.memory_space<vmem>>, vector<1x1x128xf32>
      %218 = vector.shape_cast %217 : vector<1x1x128xf32> to vector<1x128xf32>
      %219 = vector.broadcast %218 : vector<1x128xf32> to vector<56x128xf32>
      %220 = arith.mulf %212, %219 : vector<56x128xf32>
      %221 = arith.addf %203, %220 : vector<56x128xf32>
      %c21 = arith.constant 21 : index
      %c0_155 = arith.constant 0 : index
      %c0_156 = arith.constant 0 : index
      %222 = vector.load %arg4[%c21, %c0_155, %c0_156] : memref<25x1x128xf32, #tpu.memory_space<vmem>>, vector<1x1x128xf32>
      %223 = vector.shape_cast %222 : vector<1x1x128xf32> to vector<1x128xf32>
      %224 = vector.broadcast %223 : vector<1x128xf32> to vector<56x128xf32>
      %225 = arith.mulf %213, %224 : vector<56x128xf32>
      %226 = arith.addf %221, %225 : vector<56x128xf32>
      %c22 = arith.constant 22 : index
      %c0_157 = arith.constant 0 : index
      %c0_158 = arith.constant 0 : index
      %227 = vector.load %arg4[%c22, %c0_157, %c0_158] : memref<25x1x128xf32, #tpu.memory_space<vmem>>, vector<1x1x128xf32>
      %228 = vector.shape_cast %227 : vector<1x1x128xf32> to vector<1x128xf32>
      %229 = vector.broadcast %228 : vector<1x128xf32> to vector<56x128xf32>
      %230 = arith.mulf %214, %229 : vector<56x128xf32>
      %231 = arith.addf %226, %230 : vector<56x128xf32>
      %c23 = arith.constant 23 : index
      %c0_159 = arith.constant 0 : index
      %c0_160 = arith.constant 0 : index
      %232 = vector.load %arg4[%c23, %c0_159, %c0_160] : memref<25x1x128xf32, #tpu.memory_space<vmem>>, vector<1x1x128xf32>
      %233 = vector.shape_cast %232 : vector<1x1x128xf32> to vector<1x128xf32>
      %234 = vector.broadcast %233 : vector<1x128xf32> to vector<56x128xf32>
      %235 = arith.mulf %215, %234 : vector<56x128xf32>
      %236 = arith.addf %231, %235 : vector<56x128xf32>
      %c24 = arith.constant 24 : index
      %c0_161 = arith.constant 0 : index
      %c0_162 = arith.constant 0 : index
      %237 = vector.load %arg4[%c24, %c0_161, %c0_162] : memref<25x1x128xf32, #tpu.memory_space<vmem>>, vector<1x1x128xf32>
      %238 = vector.shape_cast %237 : vector<1x1x128xf32> to vector<1x128xf32>
      %239 = vector.broadcast %238 : vector<1x128xf32> to vector<56x128xf32>
      %240 = arith.mulf %216, %239 : vector<56x128xf32>
      %241 = arith.addf %236, %240 : vector<56x128xf32>
      %242 = arith.index_cast %arg27 : i32 to index
      %c0_163 = arith.constant 0 : index
      %c0_164 = arith.constant 0 : index
      %243 = vector.load %arg20[%242, %c0_163, %c0_164] : memref<56x56x128xf32, #tpu.memory_space<vmem>>, vector<1x56x128xf32>
      %244 = vector.shape_cast %243 : vector<1x56x128xf32> to vector<56x128xf32>
      %245 = vector.shape_cast %241 : vector<56x128xf32> to vector<1x56x128xf32>
      tpu.vector_store %arg20[%242, %c0_163, %c0_164], %245 {strides = array<i32>} : memref<56x56x128xf32, #tpu.memory_space<vmem>>, vector<1x56x128xf32>,
    }
    %c56_i32_44 = arith.constant 56 : i32
    %cst_45 = arith.constant 0.000000e+00 : f32
    %26 = vector.broadcast %cst_45 : f32 to vector<4x8x128xf32>
    %cst_46 = arith.constant 0.000000e+00 : f32
    %27 = vector.broadcast %cst_46 : f32 to vector<4x8x128xf32>
    %c0_i32_47 = arith.constant 0 : i32
    %c14_i32 = arith.constant 14 : i32
    %28 = arith.addi %c0_i32_47, %c14_i32 : i32
    %c1_i32_48 = arith.constant 1 : i32
    scf.for %arg27 = %c0_i32_47 to %28 step %c1_i32_48  : i32 {
      %c4_i32_83 = arith.constant 4 : i32
      %51 = arith.muli %arg27, %c4_i32_83 : i32
      %52 = arith.index_cast %51 : i32 to index
      %c0_84 = arith.constant 0 : index
      %c0_85 = arith.constant 0 : index
      %53 = vector.load %arg20[%52, %c0_84, %c0_85] : memref<56x56x128xf32, #tpu.memory_space<vmem>>, vector<4x56x128xf32>
      %54 = vector.shape_cast %53 : vector<4x56x128xf32> to vector<224x128xf32>
      %c0_86 = arith.constant 0 : index
      %c0_87 = arith.constant 0 : index
      %55 = vector.load %arg5[%c0_86, %c0_87] : memref<128x128xf32, #tpu.memory_space<vmem>>, vector<128x128xf32>
      %cst_88 = arith.constant dense<0.000000e+00> : vector<224x128xf32>
      %56 = tpu.matmul %54, %55, %cst_88 {dimension_numbers = #tpu.dot_dimension_numbers<[1], [0], [0], [1], [0, 0, 1, 1], [], []>} : vector<224x128xf32>, vector<128x128xf32>, vector<224x128xf32> -> vector<224x128xf32>
      %c0_89 = arith.constant 0 : index
      %c0_90 = arith.constant 0 : index
      %57 = vector.load %arg6[%c0_89, %c0_90] : memref<1x128xf32, #tpu.memory_space<vmem>>, vector<1x128xf32>
      %58 = vector.broadcast %57 : vector<1x128xf32> to vector<224x128xf32>
      %59 = arith.addf %56, %58 : vector<224x128xf32>
      %cst_91 = arith.constant 0.000000e+00 : f32
      %60 = vector.broadcast %cst_91 : f32 to vector<224x128xf32>
      %61 = arith.maximumf %59, %60 : vector<224x128xf32>
      %62 = vector.shape_cast %61 : vector<224x128xf32> to vector<4x56x128xf32>
      %63 = tpu.concatenate %26, %62, %27 in 1 : vector<4x8x128xf32>, vector<4x56x128xf32>, vector<4x8x128xf32> -> vector<4x72x128xf32>
      %c4_i32_92 = arith.constant 4 : i32
      %64 = arith.muli %arg27, %c4_i32_92 : i32
      %c1_i32_93 = arith.constant 1 : i32
      %65 = arith.addi %c1_i32_93, %64 : i32
      %66 = arith.index_cast %65 : i32 to index
      %c0_94 = arith.constant 0 : index
      %c0_95 = arith.constant 0 : index
      %67 = vector.load %arg21[%66, %c0_94, %c0_95] : memref<60x72x128xf32, #tpu.memory_space<vmem>>, vector<4x72x128xf32>
      tpu.vector_store %arg21[%66, %c0_94, %c0_95], %63 {strides = array<i32>} : memref<60x72x128xf32, #tpu.memory_space<vmem>>, vector<4x72x128xf32>,
    }
    %c14_i32_49 = arith.constant 14 : i32
    %c0_i32_50 = arith.constant 0 : i32
    %c28_i32 = arith.constant 28 : i32
    %29 = arith.addi %c0_i32_50, %c28_i32 : i32
    %c1_i32_51 = arith.constant 1 : i32
    scf.for %arg27 = %c0_i32_50 to %29 step %c1_i32_51  : i32 {
      %cst_83 = arith.constant 0.000000e+00 : f32
      %51 = vector.broadcast %cst_83 : f32 to vector<28x128xf32>
      %c2_i32 = arith.constant 2 : i32
      %52 = arith.muli %c2_i32, %arg27 : i32
      %c0_i32_84 = arith.constant 0 : i32
      %53 = arith.addi %52, %c0_i32_84 : i32
      %54 = arith.index_cast %53 : i32 to index
      %c7 = arith.constant 7 : index
      %c0_85 = arith.constant 0 : index
      %55 = tpu.strided_load %arg21[%54, %c7, %c0_85] {strides = array<i32: 1, 2, 1>} : memref<60x72x128xf32, #tpu.memory_space<vmem>>, vector<1x30x128xf32>
      %56 = vector.shape_cast %55 : vector<1x30x128xf32> to vector<30x128xf32>
      %57 = arith.index_cast %53 : i32 to index
      %c8 = arith.constant 8 : index
      %c0_86 = arith.constant 0 : index
      %58 = tpu.strided_load %arg21[%57, %c8, %c0_86] {strides = array<i32: 1, 2, 1>} : memref<60x72x128xf32, #tpu.memory_space<vmem>>, vector<1x29x128xf32>
      %59 = vector.shape_cast %58 : vector<1x29x128xf32> to vector<29x128xf32>
      %60 = vector.extract_strided_slice %56 {offsets = [0, 0], sizes = [28, 128], strides = [1, 1]} : vector<30x128xf32> to vector<28x128xf32>
      %61 = vector.extract_strided_slice %59 {offsets = [0, 0], sizes = [28, 128], strides = [1, 1]} : vector<29x128xf32> to vector<28x128xf32>
      %62 = vector.extract_strided_slice %56 {offsets = [1, 0], sizes = [28, 128], strides = [1, 1]} : vector<30x128xf32> to vector<28x128xf32>
      %63 = vector.extract_strided_slice %59 {offsets = [1, 0], sizes = [28, 128], strides = [1, 1]} : vector<29x128xf32> to vector<28x128xf32>
      %64 = vector.extract_strided_slice %56 {offsets = [2, 0], sizes = [28, 128], strides = [1, 1]} : vector<30x128xf32> to vector<28x128xf32>
      %c0_87 = arith.constant 0 : index
      %c0_88 = arith.constant 0 : index
      %c0_89 = arith.constant 0 : index
      %65 = vector.load %arg7[%c0_87, %c0_88, %c0_89] : memref<25x1x128xf32, #tpu.memory_space<vmem>>, vector<1x1x128xf32>
      %66 = vector.shape_cast %65 : vector<1x1x128xf32> to vector<1x128xf32>
      %67 = vector.broadcast %66 : vector<1x128xf32> to vector<28x128xf32>
      %68 = arith.mulf %60, %67 : vector<28x128xf32>
      %69 = arith.addf %51, %68 : vector<28x128xf32>
      %c1 = arith.constant 1 : index
      %c0_90 = arith.constant 0 : index
      %c0_91 = arith.constant 0 : index
      %70 = vector.load %arg7[%c1, %c0_90, %c0_91] : memref<25x1x128xf32, #tpu.memory_space<vmem>>, vector<1x1x128xf32>
      %71 = vector.shape_cast %70 : vector<1x1x128xf32> to vector<1x128xf32>
      %72 = vector.broadcast %71 : vector<1x128xf32> to vector<28x128xf32>
      %73 = arith.mulf %61, %72 : vector<28x128xf32>
      %74 = arith.addf %69, %73 : vector<28x128xf32>
      %c2 = arith.constant 2 : index
      %c0_92 = arith.constant 0 : index
      %c0_93 = arith.constant 0 : index
      %75 = vector.load %arg7[%c2, %c0_92, %c0_93] : memref<25x1x128xf32, #tpu.memory_space<vmem>>, vector<1x1x128xf32>
      %76 = vector.shape_cast %75 : vector<1x1x128xf32> to vector<1x128xf32>
      %77 = vector.broadcast %76 : vector<1x128xf32> to vector<28x128xf32>
      %78 = arith.mulf %62, %77 : vector<28x128xf32>
      %79 = arith.addf %74, %78 : vector<28x128xf32>
      %c3 = arith.constant 3 : index
      %c0_94 = arith.constant 0 : index
      %c0_95 = arith.constant 0 : index
      %80 = vector.load %arg7[%c3, %c0_94, %c0_95] : memref<25x1x128xf32, #tpu.memory_space<vmem>>, vector<1x1x128xf32>
      %81 = vector.shape_cast %80 : vector<1x1x128xf32> to vector<1x128xf32>
      %82 = vector.broadcast %81 : vector<1x128xf32> to vector<28x128xf32>
      %83 = arith.mulf %63, %82 : vector<28x128xf32>
      %84 = arith.addf %79, %83 : vector<28x128xf32>
      %c4 = arith.constant 4 : index
      %c0_96 = arith.constant 0 : index
      %c0_97 = arith.constant 0 : index
      %85 = vector.load %arg7[%c4, %c0_96, %c0_97] : memref<25x1x128xf32, #tpu.memory_space<vmem>>, vector<1x1x128xf32>
      %86 = vector.shape_cast %85 : vector<1x1x128xf32> to vector<1x128xf32>
      %87 = vector.broadcast %86 : vector<1x128xf32> to vector<28x128xf32>
      %88 = arith.mulf %64, %87 : vector<28x128xf32>
      %89 = arith.addf %84, %88 : vector<28x128xf32>
      %c2_i32_98 = arith.constant 2 : i32
      %90 = arith.muli %c2_i32_98, %arg27 : i32
      %c1_i32_99 = arith.constant 1 : i32
      %91 = arith.addi %90, %c1_i32_99 : i32
      %92 = arith.index_cast %91 : i32 to index
      %c7_100 = arith.constant 7 : index
      %c0_101 = arith.constant 0 : index
      %93 = tpu.strided_load %arg21[%92, %c7_100, %c0_101] {strides = array<i32: 1, 2, 1>} : memref<60x72x128xf32, #tpu.memory_space<vmem>>, vector<1x30x128xf32>
      %94 = vector.shape_cast %93 : vector<1x30x128xf32> to vector<30x128xf32>
      %95 = arith.index_cast %91 : i32 to index
      %c8_102 = arith.constant 8 : index
      %c0_103 = arith.constant 0 : index
      %96 = tpu.strided_load %arg21[%95, %c8_102, %c0_103] {strides = array<i32: 1, 2, 1>} : memref<60x72x128xf32, #tpu.memory_space<vmem>>, vector<1x29x128xf32>
      %97 = vector.shape_cast %96 : vector<1x29x128xf32> to vector<29x128xf32>
      %98 = vector.extract_strided_slice %94 {offsets = [0, 0], sizes = [28, 128], strides = [1, 1]} : vector<30x128xf32> to vector<28x128xf32>
      %99 = vector.extract_strided_slice %97 {offsets = [0, 0], sizes = [28, 128], strides = [1, 1]} : vector<29x128xf32> to vector<28x128xf32>
      %100 = vector.extract_strided_slice %94 {offsets = [1, 0], sizes = [28, 128], strides = [1, 1]} : vector<30x128xf32> to vector<28x128xf32>
      %101 = vector.extract_strided_slice %97 {offsets = [1, 0], sizes = [28, 128], strides = [1, 1]} : vector<29x128xf32> to vector<28x128xf32>
      %102 = vector.extract_strided_slice %94 {offsets = [2, 0], sizes = [28, 128], strides = [1, 1]} : vector<30x128xf32> to vector<28x128xf32>
      %c5 = arith.constant 5 : index
      %c0_104 = arith.constant 0 : index
      %c0_105 = arith.constant 0 : index
      %103 = vector.load %arg7[%c5, %c0_104, %c0_105] : memref<25x1x128xf32, #tpu.memory_space<vmem>>, vector<1x1x128xf32>
      %104 = vector.shape_cast %103 : vector<1x1x128xf32> to vector<1x128xf32>
      %105 = vector.broadcast %104 : vector<1x128xf32> to vector<28x128xf32>
      %106 = arith.mulf %98, %105 : vector<28x128xf32>
      %107 = arith.addf %89, %106 : vector<28x128xf32>
      %c6 = arith.constant 6 : index
      %c0_106 = arith.constant 0 : index
      %c0_107 = arith.constant 0 : index
      %108 = vector.load %arg7[%c6, %c0_106, %c0_107] : memref<25x1x128xf32, #tpu.memory_space<vmem>>, vector<1x1x128xf32>
      %109 = vector.shape_cast %108 : vector<1x1x128xf32> to vector<1x128xf32>
      %110 = vector.broadcast %109 : vector<1x128xf32> to vector<28x128xf32>
      %111 = arith.mulf %99, %110 : vector<28x128xf32>
      %112 = arith.addf %107, %111 : vector<28x128xf32>
      %c7_108 = arith.constant 7 : index
      %c0_109 = arith.constant 0 : index
      %c0_110 = arith.constant 0 : index
      %113 = vector.load %arg7[%c7_108, %c0_109, %c0_110] : memref<25x1x128xf32, #tpu.memory_space<vmem>>, vector<1x1x128xf32>
      %114 = vector.shape_cast %113 : vector<1x1x128xf32> to vector<1x128xf32>
      %115 = vector.broadcast %114 : vector<1x128xf32> to vector<28x128xf32>
      %116 = arith.mulf %100, %115 : vector<28x128xf32>
      %117 = arith.addf %112, %116 : vector<28x128xf32>
      %c8_111 = arith.constant 8 : index
      %c0_112 = arith.constant 0 : index
      %c0_113 = arith.constant 0 : index
      %118 = vector.load %arg7[%c8_111, %c0_112, %c0_113] : memref<25x1x128xf32, #tpu.memory_space<vmem>>, vector<1x1x128xf32>
      %119 = vector.shape_cast %118 : vector<1x1x128xf32> to vector<1x128xf32>
      %120 = vector.broadcast %119 : vector<1x128xf32> to vector<28x128xf32>
      %121 = arith.mulf %101, %120 : vector<28x128xf32>
      %122 = arith.addf %117, %121 : vector<28x128xf32>
      %c9 = arith.constant 9 : index
      %c0_114 = arith.constant 0 : index
      %c0_115 = arith.constant 0 : index
      %123 = vector.load %arg7[%c9, %c0_114, %c0_115] : memref<25x1x128xf32, #tpu.memory_space<vmem>>, vector<1x1x128xf32>
      %124 = vector.shape_cast %123 : vector<1x1x128xf32> to vector<1x128xf32>
      %125 = vector.broadcast %124 : vector<1x128xf32> to vector<28x128xf32>
      %126 = arith.mulf %102, %125 : vector<28x128xf32>
      %127 = arith.addf %122, %126 : vector<28x128xf32>
      %c2_i32_116 = arith.constant 2 : i32
      %128 = arith.muli %c2_i32_116, %arg27 : i32
      %c2_i32_117 = arith.constant 2 : i32
      %129 = arith.addi %128, %c2_i32_117 : i32
      %130 = arith.index_cast %129 : i32 to index
      %c7_118 = arith.constant 7 : index
      %c0_119 = arith.constant 0 : index
      %131 = tpu.strided_load %arg21[%130, %c7_118, %c0_119] {strides = array<i32: 1, 2, 1>} : memref<60x72x128xf32, #tpu.memory_space<vmem>>, vector<1x30x128xf32>
      %132 = vector.shape_cast %131 : vector<1x30x128xf32> to vector<30x128xf32>
      %133 = arith.index_cast %129 : i32 to index
      %c8_120 = arith.constant 8 : index
      %c0_121 = arith.constant 0 : index
      %134 = tpu.strided_load %arg21[%133, %c8_120, %c0_121] {strides = array<i32: 1, 2, 1>} : memref<60x72x128xf32, #tpu.memory_space<vmem>>, vector<1x29x128xf32>
      %135 = vector.shape_cast %134 : vector<1x29x128xf32> to vector<29x128xf32>
      %136 = vector.extract_strided_slice %132 {offsets = [0, 0], sizes = [28, 128], strides = [1, 1]} : vector<30x128xf32> to vector<28x128xf32>
      %137 = vector.extract_strided_slice %135 {offsets = [0, 0], sizes = [28, 128], strides = [1, 1]} : vector<29x128xf32> to vector<28x128xf32>
      %138 = vector.extract_strided_slice %132 {offsets = [1, 0], sizes = [28, 128], strides = [1, 1]} : vector<30x128xf32> to vector<28x128xf32>
      %139 = vector.extract_strided_slice %135 {offsets = [1, 0], sizes = [28, 128], strides = [1, 1]} : vector<29x128xf32> to vector<28x128xf32>
      %140 = vector.extract_strided_slice %132 {offsets = [2, 0], sizes = [28, 128], strides = [1, 1]} : vector<30x128xf32> to vector<28x128xf32>
      %c10 = arith.constant 10 : index
      %c0_122 = arith.constant 0 : index
      %c0_123 = arith.constant 0 : index
      %141 = vector.load %arg7[%c10, %c0_122, %c0_123] : memref<25x1x128xf32, #tpu.memory_space<vmem>>, vector<1x1x128xf32>
      %142 = vector.shape_cast %141 : vector<1x1x128xf32> to vector<1x128xf32>
      %143 = vector.broadcast %142 : vector<1x128xf32> to vector<28x128xf32>
      %144 = arith.mulf %136, %143 : vector<28x128xf32>
      %145 = arith.addf %127, %144 : vector<28x128xf32>
      %c11 = arith.constant 11 : index
      %c0_124 = arith.constant 0 : index
      %c0_125 = arith.constant 0 : index
      %146 = vector.load %arg7[%c11, %c0_124, %c0_125] : memref<25x1x128xf32, #tpu.memory_space<vmem>>, vector<1x1x128xf32>
      %147 = vector.shape_cast %146 : vector<1x1x128xf32> to vector<1x128xf32>
      %148 = vector.broadcast %147 : vector<1x128xf32> to vector<28x128xf32>
      %149 = arith.mulf %137, %148 : vector<28x128xf32>
      %150 = arith.addf %145, %149 : vector<28x128xf32>
      %c12 = arith.constant 12 : index
      %c0_126 = arith.constant 0 : index
      %c0_127 = arith.constant 0 : index
      %151 = vector.load %arg7[%c12, %c0_126, %c0_127] : memref<25x1x128xf32, #tpu.memory_space<vmem>>, vector<1x1x128xf32>
      %152 = vector.shape_cast %151 : vector<1x1x128xf32> to vector<1x128xf32>
      %153 = vector.broadcast %152 : vector<1x128xf32> to vector<28x128xf32>
      %154 = arith.mulf %138, %153 : vector<28x128xf32>
      %155 = arith.addf %150, %154 : vector<28x128xf32>
      %c13 = arith.constant 13 : index
      %c0_128 = arith.constant 0 : index
      %c0_129 = arith.constant 0 : index
      %156 = vector.load %arg7[%c13, %c0_128, %c0_129] : memref<25x1x128xf32, #tpu.memory_space<vmem>>, vector<1x1x128xf32>
      %157 = vector.shape_cast %156 : vector<1x1x128xf32> to vector<1x128xf32>
      %158 = vector.broadcast %157 : vector<1x128xf32> to vector<28x128xf32>
      %159 = arith.mulf %139, %158 : vector<28x128xf32>
      %160 = arith.addf %155, %159 : vector<28x128xf32>
      %c14 = arith.constant 14 : index
      %c0_130 = arith.constant 0 : index
      %c0_131 = arith.constant 0 : index
      %161 = vector.load %arg7[%c14, %c0_130, %c0_131] : memref<25x1x128xf32, #tpu.memory_space<vmem>>, vector<1x1x128xf32>
      %162 = vector.shape_cast %161 : vector<1x1x128xf32> to vector<1x128xf32>
      %163 = vector.broadcast %162 : vector<1x128xf32> to vector<28x128xf32>
      %164 = arith.mulf %140, %163 : vector<28x128xf32>
      %165 = arith.addf %160, %164 : vector<28x128xf32>
      %c2_i32_132 = arith.constant 2 : i32
      %166 = arith.muli %c2_i32_132, %arg27 : i32
      %c3_i32 = arith.constant 3 : i32
      %167 = arith.addi %166, %c3_i32 : i32
      %168 = arith.index_cast %167 : i32 to index
      %c7_133 = arith.constant 7 : index
      %c0_134 = arith.constant 0 : index
      %169 = tpu.strided_load %arg21[%168, %c7_133, %c0_134] {strides = array<i32: 1, 2, 1>} : memref<60x72x128xf32, #tpu.memory_space<vmem>>, vector<1x30x128xf32>
      %170 = vector.shape_cast %169 : vector<1x30x128xf32> to vector<30x128xf32>
      %171 = arith.index_cast %167 : i32 to index
      %c8_135 = arith.constant 8 : index
      %c0_136 = arith.constant 0 : index
      %172 = tpu.strided_load %arg21[%171, %c8_135, %c0_136] {strides = array<i32: 1, 2, 1>} : memref<60x72x128xf32, #tpu.memory_space<vmem>>, vector<1x29x128xf32>
      %173 = vector.shape_cast %172 : vector<1x29x128xf32> to vector<29x128xf32>
      %174 = vector.extract_strided_slice %170 {offsets = [0, 0], sizes = [28, 128], strides = [1, 1]} : vector<30x128xf32> to vector<28x128xf32>
      %175 = vector.extract_strided_slice %173 {offsets = [0, 0], sizes = [28, 128], strides = [1, 1]} : vector<29x128xf32> to vector<28x128xf32>
      %176 = vector.extract_strided_slice %170 {offsets = [1, 0], sizes = [28, 128], strides = [1, 1]} : vector<30x128xf32> to vector<28x128xf32>
      %177 = vector.extract_strided_slice %173 {offsets = [1, 0], sizes = [28, 128], strides = [1, 1]} : vector<29x128xf32> to vector<28x128xf32>
      %178 = vector.extract_strided_slice %170 {offsets = [2, 0], sizes = [28, 128], strides = [1, 1]} : vector<30x128xf32> to vector<28x128xf32>
      %c15 = arith.constant 15 : index
      %c0_137 = arith.constant 0 : index
      %c0_138 = arith.constant 0 : index
      %179 = vector.load %arg7[%c15, %c0_137, %c0_138] : memref<25x1x128xf32, #tpu.memory_space<vmem>>, vector<1x1x128xf32>
      %180 = vector.shape_cast %179 : vector<1x1x128xf32> to vector<1x128xf32>
      %181 = vector.broadcast %180 : vector<1x128xf32> to vector<28x128xf32>
      %182 = arith.mulf %174, %181 : vector<28x128xf32>
      %183 = arith.addf %165, %182 : vector<28x128xf32>
      %c16 = arith.constant 16 : index
      %c0_139 = arith.constant 0 : index
      %c0_140 = arith.constant 0 : index
      %184 = vector.load %arg7[%c16, %c0_139, %c0_140] : memref<25x1x128xf32, #tpu.memory_space<vmem>>, vector<1x1x128xf32>
      %185 = vector.shape_cast %184 : vector<1x1x128xf32> to vector<1x128xf32>
      %186 = vector.broadcast %185 : vector<1x128xf32> to vector<28x128xf32>
      %187 = arith.mulf %175, %186 : vector<28x128xf32>
      %188 = arith.addf %183, %187 : vector<28x128xf32>
      %c17 = arith.constant 17 : index
      %c0_141 = arith.constant 0 : index
      %c0_142 = arith.constant 0 : index
      %189 = vector.load %arg7[%c17, %c0_141, %c0_142] : memref<25x1x128xf32, #tpu.memory_space<vmem>>, vector<1x1x128xf32>
      %190 = vector.shape_cast %189 : vector<1x1x128xf32> to vector<1x128xf32>
      %191 = vector.broadcast %190 : vector<1x128xf32> to vector<28x128xf32>
      %192 = arith.mulf %176, %191 : vector<28x128xf32>
      %193 = arith.addf %188, %192 : vector<28x128xf32>
      %c18 = arith.constant 18 : index
      %c0_143 = arith.constant 0 : index
      %c0_144 = arith.constant 0 : index
      %194 = vector.load %arg7[%c18, %c0_143, %c0_144] : memref<25x1x128xf32, #tpu.memory_space<vmem>>, vector<1x1x128xf32>
      %195 = vector.shape_cast %194 : vector<1x1x128xf32> to vector<1x128xf32>
      %196 = vector.broadcast %195 : vector<1x128xf32> to vector<28x128xf32>
      %197 = arith.mulf %177, %196 : vector<28x128xf32>
      %198 = arith.addf %193, %197 : vector<28x128xf32>
      %c19 = arith.constant 19 : index
      %c0_145 = arith.constant 0 : index
      %c0_146 = arith.constant 0 : index
      %199 = vector.load %arg7[%c19, %c0_145, %c0_146] : memref<25x1x128xf32, #tpu.memory_space<vmem>>, vector<1x1x128xf32>
      %200 = vector.shape_cast %199 : vector<1x1x128xf32> to vector<1x128xf32>
      %201 = vector.broadcast %200 : vector<1x128xf32> to vector<28x128xf32>
      %202 = arith.mulf %178, %201 : vector<28x128xf32>
      %203 = arith.addf %198, %202 : vector<28x128xf32>
      %c2_i32_147 = arith.constant 2 : i32
      %204 = arith.muli %c2_i32_147, %arg27 : i32
      %c4_i32_148 = arith.constant 4 : i32
      %205 = arith.addi %204, %c4_i32_148 : i32
      %206 = arith.index_cast %205 : i32 to index
      %c7_149 = arith.constant 7 : index
      %c0_150 = arith.constant 0 : index
      %207 = tpu.strided_load %arg21[%206, %c7_149, %c0_150] {strides = array<i32: 1, 2, 1>} : memref<60x72x128xf32, #tpu.memory_space<vmem>>, vector<1x30x128xf32>
      %208 = vector.shape_cast %207 : vector<1x30x128xf32> to vector<30x128xf32>
      %209 = arith.index_cast %205 : i32 to index
      %c8_151 = arith.constant 8 : index
      %c0_152 = arith.constant 0 : index
      %210 = tpu.strided_load %arg21[%209, %c8_151, %c0_152] {strides = array<i32: 1, 2, 1>} : memref<60x72x128xf32, #tpu.memory_space<vmem>>, vector<1x29x128xf32>
      %211 = vector.shape_cast %210 : vector<1x29x128xf32> to vector<29x128xf32>
      %212 = vector.extract_strided_slice %208 {offsets = [0, 0], sizes = [28, 128], strides = [1, 1]} : vector<30x128xf32> to vector<28x128xf32>
      %213 = vector.extract_strided_slice %211 {offsets = [0, 0], sizes = [28, 128], strides = [1, 1]} : vector<29x128xf32> to vector<28x128xf32>
      %214 = vector.extract_strided_slice %208 {offsets = [1, 0], sizes = [28, 128], strides = [1, 1]} : vector<30x128xf32> to vector<28x128xf32>
      %215 = vector.extract_strided_slice %211 {offsets = [1, 0], sizes = [28, 128], strides = [1, 1]} : vector<29x128xf32> to vector<28x128xf32>
      %216 = vector.extract_strided_slice %208 {offsets = [2, 0], sizes = [28, 128], strides = [1, 1]} : vector<30x128xf32> to vector<28x128xf32>
      %c20 = arith.constant 20 : index
      %c0_153 = arith.constant 0 : index
      %c0_154 = arith.constant 0 : index
      %217 = vector.load %arg7[%c20, %c0_153, %c0_154] : memref<25x1x128xf32, #tpu.memory_space<vmem>>, vector<1x1x128xf32>
      %218 = vector.shape_cast %217 : vector<1x1x128xf32> to vector<1x128xf32>
      %219 = vector.broadcast %218 : vector<1x128xf32> to vector<28x128xf32>
      %220 = arith.mulf %212, %219 : vector<28x128xf32>
      %221 = arith.addf %203, %220 : vector<28x128xf32>
      %c21 = arith.constant 21 : index
      %c0_155 = arith.constant 0 : index
      %c0_156 = arith.constant 0 : index
      %222 = vector.load %arg7[%c21, %c0_155, %c0_156] : memref<25x1x128xf32, #tpu.memory_space<vmem>>, vector<1x1x128xf32>
      %223 = vector.shape_cast %222 : vector<1x1x128xf32> to vector<1x128xf32>
      %224 = vector.broadcast %223 : vector<1x128xf32> to vector<28x128xf32>
      %225 = arith.mulf %213, %224 : vector<28x128xf32>
      %226 = arith.addf %221, %225 : vector<28x128xf32>
      %c22 = arith.constant 22 : index
      %c0_157 = arith.constant 0 : index
      %c0_158 = arith.constant 0 : index
      %227 = vector.load %arg7[%c22, %c0_157, %c0_158] : memref<25x1x128xf32, #tpu.memory_space<vmem>>, vector<1x1x128xf32>
      %228 = vector.shape_cast %227 : vector<1x1x128xf32> to vector<1x128xf32>
      %229 = vector.broadcast %228 : vector<1x128xf32> to vector<28x128xf32>
      %230 = arith.mulf %214, %229 : vector<28x128xf32>
      %231 = arith.addf %226, %230 : vector<28x128xf32>
      %c23 = arith.constant 23 : index
      %c0_159 = arith.constant 0 : index
      %c0_160 = arith.constant 0 : index
      %232 = vector.load %arg7[%c23, %c0_159, %c0_160] : memref<25x1x128xf32, #tpu.memory_space<vmem>>, vector<1x1x128xf32>
      %233 = vector.shape_cast %232 : vector<1x1x128xf32> to vector<1x128xf32>
      %234 = vector.broadcast %233 : vector<1x128xf32> to vector<28x128xf32>
      %235 = arith.mulf %215, %234 : vector<28x128xf32>
      %236 = arith.addf %231, %235 : vector<28x128xf32>
      %c24 = arith.constant 24 : index
      %c0_161 = arith.constant 0 : index
      %c0_162 = arith.constant 0 : index
      %237 = vector.load %arg7[%c24, %c0_161, %c0_162] : memref<25x1x128xf32, #tpu.memory_space<vmem>>, vector<1x1x128xf32>
      %238 = vector.shape_cast %237 : vector<1x1x128xf32> to vector<1x128xf32>
      %239 = vector.broadcast %238 : vector<1x128xf32> to vector<28x128xf32>
      %240 = arith.mulf %216, %239 : vector<28x128xf32>
      %241 = arith.addf %236, %240 : vector<28x128xf32>
      %242 = arith.index_cast %arg27 : i32 to index
      %c0_163 = arith.constant 0 : index
      %c0_164 = arith.constant 0 : index
      %243 = vector.load %arg22[%242, %c0_163, %c0_164] : memref<28x32x128xf32, #tpu.memory_space<vmem>>, vector<1x28x128xf32>
      %244 = vector.shape_cast %243 : vector<1x28x128xf32> to vector<28x128xf32>
      %245 = vector.shape_cast %241 : vector<28x128xf32> to vector<1x28x128xf32>
      tpu.vector_store %arg22[%242, %c0_163, %c0_164], %245 {strides = array<i32>} : memref<28x32x128xf32, #tpu.memory_space<vmem>>, vector<1x28x128xf32>,
    }
    %c28_i32_52 = arith.constant 28 : i32
    %cst_53 = arith.constant 0.000000e+00 : f32
    %30 = vector.broadcast %cst_53 : f32 to vector<7x8x128xf32>
    %cst_54 = arith.constant 0.000000e+00 : f32
    %31 = vector.broadcast %cst_54 : f32 to vector<7x4x128xf32>
    %c0_i32_55 = arith.constant 0 : i32
    %c4_i32 = arith.constant 4 : i32
    %32 = arith.addi %c0_i32_55, %c4_i32 : i32
    %c1_i32_56 = arith.constant 1 : i32
    scf.for %arg27 = %c0_i32_55 to %32 step %c1_i32_56  : i32 {
      %c7_i32 = arith.constant 7 : i32
      %51 = arith.muli %arg27, %c7_i32 : i32
      %52 = arith.index_cast %51 : i32 to index
      %c0_83 = arith.constant 0 : index
      %c0_84 = arith.constant 0 : index
      %53 = vector.load %arg22[%52, %c0_83, %c0_84] : memref<28x32x128xf32, #tpu.memory_space<vmem>>, vector<7x32x128xf32>
      %54 = vector.shape_cast %53 : vector<7x32x128xf32> to vector<224x128xf32>
      %c0_85 = arith.constant 0 : index
      %c0_86 = arith.constant 0 : index
      %55 = vector.load %arg8[%c0_85, %c0_86] : memref<128x128xf32, #tpu.memory_space<vmem>>, vector<128x128xf32>
      %cst_87 = arith.constant dense<0.000000e+00> : vector<224x128xf32>
      %56 = tpu.matmul %54, %55, %cst_87 {dimension_numbers = #tpu.dot_dimension_numbers<[1], [0], [0], [1], [0, 0, 1, 1], [], []>} : vector<224x128xf32>, vector<128x128xf32>, vector<224x128xf32> -> vector<224x128xf32>
      %c0_88 = arith.constant 0 : index
      %c0_89 = arith.constant 0 : index
      %57 = vector.load %arg9[%c0_88, %c0_89] : memref<1x128xf32, #tpu.memory_space<vmem>>, vector<1x128xf32>
      %58 = vector.broadcast %57 : vector<1x128xf32> to vector<224x128xf32>
      %59 = arith.addf %56, %58 : vector<224x128xf32>
      %cst_90 = arith.constant 0.000000e+00 : f32
      %60 = vector.broadcast %cst_90 : f32 to vector<224x128xf32>
      %61 = arith.maximumf %59, %60 : vector<224x128xf32>
      %62 = vector.shape_cast %61 : vector<224x128xf32> to vector<7x32x128xf32>
      %63 = vector.extract_strided_slice %62 {offsets = [0, 0, 0], sizes = [7, 28, 128], strides = [1, 1, 1]} : vector<7x32x128xf32> to vector<7x28x128xf32>
      %64 = tpu.concatenate %30, %63, %31 in 1 : vector<7x8x128xf32>, vector<7x28x128xf32>, vector<7x4x128xf32> -> vector<7x40x128xf32>
      %c7_i32_91 = arith.constant 7 : i32
      %65 = arith.muli %arg27, %c7_i32_91 : i32
      %c2_i32 = arith.constant 2 : i32
      %66 = arith.addi %c2_i32, %65 : i32
      %67 = arith.index_cast %66 : i32 to index
      %c0_92 = arith.constant 0 : index
      %c0_93 = arith.constant 0 : index
      %68 = vector.load %arg23[%67, %c0_92, %c0_93] : memref<32x40x128xf32, #tpu.memory_space<vmem>>, vector<7x40x128xf32>
      tpu.vector_store %arg23[%67, %c0_92, %c0_93], %64 {strides = array<i32>} : memref<32x40x128xf32, #tpu.memory_space<vmem>>, vector<7x40x128xf32>,
    }
    %c4_i32_57 = arith.constant 4 : i32
    %c0_i32_58 = arith.constant 0 : i32
    %c28_i32_59 = arith.constant 28 : i32
    %33 = arith.addi %c0_i32_58, %c28_i32_59 : i32
    %c1_i32_60 = arith.constant 1 : i32
    scf.for %arg27 = %c0_i32_58 to %33 step %c1_i32_60  : i32 {
      %cst_83 = arith.constant 0.000000e+00 : f32
      %51 = vector.broadcast %cst_83 : f32 to vector<28x128xf32>
      %c0_i32_84 = arith.constant 0 : i32
      %52 = arith.addi %arg27, %c0_i32_84 : i32
      %53 = arith.index_cast %52 : i32 to index
      %c6 = arith.constant 6 : index
      %c0_85 = arith.constant 0 : index
      %54 = vector.load %arg23[%53, %c6, %c0_85] : memref<32x40x128xf32, #tpu.memory_space<vmem>>, vector<1x28x128xf32>
      %55 = vector.shape_cast %54 : vector<1x28x128xf32> to vector<28x128xf32>
      %c0_86 = arith.constant 0 : index
      %c0_87 = arith.constant 0 : index
      %c0_88 = arith.constant 0 : index
      %56 = vector.load %arg10[%c0_86, %c0_87, %c0_88] : memref<25x1x128xf32, #tpu.memory_space<vmem>>, vector<1x1x128xf32>
      %57 = vector.shape_cast %56 : vector<1x1x128xf32> to vector<1x128xf32>
      %58 = vector.broadcast %57 : vector<1x128xf32> to vector<28x128xf32>
      %59 = arith.mulf %55, %58 : vector<28x128xf32>
      %60 = arith.addf %51, %59 : vector<28x128xf32>
      %61 = arith.index_cast %52 : i32 to index
      %c7 = arith.constant 7 : index
      %c0_89 = arith.constant 0 : index
      %62 = vector.load %arg23[%61, %c7, %c0_89] : memref<32x40x128xf32, #tpu.memory_space<vmem>>, vector<1x28x128xf32>
      %63 = vector.shape_cast %62 : vector<1x28x128xf32> to vector<28x128xf32>
      %c1 = arith.constant 1 : index
      %c0_90 = arith.constant 0 : index
      %c0_91 = arith.constant 0 : index
      %64 = vector.load %arg10[%c1, %c0_90, %c0_91] : memref<25x1x128xf32, #tpu.memory_space<vmem>>, vector<1x1x128xf32>
      %65 = vector.shape_cast %64 : vector<1x1x128xf32> to vector<1x128xf32>
      %66 = vector.broadcast %65 : vector<1x128xf32> to vector<28x128xf32>
      %67 = arith.mulf %63, %66 : vector<28x128xf32>
      %68 = arith.addf %60, %67 : vector<28x128xf32>
      %69 = arith.index_cast %52 : i32 to index
      %c8 = arith.constant 8 : index
      %c0_92 = arith.constant 0 : index
      %70 = vector.load %arg23[%69, %c8, %c0_92] : memref<32x40x128xf32, #tpu.memory_space<vmem>>, vector<1x28x128xf32>
      %71 = vector.shape_cast %70 : vector<1x28x128xf32> to vector<28x128xf32>
      %c2 = arith.constant 2 : index
      %c0_93 = arith.constant 0 : index
      %c0_94 = arith.constant 0 : index
      %72 = vector.load %arg10[%c2, %c0_93, %c0_94] : memref<25x1x128xf32, #tpu.memory_space<vmem>>, vector<1x1x128xf32>
      %73 = vector.shape_cast %72 : vector<1x1x128xf32> to vector<1x128xf32>
      %74 = vector.broadcast %73 : vector<1x128xf32> to vector<28x128xf32>
      %75 = arith.mulf %71, %74 : vector<28x128xf32>
      %76 = arith.addf %68, %75 : vector<28x128xf32>
      %77 = arith.index_cast %52 : i32 to index
      %c9 = arith.constant 9 : index
      %c0_95 = arith.constant 0 : index
      %78 = vector.load %arg23[%77, %c9, %c0_95] : memref<32x40x128xf32, #tpu.memory_space<vmem>>, vector<1x28x128xf32>
      %79 = vector.shape_cast %78 : vector<1x28x128xf32> to vector<28x128xf32>
      %c3 = arith.constant 3 : index
      %c0_96 = arith.constant 0 : index
      %c0_97 = arith.constant 0 : index
      %80 = vector.load %arg10[%c3, %c0_96, %c0_97] : memref<25x1x128xf32, #tpu.memory_space<vmem>>, vector<1x1x128xf32>
      %81 = vector.shape_cast %80 : vector<1x1x128xf32> to vector<1x128xf32>
      %82 = vector.broadcast %81 : vector<1x128xf32> to vector<28x128xf32>
      %83 = arith.mulf %79, %82 : vector<28x128xf32>
      %84 = arith.addf %76, %83 : vector<28x128xf32>
      %85 = arith.index_cast %52 : i32 to index
      %c10 = arith.constant 10 : index
      %c0_98 = arith.constant 0 : index
      %86 = vector.load %arg23[%85, %c10, %c0_98] : memref<32x40x128xf32, #tpu.memory_space<vmem>>, vector<1x28x128xf32>
      %87 = vector.shape_cast %86 : vector<1x28x128xf32> to vector<28x128xf32>
      %c4 = arith.constant 4 : index
      %c0_99 = arith.constant 0 : index
      %c0_100 = arith.constant 0 : index
      %88 = vector.load %arg10[%c4, %c0_99, %c0_100] : memref<25x1x128xf32, #tpu.memory_space<vmem>>, vector<1x1x128xf32>
      %89 = vector.shape_cast %88 : vector<1x1x128xf32> to vector<1x128xf32>
      %90 = vector.broadcast %89 : vector<1x128xf32> to vector<28x128xf32>
      %91 = arith.mulf %87, %90 : vector<28x128xf32>
      %92 = arith.addf %84, %91 : vector<28x128xf32>
      %c1_i32_101 = arith.constant 1 : i32
      %93 = arith.addi %arg27, %c1_i32_101 : i32
      %94 = arith.index_cast %93 : i32 to index
      %c6_102 = arith.constant 6 : index
      %c0_103 = arith.constant 0 : index
      %95 = vector.load %arg23[%94, %c6_102, %c0_103] : memref<32x40x128xf32, #tpu.memory_space<vmem>>, vector<1x28x128xf32>
      %96 = vector.shape_cast %95 : vector<1x28x128xf32> to vector<28x128xf32>
      %c5 = arith.constant 5 : index
      %c0_104 = arith.constant 0 : index
      %c0_105 = arith.constant 0 : index
      %97 = vector.load %arg10[%c5, %c0_104, %c0_105] : memref<25x1x128xf32, #tpu.memory_space<vmem>>, vector<1x1x128xf32>
      %98 = vector.shape_cast %97 : vector<1x1x128xf32> to vector<1x128xf32>
      %99 = vector.broadcast %98 : vector<1x128xf32> to vector<28x128xf32>
      %100 = arith.mulf %96, %99 : vector<28x128xf32>
      %101 = arith.addf %92, %100 : vector<28x128xf32>
      %102 = arith.index_cast %93 : i32 to index
      %c7_106 = arith.constant 7 : index
      %c0_107 = arith.constant 0 : index
      %103 = vector.load %arg23[%102, %c7_106, %c0_107] : memref<32x40x128xf32, #tpu.memory_space<vmem>>, vector<1x28x128xf32>
      %104 = vector.shape_cast %103 : vector<1x28x128xf32> to vector<28x128xf32>
      %c6_108 = arith.constant 6 : index
      %c0_109 = arith.constant 0 : index
      %c0_110 = arith.constant 0 : index
      %105 = vector.load %arg10[%c6_108, %c0_109, %c0_110] : memref<25x1x128xf32, #tpu.memory_space<vmem>>, vector<1x1x128xf32>
      %106 = vector.shape_cast %105 : vector<1x1x128xf32> to vector<1x128xf32>
      %107 = vector.broadcast %106 : vector<1x128xf32> to vector<28x128xf32>
      %108 = arith.mulf %104, %107 : vector<28x128xf32>
      %109 = arith.addf %101, %108 : vector<28x128xf32>
      %110 = arith.index_cast %93 : i32 to index
      %c8_111 = arith.constant 8 : index
      %c0_112 = arith.constant 0 : index
      %111 = vector.load %arg23[%110, %c8_111, %c0_112] : memref<32x40x128xf32, #tpu.memory_space<vmem>>, vector<1x28x128xf32>
      %112 = vector.shape_cast %111 : vector<1x28x128xf32> to vector<28x128xf32>
      %c7_113 = arith.constant 7 : index
      %c0_114 = arith.constant 0 : index
      %c0_115 = arith.constant 0 : index
      %113 = vector.load %arg10[%c7_113, %c0_114, %c0_115] : memref<25x1x128xf32, #tpu.memory_space<vmem>>, vector<1x1x128xf32>
      %114 = vector.shape_cast %113 : vector<1x1x128xf32> to vector<1x128xf32>
      %115 = vector.broadcast %114 : vector<1x128xf32> to vector<28x128xf32>
      %116 = arith.mulf %112, %115 : vector<28x128xf32>
      %117 = arith.addf %109, %116 : vector<28x128xf32>
      %118 = arith.index_cast %93 : i32 to index
      %c9_116 = arith.constant 9 : index
      %c0_117 = arith.constant 0 : index
      %119 = vector.load %arg23[%118, %c9_116, %c0_117] : memref<32x40x128xf32, #tpu.memory_space<vmem>>, vector<1x28x128xf32>
      %120 = vector.shape_cast %119 : vector<1x28x128xf32> to vector<28x128xf32>
      %c8_118 = arith.constant 8 : index
      %c0_119 = arith.constant 0 : index
      %c0_120 = arith.constant 0 : index
      %121 = vector.load %arg10[%c8_118, %c0_119, %c0_120] : memref<25x1x128xf32, #tpu.memory_space<vmem>>, vector<1x1x128xf32>
      %122 = vector.shape_cast %121 : vector<1x1x128xf32> to vector<1x128xf32>
      %123 = vector.broadcast %122 : vector<1x128xf32> to vector<28x128xf32>
      %124 = arith.mulf %120, %123 : vector<28x128xf32>
      %125 = arith.addf %117, %124 : vector<28x128xf32>
      %126 = arith.index_cast %93 : i32 to index
      %c10_121 = arith.constant 10 : index
      %c0_122 = arith.constant 0 : index
      %127 = vector.load %arg23[%126, %c10_121, %c0_122] : memref<32x40x128xf32, #tpu.memory_space<vmem>>, vector<1x28x128xf32>
      %128 = vector.shape_cast %127 : vector<1x28x128xf32> to vector<28x128xf32>
      %c9_123 = arith.constant 9 : index
      %c0_124 = arith.constant 0 : index
      %c0_125 = arith.constant 0 : index
      %129 = vector.load %arg10[%c9_123, %c0_124, %c0_125] : memref<25x1x128xf32, #tpu.memory_space<vmem>>, vector<1x1x128xf32>
      %130 = vector.shape_cast %129 : vector<1x1x128xf32> to vector<1x128xf32>
      %131 = vector.broadcast %130 : vector<1x128xf32> to vector<28x128xf32>
      %132 = arith.mulf %128, %131 : vector<28x128xf32>
      %133 = arith.addf %125, %132 : vector<28x128xf32>
      %c2_i32 = arith.constant 2 : i32
      %134 = arith.addi %arg27, %c2_i32 : i32
      %135 = arith.index_cast %134 : i32 to index
      %c6_126 = arith.constant 6 : index
      %c0_127 = arith.constant 0 : index
      %136 = vector.load %arg23[%135, %c6_126, %c0_127] : memref<32x40x128xf32, #tpu.memory_space<vmem>>, vector<1x28x128xf32>
      %137 = vector.shape_cast %136 : vector<1x28x128xf32> to vector<28x128xf32>
      %c10_128 = arith.constant 10 : index
      %c0_129 = arith.constant 0 : index
      %c0_130 = arith.constant 0 : index
      %138 = vector.load %arg10[%c10_128, %c0_129, %c0_130] : memref<25x1x128xf32, #tpu.memory_space<vmem>>, vector<1x1x128xf32>
      %139 = vector.shape_cast %138 : vector<1x1x128xf32> to vector<1x128xf32>
      %140 = vector.broadcast %139 : vector<1x128xf32> to vector<28x128xf32>
      %141 = arith.mulf %137, %140 : vector<28x128xf32>
      %142 = arith.addf %133, %141 : vector<28x128xf32>
      %143 = arith.index_cast %134 : i32 to index
      %c7_131 = arith.constant 7 : index
      %c0_132 = arith.constant 0 : index
      %144 = vector.load %arg23[%143, %c7_131, %c0_132] : memref<32x40x128xf32, #tpu.memory_space<vmem>>, vector<1x28x128xf32>
      %145 = vector.shape_cast %144 : vector<1x28x128xf32> to vector<28x128xf32>
      %c11 = arith.constant 11 : index
      %c0_133 = arith.constant 0 : index
      %c0_134 = arith.constant 0 : index
      %146 = vector.load %arg10[%c11, %c0_133, %c0_134] : memref<25x1x128xf32, #tpu.memory_space<vmem>>, vector<1x1x128xf32>
      %147 = vector.shape_cast %146 : vector<1x1x128xf32> to vector<1x128xf32>
      %148 = vector.broadcast %147 : vector<1x128xf32> to vector<28x128xf32>
      %149 = arith.mulf %145, %148 : vector<28x128xf32>
      %150 = arith.addf %142, %149 : vector<28x128xf32>
      %151 = arith.index_cast %134 : i32 to index
      %c8_135 = arith.constant 8 : index
      %c0_136 = arith.constant 0 : index
      %152 = vector.load %arg23[%151, %c8_135, %c0_136] : memref<32x40x128xf32, #tpu.memory_space<vmem>>, vector<1x28x128xf32>
      %153 = vector.shape_cast %152 : vector<1x28x128xf32> to vector<28x128xf32>
      %c12 = arith.constant 12 : index
      %c0_137 = arith.constant 0 : index
      %c0_138 = arith.constant 0 : index
      %154 = vector.load %arg10[%c12, %c0_137, %c0_138] : memref<25x1x128xf32, #tpu.memory_space<vmem>>, vector<1x1x128xf32>
      %155 = vector.shape_cast %154 : vector<1x1x128xf32> to vector<1x128xf32>
      %156 = vector.broadcast %155 : vector<1x128xf32> to vector<28x128xf32>
      %157 = arith.mulf %153, %156 : vector<28x128xf32>
      %158 = arith.addf %150, %157 : vector<28x128xf32>
      %159 = arith.index_cast %134 : i32 to index
      %c9_139 = arith.constant 9 : index
      %c0_140 = arith.constant 0 : index
      %160 = vector.load %arg23[%159, %c9_139, %c0_140] : memref<32x40x128xf32, #tpu.memory_space<vmem>>, vector<1x28x128xf32>
      %161 = vector.shape_cast %160 : vector<1x28x128xf32> to vector<28x128xf32>
      %c13 = arith.constant 13 : index
      %c0_141 = arith.constant 0 : index
      %c0_142 = arith.constant 0 : index
      %162 = vector.load %arg10[%c13, %c0_141, %c0_142] : memref<25x1x128xf32, #tpu.memory_space<vmem>>, vector<1x1x128xf32>
      %163 = vector.shape_cast %162 : vector<1x1x128xf32> to vector<1x128xf32>
      %164 = vector.broadcast %163 : vector<1x128xf32> to vector<28x128xf32>
      %165 = arith.mulf %161, %164 : vector<28x128xf32>
      %166 = arith.addf %158, %165 : vector<28x128xf32>
      %167 = arith.index_cast %134 : i32 to index
      %c10_143 = arith.constant 10 : index
      %c0_144 = arith.constant 0 : index
      %168 = vector.load %arg23[%167, %c10_143, %c0_144] : memref<32x40x128xf32, #tpu.memory_space<vmem>>, vector<1x28x128xf32>
      %169 = vector.shape_cast %168 : vector<1x28x128xf32> to vector<28x128xf32>
      %c14 = arith.constant 14 : index
      %c0_145 = arith.constant 0 : index
      %c0_146 = arith.constant 0 : index
      %170 = vector.load %arg10[%c14, %c0_145, %c0_146] : memref<25x1x128xf32, #tpu.memory_space<vmem>>, vector<1x1x128xf32>
      %171 = vector.shape_cast %170 : vector<1x1x128xf32> to vector<1x128xf32>
      %172 = vector.broadcast %171 : vector<1x128xf32> to vector<28x128xf32>
      %173 = arith.mulf %169, %172 : vector<28x128xf32>
      %174 = arith.addf %166, %173 : vector<28x128xf32>
      %c3_i32 = arith.constant 3 : i32
      %175 = arith.addi %arg27, %c3_i32 : i32
      %176 = arith.index_cast %175 : i32 to index
      %c6_147 = arith.constant 6 : index
      %c0_148 = arith.constant 0 : index
      %177 = vector.load %arg23[%176, %c6_147, %c0_148] : memref<32x40x128xf32, #tpu.memory_space<vmem>>, vector<1x28x128xf32>
      %178 = vector.shape_cast %177 : vector<1x28x128xf32> to vector<28x128xf32>
      %c15 = arith.constant 15 : index
      %c0_149 = arith.constant 0 : index
      %c0_150 = arith.constant 0 : index
      %179 = vector.load %arg10[%c15, %c0_149, %c0_150] : memref<25x1x128xf32, #tpu.memory_space<vmem>>, vector<1x1x128xf32>
      %180 = vector.shape_cast %179 : vector<1x1x128xf32> to vector<1x128xf32>
      %181 = vector.broadcast %180 : vector<1x128xf32> to vector<28x128xf32>
      %182 = arith.mulf %178, %181 : vector<28x128xf32>
      %183 = arith.addf %174, %182 : vector<28x128xf32>
      %184 = arith.index_cast %175 : i32 to index
      %c7_151 = arith.constant 7 : index
      %c0_152 = arith.constant 0 : index
      %185 = vector.load %arg23[%184, %c7_151, %c0_152] : memref<32x40x128xf32, #tpu.memory_space<vmem>>, vector<1x28x128xf32>
      %186 = vector.shape_cast %185 : vector<1x28x128xf32> to vector<28x128xf32>
      %c16 = arith.constant 16 : index
      %c0_153 = arith.constant 0 : index
      %c0_154 = arith.constant 0 : index
      %187 = vector.load %arg10[%c16, %c0_153, %c0_154] : memref<25x1x128xf32, #tpu.memory_space<vmem>>, vector<1x1x128xf32>
      %188 = vector.shape_cast %187 : vector<1x1x128xf32> to vector<1x128xf32>
      %189 = vector.broadcast %188 : vector<1x128xf32> to vector<28x128xf32>
      %190 = arith.mulf %186, %189 : vector<28x128xf32>
      %191 = arith.addf %183, %190 : vector<28x128xf32>
      %192 = arith.index_cast %175 : i32 to index
      %c8_155 = arith.constant 8 : index
      %c0_156 = arith.constant 0 : index
      %193 = vector.load %arg23[%192, %c8_155, %c0_156] : memref<32x40x128xf32, #tpu.memory_space<vmem>>, vector<1x28x128xf32>
      %194 = vector.shape_cast %193 : vector<1x28x128xf32> to vector<28x128xf32>
      %c17 = arith.constant 17 : index
      %c0_157 = arith.constant 0 : index
      %c0_158 = arith.constant 0 : index
      %195 = vector.load %arg10[%c17, %c0_157, %c0_158] : memref<25x1x128xf32, #tpu.memory_space<vmem>>, vector<1x1x128xf32>
      %196 = vector.shape_cast %195 : vector<1x1x128xf32> to vector<1x128xf32>
      %197 = vector.broadcast %196 : vector<1x128xf32> to vector<28x128xf32>
      %198 = arith.mulf %194, %197 : vector<28x128xf32>
      %199 = arith.addf %191, %198 : vector<28x128xf32>
      %200 = arith.index_cast %175 : i32 to index
      %c9_159 = arith.constant 9 : index
      %c0_160 = arith.constant 0 : index
      %201 = vector.load %arg23[%200, %c9_159, %c0_160] : memref<32x40x128xf32, #tpu.memory_space<vmem>>, vector<1x28x128xf32>
      %202 = vector.shape_cast %201 : vector<1x28x128xf32> to vector<28x128xf32>
      %c18 = arith.constant 18 : index
      %c0_161 = arith.constant 0 : index
      %c0_162 = arith.constant 0 : index
      %203 = vector.load %arg10[%c18, %c0_161, %c0_162] : memref<25x1x128xf32, #tpu.memory_space<vmem>>, vector<1x1x128xf32>
      %204 = vector.shape_cast %203 : vector<1x1x128xf32> to vector<1x128xf32>
      %205 = vector.broadcast %204 : vector<1x128xf32> to vector<28x128xf32>
      %206 = arith.mulf %202, %205 : vector<28x128xf32>
      %207 = arith.addf %199, %206 : vector<28x128xf32>
      %208 = arith.index_cast %175 : i32 to index
      %c10_163 = arith.constant 10 : index
      %c0_164 = arith.constant 0 : index
      %209 = vector.load %arg23[%208, %c10_163, %c0_164] : memref<32x40x128xf32, #tpu.memory_space<vmem>>, vector<1x28x128xf32>
      %210 = vector.shape_cast %209 : vector<1x28x128xf32> to vector<28x128xf32>
      %c19 = arith.constant 19 : index
      %c0_165 = arith.constant 0 : index
      %c0_166 = arith.constant 0 : index
      %211 = vector.load %arg10[%c19, %c0_165, %c0_166] : memref<25x1x128xf32, #tpu.memory_space<vmem>>, vector<1x1x128xf32>
      %212 = vector.shape_cast %211 : vector<1x1x128xf32> to vector<1x128xf32>
      %213 = vector.broadcast %212 : vector<1x128xf32> to vector<28x128xf32>
      %214 = arith.mulf %210, %213 : vector<28x128xf32>
      %215 = arith.addf %207, %214 : vector<28x128xf32>
      %c4_i32_167 = arith.constant 4 : i32
      %216 = arith.addi %arg27, %c4_i32_167 : i32
      %217 = arith.index_cast %216 : i32 to index
      %c6_168 = arith.constant 6 : index
      %c0_169 = arith.constant 0 : index
      %218 = vector.load %arg23[%217, %c6_168, %c0_169] : memref<32x40x128xf32, #tpu.memory_space<vmem>>, vector<1x28x128xf32>
      %219 = vector.shape_cast %218 : vector<1x28x128xf32> to vector<28x128xf32>
      %c20 = arith.constant 20 : index
      %c0_170 = arith.constant 0 : index
      %c0_171 = arith.constant 0 : index
      %220 = vector.load %arg10[%c20, %c0_170, %c0_171] : memref<25x1x128xf32, #tpu.memory_space<vmem>>, vector<1x1x128xf32>
      %221 = vector.shape_cast %220 : vector<1x1x128xf32> to vector<1x128xf32>
      %222 = vector.broadcast %221 : vector<1x128xf32> to vector<28x128xf32>
      %223 = arith.mulf %219, %222 : vector<28x128xf32>
      %224 = arith.addf %215, %223 : vector<28x128xf32>
      %225 = arith.index_cast %216 : i32 to index
      %c7_172 = arith.constant 7 : index
      %c0_173 = arith.constant 0 : index
      %226 = vector.load %arg23[%225, %c7_172, %c0_173] : memref<32x40x128xf32, #tpu.memory_space<vmem>>, vector<1x28x128xf32>
      %227 = vector.shape_cast %226 : vector<1x28x128xf32> to vector<28x128xf32>
      %c21 = arith.constant 21 : index
      %c0_174 = arith.constant 0 : index
      %c0_175 = arith.constant 0 : index
      %228 = vector.load %arg10[%c21, %c0_174, %c0_175] : memref<25x1x128xf32, #tpu.memory_space<vmem>>, vector<1x1x128xf32>
      %229 = vector.shape_cast %228 : vector<1x1x128xf32> to vector<1x128xf32>
      %230 = vector.broadcast %229 : vector<1x128xf32> to vector<28x128xf32>
      %231 = arith.mulf %227, %230 : vector<28x128xf32>
      %232 = arith.addf %224, %231 : vector<28x128xf32>
      %233 = arith.index_cast %216 : i32 to index
      %c8_176 = arith.constant 8 : index
      %c0_177 = arith.constant 0 : index
      %234 = vector.load %arg23[%233, %c8_176, %c0_177] : memref<32x40x128xf32, #tpu.memory_space<vmem>>, vector<1x28x128xf32>
      %235 = vector.shape_cast %234 : vector<1x28x128xf32> to vector<28x128xf32>
      %c22 = arith.constant 22 : index
      %c0_178 = arith.constant 0 : index
      %c0_179 = arith.constant 0 : index
      %236 = vector.load %arg10[%c22, %c0_178, %c0_179] : memref<25x1x128xf32, #tpu.memory_space<vmem>>, vector<1x1x128xf32>
      %237 = vector.shape_cast %236 : vector<1x1x128xf32> to vector<1x128xf32>
      %238 = vector.broadcast %237 : vector<1x128xf32> to vector<28x128xf32>
      %239 = arith.mulf %235, %238 : vector<28x128xf32>
      %240 = arith.addf %232, %239 : vector<28x128xf32>
      %241 = arith.index_cast %216 : i32 to index
      %c9_180 = arith.constant 9 : index
      %c0_181 = arith.constant 0 : index
      %242 = vector.load %arg23[%241, %c9_180, %c0_181] : memref<32x40x128xf32, #tpu.memory_space<vmem>>, vector<1x28x128xf32>
      %243 = vector.shape_cast %242 : vector<1x28x128xf32> to vector<28x128xf32>
      %c23 = arith.constant 23 : index
      %c0_182 = arith.constant 0 : index
      %c0_183 = arith.constant 0 : index
      %244 = vector.load %arg10[%c23, %c0_182, %c0_183] : memref<25x1x128xf32, #tpu.memory_space<vmem>>, vector<1x1x128xf32>
      %245 = vector.shape_cast %244 : vector<1x1x128xf32> to vector<1x128xf32>
      %246 = vector.broadcast %245 : vector<1x128xf32> to vector<28x128xf32>
      %247 = arith.mulf %243, %246 : vector<28x128xf32>
      %248 = arith.addf %240, %247 : vector<28x128xf32>
      %249 = arith.index_cast %216 : i32 to index
      %c10_184 = arith.constant 10 : index
      %c0_185 = arith.constant 0 : index
      %250 = vector.load %arg23[%249, %c10_184, %c0_185] : memref<32x40x128xf32, #tpu.memory_space<vmem>>, vector<1x28x128xf32>
      %251 = vector.shape_cast %250 : vector<1x28x128xf32> to vector<28x128xf32>
      %c24 = arith.constant 24 : index
      %c0_186 = arith.constant 0 : index
      %c0_187 = arith.constant 0 : index
      %252 = vector.load %arg10[%c24, %c0_186, %c0_187] : memref<25x1x128xf32, #tpu.memory_space<vmem>>, vector<1x1x128xf32>
      %253 = vector.shape_cast %252 : vector<1x1x128xf32> to vector<1x128xf32>
      %254 = vector.broadcast %253 : vector<1x128xf32> to vector<28x128xf32>
      %255 = arith.mulf %251, %254 : vector<28x128xf32>
      %256 = arith.addf %248, %255 : vector<28x128xf32>
      %257 = arith.index_cast %arg27 : i32 to index
      %c0_188 = arith.constant 0 : index
      %c0_189 = arith.constant 0 : index
      %258 = vector.load %arg24[%257, %c0_188, %c0_189] : memref<28x32x128xf32, #tpu.memory_space<vmem>>, vector<1x28x128xf32>
      %259 = vector.shape_cast %258 : vector<1x28x128xf32> to vector<28x128xf32>
      %260 = vector.shape_cast %256 : vector<28x128xf32> to vector<1x28x128xf32>
      tpu.vector_store %arg24[%257, %c0_188, %c0_189], %260 {strides = array<i32>} : memref<28x32x128xf32, #tpu.memory_space<vmem>>, vector<1x28x128xf32>,
    }
    %c28_i32_61 = arith.constant 28 : i32
    %cst_62 = arith.constant 0.000000e+00 : f32
    %34 = vector.broadcast %cst_62 : f32 to vector<7x8x128xf32>
    %cst_63 = arith.constant 0.000000e+00 : f32
    %35 = vector.broadcast %cst_63 : f32 to vector<7x4x128xf32>
    %c0_i32_64 = arith.constant 0 : i32
    %c4_i32_65 = arith.constant 4 : i32
    %36 = arith.addi %c0_i32_64, %c4_i32_65 : i32
    %c1_i32_66 = arith.constant 1 : i32
    scf.for %arg27 = %c0_i32_64 to %36 step %c1_i32_66  : i32 {
      %c7_i32 = arith.constant 7 : i32
      %51 = arith.muli %arg27, %c7_i32 : i32
      %52 = arith.index_cast %51 : i32 to index
      %c0_83 = arith.constant 0 : index
      %c0_84 = arith.constant 0 : index
      %53 = vector.load %arg24[%52, %c0_83, %c0_84] : memref<28x32x128xf32, #tpu.memory_space<vmem>>, vector<7x32x128xf32>
      %54 = vector.shape_cast %53 : vector<7x32x128xf32> to vector<224x128xf32>
      %c0_85 = arith.constant 0 : index
      %c0_86 = arith.constant 0 : index
      %55 = vector.load %arg11[%c0_85, %c0_86] : memref<128x128xf32, #tpu.memory_space<vmem>>, vector<128x128xf32>
      %cst_87 = arith.constant dense<0.000000e+00> : vector<224x128xf32>
      %56 = tpu.matmul %54, %55, %cst_87 {dimension_numbers = #tpu.dot_dimension_numbers<[1], [0], [0], [1], [0, 0, 1, 1], [], []>} : vector<224x128xf32>, vector<128x128xf32>, vector<224x128xf32> -> vector<224x128xf32>
      %c0_88 = arith.constant 0 : index
      %c0_89 = arith.constant 0 : index
      %57 = vector.load %arg12[%c0_88, %c0_89] : memref<1x128xf32, #tpu.memory_space<vmem>>, vector<1x128xf32>
      %58 = vector.broadcast %57 : vector<1x128xf32> to vector<224x128xf32>
      %59 = arith.addf %56, %58 : vector<224x128xf32>
      %cst_90 = arith.constant 0.000000e+00 : f32
      %60 = vector.broadcast %cst_90 : f32 to vector<224x128xf32>
      %61 = arith.maximumf %59, %60 : vector<224x128xf32>
      %62 = vector.shape_cast %61 : vector<224x128xf32> to vector<7x32x128xf32>
      %63 = vector.extract_strided_slice %62 {offsets = [0, 0, 0], sizes = [7, 28, 128], strides = [1, 1, 1]} : vector<7x32x128xf32> to vector<7x28x128xf32>
      %64 = tpu.concatenate %34, %63, %35 in 1 : vector<7x8x128xf32>, vector<7x28x128xf32>, vector<7x4x128xf32> -> vector<7x40x128xf32>
      %c7_i32_91 = arith.constant 7 : i32
      %65 = arith.muli %arg27, %c7_i32_91 : i32
      %c2_i32 = arith.constant 2 : i32
      %66 = arith.addi %c2_i32, %65 : i32
      %67 = arith.index_cast %66 : i32 to index
      %c0_92 = arith.constant 0 : index
      %c0_93 = arith.constant 0 : index
      %68 = vector.load %arg25[%67, %c0_92, %c0_93] : memref<32x40x128xf32, #tpu.memory_space<vmem>>, vector<7x40x128xf32>
      tpu.vector_store %arg25[%67, %c0_92, %c0_93], %64 {strides = array<i32>} : memref<32x40x128xf32, #tpu.memory_space<vmem>>, vector<7x40x128xf32>,
    }
    %c4_i32_67 = arith.constant 4 : i32
    %c0_i32_68 = arith.constant 0 : i32
    %c28_i32_69 = arith.constant 28 : i32
    %37 = arith.addi %c0_i32_68, %c28_i32_69 : i32
    %c1_i32_70 = arith.constant 1 : i32
    scf.for %arg27 = %c0_i32_68 to %37 step %c1_i32_70  : i32 {
      %cst_83 = arith.constant 0.000000e+00 : f32
      %51 = vector.broadcast %cst_83 : f32 to vector<28x128xf32>
      %c0_i32_84 = arith.constant 0 : i32
      %52 = arith.addi %arg27, %c0_i32_84 : i32
      %53 = arith.index_cast %52 : i32 to index
      %c6 = arith.constant 6 : index
      %c0_85 = arith.constant 0 : index
      %54 = vector.load %arg25[%53, %c6, %c0_85] : memref<32x40x128xf32, #tpu.memory_space<vmem>>, vector<1x28x128xf32>
      %55 = vector.shape_cast %54 : vector<1x28x128xf32> to vector<28x128xf32>
      %c0_86 = arith.constant 0 : index
      %c0_87 = arith.constant 0 : index
      %c0_88 = arith.constant 0 : index
      %56 = vector.load %arg13[%c0_86, %c0_87, %c0_88] : memref<25x1x128xf32, #tpu.memory_space<vmem>>, vector<1x1x128xf32>
      %57 = vector.shape_cast %56 : vector<1x1x128xf32> to vector<1x128xf32>
      %58 = vector.broadcast %57 : vector<1x128xf32> to vector<28x128xf32>
      %59 = arith.mulf %55, %58 : vector<28x128xf32>
      %60 = arith.addf %51, %59 : vector<28x128xf32>
      %61 = arith.index_cast %52 : i32 to index
      %c7 = arith.constant 7 : index
      %c0_89 = arith.constant 0 : index
      %62 = vector.load %arg25[%61, %c7, %c0_89] : memref<32x40x128xf32, #tpu.memory_space<vmem>>, vector<1x28x128xf32>
      %63 = vector.shape_cast %62 : vector<1x28x128xf32> to vector<28x128xf32>
      %c1 = arith.constant 1 : index
      %c0_90 = arith.constant 0 : index
      %c0_91 = arith.constant 0 : index
      %64 = vector.load %arg13[%c1, %c0_90, %c0_91] : memref<25x1x128xf32, #tpu.memory_space<vmem>>, vector<1x1x128xf32>
      %65 = vector.shape_cast %64 : vector<1x1x128xf32> to vector<1x128xf32>
      %66 = vector.broadcast %65 : vector<1x128xf32> to vector<28x128xf32>
      %67 = arith.mulf %63, %66 : vector<28x128xf32>
      %68 = arith.addf %60, %67 : vector<28x128xf32>
      %69 = arith.index_cast %52 : i32 to index
      %c8 = arith.constant 8 : index
      %c0_92 = arith.constant 0 : index
      %70 = vector.load %arg25[%69, %c8, %c0_92] : memref<32x40x128xf32, #tpu.memory_space<vmem>>, vector<1x28x128xf32>
      %71 = vector.shape_cast %70 : vector<1x28x128xf32> to vector<28x128xf32>
      %c2 = arith.constant 2 : index
      %c0_93 = arith.constant 0 : index
      %c0_94 = arith.constant 0 : index
      %72 = vector.load %arg13[%c2, %c0_93, %c0_94] : memref<25x1x128xf32, #tpu.memory_space<vmem>>, vector<1x1x128xf32>
      %73 = vector.shape_cast %72 : vector<1x1x128xf32> to vector<1x128xf32>
      %74 = vector.broadcast %73 : vector<1x128xf32> to vector<28x128xf32>
      %75 = arith.mulf %71, %74 : vector<28x128xf32>
      %76 = arith.addf %68, %75 : vector<28x128xf32>
      %77 = arith.index_cast %52 : i32 to index
      %c9 = arith.constant 9 : index
      %c0_95 = arith.constant 0 : index
      %78 = vector.load %arg25[%77, %c9, %c0_95] : memref<32x40x128xf32, #tpu.memory_space<vmem>>, vector<1x28x128xf32>
      %79 = vector.shape_cast %78 : vector<1x28x128xf32> to vector<28x128xf32>
      %c3 = arith.constant 3 : index
      %c0_96 = arith.constant 0 : index
      %c0_97 = arith.constant 0 : index
      %80 = vector.load %arg13[%c3, %c0_96, %c0_97] : memref<25x1x128xf32, #tpu.memory_space<vmem>>, vector<1x1x128xf32>
      %81 = vector.shape_cast %80 : vector<1x1x128xf32> to vector<1x128xf32>
      %82 = vector.broadcast %81 : vector<1x128xf32> to vector<28x128xf32>
      %83 = arith.mulf %79, %82 : vector<28x128xf32>
      %84 = arith.addf %76, %83 : vector<28x128xf32>
      %85 = arith.index_cast %52 : i32 to index
      %c10 = arith.constant 10 : index
      %c0_98 = arith.constant 0 : index
      %86 = vector.load %arg25[%85, %c10, %c0_98] : memref<32x40x128xf32, #tpu.memory_space<vmem>>, vector<1x28x128xf32>
      %87 = vector.shape_cast %86 : vector<1x28x128xf32> to vector<28x128xf32>
      %c4 = arith.constant 4 : index
      %c0_99 = arith.constant 0 : index
      %c0_100 = arith.constant 0 : index
      %88 = vector.load %arg13[%c4, %c0_99, %c0_100] : memref<25x1x128xf32, #tpu.memory_space<vmem>>, vector<1x1x128xf32>
      %89 = vector.shape_cast %88 : vector<1x1x128xf32> to vector<1x128xf32>
      %90 = vector.broadcast %89 : vector<1x128xf32> to vector<28x128xf32>
      %91 = arith.mulf %87, %90 : vector<28x128xf32>
      %92 = arith.addf %84, %91 : vector<28x128xf32>
      %c1_i32_101 = arith.constant 1 : i32
      %93 = arith.addi %arg27, %c1_i32_101 : i32
      %94 = arith.index_cast %93 : i32 to index
      %c6_102 = arith.constant 6 : index
      %c0_103 = arith.constant 0 : index
      %95 = vector.load %arg25[%94, %c6_102, %c0_103] : memref<32x40x128xf32, #tpu.memory_space<vmem>>, vector<1x28x128xf32>
      %96 = vector.shape_cast %95 : vector<1x28x128xf32> to vector<28x128xf32>
      %c5 = arith.constant 5 : index
      %c0_104 = arith.constant 0 : index
      %c0_105 = arith.constant 0 : index
      %97 = vector.load %arg13[%c5, %c0_104, %c0_105] : memref<25x1x128xf32, #tpu.memory_space<vmem>>, vector<1x1x128xf32>
      %98 = vector.shape_cast %97 : vector<1x1x128xf32> to vector<1x128xf32>
      %99 = vector.broadcast %98 : vector<1x128xf32> to vector<28x128xf32>
      %100 = arith.mulf %96, %99 : vector<28x128xf32>
      %101 = arith.addf %92, %100 : vector<28x128xf32>
      %102 = arith.index_cast %93 : i32 to index
      %c7_106 = arith.constant 7 : index
      %c0_107 = arith.constant 0 : index
      %103 = vector.load %arg25[%102, %c7_106, %c0_107] : memref<32x40x128xf32, #tpu.memory_space<vmem>>, vector<1x28x128xf32>
      %104 = vector.shape_cast %103 : vector<1x28x128xf32> to vector<28x128xf32>
      %c6_108 = arith.constant 6 : index
      %c0_109 = arith.constant 0 : index
      %c0_110 = arith.constant 0 : index
      %105 = vector.load %arg13[%c6_108, %c0_109, %c0_110] : memref<25x1x128xf32, #tpu.memory_space<vmem>>, vector<1x1x128xf32>
      %106 = vector.shape_cast %105 : vector<1x1x128xf32> to vector<1x128xf32>
      %107 = vector.broadcast %106 : vector<1x128xf32> to vector<28x128xf32>
      %108 = arith.mulf %104, %107 : vector<28x128xf32>
      %109 = arith.addf %101, %108 : vector<28x128xf32>
      %110 = arith.index_cast %93 : i32 to index
      %c8_111 = arith.constant 8 : index
      %c0_112 = arith.constant 0 : index
      %111 = vector.load %arg25[%110, %c8_111, %c0_112] : memref<32x40x128xf32, #tpu.memory_space<vmem>>, vector<1x28x128xf32>
      %112 = vector.shape_cast %111 : vector<1x28x128xf32> to vector<28x128xf32>
      %c7_113 = arith.constant 7 : index
      %c0_114 = arith.constant 0 : index
      %c0_115 = arith.constant 0 : index
      %113 = vector.load %arg13[%c7_113, %c0_114, %c0_115] : memref<25x1x128xf32, #tpu.memory_space<vmem>>, vector<1x1x128xf32>
      %114 = vector.shape_cast %113 : vector<1x1x128xf32> to vector<1x128xf32>
      %115 = vector.broadcast %114 : vector<1x128xf32> to vector<28x128xf32>
      %116 = arith.mulf %112, %115 : vector<28x128xf32>
      %117 = arith.addf %109, %116 : vector<28x128xf32>
      %118 = arith.index_cast %93 : i32 to index
      %c9_116 = arith.constant 9 : index
      %c0_117 = arith.constant 0 : index
      %119 = vector.load %arg25[%118, %c9_116, %c0_117] : memref<32x40x128xf32, #tpu.memory_space<vmem>>, vector<1x28x128xf32>
      %120 = vector.shape_cast %119 : vector<1x28x128xf32> to vector<28x128xf32>
      %c8_118 = arith.constant 8 : index
      %c0_119 = arith.constant 0 : index
      %c0_120 = arith.constant 0 : index
      %121 = vector.load %arg13[%c8_118, %c0_119, %c0_120] : memref<25x1x128xf32, #tpu.memory_space<vmem>>, vector<1x1x128xf32>
      %122 = vector.shape_cast %121 : vector<1x1x128xf32> to vector<1x128xf32>
      %123 = vector.broadcast %122 : vector<1x128xf32> to vector<28x128xf32>
      %124 = arith.mulf %120, %123 : vector<28x128xf32>
      %125 = arith.addf %117, %124 : vector<28x128xf32>
      %126 = arith.index_cast %93 : i32 to index
      %c10_121 = arith.constant 10 : index
      %c0_122 = arith.constant 0 : index
      %127 = vector.load %arg25[%126, %c10_121, %c0_122] : memref<32x40x128xf32, #tpu.memory_space<vmem>>, vector<1x28x128xf32>
      %128 = vector.shape_cast %127 : vector<1x28x128xf32> to vector<28x128xf32>
      %c9_123 = arith.constant 9 : index
      %c0_124 = arith.constant 0 : index
      %c0_125 = arith.constant 0 : index
      %129 = vector.load %arg13[%c9_123, %c0_124, %c0_125] : memref<25x1x128xf32, #tpu.memory_space<vmem>>, vector<1x1x128xf32>
      %130 = vector.shape_cast %129 : vector<1x1x128xf32> to vector<1x128xf32>
      %131 = vector.broadcast %130 : vector<1x128xf32> to vector<28x128xf32>
      %132 = arith.mulf %128, %131 : vector<28x128xf32>
      %133 = arith.addf %125, %132 : vector<28x128xf32>
      %c2_i32 = arith.constant 2 : i32
      %134 = arith.addi %arg27, %c2_i32 : i32
      %135 = arith.index_cast %134 : i32 to index
      %c6_126 = arith.constant 6 : index
      %c0_127 = arith.constant 0 : index
      %136 = vector.load %arg25[%135, %c6_126, %c0_127] : memref<32x40x128xf32, #tpu.memory_space<vmem>>, vector<1x28x128xf32>
      %137 = vector.shape_cast %136 : vector<1x28x128xf32> to vector<28x128xf32>
      %c10_128 = arith.constant 10 : index
      %c0_129 = arith.constant 0 : index
      %c0_130 = arith.constant 0 : index
      %138 = vector.load %arg13[%c10_128, %c0_129, %c0_130] : memref<25x1x128xf32, #tpu.memory_space<vmem>>, vector<1x1x128xf32>
      %139 = vector.shape_cast %138 : vector<1x1x128xf32> to vector<1x128xf32>
      %140 = vector.broadcast %139 : vector<1x128xf32> to vector<28x128xf32>
      %141 = arith.mulf %137, %140 : vector<28x128xf32>
      %142 = arith.addf %133, %141 : vector<28x128xf32>
      %143 = arith.index_cast %134 : i32 to index
      %c7_131 = arith.constant 7 : index
      %c0_132 = arith.constant 0 : index
      %144 = vector.load %arg25[%143, %c7_131, %c0_132] : memref<32x40x128xf32, #tpu.memory_space<vmem>>, vector<1x28x128xf32>
      %145 = vector.shape_cast %144 : vector<1x28x128xf32> to vector<28x128xf32>
      %c11 = arith.constant 11 : index
      %c0_133 = arith.constant 0 : index
      %c0_134 = arith.constant 0 : index
      %146 = vector.load %arg13[%c11, %c0_133, %c0_134] : memref<25x1x128xf32, #tpu.memory_space<vmem>>, vector<1x1x128xf32>
      %147 = vector.shape_cast %146 : vector<1x1x128xf32> to vector<1x128xf32>
      %148 = vector.broadcast %147 : vector<1x128xf32> to vector<28x128xf32>
      %149 = arith.mulf %145, %148 : vector<28x128xf32>
      %150 = arith.addf %142, %149 : vector<28x128xf32>
      %151 = arith.index_cast %134 : i32 to index
      %c8_135 = arith.constant 8 : index
      %c0_136 = arith.constant 0 : index
      %152 = vector.load %arg25[%151, %c8_135, %c0_136] : memref<32x40x128xf32, #tpu.memory_space<vmem>>, vector<1x28x128xf32>
      %153 = vector.shape_cast %152 : vector<1x28x128xf32> to vector<28x128xf32>
      %c12 = arith.constant 12 : index
      %c0_137 = arith.constant 0 : index
      %c0_138 = arith.constant 0 : index
      %154 = vector.load %arg13[%c12, %c0_137, %c0_138] : memref<25x1x128xf32, #tpu.memory_space<vmem>>, vector<1x1x128xf32>
      %155 = vector.shape_cast %154 : vector<1x1x128xf32> to vector<1x128xf32>
      %156 = vector.broadcast %155 : vector<1x128xf32> to vector<28x128xf32>
      %157 = arith.mulf %153, %156 : vector<28x128xf32>
      %158 = arith.addf %150, %157 : vector<28x128xf32>
      %159 = arith.index_cast %134 : i32 to index
      %c9_139 = arith.constant 9 : index
      %c0_140 = arith.constant 0 : index
      %160 = vector.load %arg25[%159, %c9_139, %c0_140] : memref<32x40x128xf32, #tpu.memory_space<vmem>>, vector<1x28x128xf32>
      %161 = vector.shape_cast %160 : vector<1x28x128xf32> to vector<28x128xf32>
      %c13 = arith.constant 13 : index
      %c0_141 = arith.constant 0 : index
      %c0_142 = arith.constant 0 : index
      %162 = vector.load %arg13[%c13, %c0_141, %c0_142] : memref<25x1x128xf32, #tpu.memory_space<vmem>>, vector<1x1x128xf32>
      %163 = vector.shape_cast %162 : vector<1x1x128xf32> to vector<1x128xf32>
      %164 = vector.broadcast %163 : vector<1x128xf32> to vector<28x128xf32>
      %165 = arith.mulf %161, %164 : vector<28x128xf32>
      %166 = arith.addf %158, %165 : vector<28x128xf32>
      %167 = arith.index_cast %134 : i32 to index
      %c10_143 = arith.constant 10 : index
      %c0_144 = arith.constant 0 : index
      %168 = vector.load %arg25[%167, %c10_143, %c0_144] : memref<32x40x128xf32, #tpu.memory_space<vmem>>, vector<1x28x128xf32>
      %169 = vector.shape_cast %168 : vector<1x28x128xf32> to vector<28x128xf32>
      %c14 = arith.constant 14 : index
      %c0_145 = arith.constant 0 : index
      %c0_146 = arith.constant 0 : index
      %170 = vector.load %arg13[%c14, %c0_145, %c0_146] : memref<25x1x128xf32, #tpu.memory_space<vmem>>, vector<1x1x128xf32>
      %171 = vector.shape_cast %170 : vector<1x1x128xf32> to vector<1x128xf32>
      %172 = vector.broadcast %171 : vector<1x128xf32> to vector<28x128xf32>
      %173 = arith.mulf %169, %172 : vector<28x128xf32>
      %174 = arith.addf %166, %173 : vector<28x128xf32>
      %c3_i32 = arith.constant 3 : i32
      %175 = arith.addi %arg27, %c3_i32 : i32
      %176 = arith.index_cast %175 : i32 to index
      %c6_147 = arith.constant 6 : index
      %c0_148 = arith.constant 0 : index
      %177 = vector.load %arg25[%176, %c6_147, %c0_148] : memref<32x40x128xf32, #tpu.memory_space<vmem>>, vector<1x28x128xf32>
      %178 = vector.shape_cast %177 : vector<1x28x128xf32> to vector<28x128xf32>
      %c15 = arith.constant 15 : index
      %c0_149 = arith.constant 0 : index
      %c0_150 = arith.constant 0 : index
      %179 = vector.load %arg13[%c15, %c0_149, %c0_150] : memref<25x1x128xf32, #tpu.memory_space<vmem>>, vector<1x1x128xf32>
      %180 = vector.shape_cast %179 : vector<1x1x128xf32> to vector<1x128xf32>
      %181 = vector.broadcast %180 : vector<1x128xf32> to vector<28x128xf32>
      %182 = arith.mulf %178, %181 : vector<28x128xf32>
      %183 = arith.addf %174, %182 : vector<28x128xf32>
      %184 = arith.index_cast %175 : i32 to index
      %c7_151 = arith.constant 7 : index
      %c0_152 = arith.constant 0 : index
      %185 = vector.load %arg25[%184, %c7_151, %c0_152] : memref<32x40x128xf32, #tpu.memory_space<vmem>>, vector<1x28x128xf32>
      %186 = vector.shape_cast %185 : vector<1x28x128xf32> to vector<28x128xf32>
      %c16 = arith.constant 16 : index
      %c0_153 = arith.constant 0 : index
      %c0_154 = arith.constant 0 : index
      %187 = vector.load %arg13[%c16, %c0_153, %c0_154] : memref<25x1x128xf32, #tpu.memory_space<vmem>>, vector<1x1x128xf32>
      %188 = vector.shape_cast %187 : vector<1x1x128xf32> to vector<1x128xf32>
      %189 = vector.broadcast %188 : vector<1x128xf32> to vector<28x128xf32>
      %190 = arith.mulf %186, %189 : vector<28x128xf32>
      %191 = arith.addf %183, %190 : vector<28x128xf32>
      %192 = arith.index_cast %175 : i32 to index
      %c8_155 = arith.constant 8 : index
      %c0_156 = arith.constant 0 : index
      %193 = vector.load %arg25[%192, %c8_155, %c0_156] : memref<32x40x128xf32, #tpu.memory_space<vmem>>, vector<1x28x128xf32>
      %194 = vector.shape_cast %193 : vector<1x28x128xf32> to vector<28x128xf32>
      %c17 = arith.constant 17 : index
      %c0_157 = arith.constant 0 : index
      %c0_158 = arith.constant 0 : index
      %195 = vector.load %arg13[%c17, %c0_157, %c0_158] : memref<25x1x128xf32, #tpu.memory_space<vmem>>, vector<1x1x128xf32>
      %196 = vector.shape_cast %195 : vector<1x1x128xf32> to vector<1x128xf32>
      %197 = vector.broadcast %196 : vector<1x128xf32> to vector<28x128xf32>
      %198 = arith.mulf %194, %197 : vector<28x128xf32>
      %199 = arith.addf %191, %198 : vector<28x128xf32>
      %200 = arith.index_cast %175 : i32 to index
      %c9_159 = arith.constant 9 : index
      %c0_160 = arith.constant 0 : index
      %201 = vector.load %arg25[%200, %c9_159, %c0_160] : memref<32x40x128xf32, #tpu.memory_space<vmem>>, vector<1x28x128xf32>
      %202 = vector.shape_cast %201 : vector<1x28x128xf32> to vector<28x128xf32>
      %c18 = arith.constant 18 : index
      %c0_161 = arith.constant 0 : index
      %c0_162 = arith.constant 0 : index
      %203 = vector.load %arg13[%c18, %c0_161, %c0_162] : memref<25x1x128xf32, #tpu.memory_space<vmem>>, vector<1x1x128xf32>
      %204 = vector.shape_cast %203 : vector<1x1x128xf32> to vector<1x128xf32>
      %205 = vector.broadcast %204 : vector<1x128xf32> to vector<28x128xf32>
      %206 = arith.mulf %202, %205 : vector<28x128xf32>
      %207 = arith.addf %199, %206 : vector<28x128xf32>
      %208 = arith.index_cast %175 : i32 to index
      %c10_163 = arith.constant 10 : index
      %c0_164 = arith.constant 0 : index
      %209 = vector.load %arg25[%208, %c10_163, %c0_164] : memref<32x40x128xf32, #tpu.memory_space<vmem>>, vector<1x28x128xf32>
      %210 = vector.shape_cast %209 : vector<1x28x128xf32> to vector<28x128xf32>
      %c19 = arith.constant 19 : index
      %c0_165 = arith.constant 0 : index
      %c0_166 = arith.constant 0 : index
      %211 = vector.load %arg13[%c19, %c0_165, %c0_166] : memref<25x1x128xf32, #tpu.memory_space<vmem>>, vector<1x1x128xf32>
      %212 = vector.shape_cast %211 : vector<1x1x128xf32> to vector<1x128xf32>
      %213 = vector.broadcast %212 : vector<1x128xf32> to vector<28x128xf32>
      %214 = arith.mulf %210, %213 : vector<28x128xf32>
      %215 = arith.addf %207, %214 : vector<28x128xf32>
      %c4_i32_167 = arith.constant 4 : i32
      %216 = arith.addi %arg27, %c4_i32_167 : i32
      %217 = arith.index_cast %216 : i32 to index
      %c6_168 = arith.constant 6 : index
      %c0_169 = arith.constant 0 : index
      %218 = vector.load %arg25[%217, %c6_168, %c0_169] : memref<32x40x128xf32, #tpu.memory_space<vmem>>, vector<1x28x128xf32>
      %219 = vector.shape_cast %218 : vector<1x28x128xf32> to vector<28x128xf32>
      %c20 = arith.constant 20 : index
      %c0_170 = arith.constant 0 : index
      %c0_171 = arith.constant 0 : index
      %220 = vector.load %arg13[%c20, %c0_170, %c0_171] : memref<25x1x128xf32, #tpu.memory_space<vmem>>, vector<1x1x128xf32>
      %221 = vector.shape_cast %220 : vector<1x1x128xf32> to vector<1x128xf32>
      %222 = vector.broadcast %221 : vector<1x128xf32> to vector<28x128xf32>
      %223 = arith.mulf %219, %222 : vector<28x128xf32>
      %224 = arith.addf %215, %223 : vector<28x128xf32>
      %225 = arith.index_cast %216 : i32 to index
      %c7_172 = arith.constant 7 : index
      %c0_173 = arith.constant 0 : index
      %226 = vector.load %arg25[%225, %c7_172, %c0_173] : memref<32x40x128xf32, #tpu.memory_space<vmem>>, vector<1x28x128xf32>
      %227 = vector.shape_cast %226 : vector<1x28x128xf32> to vector<28x128xf32>
      %c21 = arith.constant 21 : index
      %c0_174 = arith.constant 0 : index
      %c0_175 = arith.constant 0 : index
      %228 = vector.load %arg13[%c21, %c0_174, %c0_175] : memref<25x1x128xf32, #tpu.memory_space<vmem>>, vector<1x1x128xf32>
      %229 = vector.shape_cast %228 : vector<1x1x128xf32> to vector<1x128xf32>
      %230 = vector.broadcast %229 : vector<1x128xf32> to vector<28x128xf32>
      %231 = arith.mulf %227, %230 : vector<28x128xf32>
      %232 = arith.addf %224, %231 : vector<28x128xf32>
      %233 = arith.index_cast %216 : i32 to index
      %c8_176 = arith.constant 8 : index
      %c0_177 = arith.constant 0 : index
      %234 = vector.load %arg25[%233, %c8_176, %c0_177] : memref<32x40x128xf32, #tpu.memory_space<vmem>>, vector<1x28x128xf32>
      %235 = vector.shape_cast %234 : vector<1x28x128xf32> to vector<28x128xf32>
      %c22 = arith.constant 22 : index
      %c0_178 = arith.constant 0 : index
      %c0_179 = arith.constant 0 : index
      %236 = vector.load %arg13[%c22, %c0_178, %c0_179] : memref<25x1x128xf32, #tpu.memory_space<vmem>>, vector<1x1x128xf32>
      %237 = vector.shape_cast %236 : vector<1x1x128xf32> to vector<1x128xf32>
      %238 = vector.broadcast %237 : vector<1x128xf32> to vector<28x128xf32>
      %239 = arith.mulf %235, %238 : vector<28x128xf32>
      %240 = arith.addf %232, %239 : vector<28x128xf32>
      %241 = arith.index_cast %216 : i32 to index
      %c9_180 = arith.constant 9 : index
      %c0_181 = arith.constant 0 : index
      %242 = vector.load %arg25[%241, %c9_180, %c0_181] : memref<32x40x128xf32, #tpu.memory_space<vmem>>, vector<1x28x128xf32>
      %243 = vector.shape_cast %242 : vector<1x28x128xf32> to vector<28x128xf32>
      %c23 = arith.constant 23 : index
      %c0_182 = arith.constant 0 : index
      %c0_183 = arith.constant 0 : index
      %244 = vector.load %arg13[%c23, %c0_182, %c0_183] : memref<25x1x128xf32, #tpu.memory_space<vmem>>, vector<1x1x128xf32>
      %245 = vector.shape_cast %244 : vector<1x1x128xf32> to vector<1x128xf32>
      %246 = vector.broadcast %245 : vector<1x128xf32> to vector<28x128xf32>
      %247 = arith.mulf %243, %246 : vector<28x128xf32>
      %248 = arith.addf %240, %247 : vector<28x128xf32>
      %249 = arith.index_cast %216 : i32 to index
      %c10_184 = arith.constant 10 : index
      %c0_185 = arith.constant 0 : index
      %250 = vector.load %arg25[%249, %c10_184, %c0_185] : memref<32x40x128xf32, #tpu.memory_space<vmem>>, vector<1x28x128xf32>
      %251 = vector.shape_cast %250 : vector<1x28x128xf32> to vector<28x128xf32>
      %c24 = arith.constant 24 : index
      %c0_186 = arith.constant 0 : index
      %c0_187 = arith.constant 0 : index
      %252 = vector.load %arg13[%c24, %c0_186, %c0_187] : memref<25x1x128xf32, #tpu.memory_space<vmem>>, vector<1x1x128xf32>
      %253 = vector.shape_cast %252 : vector<1x1x128xf32> to vector<1x128xf32>
      %254 = vector.broadcast %253 : vector<1x128xf32> to vector<28x128xf32>
      %255 = arith.mulf %251, %254 : vector<28x128xf32>
      %256 = arith.addf %248, %255 : vector<28x128xf32>
      %257 = arith.index_cast %arg27 : i32 to index
      %c0_188 = arith.constant 0 : index
      %c0_189 = arith.constant 0 : index
      %258 = vector.load %arg26[%257, %c0_188, %c0_189] : memref<28x32x128xf32, #tpu.memory_space<vmem>>, vector<1x28x128xf32>
      %259 = vector.shape_cast %258 : vector<1x28x128xf32> to vector<28x128xf32>
      %260 = vector.shape_cast %256 : vector<28x128xf32> to vector<1x28x128xf32>
      tpu.vector_store %arg26[%257, %c0_188, %c0_189], %260 {strides = array<i32>} : memref<28x32x128xf32, #tpu.memory_space<vmem>>, vector<1x28x128xf32>,
    }
    %c28_i32_71 = arith.constant 28 : i32
    %cst_72 = arith.constant 0.000000e+00 : f32
    %38 = vector.broadcast %cst_72 : f32 to vector<28x128xf32>
    %c0_i32_73 = arith.constant 0 : i32
    %c4_i32_74 = arith.constant 4 : i32
    %39 = arith.addi %c0_i32_73, %c4_i32_74 : i32
    %c1_i32_75 = arith.constant 1 : i32
    %40 = scf.for %arg27 = %c0_i32_73 to %39 step %c1_i32_75 iter_args(%arg28 = %38) -> (vector<28x128xf32>)  : i32 {
      %c7_i32 = arith.constant 7 : i32
      %51 = arith.muli %arg27, %c7_i32 : i32
      %52 = arith.index_cast %51 : i32 to index
      %c0_83 = arith.constant 0 : index
      %c0_84 = arith.constant 0 : index
      %53 = vector.load %arg26[%52, %c0_83, %c0_84] : memref<28x32x128xf32, #tpu.memory_space<vmem>>, vector<7x32x128xf32>
      %54 = vector.shape_cast %53 : vector<7x32x128xf32> to vector<224x128xf32>
      %c0_85 = arith.constant 0 : index
      %c0_86 = arith.constant 0 : index
      %55 = vector.load %arg14[%c0_85, %c0_86] : memref<128x128xf32, #tpu.memory_space<vmem>>, vector<128x128xf32>
      %cst_87 = arith.constant dense<0.000000e+00> : vector<224x128xf32>
      %56 = tpu.matmul %54, %55, %cst_87 {dimension_numbers = #tpu.dot_dimension_numbers<[1], [0], [0], [1], [0, 0, 1, 1], [], []>} : vector<224x128xf32>, vector<128x128xf32>, vector<224x128xf32> -> vector<224x128xf32>
      %c0_88 = arith.constant 0 : index
      %c0_89 = arith.constant 0 : index
      %57 = vector.load %arg15[%c0_88, %c0_89] : memref<1x128xf32, #tpu.memory_space<vmem>>, vector<1x128xf32>
      %58 = vector.broadcast %57 : vector<1x128xf32> to vector<224x128xf32>
      %59 = arith.addf %56, %58 : vector<224x128xf32>
      %cst_90 = arith.constant 0.000000e+00 : f32
      %60 = vector.broadcast %cst_90 : f32 to vector<224x128xf32>
      %61 = arith.maximumf %59, %60 : vector<224x128xf32>
      %62 = vector.shape_cast %61 : vector<224x128xf32> to vector<7x32x128xf32>
      %63 = vector.extract_strided_slice %62 {offsets = [0, 0, 0], sizes = [7, 28, 128], strides = [1, 1, 1]} : vector<7x32x128xf32> to vector<7x28x128xf32>
      %c7_i32_91 = arith.constant 7 : i32
      %64 = arith.muli %arg27, %c7_i32_91 : i32
      %65 = arith.index_cast %64 : i32 to index
      %c0_92 = arith.constant 0 : index
      %c0_93 = arith.constant 0 : index
      %66 = vector.load %arg16[%65, %c0_92, %c0_93] : memref<28x28x128xf32, #tpu.memory_space<vmem>>, vector<7x28x128xf32>
      %67 = arith.mulf %63, %66 : vector<7x28x128xf32>
      %cst_94 = arith.constant dense<0.000000e+00> : vector<28x128xf32>
      %68 = vector.multi_reduction <add>, %67, %cst_94 [0] : vector<7x28x128xf32> to vector<28x128xf32>
      %69 = arith.addf %arg28, %68 : vector<28x128xf32>
      scf.yield %69 : vector<28x128xf32>
    }
    %c4_i32_76 = arith.constant 4 : i32
    %41 = vector.shape_cast %40 : vector<28x128xf32> to vector<1x28x128xf32>
    %cst_77 = arith.constant dense<0.000000e+00> : vector<1xf32>
    %42 = vector.multi_reduction <add>, %41, %cst_77 [1, 2] : vector<1x28x128xf32> to vector<1xf32>
    %43 = vector.shape_cast %42 : vector<1xf32> to vector<1x1x1xf32>
    %44 = vector.extract %43[0, 0, 0] : f32 from vector<1x1x1xf32>
    %45 = vector.broadcast %44 : f32 to vector<1x1xf32>
    %c0_78 = arith.constant 0 : index
    %c0_79 = arith.constant 0 : index
    %46 = vector.load %arg17[%c0_78, %c0_79] : memref<1x1xf32, #tpu.memory_space<vmem>>, vector<1x1xf32>
    %47 = arith.addf %45, %46 : vector<1x1xf32>
    %c0_80 = arith.constant 0 : index
    %c0_81 = arith.constant 0 : index
    %c0_82 = arith.constant 0 : index
    %48 = vector.load %arg18[%c0_80, %c0_81, %c0_82] : memref<1x1x1xf32, #tpu.memory_space<vmem>>, vector<1x1x1xf32>
    %49 = vector.shape_cast %48 : vector<1x1x1xf32> to vector<1x1xf32>
    %50 = vector.shape_cast %47 : vector<1x1xf32> to vector<1x1x1xf32>
    tpu.vector_store %arg18[%c0_80, %c0_81, %c0_82], %50 {strides = array<i32>} : memref<1x1x1xf32, #tpu.memory_space<vmem>>, vector<1x1x1xf32>,
    return
  }
  func.func @transform_0(%arg0: i32) -> (i32, i32, i32, i32) {
    %c0_i32 = arith.constant 0 : i32
    %c0_i32_0 = arith.constant 0 : i32
    %c0_i32_1 = arith.constant 0 : i32
    %c0_i32_2 = arith.constant 0 : i32
    return %arg0, %c0_i32, %c0_i32_0, %c0_i32_1 : i32, i32, i32, i32
  }
  func.func @transform_1(%arg0: i32) -> (i32, i32) {
    %c0_i32 = arith.constant 0 : i32
    %c0_i32_0 = arith.constant 0 : i32
    %c0_i32_1 = arith.constant 0 : i32
    return %c0_i32, %c0_i32_0 : i32, i32
  }
  func.func @transform_2(%arg0: i32) -> (i32, i32) {
    %c0_i32 = arith.constant 0 : i32
    %c0_i32_0 = arith.constant 0 : i32
    %c0_i32_1 = arith.constant 0 : i32
    return %c0_i32, %c0_i32_0 : i32, i32
  }
  func.func @transform_3(%arg0: i32) -> (i32, i32, i32) {
    %c0_i32 = arith.constant 0 : i32
    %c0_i32_0 = arith.constant 0 : i32
    %c0_i32_1 = arith.constant 0 : i32
    %c0_i32_2 = arith.constant 0 : i32
    return %c0_i32, %c0_i32_0, %c0_i32_1 : i32, i32, i32
  }
  func.func @transform_4(%arg0: i32) -> (i32, i32) {
    %c0_i32 = arith.constant 0 : i32
    %c0_i32_0 = arith.constant 0 : i32
    %c0_i32_1 = arith.constant 0 : i32
    return %c0_i32, %c0_i32_0 : i32, i32
  }
  func.func @transform_5(%arg0: i32) -> (i32, i32) {
    %c0_i32 = arith.constant 0 : i32
    %c0_i32_0 = arith.constant 0 : i32
    %c0_i32_1 = arith.constant 0 : i32
    return %c0_i32, %c0_i32_0 : i32, i32
  }
  func.func @transform_6(%arg0: i32) -> (i32, i32, i32) {
    %c0_i32 = arith.constant 0 : i32
    %c0_i32_0 = arith.constant 0 : i32
    %c0_i32_1 = arith.constant 0 : i32
    %c0_i32_2 = arith.constant 0 : i32
    return %c0_i32, %c0_i32_0, %c0_i32_1 : i32, i32, i32
  }
  func.func @transform_7(%arg0: i32) -> (i32, i32) {
    %c0_i32 = arith.constant 0 : i32
    %c0_i32_0 = arith.constant 0 : i32
    %c0_i32_1 = arith.constant 0 : i32
    return %c0_i32, %c0_i32_0 : i32, i32
  }
  func.func @transform_8(%arg0: i32) -> (i32, i32) {
    %c0_i32 = arith.constant 0 : i32
    %c0_i32_0 = arith.constant 0 : i32
    %c0_i32_1 = arith.constant 0 : i32
    return %c0_i32, %c0_i32_0 : i32, i32
  }
  func.func @transform_9(%arg0: i32) -> (i32, i32, i32) {
    %c0_i32 = arith.constant 0 : i32
    %c0_i32_0 = arith.constant 0 : i32
    %c0_i32_1 = arith.constant 0 : i32
    %c0_i32_2 = arith.constant 0 : i32
    return %c0_i32, %c0_i32_0, %c0_i32_1 : i32, i32, i32
  }
  func.func @transform_10(%arg0: i32) -> (i32, i32) {
    %c0_i32 = arith.constant 0 : i32
    %c0_i32_0 = arith.constant 0 : i32
    %c0_i32_1 = arith.constant 0 : i32
    return %c0_i32, %c0_i32_0 : i32, i32
  }
  func.func @transform_11(%arg0: i32) -> (i32, i32) {
    %c0_i32 = arith.constant 0 : i32
    %c0_i32_0 = arith.constant 0 : i32
    %c0_i32_1 = arith.constant 0 : i32
    return %c0_i32, %c0_i32_0 : i32, i32
  }
  func.func @transform_12(%arg0: i32) -> (i32, i32, i32) {
    %c0_i32 = arith.constant 0 : i32
    %c0_i32_0 = arith.constant 0 : i32
    %c0_i32_1 = arith.constant 0 : i32
    %c0_i32_2 = arith.constant 0 : i32
    return %c0_i32, %c0_i32_0, %c0_i32_1 : i32, i32, i32
  }
  func.func @transform_13(%arg0: i32) -> (i32, i32) {
    %c0_i32 = arith.constant 0 : i32
    %c0_i32_0 = arith.constant 0 : i32
    %c0_i32_1 = arith.constant 0 : i32
    return %c0_i32, %c0_i32_0 : i32, i32
  }
  func.func @transform_14(%arg0: i32) -> (i32, i32) {
    %c0_i32 = arith.constant 0 : i32
    %c0_i32_0 = arith.constant 0 : i32
    %c0_i32_1 = arith.constant 0 : i32
    return %c0_i32, %c0_i32_0 : i32, i32
  }
  func.func @transform_15(%arg0: i32) -> (i32, i32, i32) {
    %c0_i32 = arith.constant 0 : i32
    %c0_i32_0 = arith.constant 0 : i32
    %c0_i32_1 = arith.constant 0 : i32
    %c0_i32_2 = arith.constant 0 : i32
    return %c0_i32, %c0_i32_0, %c0_i32_1 : i32, i32, i32
  }
  func.func @transform_16(%arg0: i32) -> (i32, i32) {
    %c0_i32 = arith.constant 0 : i32
    %c0_i32_0 = arith.constant 0 : i32
    %c0_i32_1 = arith.constant 0 : i32
    return %c0_i32, %c0_i32_0 : i32, i32
  }
  func.func @transform_17(%arg0: i32) -> (i32, i32, i32) {
    %c0_i32 = arith.constant 0 : i32
    %c0_i32_0 = arith.constant 0 : i32
    %c0_i32_1 = arith.constant 0 : i32
    return %arg0, %c0_i32, %c0_i32_0 : i32, i32, i32
  }
}

</mosaic_0001>

<bundles_post_ra>
// kernel: compact_model_forward.1
= control target key start
LH: loop header
LB: loop body
LE: loop exit
PB: predicated region body
PF: predicated region fallthrough
CT: control target
= control target key end

     0   :  { %s10258_s0 = inlined_call_operand.hbm [shape: f32[2,112,112,75], index: 0, kind: input, shape index: {}]   ;;  %s10259_s1 = inlined_call_operand.vmem [shape: f32[75,128], index: 1, kind: input, shape index: {}]   ;;  %s10260_s2 = inlined_call_operand.vmem [shape: f32[1,128], index: 2, kind: input, shape index: {}]   ;;  %s10261_s3 = inlined_call_operand.vmem [shape: f32[25,1,128], index: 3, kind: input, shape index: {}]   ;;  %s10262_s4 = inlined_call_operand.vmem [shape: f32[128,128], index: 4, kind: input, shape index: {}]   ;;  %s10263_s5 = inlined_call_operand.vmem [shape: f32[1,128], index: 5, kind: input, shape index: {}]   ;;  %s10264_s6 = inlined_call_operand.vmem [shape: f32[25,1,128], index: 6, kind: input, shape index: {}]   ;;  %s10265_s7 = inlined_call_operand.vmem [shape: f32[128,128], index: 7, kind: input, shape index: {}]   ;;  %s10266_s8 = inlined_call_operand.vmem [shape: f32[1,128], index: 8, kind: input, shape index: {}]   ;;  %s10267_s9 = inlined_call_operand.vmem [shape: f32[25,1,128], index: 9, kind: input, shape index: {}]   ;;  %s10268_s10 = inlined_call_operand.vmem [shape: f32[128,128], index: 10, kind: input, shape index: {}]   ;;  %s10269_s11 = inlined_call_operand.vmem [shape: f32[1,128], index: 11, kind: input, shape index: {}]   ;;  %s10270_s12 = inlined_call_operand.vmem [shape: f32[25,1,128], index: 12, kind: input, shape index: {}]   ;;  %s10271_s13 = inlined_call_operand.vmem [shape: f32[128,128], index: 13, kind: input, shape index: {}]   ;;  %s10272_s14 = inlined_call_operand.vmem [shape: f32[1,128], index: 14, kind: input, shape index: {}]   ;;  %s10273_s15 = inlined_call_operand.vmem [shape: f32[28,28,128], index: 15, kind: input, shape index: {}]   ;;  %s10274_s16 = inlined_call_operand.<no memory space> [shape: f32[1,1], index: 16, kind: input, shape index: {}]   ;;  %s10275_s17 = inlined_call_operand.vmem [shape: f32[2,1,1], index: 17, kind: output, shape index: {}]  }
   0x1   :  { %10281 = sst [smem:[#allocation17_spill]] %s10258_s0  ;;  %v22_v0 = vstv %s10274_s16 }
   0x2   :  { %10282 = sst [smem:[#allocation18_spill]] %s10259_s1  ;;  %23 = vst [vmem:[#allocation10] sm:$0x1] %v22_v0 }
   0x3   :  { %10283 = sst [smem:[#allocation19_spill]] %s10273_s15 }
   0x4   :  { %24 = vsyncpa [#allocation12], 0 }
   0x5   :  { %26 = vsyncpa [#allocation12 + $0x1], 0  ;;  %s7847_s26 = smov 0   ;;  %s7849_s27 = smov 0  }
   0x6   :  { %s7851_s28 = smov 0   ;;  %s7853_s29 = smov 0  }
   0x7 LB: > { %10284 = sst [smem:[#allocation14_spill]] %s7687_s28  ;;  %s7866_s16 = sadd.s32 4294967295, %s7691_s29   ;;  %s7691_s29 = sphi %s7853_s29, %s10298_s29   ;;  %s7687_s28 = sphi %s7851_s28, %s10300_s28   ;;  %s7683_s27 = sphi %s7849_s27, %s10302_s27   ;;  %s7679_s26 = sphi %s7847_s26, %s10301_s26  }
   0x8   : > { %s7869_s0 = sadd.s32 1, %s7691_s29   ;;  %s39_s18 = sadd.s32 1, %s7687_s28 }
   0x9   : > { %10285 = sst [smem:[#allocation15_spill]] %s7869_s0  ;;  %s36_s30 = ssub.s32 %s7691_s29, %s7869_s0 }
   0xa   : > { %p37_p0 = scmp.eq.s32.totalorder %s36_s30, 0  ;;  %p46_p1 = scmp.ne.s32.totalorder %s7687_s28, %s7683_s27 }
   0xb   : > { %p47_p2 = scmp.eq.s32.totalorder %s7691_s29, 0  ;;  %p52_p3 = scmp.ne.s32.totalorder %s7683_s27, %s7679_s26 }
   0xc   : > { %s7879_s19 = scalar_select %p37_p0, %s7687_s28, %s39_s18  }
   0xd   : > { %p48_p4 = por %p47_p2, %p46_p1  ;;  %p53_p5 = scmp.eq.s32.totalorder %s7866_s16, 0 }
   0xe   : > { %10286 = sst [smem:[#allocation16_spill]] %s7879_s19  ;;  %p7430_p6 = scmp.lt.s32.totalorder %s7691_s29, 2 }
   0xf   : > { %p7883_p7 = por %p53_p5, %p52_p3  ;;  %s486_s20 = sand.u32 1, %s7687_s28  }
  0x10   : > { %s7419_s21 = smul.u32 12544, %s486_s20  ;;  %p7889_p8 = pnand %p7430_p6, %p48_p4 }
  0x11   : > { %s7420_s22 = smul.u32 200704, %s7691_s29  ;;  %s10289_s30 = sld [smem:[#allocation17_spill]] }
  0x12   : > { %s490_s18 = scalar_lea.vmem [#allocation11], %s7419_s21  ;;  %s7901_s28 = scalar_lea.sflag [#allocation12], %s486_s20 }
  0x13   : > { %s497_s19 = sshll.u32 %s490_s18, 4  ;;  %p7577_p11 = pneg %p7889_p8  ;;  %s7898_s19 = int_to_ptr.vmem [resolvable:$true] %s497_s19 }
  0x17   : > { %s7896_s26 = scalar_lea.hbm %s10289_s30, %s7420_s22  ;;  %s7580_s25 = scalar_lea.hbm %s10289_s30, 401408 }
  0x18   : > { %s7575_s0 = scalar_lea.hbm %s7896_s26, 200704  ;;  %p7581_p0 = scmp.lt.u32.totalorder %s7896_s26, %s10289_s30 }
  0x19   : > { %p7576_p10 = scmp.ne.s32.totalorder %s7896_s26, %s7575_s0  ;;  %p7582_p1 = scmp.lt.u32.totalorder %s7580_s25, %s7575_s0 }
  0x1a   : > { %p7584_p3 = scmp.lt.u32.totalorder %s7575_s0, %s7896_s26 }
  0x1b   : > { %p7578_p12 = pnand %p7577_p11, %p7576_p10  ;;  %p7583_p2 = por %p7582_p1, %p7581_p0 }
  0x1d   : > { %p7579_p13 = pneg %p7578_p12  ;;  %p7585_p4 = por %p7584_p3, %p7583_p2 }
  0x1f   : > { %p7586_p5 = pnand %p7585_p4, %p7579_p13 }
  0x21   : > { %7589 = shalt.err (!%p7586_p5)
}
  0x22   : > { %s7590_s20 = scalar_lea.vmem %s7898_s19, 200704  ;;  %s7745_s18 = smov [#allocation11]  }
  0x23   : > { %p7591_p6 = scmp.ne.s32.totalorder %s7898_s19, %s7590_s20  ;;  %s7595_s22 = sshll.u32 %s7745_s18, 4  ;;  %s7596_s22 = int_to_ptr.vmem [resolvable:$false] %s7595_s22 }
  0x24   : > { %s7597_s15 = scalar_lea.vmem %s7596_s22, 401408  ;;  %p7598_p9 = scmp.lt.s32.totalorder %s7898_s19, %s7596_s22 }
  0x25   : > { %p7593_p10 = pnand %p7591_p6, %p7577_p11  ;;  %p7599_p0 = scmp.lt.s32.totalorder %s7597_s15, %s7590_s20 }
  0x27   : > { %p7594_p12 = pneg %p7593_p10  ;;  %p7600_p1 = por %p7599_p0, %p7598_p9 }
  0x29   : > { %p7601_p2 = pnand %p7600_p1, %p7594_p12 }
  0x2b   : > { %7604 = shalt.err (!%p7601_p2)
}
  0x2c   : > { %s7746_s0 = smov 128   ;;  %s7747_s24 = smov 8  }
  0x2d   : > { %7429 = dma.hbm_to_vmem [thread:$0]  (!%p7889_p8), %s7896_s26, 200704, %s7898_s19, %s7901_s28, %s7746_s0, %s7746_s0, %s7747_s24  }
  0x2e   : > { %p505_p11 = scmp.lt.s32.totalorder %s7691_s29, 3  ;;  %p10290_p13 = scmp.ge.s32.totalorder %s7691_s29, 1 }
  0x30   : > { %p506_p3 = pnand %p10290_p13, %p505_p11 }
  0x31   : > { %s511_s25 = sand.u32 (!%p506_p3), 1, %s7683_s27  }
  0x32   : > { %509 = sbr.rel (%p506_p3) target bundleno = 2140 (0x85c), region = 88  ;;  %s512_s20 = scalar_lea.sflag (!%p506_p3), [#allocation12], %s511_s25 }
  0x33   : > { %s7933_s21 = smul.u32 (!%p506_p3), 12544, %s511_s25 }
  0x35   : > { %s515_s18 = scalar_lea.vmem (!%p506_p3), [#allocation11], %s7933_s21 }
  0x39   : > { %7674 = dma.done.wait (%p7883_p7), %s512_s20, 200704  }
  0x3a   : > { %7676 = vsyncadd (%p7883_p7), %s512_s20, 4294766592  ;;  %p564_p9 = scmp.lt.s32.totalorder %s7866_s16, 1  ;;  %v7748_v1 = vmov 0.0   ;;  %s8174_s1 = smov 0  }
  0x3b   : > { %567 = vst [vmem:[#allocation2] sm:$0xff] %v7748_v1  ;;  %568 = vst [vmem:[#allocation2 + $0x8] sm:$0xff] %v7748_v1 }
  0x3c   : > { %569 = vst [vmem:[#allocation2 + $0x10] sm:$0xff] %v7748_v1  ;;  %570 = vst [vmem:[#allocation2 + $0x18] sm:$0xff] %v7748_v1  ;;  %s10304_s16 = smov (!%p564_p9, %s7866_s16), 1 }
  0x3d   : > { %571 = vst [vmem:[#allocation2 + $0x20] sm:$0xff] %v7748_v1  ;;  %572 = vst [vmem:[#allocation2 + $0x28] sm:$0xff] %v7748_v1 }
  0x3e   : > { %573 = vst [vmem:[#allocation2 + $0x30] sm:$0xff] %v7748_v1  ;;  %574 = vst [vmem:[#allocation2 + $0x38] sm:$0xff] %v7748_v1 }
  0x3f   : > { %575 = vst [vmem:[#allocation2 + $0x40] sm:$0xff] %v7748_v1  ;;  %576 = vst [vmem:[#allocation2 + $0x48] sm:$0xff] %v7748_v1 }
  0x40   : > { %577 = vst [vmem:[#allocation2 + $0x50] sm:$0xff] %v7748_v1  ;;  %578 = vst [vmem:[#allocation2 + $0x58] sm:$0xff] %v7748_v1 }
  0x41   : > { %579 = vst [vmem:[#allocation2 + $0x60] sm:$0xff] %v7748_v1  ;;  %580 = vst [vmem:[#allocation2 + $0x68] sm:$0xff] %v7748_v1 }
  0x42   : > { %581 = vst [vmem:[#allocation2 + $0x70] sm:$0xff] %v7748_v1  ;;  %582 = vst [vmem:[#allocation2 + $0x78] sm:$0xff] %v7748_v1 }
  0x43   : > { %584 = vst [vmem:[#allocation2 + $0x3880] sm:$0xff] %v7748_v1  ;;  %585 = vst [vmem:[#allocation2 + $0x3888] sm:$0xff] %v7748_v1 }
  0x44   : > { %586 = vst [vmem:[#allocation2 + $0x3890] sm:$0xff] %v7748_v1  ;;  %587 = vst [vmem:[#allocation2 + $0x3898] sm:$0xff] %v7748_v1 }
  0x45   : > { %588 = vst [vmem:[#allocation2 + $0x38a0] sm:$0xff] %v7748_v1  ;;  %589 = vst [vmem:[#allocation2 + $0x38a8] sm:$0xff] %v7748_v1 }
  0x46   : > { %590 = vst [vmem:[#allocation2 + $0x38b0] sm:$0xff] %v7748_v1  ;;  %591 = vst [vmem:[#allocation2 + $0x38b8] sm:$0xff] %v7748_v1 }
  0x47   : > { %592 = vst [vmem:[#allocation2 + $0x38c0] sm:$0xff] %v7748_v1  ;;  %593 = vst [vmem:[#allocation2 + $0x38c8] sm:$0xff] %v7748_v1 }
  0x48   : > { %594 = vst [vmem:[#allocation2 + $0x38d0] sm:$0xff] %v7748_v1  ;;  %595 = vst [vmem:[#allocation2 + $0x38d8] sm:$0xff] %v7748_v1 }
  0x49   : > { %596 = vst [vmem:[#allocation2 + $0x38e0] sm:$0xff] %v7748_v1  ;;  %597 = vst [vmem:[#allocation2 + $0x38e8] sm:$0xff] %v7748_v1 }
  0x4a   : > { %598 = vst [vmem:[#allocation2 + $0x38f0] sm:$0xff] %v7748_v1  ;;  %599 = vst [vmem:[#allocation2 + $0x38f8] sm:$0xff] %v7748_v1 }
  0x4b   : > { %600 = vst [vmem:[#allocation2 + $0x3900] sm:$0xff] %v7748_v1  ;;  %601 = vst [vmem:[#allocation2 + $0x3908] sm:$0xff] %v7748_v1 }
  0x4c   : > { %602 = vst [vmem:[#allocation2 + $0x3910] sm:$0xff] %v7748_v1  ;;  %603 = vst [vmem:[#allocation2 + $0x3918] sm:$0xff] %v7748_v1 }
  0x4d   : > { %604 = vst [vmem:[#allocation2 + $0x3920] sm:$0xff] %v7748_v1  ;;  %605 = vst [vmem:[#allocation2 + $0x3928] sm:$0xff] %v7748_v1 }
  0x4e   : > { %606 = vst [vmem:[#allocation2 + $0x3930] sm:$0xff] %v7748_v1  ;;  %607 = vst [vmem:[#allocation2 + $0x3938] sm:$0xff] %v7748_v1 }
  0x4f   : > { %608 = vst [vmem:[#allocation2 + $0x3940] sm:$0xff] %v7748_v1  ;;  %609 = vst [vmem:[#allocation2 + $0x3948] sm:$0xff] %v7748_v1 }
  0x50   : > { %610 = vst [vmem:[#allocation2 + $0x3950] sm:$0xff] %v7748_v1  ;;  %611 = vst [vmem:[#allocation2 + $0x3958] sm:$0xff] %v7748_v1 }
  0x51   : > { %612 = vst [vmem:[#allocation2 + $0x3960] sm:$0xff] %v7748_v1  ;;  %613 = vst [vmem:[#allocation2 + $0x3968] sm:$0xff] %v7748_v1 }
  0x52   : > { %614 = vst [vmem:[#allocation2 + $0x3970] sm:$0xff] %v7748_v1  ;;  %615 = vst [vmem:[#allocation2 + $0x3978] sm:$0xff] %v7748_v1 }
  0x53   : > { %616 = vst [vmem:[#allocation2 + $0x3980] sm:$0xff] %v7748_v1  ;;  %617 = vst [vmem:[#allocation2 + $0x3988] sm:$0xff] %v7748_v1 }
  0x54   : > { %618 = vst [vmem:[#allocation2 + $0x3990] sm:$0xff] %v7748_v1  ;;  %619 = vst [vmem:[#allocation2 + $0x3998] sm:$0xff] %v7748_v1 }
  0x55   : > { %620 = vst [vmem:[#allocation2 + $0x39a0] sm:$0xff] %v7748_v1  ;;  %621 = vst [vmem:[#allocation2 + $0x39a8] sm:$0xff] %v7748_v1 }
  0x56   : > { %622 = vst [vmem:[#allocation2 + $0x39b0] sm:$0xff] %v7748_v1  ;;  %623 = vst [vmem:[#allocation2 + $0x39b8] sm:$0xff] %v7748_v1 }
  0x57   : > { %624 = vst [vmem:[#allocation2 + $0x39c0] sm:$0xff] %v7748_v1  ;;  %625 = vst [vmem:[#allocation2 + $0x39c8] sm:$0xff] %v7748_v1 }
  0x58   : > { %626 = vst [vmem:[#allocation2 + $0x39d0] sm:$0xff] %v7748_v1  ;;  %627 = vst [vmem:[#allocation2 + $0x39d8] sm:$0xff] %v7748_v1 }
  0x59   : > { %628 = vst [vmem:[#allocation2 + $0x39e0] sm:$0xff] %v7748_v1  ;;  %629 = vst [vmem:[#allocation2 + $0x39e8] sm:$0xff] %v7748_v1 }
  0x5a   : > { %630 = vst [vmem:[#allocation2 + $0x39f0] sm:$0xff] %v7748_v1  ;;  %631 = vst [vmem:[#allocation2 + $0x39f8] sm:$0xff] %v7748_v1 }
  0x5b   : > { %632 = vst [vmem:[#allocation4] sm:$0xff] %v7748_v1  ;;  %633 = vst [vmem:[#allocation4 + $0x8] sm:$0xff] %v7748_v1 }
  0x5c   : > { %634 = vst [vmem:[#allocation4 + $0x10] sm:$0xff] %v7748_v1  ;;  %635 = vst [vmem:[#allocation4 + $0x18] sm:$0xff] %v7748_v1 }
  0x5d   : > { %636 = vst [vmem:[#allocation4 + $0x20] sm:$0xff] %v7748_v1  ;;  %637 = vst [vmem:[#allocation4 + $0x28] sm:$0xff] %v7748_v1 }
  0x5e   : > { %638 = vst [vmem:[#allocation4 + $0x30] sm:$0xff] %v7748_v1  ;;  %639 = vst [vmem:[#allocation4 + $0x38] sm:$0xff] %v7748_v1 }
  0x5f   : > { %640 = vst [vmem:[#allocation4 + $0x40] sm:$0xff] %v7748_v1  ;;  %642 = vst [vmem:[#allocation4 + $0x1008] sm:$0xff] %v7748_v1 }
  0x60   : > { %643 = vst [vmem:[#allocation4 + $0x1010] sm:$0xff] %v7748_v1  ;;  %644 = vst [vmem:[#allocation4 + $0x1018] sm:$0xff] %v7748_v1 }
  0x61   : > { %645 = vst [vmem:[#allocation4 + $0x1020] sm:$0xff] %v7748_v1  ;;  %646 = vst [vmem:[#allocation4 + $0x1028] sm:$0xff] %v7748_v1 }
  0x62   : > { %647 = vst [vmem:[#allocation4 + $0x1030] sm:$0xff] %v7748_v1  ;;  %648 = vst [vmem:[#allocation4 + $0x1038] sm:$0xff] %v7748_v1 }
  0x63   : > { %649 = vst [vmem:[#allocation4 + $0x1040] sm:$0xff] %v7748_v1  ;;  %650 = vst [vmem:[#allocation4 + $0x1048] sm:$0xff] %v7748_v1 }
  0x64   : > { %651 = vst [vmem:[#allocation4 + $0x1050] sm:$0xff] %v7748_v1  ;;  %652 = vst [vmem:[#allocation4 + $0x1058] sm:$0xff] %v7748_v1 }
  0x65   : > { %653 = vst [vmem:[#allocation4 + $0x1060] sm:$0xff] %v7748_v1  ;;  %654 = vst [vmem:[#allocation4 + $0x1068] sm:$0xff] %v7748_v1 }
  0x66   : > { %655 = vst [vmem:[#allocation4 + $0x1070] sm:$0xff] %v7748_v1  ;;  %656 = vst [vmem:[#allocation4 + $0x1078] sm:$0xff] %v7748_v1 }
  0x67   : > { %657 = vst [vmem:[#allocation4 + $0x1080] sm:$0xff] %v7748_v1  ;;  %658 = vst [vmem:[#allocation4 + $0x1088] sm:$0xff] %v7748_v1 }
  0x68   : > { %659 = vst [vmem:[#allocation4 + $0x1090] sm:$0xff] %v7748_v1  ;;  %660 = vst [vmem:[#allocation4 + $0x1098] sm:$0xff] %v7748_v1 }
  0x69   : > { %661 = vst [vmem:[#allocation4 + $0x10a0] sm:$0xff] %v7748_v1  ;;  %662 = vst [vmem:[#allocation4 + $0x10a8] sm:$0xff] %v7748_v1 }
  0x6a   : > { %663 = vst [vmem:[#allocation4 + $0x10b0] sm:$0xff] %v7748_v1  ;;  %664 = vst [vmem:[#allocation4 + $0x10b8] sm:$0xff] %v7748_v1 }
  0x6b   : > { %665 = vst [vmem:[#allocation4 + $0x10c0] sm:$0xff] %v7748_v1  ;;  %666 = vst [vmem:[#allocation4 + $0x10c8] sm:$0xff] %v7748_v1 }
  0x6c   : > { %667 = vst [vmem:[#allocation4 + $0x10d0] sm:$0xff] %v7748_v1  ;;  %668 = vst [vmem:[#allocation4 + $0x10d8] sm:$0xff] %v7748_v1 }
  0x6d   : > { %669 = vst [vmem:[#allocation6] sm:$0xff] %v7748_v1  ;;  %670 = vst [vmem:[#allocation6 + $0x8] sm:$0xff] %v7748_v1 }
  0x6e   : > { %671 = vst [vmem:[#allocation6 + $0x10] sm:$0xff] %v7748_v1  ;;  %672 = vst [vmem:[#allocation6 + $0x18] sm:$0xff] %v7748_v1 }
  0x6f   : > { %673 = vst [vmem:[#allocation6 + $0x20] sm:$0xff] %v7748_v1  ;;  %674 = vst [vmem:[#allocation6 + $0x28] sm:$0xff] %v7748_v1 }
  0x70   : > { %675 = vst [vmem:[#allocation6 + $0x30] sm:$0xff] %v7748_v1  ;;  %676 = vst [vmem:[#allocation6 + $0x38] sm:$0xff] %v7748_v1 }
  0x71   : > { %677 = vst [vmem:[#allocation6 + $0x40] sm:$0xff] %v7748_v1  ;;  %678 = vst [vmem:[#allocation6 + $0x48] sm:$0xff] %v7748_v1 }
  0x72   : > { %680 = vst [vmem:[#allocation6 + $0x4b0] sm:$0xff] %v7748_v1  ;;  %681 = vst [vmem:[#allocation6 + $0x4b8] sm:$0xff] %v7748_v1 }
  0x73   : > { %682 = vst [vmem:[#allocation6 + $0x4c0] sm:$0xff] %v7748_v1  ;;  %683 = vst [vmem:[#allocation6 + $0x4c8] sm:$0xff] %v7748_v1 }
  0x74   : > { %684 = vst [vmem:[#allocation6 + $0x4d0] sm:$0xff] %v7748_v1  ;;  %685 = vst [vmem:[#allocation6 + $0x4d8] sm:$0xff] %v7748_v1 }
  0x75   : > { %686 = vst [vmem:[#allocation6 + $0x4e0] sm:$0xff] %v7748_v1  ;;  %687 = vst [vmem:[#allocation6 + $0x4e8] sm:$0xff] %v7748_v1 }
  0x76   : > { %688 = vst [vmem:[#allocation6 + $0x4f0] sm:$0xff] %v7748_v1  ;;  %689 = vst [vmem:[#allocation6 + $0x4f8] sm:$0xff] %v7748_v1 }
  0x77   : > { %690 = vst [vmem:[#allocation8] sm:$0xff] %v7748_v1  ;;  %691 = vst [vmem:[#allocation8 + $0x8] sm:$0xff] %v7748_v1 }
  0x78   : > { %692 = vst [vmem:[#allocation8 + $0x10] sm:$0xff] %v7748_v1  ;;  %693 = vst [vmem:[#allocation8 + $0x18] sm:$0xff] %v7748_v1 }
  0x79   : > { %694 = vst [vmem:[#allocation8 + $0x20] sm:$0xff] %v7748_v1  ;;  %695 = vst [vmem:[#allocation8 + $0x28] sm:$0xff] %v7748_v1 }
  0x7a   : > { %696 = vst [vmem:[#allocation8 + $0x30] sm:$0xff] %v7748_v1  ;;  %697 = vst [vmem:[#allocation8 + $0x38] sm:$0xff] %v7748_v1 }
  0x7b   : > { %698 = vst [vmem:[#allocation8 + $0x40] sm:$0xff] %v7748_v1  ;;  %699 = vst [vmem:[#allocation8 + $0x48] sm:$0xff] %v7748_v1 }
  0x7c   : > { %701 = vst [vmem:[#allocation8 + $0x4b0] sm:$0xff] %v7748_v1  ;;  %702 = vst [vmem:[#allocation8 + $0x4b8] sm:$0xff] %v7748_v1 }
  0x7d   : > { %703 = vst [vmem:[#allocation8 + $0x4c0] sm:$0xff] %v7748_v1  ;;  %704 = vst [vmem:[#allocation8 + $0x4c8] sm:$0xff] %v7748_v1 }
  0x7e   : > { %705 = vst [vmem:[#allocation8 + $0x4d0] sm:$0xff] %v7748_v1  ;;  %706 = vst [vmem:[#allocation8 + $0x4d8] sm:$0xff] %v7748_v1 }
  0x7f   : > { %707 = vst [vmem:[#allocation8 + $0x4e0] sm:$0xff] %v7748_v1  ;;  %708 = vst [vmem:[#allocation8 + $0x4e8] sm:$0xff] %v7748_v1 }
  0x80   : > { %709 = vst [vmem:[#allocation8 + $0x4f0] sm:$0xff] %v7748_v1  ;;  %710 = vst [vmem:[#allocation8 + $0x4f8] sm:$0xff] %v7748_v1 }
  0x81   : > { %711 = vst [vmem:[#allocation5 + $0x1c] sm:$0xf] %v7748_v1  ;;  %712 = vst [vmem:[#allocation5 + $0x3c] sm:$0xf] %v7748_v1 }
  0x82   : > { %713 = vst [vmem:[#allocation5 + $0x5c] sm:$0xf] %v7748_v1  ;;  %714 = vst [vmem:[#allocation5 + $0x7c] sm:$0xf] %v7748_v1 }
  0x83   : > { %715 = vst [vmem:[#allocation5 + $0x9c] sm:$0xf] %v7748_v1  ;;  %716 = vst [vmem:[#allocation5 + $0xbc] sm:$0xf] %v7748_v1 }
  0x84   : > { %717 = vst [vmem:[#allocation5 + $0xdc] sm:$0xf] %v7748_v1  ;;  %718 = vst [vmem:[#allocation5 + $0xfc] sm:$0xf] %v7748_v1 }
  0x85   : > { %719 = vst [vmem:[#allocation5 + $0x11c] sm:$0xf] %v7748_v1  ;;  %720 = vst [vmem:[#allocation5 + $0x13c] sm:$0xf] %v7748_v1 }
  0x86   : > { %721 = vst [vmem:[#allocation5 + $0x15c] sm:$0xf] %v7748_v1  ;;  %722 = vst [vmem:[#allocation5 + $0x17c] sm:$0xf] %v7748_v1 }
  0x87   : > { %723 = vst [vmem:[#allocation5 + $0x19c] sm:$0xf] %v7748_v1  ;;  %724 = vst [vmem:[#allocation5 + $0x1bc] sm:$0xf] %v7748_v1 }
  0x88   : > { %725 = vst [vmem:[#allocation5 + $0x1dc] sm:$0xf] %v7748_v1  ;;  %726 = vst [vmem:[#allocation5 + $0x1fc] sm:$0xf] %v7748_v1 }
  0x89   : > { %727 = vst [vmem:[#allocation5 + $0x21c] sm:$0xf] %v7748_v1  ;;  %728 = vst [vmem:[#allocation5 + $0x23c] sm:$0xf] %v7748_v1 }
  0x8a   : > { %729 = vst [vmem:[#allocation5 + $0x25c] sm:$0xf] %v7748_v1  ;;  %730 = vst [vmem:[#allocation5 + $0x27c] sm:$0xf] %v7748_v1 }
  0x8b   : > { %731 = vst [vmem:[#allocation5 + $0x29c] sm:$0xf] %v7748_v1  ;;  %732 = vst [vmem:[#allocation5 + $0x2bc] sm:$0xf] %v7748_v1 }
  0x8c   : > { %733 = vst [vmem:[#allocation5 + $0x2dc] sm:$0xf] %v7748_v1  ;;  %734 = vst [vmem:[#allocation5 + $0x2fc] sm:$0xf] %v7748_v1 }
  0x8d   : > { %735 = vst [vmem:[#allocation5 + $0x31c] sm:$0xf] %v7748_v1  ;;  %736 = vst [vmem:[#allocation5 + $0x33c] sm:$0xf] %v7748_v1 }
  0x8e   : > { %737 = vst [vmem:[#allocation5 + $0x35c] sm:$0xf] %v7748_v1  ;;  %738 = vst [vmem:[#allocation5 + $0x37c] sm:$0xf] %v7748_v1 }
  0x8f   : > { %739 = vst [vmem:[#allocation7 + $0x1c] sm:$0xf] %v7748_v1  ;;  %740 = vst [vmem:[#allocation7 + $0x3c] sm:$0xf] %v7748_v1 }
  0x90   : > { %741 = vst [vmem:[#allocation7 + $0x5c] sm:$0xf] %v7748_v1  ;;  %742 = vst [vmem:[#allocation7 + $0x7c] sm:$0xf] %v7748_v1 }
  0x91   : > { %743 = vst [vmem:[#allocation7 + $0x9c] sm:$0xf] %v7748_v1  ;;  %744 = vst [vmem:[#allocation7 + $0xbc] sm:$0xf] %v7748_v1 }
  0x92   : > { %745 = vst [vmem:[#allocation7 + $0xdc] sm:$0xf] %v7748_v1  ;;  %746 = vst [vmem:[#allocation7 + $0xfc] sm:$0xf] %v7748_v1 }
  0x93   : > { %747 = vst [vmem:[#allocation7 + $0x11c] sm:$0xf] %v7748_v1  ;;  %748 = vst [vmem:[#allocation7 + $0x13c] sm:$0xf] %v7748_v1 }
  0x94   : > { %749 = vst [vmem:[#allocation7 + $0x15c] sm:$0xf] %v7748_v1  ;;  %750 = vst [vmem:[#allocation7 + $0x17c] sm:$0xf] %v7748_v1 }
  0x95   : > { %751 = vst [vmem:[#allocation7 + $0x19c] sm:$0xf] %v7748_v1  ;;  %752 = vst [vmem:[#allocation7 + $0x1bc] sm:$0xf] %v7748_v1 }
  0x96   : > { %753 = vst [vmem:[#allocation7 + $0x1dc] sm:$0xf] %v7748_v1  ;;  %754 = vst [vmem:[#allocation7 + $0x1fc] sm:$0xf] %v7748_v1 }
  0x97   : > { %755 = vst [vmem:[#allocation7 + $0x21c] sm:$0xf] %v7748_v1  ;;  %756 = vst [vmem:[#allocation7 + $0x23c] sm:$0xf] %v7748_v1 }
  0x98   : > { %757 = vst [vmem:[#allocation7 + $0x25c] sm:$0xf] %v7748_v1  ;;  %758 = vst [vmem:[#allocation7 + $0x27c] sm:$0xf] %v7748_v1 }
  0x99   : > { %759 = vst [vmem:[#allocation7 + $0x29c] sm:$0xf] %v7748_v1  ;;  %760 = vst [vmem:[#allocation7 + $0x2bc] sm:$0xf] %v7748_v1 }
  0x9a   : > { %761 = vst [vmem:[#allocation7 + $0x2dc] sm:$0xf] %v7748_v1  ;;  %762 = vst [vmem:[#allocation7 + $0x2fc] sm:$0xf] %v7748_v1 }
  0x9b   : > { %763 = vst [vmem:[#allocation7 + $0x31c] sm:$0xf] %v7748_v1  ;;  %764 = vst [vmem:[#allocation7 + $0x33c] sm:$0xf] %v7748_v1 }
  0x9c   : > { %765 = vst [vmem:[#allocation7 + $0x35c] sm:$0xf] %v7748_v1  ;;  %766 = vst [vmem:[#allocation7 + $0x37c] sm:$0xf] %v7748_v1 }
  0x9d   : > { %767 = vst [vmem:[#allocation9 + $0x1c] sm:$0xf] %v7748_v1  ;;  %768 = vst [vmem:[#allocation9 + $0x3c] sm:$0xf] %v7748_v1 }
  0x9e   : > { %769 = vst [vmem:[#allocation9 + $0x5c] sm:$0xf] %v7748_v1  ;;  %770 = vst [vmem:[#allocation9 + $0x7c] sm:$0xf] %v7748_v1 }
  0x9f   : > { %771 = vst [vmem:[#allocation9 + $0x9c] sm:$0xf] %v7748_v1  ;;  %772 = vst [vmem:[#allocation9 + $0xbc] sm:$0xf] %v7748_v1 }
  0xa0   : > { %773 = vst [vmem:[#allocation9 + $0xdc] sm:$0xf] %v7748_v1  ;;  %774 = vst [vmem:[#allocation9 + $0xfc] sm:$0xf] %v7748_v1 }
  0xa1   : > { %775 = vst [vmem:[#allocation9 + $0x11c] sm:$0xf] %v7748_v1  ;;  %776 = vst [vmem:[#allocation9 + $0x13c] sm:$0xf] %v7748_v1 }
  0xa2   : > { %777 = vst [vmem:[#allocation9 + $0x15c] sm:$0xf] %v7748_v1  ;;  %778 = vst [vmem:[#allocation9 + $0x17c] sm:$0xf] %v7748_v1 }
  0xa3   : > { %779 = vst [vmem:[#allocation9 + $0x19c] sm:$0xf] %v7748_v1  ;;  %780 = vst [vmem:[#allocation9 + $0x1bc] sm:$0xf] %v7748_v1 }
  0xa4   : > { %781 = vst [vmem:[#allocation9 + $0x1dc] sm:$0xf] %v7748_v1  ;;  %782 = vst [vmem:[#allocation9 + $0x1fc] sm:$0xf] %v7748_v1 }
  0xa5   : > { %783 = vst [vmem:[#allocation9 + $0x21c] sm:$0xf] %v7748_v1  ;;  %784 = vst [vmem:[#allocation9 + $0x23c] sm:$0xf] %v7748_v1 }
  0xa6   : > { %785 = vst [vmem:[#allocation9 + $0x25c] sm:$0xf] %v7748_v1  ;;  %786 = vst [vmem:[#allocation9 + $0x27c] sm:$0xf] %v7748_v1 }
  0xa7   : > { %787 = vst [vmem:[#allocation9 + $0x29c] sm:$0xf] %v7748_v1  ;;  %788 = vst [vmem:[#allocation9 + $0x2bc] sm:$0xf] %v7748_v1 }
  0xa8   : > { %789 = vst [vmem:[#allocation9 + $0x2dc] sm:$0xf] %v7748_v1  ;;  %790 = vst [vmem:[#allocation9 + $0x2fc] sm:$0xf] %v7748_v1 }
  0xa9   : > { %791 = vst [vmem:[#allocation9 + $0x31c] sm:$0xf] %v7748_v1  ;;  %792 = vst [vmem:[#allocation9 + $0x33c] sm:$0xf] %v7748_v1 }
  0xaa   : > { %793 = vst [vmem:[#allocation9 + $0x35c] sm:$0xf] %v7748_v1  ;;  %794 = vst [vmem:[#allocation9 + $0x37c] sm:$0xf] %v7748_v1 }
  0xab LB: >> { %s10291_s22 = sld [smem:[#allocation18_spill]]  ;;  %s5932_s15 = smul.u32 224, %s7695_s1  ;;  %vm849_vm0 = vcmask 613376   ;;  %v7749_v10 = vmov 0.0   ;;  %vm934_vm1 = vcmask 1042432   ;;  %vm7750_vm2 = vmmov 1   ;;  %s7695_s1 = sphi %s8174_s1, %s800_s1  }
  0xac   : >> { %s6617_s0 = sshll.u32 %s7695_s1, 8  ;;  %vm7212_vm3 = vmpackc.low %vm934_vm1, %vm7750_vm2  ;;  %v8280_v46 = vld [vmem:[%s10260_s2] ss:$0 sm:$0xff]  ;;  %s800_s1 = sadd.s32 1, %s7695_s1  }
  0xad   : >> { %s8201_s24 = scalar_lea.vmem %s515_s18, %s5932_s15 [#allocation11]  ;;  %s8203_s25 = scalar_lea.vmem [#allocation2], %s6617_s0 }
  0xae   : >> { %5965 = vst [vmem:[%s8203_s25 + $0x80] sm:$0xff] %v7749_v10  ;;  %5980 = vst [vmem:[%s8203_s25 + $0xf8] sm:$0xff] %v7749_v10  ;;  %v804_v12 = vld [vmem:[%s8201_s24] sm:$0xff]  ;;  %v818_v13 = vld [vmem:[%s8201_s24 + $0x70] sm:$0xff]  ;;  %p797_p7 = scmp.ge.s32.totalorder %s800_s1, 56  }
  0xaf   : >> { %5981 = vst [vmem:[%s8203_s25 + $0x100] sm:$0xff] %v7749_v10  ;;  %5996 = vst [vmem:[%s8203_s25 + $0x178] sm:$0xff] %v7749_v10  ;;  %6857 = vmatprep.mubr.msk.f32.mxu0 %vm849_vm0, %v804_v12  ;;  %6878 = vmatprep.mubr.msk.f32.mxu1 %vm849_vm0, %v818_v13  ;;  %v805_v20 = vld [vmem:[%s8201_s24 + $0x8] sm:$0xff]  ;;  %v819_v21 = vld [vmem:[%s8201_s24 + $0x78] sm:$0xff] }
  0xb0   : >> { %v806_v22 = vld [vmem:[%s8201_s24 + $0x10] sm:$0xff]  ;;  %v820_v23 = vld [vmem:[%s8201_s24 + $0x80] sm:$0xff]  ;;  %v807_v24 = vld [vmem:[%s8201_s24 + $0x18] sm:$0xff] }
  0xb1   : >> { %v832_v2 = vld [vmem:[%s10291_s22] sm:$0xff]  ;;  %v833_v3 = vld [vmem:[%s10291_s22 + $0x8] sm:$0xff]  ;;  %v834_v4 = vld [vmem:[%s10291_s22 + $0x10] sm:$0xff] }
  0xb2   : >> { %v7195_v5 = vpack.c.bf16 %v833_v3, %v832_v2  ;;  %v835_v6 = vld [vmem:[%s10291_s22 + $0x18] sm:$0xff]  ;;  %v836_v8 = vld [vmem:[%s10291_s22 + $0x20] sm:$0xff]  ;;  %v837_v9 = vld [vmem:[%s10291_s22 + $0x28] sm:$0xff] }
  0xb3   : >> { %v7199_v7 = vpack.c.bf16 %v835_v6, %v834_v4  ;;  %v7203_v11 = vpack.c.bf16 %v837_v9, %v836_v8  ;;  %v838_v14 = vld [vmem:[%s10291_s22 + $0x30] sm:$0xff]  ;;  %v839_v15 = vld [vmem:[%s10291_s22 + $0x38] sm:$0xff]  ;;  %v840_v17 = vld [vmem:[%s10291_s22 + $0x40] sm:$0xff] }
  0xb4   : >> { %7196 = vmatprep.subr.bf16.mxu0 %v7195_v5  ;;  %7345 = vmatprep.subr.bf16.mxu1 %v7195_v5  ;;  %v7207_v16 = vpack.c.bf16 %v839_v15, %v838_v14  ;;  %v841_v18 = vld [vmem:[%s10291_s22 + $0x48] sm:$0x7]  ;;  %v808_v26 = vld [vmem:[%s8201_s24 + $0x20] sm:$0xff]  ;;  %v822_v27 = vld [vmem:[%s8201_s24 + $0x90] sm:$0xff] }
  0xb5   : >> { %7198 = vmatpush3.bf16.msra.mxu0 %v7195_v5  ;;  %7350 = vmatpush3.bf16.msra.mxu1 %v7195_v5  ;;  %v7211_v19 = vpack.c.bf16 %v841_v18, %v840_v17  ;;  %v821_v25 = vld [vmem:[%s8201_s24 + $0x88] sm:$0xff]  ;;  %v823_v29 = vld [vmem:[%s8201_s24 + $0x98] sm:$0xff]  ;;  %v810_v30 = vld [vmem:[%s8201_s24 + $0x30] sm:$0xff] }
  0xb6   : >> { %7200 = vmatprep.subr.bf16.mxu0 %v7199_v7  ;;  %7346 = vmatprep.subr.bf16.mxu1 %v7199_v7  ;;  %v809_v28 = vld [vmem:[%s8201_s24 + $0x28] sm:$0xff]  ;;  %v824_v31 = vld [vmem:[%s8201_s24 + $0xa0] sm:$0xff]  ;;  %v811_v32 = vld [vmem:[%s8201_s24 + $0x38] sm:$0xff] }
  0xb7   : >> { %v825_v33 = vld [vmem:[%s8201_s24 + $0xa8] sm:$0xff]  ;;  %v812_v34 = vld [vmem:[%s8201_s24 + $0x40] sm:$0xff]  ;;  %v826_v35 = vld [vmem:[%s8201_s24 + $0xb0] sm:$0xff] }
  0xb8   : >> { %v813_v36 = vld [vmem:[%s8201_s24 + $0x48] sm:$0xff]  ;;  %v827_v37 = vld [vmem:[%s8201_s24 + $0xb8] sm:$0xff]  ;;  %v814_v38 = vld [vmem:[%s8201_s24 + $0x50] sm:$0xff] }
  0xb9   : >> { %7202 = vmatpush3.bf16.msra.mxu0 %v7199_v7  ;;  %7351 = vmatpush3.bf16.msra.mxu1 %v7199_v7  ;;  %v828_v39 = vld [vmem:[%s8201_s24 + $0xc0] sm:$0xff]  ;;  %v815_v40 = vld [vmem:[%s8201_s24 + $0x58] sm:$0xff]  ;;  %v829_v41 = vld [vmem:[%s8201_s24 + $0xc8] sm:$0xff] }
  0xba   : >> { %7204 = vmatprep.subr.bf16.mxu0 %v7203_v11  ;;  %7347 = vmatprep.subr.bf16.mxu1 %v7203_v11  ;;  %v816_v42 = vld [vmem:[%s8201_s24 + $0x60] sm:$0xff]  ;;  %v830_v43 = vld [vmem:[%s8201_s24 + $0xd0] sm:$0xff]  ;;  %v817_v44 = vld [vmem:[%s8201_s24 + $0x68] sm:$0xff] }
  0xbb   : >> { %v831_v45 = vld [vmem:[%s8201_s24 + $0xd8] sm:$0xff]  ;;  %s8341_s24 = smov (%p797_p7), 0  }
  0xbd   : >> { %7206 = vmatpush3.bf16.msra.mxu0 %v7203_v11  ;;  %7352 = vmatpush3.bf16.msra.mxu1 %v7203_v11 }
  0xbe   : >> { %7208 = vmatprep.subr.bf16.mxu0 %v7207_v16  ;;  %7348 = vmatprep.subr.bf16.mxu1 %v7207_v16 }
  0xc1   : >> { %7210 = vmatpush3.bf16.msra.mxu0 %v7207_v16  ;;  %7353 = vmatpush3.bf16.msra.mxu1 %v7207_v16 }
  0xc2   : >> { %7213 = vmatprep.subr.msk.bf16.mxu0 %vm7212_vm3, %v7211_v19  ;;  %7349 = vmatprep.subr.msk.bf16.mxu1 %vm7212_vm3, %v7211_v19 }
  0xc5   : >> { %7216 = vmatpush3.bf16.msk.msra.mxu0 %vm7212_vm3, %v7211_v19  ;;  %7354 = vmatpush3.bf16.msk.msra.mxu1 %vm7212_vm3, %v7211_v19 }
  0xc8   : >> { %6858 = vmatmul.mubr.msk.f32.vlgmr.msra.gmra.mrb[0].mxu0 %vm849_vm0, %v805_v20  ;;  %6879 = vmatmul.mubr.msk.f32.vlgmr.msra.gmra.mrb[0].mxu1 %vm849_vm0, %v819_v21 }
  0xc9   : >> { %6860 = vmatprep.mubr.msk.f32.mxu0 %vm849_vm0, %v806_v22  ;;  %6881 = vmatprep.mubr.msk.f32.mxu1 %vm849_vm0, %v820_v23 }
  0xcc   : >> { %6861 = vmatmul.mubr.msk.f32.gmra.mrb[2].mxu0 %vm849_vm0, %v807_v24  ;;  %6882 = vmatmul.mubr.msk.f32.gmra.mrb[2].mxu1 %vm849_vm0, %v821_v25 }
  0xcd   : >> { %6863 = vmatprep.mubr.msk.f32.mxu0 %vm849_vm0, %v808_v26  ;;  %6884 = vmatprep.mubr.msk.f32.mxu1 %vm849_vm0, %v822_v27 }
  0xd0   : >> { %6864 = vmatmul.mubr.msk.f32.gmra.mrb[4].mxu0 %vm849_vm0, %v809_v28  ;;  %6885 = vmatmul.mubr.msk.f32.gmra.mrb[4].mxu1 %vm849_vm0, %v823_v29 }
  0xd1   : >> { %6866 = vmatprep.mubr.msk.f32.mxu0 %vm849_vm0, %v810_v30  ;;  %6887 = vmatprep.mubr.msk.f32.mxu1 %vm849_vm0, %v824_v31 }
  0xd4   : >> { %6867 = vmatmul.mubr.msk.f32.gmra.mrb[6].mxu0 %vm849_vm0, %v811_v32  ;;  %6888 = vmatmul.mubr.msk.f32.gmra.mrb[6].mxu1 %vm849_vm0, %v825_v33 }
  0xd5   : >> { %6869 = vmatprep.mubr.msk.f32.mxu0 %vm849_vm0, %v812_v34  ;;  %6890 = vmatprep.mubr.msk.f32.mxu1 %vm849_vm0, %v826_v35 }
  0xd8   : >> { %6870 = vmatmul.mubr.msk.f32.gmra.mrb[8].mxu0 %vm849_vm0, %v813_v36  ;;  %6891 = vmatmul.mubr.msk.f32.gmra.mrb[8].mxu1 %vm849_vm0, %v827_v37 }
  0xd9   : >> { %6872 = vmatprep.mubr.msk.f32.mxu0 %vm849_vm0, %v814_v38  ;;  %6893 = vmatprep.mubr.msk.f32.mxu1 %vm849_vm0, %v828_v39 }
  0xdc   : >> { %6873 = vmatmul.mubr.msk.f32.gmra.mrb[10].mxu0 %vm849_vm0, %v815_v40  ;;  %6894 = vmatmul.mubr.msk.f32.gmra.mrb[10].mxu1 %vm849_vm0, %v829_v41 }
  0xdd   : >> { %6875 = vmatprep.mubr.msk.f32.mxu0 %vm849_vm0, %v816_v42  ;;  %6896 = vmatprep.mubr.msk.f32.mxu1 %vm849_vm0, %v830_v43 }
  0xe0   : >> { %6876 = vmatmul.mubr.msk.f32.gmra.mrb[12].mxu0 %vm849_vm0, %v817_v44  ;;  %6897 = vmatmul.mubr.msk.f32.gmra.mrb[12].mxu1 %vm849_vm0, %v831_v45 }
 0x19b   : >> { %v6859_v47 = vpop.f32.mrb[0].mxu0  ;;  %v6880_v48 = vpop.f32.mrb[0].mxu1 }
 0x19c   : >> { %v1010_v49 = vadd.f32 %v6859_v47, %v8280_v46  ;;  %v1080_v50 = vadd.f32 %v6880_v48, %v8280_v46  ;;  %v1004_v51 = vpop.f32.mrb[1].mxu0  ;;  %v1074_v52 = vpop.f32.mrb[1].mxu1 }
 0x19d   : >> { %v1005_v53 = vadd.f32 %v8280_v46, %v1004_v51  ;;  %v1075_v54 = vadd.f32 %v8280_v46, %v1074_v52 }
 0x19e   : >> { %v1144_v55 = vmax.f32 %v1010_v49, 0.0  ;;  %v1158_v56 = vmax.f32 %v1080_v50, 0.0 }
 0x19f   : >> { %v1143_v57 = vmax.f32 %v1005_v53, 0.0  ;;  %v1157_v58 = vmax.f32 %v1075_v54, 0.0  ;;  %v6862_v59 = vpop.f32.mrb[2].mxu0  ;;  %v6883_v60 = vpop.f32.mrb[2].mxu1 }
 0x1a0   : >> { %5967 = vst [vmem:[%s8203_s25 + $0x90] sm:$0xff] %v1144_v55  ;;  %5983 = vst [vmem:[%s8203_s25 + $0x110] sm:$0xff] %v1158_v56  ;;  %v1020_v61 = vadd.f32 %v6862_v59, %v8280_v46  ;;  %v1090_v62 = vadd.f32 %v6883_v60, %v8280_v46  ;;  %v1014_v63 = vpop.f32.mrb[3].mxu0  ;;  %v1084_v0 = vpop.f32.mrb[3].mxu1 }
 0x1a1   : >> { %5966 = vst [vmem:[%s8203_s25 + $0x88] sm:$0xff] %v1143_v57  ;;  %5982 = vst [vmem:[%s8203_s25 + $0x108] sm:$0xff] %v1157_v58  ;;  %v1015_v1 = vadd.f32 %v8280_v46, %v1014_v63  ;;  %v1085_v2 = vadd.f32 %v8280_v46, %v1084_v0 }
 0x1a2   : >> { %v1146_v3 = vmax.f32 %v1020_v61, 0.0  ;;  %v1160_v4 = vmax.f32 %v1090_v62, 0.0 }
 0x1a3   : >> { %v1145_v5 = vmax.f32 %v1015_v1, 0.0  ;;  %v1159_v6 = vmax.f32 %v1085_v2, 0.0  ;;  %v6865_v7 = vpop.f32.mrb[4].mxu0  ;;  %v6886_v8 = vpop.f32.mrb[4].mxu1 }
 0x1a4   : >> { %5969 = vst [vmem:[%s8203_s25 + $0xa0] sm:$0xff] %v1146_v3  ;;  %5985 = vst [vmem:[%s8203_s25 + $0x120] sm:$0xff] %v1160_v4  ;;  %v1030_v9 = vadd.f32 %v6865_v7, %v8280_v46  ;;  %v1100_v10 = vadd.f32 %v6886_v8, %v8280_v46  ;;  %v1024_v11 = vpop.f32.mrb[5].mxu0  ;;  %v1094_v12 = vpop.f32.mrb[5].mxu1 }
 0x1a5   : >> { %5968 = vst [vmem:[%s8203_s25 + $0x98] sm:$0xff] %v1145_v5  ;;  %5984 = vst [vmem:[%s8203_s25 + $0x118] sm:$0xff] %v1159_v6  ;;  %v1025_v13 = vadd.f32 %v8280_v46, %v1024_v11  ;;  %v1095_v14 = vadd.f32 %v8280_v46, %v1094_v12 }
 0x1a6   : >> { %v1148_v15 = vmax.f32 %v1030_v9, 0.0  ;;  %v1162_v16 = vmax.f32 %v1100_v10, 0.0 }
 0x1a7   : >> { %v1147_v17 = vmax.f32 %v1025_v13, 0.0  ;;  %v1161_v18 = vmax.f32 %v1095_v14, 0.0  ;;  %v6868_v19 = vpop.f32.mrb[6].mxu0  ;;  %v6889_v20 = vpop.f32.mrb[6].mxu1 }
 0x1a8   : >> { %5971 = vst [vmem:[%s8203_s25 + $0xb0] sm:$0xff] %v1148_v15  ;;  %5987 = vst [vmem:[%s8203_s25 + $0x130] sm:$0xff] %v1162_v16  ;;  %v1040_v21 = vadd.f32 %v6868_v19, %v8280_v46  ;;  %v1110_v22 = vadd.f32 %v6889_v20, %v8280_v46  ;;  %v1034_v23 = vpop.f32.mrb[7].mxu0  ;;  %v1104_v24 = vpop.f32.mrb[7].mxu1 }
 0x1a9   : >> { %5970 = vst [vmem:[%s8203_s25 + $0xa8] sm:$0xff] %v1147_v17  ;;  %5986 = vst [vmem:[%s8203_s25 + $0x128] sm:$0xff] %v1161_v18  ;;  %v1035_v25 = vadd.f32 %v8280_v46, %v1034_v23  ;;  %v1105_v26 = vadd.f32 %v8280_v46, %v1104_v24 }
 0x1aa   : >> { %v1150_v27 = vmax.f32 %v1040_v21, 0.0  ;;  %v1164_v28 = vmax.f32 %v1110_v22, 0.0 }
 0x1ab   : >> { %v1149_v29 = vmax.f32 %v1035_v25, 0.0  ;;  %v1163_v30 = vmax.f32 %v1105_v26, 0.0  ;;  %v6871_v31 = vpop.f32.mrb[8].mxu0  ;;  %v6892_v32 = vpop.f32.mrb[8].mxu1 }
 0x1ac   : >> { %5973 = vst [vmem:[%s8203_s25 + $0xc0] sm:$0xff] %v1150_v27  ;;  %5989 = vst [vmem:[%s8203_s25 + $0x140] sm:$0xff] %v1164_v28  ;;  %v1050_v33 = vadd.f32 %v6871_v31, %v8280_v46  ;;  %v1120_v34 = vadd.f32 %v6892_v32, %v8280_v46  ;;  %v1044_v35 = vpop.f32.mrb[9].mxu0  ;;  %v1114_v36 = vpop.f32.mrb[9].mxu1 }
 0x1ad   : >> { %5972 = vst [vmem:[%s8203_s25 + $0xb8] sm:$0xff] %v1149_v29  ;;  %5988 = vst [vmem:[%s8203_s25 + $0x138] sm:$0xff] %v1163_v30  ;;  %v1045_v37 = vadd.f32 %v8280_v46, %v1044_v35  ;;  %v1115_v38 = vadd.f32 %v8280_v46, %v1114_v36 }
 0x1ae   : >> { %v1152_v39 = vmax.f32 %v1050_v33, 0.0  ;;  %v1166_v40 = vmax.f32 %v1120_v34, 0.0 }
 0x1af   : >> { %v1151_v41 = vmax.f32 %v1045_v37, 0.0  ;;  %v1165_v42 = vmax.f32 %v1115_v38, 0.0  ;;  %v6874_v43 = vpop.f32.mrb[10].mxu0  ;;  %v6895_v44 = vpop.f32.mrb[10].mxu1 }
 0x1b0   : >> { %5975 = vst [vmem:[%s8203_s25 + $0xd0] sm:$0xff] %v1152_v39  ;;  %5991 = vst [vmem:[%s8203_s25 + $0x150] sm:$0xff] %v1166_v40  ;;  %v1060_v45 = vadd.f32 %v6874_v43, %v8280_v46  ;;  %v1130_v47 = vadd.f32 %v6895_v44, %v8280_v46  ;;  %v1054_v48 = vpop.f32.mrb[11].mxu0  ;;  %v1124_v49 = vpop.f32.mrb[11].mxu1 }
 0x1b1   : >> { %5974 = vst [vmem:[%s8203_s25 + $0xc8] sm:$0xff] %v1151_v41  ;;  %5990 = vst [vmem:[%s8203_s25 + $0x148] sm:$0xff] %v1165_v42  ;;  %v1055_v50 = vadd.f32 %v8280_v46, %v1054_v48  ;;  %v1125_v51 = vadd.f32 %v8280_v46, %v1124_v49 }
 0x1b2   : >> { %v1154_v52 = vmax.f32 %v1060_v45, 0.0  ;;  %v1168_v53 = vmax.f32 %v1130_v47, 0.0 }
 0x1b3   : >> { %v1153_v54 = vmax.f32 %v1055_v50, 0.0  ;;  %v1167_v55 = vmax.f32 %v1125_v51, 0.0  ;;  %v6877_v56 = vpop.f32.mrb[12].mxu0  ;;  %v6898_v57 = vpop.f32.mrb[12].mxu1  ;;  %799 = sbr.rel (!%p797_p7) target bundleno = 171 (0xab), region = 445 }
 0x1b4   : >> { %5977 = vst [vmem:[%s8203_s25 + $0xe0] sm:$0xff] %v1154_v52  ;;  %5993 = vst [vmem:[%s8203_s25 + $0x160] sm:$0xff] %v1168_v53  ;;  %v1070_v58 = vadd.f32 %v6877_v56, %v8280_v46  ;;  %v1140_v59 = vadd.f32 %v6898_v57, %v8280_v46  ;;  %v1064_v60 = vpop.f32.mrb[13].mxu0  ;;  %v1134_v61 = vpop.f32.mrb[13].mxu1 }
 0x1b5   : >> { %5976 = vst [vmem:[%s8203_s25 + $0xd8] sm:$0xff] %v1153_v54  ;;  %5992 = vst [vmem:[%s8203_s25 + $0x158] sm:$0xff] %v1167_v55  ;;  %v1065_v62 = vadd.f32 %v8280_v46, %v1064_v60  ;;  %v1135_v63 = vadd.f32 %v8280_v46, %v1134_v61 }
 0x1b6   : >> { %v1156_v0 = vmax.f32 %v1070_v58, 0.0  ;;  %v1170_v1 = vmax.f32 %v1140_v59, 0.0 }
 0x1b7   : >> { %v1155_v2 = vmax.f32 %v1065_v62, 0.0  ;;  %v1169_v3 = vmax.f32 %v1135_v63, 0.0 }
 0x1b8   : >> { %5979 = vst [vmem:[%s8203_s25 + $0xf0] sm:$0xff] %v1156_v0  ;;  %5995 = vst [vmem:[%s8203_s25 + $0x170] sm:$0xff] %v1170_v1 }
 0x1b9   : >> { %5978 = vst [vmem:[%s8203_s25 + $0xe8] sm:$0xff] %v1155_v2  ;;  %5994 = vst [vmem:[%s8203_s25 + $0x168] sm:$0xff] %v1169_v3 }
 0x1ba LB: >> { %s6618_s28 = sshll.u32 %s7699_s24, 8  ;;  %v6015_v46 = vld [vmem:[%s10261_s3] ss:$0 sm:$0xff]  ;;  %v6019_v4 = vld [vmem:[%s10261_s3 + $0x2] ss:$0 sm:$0xff]  ;;  %vm1314_vm4 = vcmask 1046528   ;;  %s7699_s24 = sphi %s8341_s24, %s1211_s24  }
 0x1bb   : >> { %v6017_v5 = vld [vmem:[%s10261_s3 + $0x1] ss:$0 sm:$0xff]  ;;  %s8356_s21 = scalar_lea.vmem [#allocation2], %s6618_s28  ;;  %v6021_v50 = vld [vmem:[%s10261_s3 + $0x3] ss:$0 sm:$0xff]  ;;  %vm1421_vm5 = vcmask 1045504  }
 0x1c0   : >> { %v8359_v6 = vld [vmem:[%s8356_s21 + $0x7] ss:$2 sm:$0xff]  ;;  %v8362_v7 = vld [vmem:[%s8356_s21 + $0x17] ss:$2 sm:$0xff]  ;;  %v6007_v22 = vld [vmem:[%s8356_s21 + $0x8] ss:$2 sm:$0xff] }
 0x1c1   : >> { %v8365_v8 = vld [vmem:[%s8356_s21 + $0x27] ss:$2 sm:$0xff]  ;;  %v8368_v9 = vld [vmem:[%s8356_s21 + $0x37] ss:$2 sm:$0xff]  ;;  %v1254_v12 = vmul.f32 %v6015_v46, %v8359_v6  ;;  %v1255_v13 = vmul.f32 %v6015_v46, %v8362_v7  ;;  %v1298_v15 = vmul.f32 %v6019_v4, %v8359_v6  ;;  %v1299_v21 = vmul.f32 %v6019_v4, %v8362_v7  ;;  %v6008_v23 = vld [vmem:[%s8356_s21 + $0x18] ss:$2 sm:$0xff] }
 0x1c2   : >> { %v8371_v10 = vld [vmem:[%s8356_s21 + $0x47] ss:$2 sm:$0xff]  ;;  %v8374_v11 = vld [vmem:[%s8356_s21 + $0x57] ss:$2 sm:$0xff]  ;;  %v1256_v14 = vmul.f32 %v6015_v46, %v8365_v8  ;;  %v1257_v18 = vmul.f32 %v6015_v46, %v8368_v9  ;;  %v6009_v24 = vld [vmem:[%s8356_s21 + $0x28] ss:$2 sm:$0xff]  ;;  %v1300_v26 = vmul.f32 %v6019_v4, %v8365_v8  ;;  %v1301_v27 = vmul.f32 %v6019_v4, %v8368_v9 }
 0x1c3   : >> { %v8381_v16 = vld [vmem:[%s8356_s21 + $0x67] ss:$2 sm:$0xff]  ;;  %v8384_v17 = vld [vmem:[%s8356_s21 + $0x77] ss:$2 sm:$0x3]  ;;  %v1258_v19 = vmul.f32 %v6015_v46, %v8371_v10  ;;  %v1259_v20 = vmul.f32 %v6015_v46, %v8374_v11  ;;  %v1302_v28 = vmul.f32 %v6019_v4, %v8371_v10  ;;  %v1276_v32 = vmul.f32 %v6017_v5, %v6007_v22 }
 0x1c4   : >> { %v1260_v25 = vmul.f32 %v6015_v46, %v8381_v16  ;;  %v6010_v29 = vld [vmem:[%s8356_s21 + $0x38] ss:$2 sm:$0xff]  ;;  %v6011_v30 = vld [vmem:[%s8356_s21 + $0x48] ss:$2 sm:$0xff]  ;;  %v1277_v33 = vmul.f32 %v6017_v5, %v6008_v23  ;;  %v1278_v34 = vmul.f32 %v6017_v5, %v6009_v24  ;;  %v1303_v35 = vmul.f32 %v6019_v4, %v8374_v11 }
 0x1c5   : >> { %v6012_v31 = vld [vmem:[%s8356_s21 + $0x58] ss:$2 sm:$0xff]  ;;  %v6013_v36 = vld [vmem:[%s8356_s21 + $0x68] ss:$2 sm:$0xff]  ;;  %v1279_v37 = vmul.f32 %v6017_v5, %v6010_v29  ;;  %v1280_v38 = vmul.f32 %v6017_v5, %v6011_v30  ;;  %v1304_v40 = vmul.f32 %v6019_v4, %v8381_v16  ;;  %v1283_v42 = vadd.f32 %v1276_v32, %v1254_v12 }
 0x1c6   : >> { %v1281_v39 = vmul.f32 %v6017_v5, %v6012_v31  ;;  %v1282_v41 = vmul.f32 %v6017_v5, %v6013_v36  ;;  %v1284_v43 = vadd.f32 %v1277_v33, %v1255_v13  ;;  %v1285_v44 = vadd.f32 %v1278_v34, %v1256_v14  ;;  %v6014_v3 = vld [vmem:[%s8356_s21 + $0x78] ss:$2 sm:$0x1] }
 0x1c7   : >> { %v1286_v45 = vadd.f32 %v1279_v37, %v1257_v18  ;;  %v1287_v47 = vadd.f32 %v1280_v38, %v1258_v19  ;;  %v1305_v49 = vmul.f32 %v6019_v4, %v8384_v17  ;;  %v1315_v52 = vrot.slane %v1298_v15, 1 }
 0x1c8   : >> { %v1288_v48 = vadd.f32 %v1281_v39, %v1259_v20  ;;  %v1289_v51 = vadd.f32 %v1282_v41, %v1260_v25  ;;  %v1316_v53 = vrot.slane %v1299_v21, 1  ;;  %v1318_v54 = vrot.slane %v1300_v26, 1  ;;  %v6023_v25 = vld [vmem:[%s10261_s3 + $0x4] ss:$0 sm:$0xff] }
 0x1c9   : >> { %v1320_v55 = vrot.slane %v1301_v27, 1  ;;  %v1322_v56 = vrot.slane %v1302_v28, 1  ;;  %v1324_v57 = vrot.slane %v1303_v35, 1  ;;  %v1326_v58 = vrot.slane %v1304_v40, 1 }
 0x1ca   : >> { %v1317_v59 = vsel %vm1314_vm4, %v1315_v52, %v1316_v53  ;;  %v1319_v60 = vsel %vm1314_vm4, %v1316_v53, %v1318_v54  ;;  %v1328_v61 = vrot.slane %v1305_v49, 1  ;;  %v1352_v62 = vmul.f32 %v6021_v50, %v6007_v22 }
 0x1cb   : >> { %v1321_v63 = vsel %vm1314_vm4, %v1318_v54, %v1320_v55  ;;  %v1323_v0 = vsel %vm1314_vm4, %v1320_v55, %v1322_v56  ;;  %v1325_v1 = vsel %vm1314_vm4, %v1322_v56, %v1324_v57  ;;  %v1327_v2 = vsel %vm1314_vm4, %v1324_v57, %v1326_v58  ;;  %v8433_v56 = vld [vmem:[%s8356_s21 + $0x87] ss:$2 sm:$0xff]  ;;  %v6043_v57 = vld [vmem:[%s10261_s3 + $0x5] ss:$0 sm:$0xff] }
 0x1cc   : >> { %v1329_v46 = vsel %vm1314_vm4, %v1326_v58, %v1328_v61  ;;  %v1337_v4 = vadd.f32 %v1317_v59, %v1283_v42  ;;  %v1338_v5 = vadd.f32 %v1319_v60, %v1284_v43  ;;  %v1339_v12 = vadd.f32 %v1321_v63, %v1285_v44  ;;  %v8442_v63 = vld [vmem:[%s8356_s21 + $0x97] ss:$2 sm:$0xff] }
 0x1cd   : >> { %v1340_v13 = vadd.f32 %v1323_v0, %v1286_v45  ;;  %v1341_v14 = vadd.f32 %v1325_v1, %v1287_v47  ;;  %v1342_v15 = vadd.f32 %v1327_v2, %v1288_v48  ;;  %v1343_v18 = vadd.f32 %v1329_v46, %v1289_v51  ;;  %v6045_v0 = vld [vmem:[%s10261_s3 + $0x6] ss:$0 sm:$0xff] }
 0x1ce   : >> { %v1353_v19 = vmul.f32 %v6021_v50, %v6008_v23  ;;  %v1354_v20 = vmul.f32 %v6021_v50, %v6009_v24  ;;  %v1355_v21 = vmul.f32 %v6021_v50, %v6010_v29  ;;  %v1356_v22 = vmul.f32 %v6021_v50, %v6011_v30 }
 0x1cf   : >> { %v1357_v26 = vmul.f32 %v6021_v50, %v6012_v31  ;;  %v1358_v27 = vmul.f32 %v6021_v50, %v6013_v36  ;;  %v1359_v28 = vmul.f32 %v6021_v50, %v6014_v3  ;;  %v1368_v32 = vrot.slane %v1352_v62, 1 }
 0x1d0   : >> { %v1369_v33 = vrot.slane %v1353_v19, 1  ;;  %v1371_v34 = vrot.slane %v1354_v20, 1  ;;  %v1373_v35 = vrot.slane %v1355_v21, 1  ;;  %v1375_v37 = vrot.slane %v1356_v22, 1  ;;  %v8463_v19 = vld [vmem:[%s8356_s21 + $0xd7] ss:$2 sm:$0xff] }
 0x1d1   : >> { %v1377_v38 = vrot.slane %v1357_v26, 1  ;;  %v1379_v39 = vrot.slane %v1358_v27, 1  ;;  %v1381_v40 = vrot.slane %v1359_v28, 1  ;;  %v1405_v23 = vmul.f32 %v6023_v25, %v8359_v6  ;;  %v8466_v20 = vld [vmem:[%s8356_s21 + $0xe7] ss:$2 sm:$0xff] }
 0x1d2   : >> { %v1370_v24 = vsel %vm1314_vm4, %v1368_v32, %v1369_v33  ;;  %v1372_v29 = vsel %vm1314_vm4, %v1369_v33, %v1371_v34  ;;  %v1374_v30 = vsel %vm1314_vm4, %v1371_v34, %v1373_v35  ;;  %v1376_v31 = vsel %vm1314_vm4, %v1373_v35, %v1375_v37  ;;  %v6034_v21 = vld [vmem:[%s8356_s21 + $0x88] ss:$2 sm:$0xff]  ;;  %v8470_v28 = vld [vmem:[%s8356_s21 + $0x98] ss:$2 sm:$0xff] }
 0x1d3   : >> { %v1378_v36 = vsel %vm1314_vm4, %v1375_v37, %v1377_v38  ;;  %v1380_v41 = vsel %vm1314_vm4, %v1377_v38, %v1379_v39  ;;  %v1382_v42 = vsel %vm1314_vm4, %v1379_v39, %v1381_v40  ;;  %v1390_v43 = vadd.f32 %v1370_v24, %v1337_v4  ;;  %v8453_v4 = vld [vmem:[%s8356_s21 + $0xa7] ss:$2 sm:$0xff]  ;;  %v8473_v32 = vld [vmem:[%s8356_s21 + $0xa8] ss:$2 sm:$0xff]  ;;  %v8476_v33 = vld [vmem:[%s8356_s21 + $0xb8] ss:$2 sm:$0xff] }
 0x1d4   : >> { %v1391_v44 = vadd.f32 %v1372_v29, %v1338_v5  ;;  %v1392_v45 = vadd.f32 %v1374_v30, %v1339_v12  ;;  %v1393_v47 = vadd.f32 %v1376_v31, %v1340_v13  ;;  %v1394_v6 = vadd.f32 %v1378_v36, %v1341_v14  ;;  %v8456_v5 = vld [vmem:[%s8356_s21 + $0xb7] ss:$2 sm:$0xff]  ;;  %v8459_v12 = vld [vmem:[%s8356_s21 + $0xc7] ss:$2 sm:$0xff]  ;;  %v8483_v39 = vld [vmem:[%s8356_s21 + $0xc8] ss:$2 sm:$0xff] }
 0x1d5   : >> { %v1395_v48 = vadd.f32 %v1380_v41, %v1342_v15  ;;  %v1396_v49 = vadd.f32 %v1382_v42, %v1343_v18  ;;  %v1406_v50 = vmul.f32 %v6023_v25, %v8362_v7  ;;  %v1407_v51 = vmul.f32 %v6023_v25, %v8365_v8  ;;  %v8486_v40 = vld [vmem:[%s8356_s21 + $0xd8] ss:$2 sm:$0xff] }
 0x1d6   : >> { %v1408_v52 = vmul.f32 %v6023_v25, %v8368_v9  ;;  %v1409_v53 = vmul.f32 %v6023_v25, %v8371_v10  ;;  %v1410_v54 = vmul.f32 %v6023_v25, %v8374_v11  ;;  %v1411_v55 = vmul.f32 %v6023_v25, %v8381_v16 }
 0x1d7   : >> { %v1412_v58 = vmul.f32 %v6023_v25, %v8384_v17  ;;  %v1422_v7 = vrot.slane %v1405_v23, 2  ;;  %v1423_v59 = vrot.slane %v1406_v50, 2  ;;  %v1425_v8 = vrot.slane %v1407_v51, 2  ;;  %v8489_v23 = vld [vmem:[%s8356_s21 + $0xe8] ss:$2 sm:$0xff] }
 0x1d8   : >> { %v1427_v9 = vrot.slane %v1408_v52, 2  ;;  %v1429_v10 = vrot.slane %v1409_v53, 2  ;;  %v1431_v60 = vrot.slane %v1410_v54, 2  ;;  %v1433_v11 = vrot.slane %v1411_v55, 2 }
 0x1d9   : >> { %v1424_v16 = vsel %vm1421_vm5, %v1422_v7, %v1423_v59  ;;  %v1426_v61 = vsel %vm1421_vm5, %v1423_v59, %v1425_v8  ;;  %v1435_v62 = vrot.slane %v1412_v58, 2  ;;  %v1494_v17 = vmul.f32 %v6043_v57, %v8433_v56  ;;  %v8503_v53 = vld [vmem:[%s8356_s21 + $0xf7] ss:$2 sm:$0x3] }
 0x1da   : >> { %v1428_v1 = vsel %vm1421_vm5, %v1425_v8, %v1427_v9  ;;  %v1430_v2 = vsel %vm1421_vm5, %v1427_v9, %v1429_v10  ;;  %v1432_v3 = vsel %vm1421_vm5, %v1429_v10, %v1431_v60  ;;  %v1434_v46 = vsel %vm1421_vm5, %v1431_v60, %v1433_v11 }
 0x1db   : >> { %v1436_v13 = vsel %vm1421_vm5, %v1433_v11, %v1435_v62  ;;  %v1444_v14 = vadd.f32 %v1424_v16, %v1390_v43  ;;  %v1445_v15 = vadd.f32 %v1426_v61, %v1391_v44  ;;  %v1446_v18 = vadd.f32 %v1428_v1, %v1392_v45  ;;  %v6047_v44 = vld [vmem:[%s10261_s3 + $0x7] ss:$0 sm:$0xff]  ;;  %v6049_v61 = vld [vmem:[%s10261_s3 + $0x8] ss:$0 sm:$0xff] }
 0x1dc   : >> { %v1447_v22 = vadd.f32 %v1430_v2, %v1393_v47  ;;  %v1448_v25 = vadd.f32 %v1432_v3, %v1394_v6  ;;  %v1449_v26 = vadd.f32 %v1434_v46, %v1395_v48  ;;  %v1450_v27 = vadd.f32 %v1436_v13, %v1396_v49 }
 0x1dd   : >> { %v1495_v34 = vmul.f32 %v6043_v57, %v8442_v63  ;;  %v1496_v35 = vmul.f32 %v6043_v57, %v8453_v4  ;;  %v1497_v37 = vmul.f32 %v6043_v57, %v8456_v5  ;;  %v1498_v38 = vmul.f32 %v6043_v57, %v8459_v12 }
 0x1de   : >> { %v1499_v24 = vmul.f32 %v6043_v57, %v8463_v19  ;;  %v1500_v29 = vmul.f32 %v6043_v57, %v8466_v20  ;;  %v1501_v30 = vadd.f32 %v1494_v17, %v1444_v14  ;;  %v1516_v31 = vmul.f32 %v6045_v0, %v6034_v21 }
 0x1df   : >> { %v1502_v36 = vadd.f32 %v1495_v34, %v1445_v15  ;;  %v1503_v41 = vadd.f32 %v1496_v35, %v1446_v18  ;;  %v1504_v42 = vadd.f32 %v1497_v37, %v1447_v22  ;;  %v1505_v43 = vadd.f32 %v1498_v38, %v1448_v25 }
 0x1e0   : >> { %v1506_v45 = vadd.f32 %v1499_v24, %v1449_v26  ;;  %v1507_v47 = vadd.f32 %v1500_v29, %v1450_v27  ;;  %v1517_v6 = vmul.f32 %v6045_v0, %v8470_v28  ;;  %v1518_v48 = vmul.f32 %v6045_v0, %v8473_v32  ;;  %v6041_v29 = vld [vmem:[%s8356_s21 + $0xf8] ss:$2 sm:$0x1] }
 0x1e1   : >> { %v1519_v49 = vmul.f32 %v6045_v0, %v8476_v33  ;;  %v1520_v50 = vmul.f32 %v6045_v0, %v8483_v39  ;;  %v1521_v51 = vmul.f32 %v6045_v0, %v8486_v40  ;;  %v1522_v52 = vmul.f32 %v6045_v0, %v8489_v23 }
 0x1e2   : >> { %v1523_v54 = vadd.f32 %v1516_v31, %v1501_v30  ;;  %v1524_v55 = vadd.f32 %v1517_v6, %v1502_v36  ;;  %v1525_v57 = vadd.f32 %v1518_v48, %v1503_v41  ;;  %v1538_v58 = vmul.f32 %v6047_v44, %v8433_v56 }
 0x1e3   : >> { %v1526_v7 = vadd.f32 %v1519_v49, %v1504_v42  ;;  %v1527_v59 = vadd.f32 %v1520_v50, %v1505_v43  ;;  %v1528_v8 = vadd.f32 %v1521_v51, %v1506_v45  ;;  %v1529_v9 = vadd.f32 %v1522_v52, %v1507_v47  ;;  %v6051_v49 = vld [vmem:[%s10261_s3 + $0x9] ss:$0 sm:$0xff] }
 0x1e4   : >> { %v1539_v10 = vmul.f32 %v6047_v44, %v8442_v63  ;;  %v1540_v60 = vmul.f32 %v6047_v44, %v8453_v4  ;;  %v1541_v11 = vmul.f32 %v6047_v44, %v8456_v5  ;;  %v1542_v16 = vmul.f32 %v6047_v44, %v8459_v12 }
 0x1e5   : >> { %v1543_v62 = vmul.f32 %v6047_v44, %v8463_v19  ;;  %v1544_v17 = vmul.f32 %v6047_v44, %v8466_v20  ;;  %v1545_v0 = vmul.f32 %v6047_v44, %v8503_v53  ;;  %v1554_v1 = vrot.slane %v1538_v58, 1 }
 0x1e6   : >> { %v1555_v2 = vrot.slane %v1539_v10, 1  ;;  %v1557_v3 = vrot.slane %v1540_v60, 1  ;;  %v1559_v46 = vrot.slane %v1541_v11, 1  ;;  %v1561_v13 = vrot.slane %v1542_v16, 1 }
 0x1e7   : >> { %v1563_v14 = vrot.slane %v1543_v62, 1  ;;  %v1565_v15 = vrot.slane %v1544_v17, 1  ;;  %v1567_v18 = vrot.slane %v1545_v0, 1  ;;  %v1591_v22 = vmul.f32 %v6049_v61, %v6034_v21 }
 0x1e8   : >> { %v1556_v25 = vsel %vm1314_vm4, %v1554_v1, %v1555_v2  ;;  %v1558_v26 = vsel %vm1314_vm4, %v1555_v2, %v1557_v3  ;;  %v1560_v27 = vsel %vm1314_vm4, %v1557_v3, %v1559_v46  ;;  %v1562_v34 = vsel %vm1314_vm4, %v1559_v46, %v1561_v13  ;;  %v8546_v3 = vld [vmem:[%s8356_s21 + $0x107] ss:$2 sm:$0xff]  ;;  %v6071_v46 = vld [vmem:[%s10261_s3 + $0xa] ss:$0 sm:$0xff] }
 0x1e9   : >> { %v1564_v35 = vsel %vm1314_vm4, %v1561_v13, %v1563_v14  ;;  %v1566_v37 = vsel %vm1314_vm4, %v1563_v14, %v1565_v15  ;;  %v1568_v38 = vsel %vm1314_vm4, %v1565_v15, %v1567_v18  ;;  %v1576_v24 = vadd.f32 %v1556_v25, %v1523_v54 }
 0x1ea   : >> { %v1577_v30 = vadd.f32 %v1558_v26, %v1524_v55  ;;  %v1578_v31 = vadd.f32 %v1560_v27, %v1525_v57  ;;  %v1579_v36 = vadd.f32 %v1562_v34, %v1526_v7  ;;  %v1580_v21 = vadd.f32 %v1564_v35, %v1527_v59  ;;  %v8560_v35 = vld [vmem:[%s8356_s21 + $0x117] ss:$2 sm:$0xff] }
 0x1eb   : >> { %v1581_v41 = vadd.f32 %v1566_v37, %v1528_v8  ;;  %v1582_v42 = vadd.f32 %v1568_v38, %v1529_v9  ;;  %v1592_v43 = vmul.f32 %v6049_v61, %v8470_v28  ;;  %v1593_v44 = vmul.f32 %v6049_v61, %v8473_v32  ;;  %v8563_v37 = vld [vmem:[%s8356_s21 + $0x127] ss:$2 sm:$0xff]  ;;  %v8566_v38 = vld [vmem:[%s8356_s21 + $0x137] ss:$2 sm:$0xff] }
 0x1ec   : >> { %v1594_v45 = vmul.f32 %v6049_v61, %v8476_v33  ;;  %v1595_v47 = vmul.f32 %v6049_v61, %v8483_v39  ;;  %v1596_v6 = vmul.f32 %v6049_v61, %v8486_v40  ;;  %v1597_v48 = vmul.f32 %v6049_v61, %v8489_v23 }
 0x1ed   : >> { %v1598_v50 = vmul.f32 %v6049_v61, %v6041_v29  ;;  %v1607_v51 = vrot.slane %v1591_v22, 1  ;;  %v1608_v52 = vrot.slane %v1592_v43, 1  ;;  %v1610_v54 = vrot.slane %v1593_v44, 1 }
 0x1ee   : >> { %v1612_v55 = vrot.slane %v1594_v45, 1  ;;  %v1614_v28 = vrot.slane %v1595_v47, 1  ;;  %v1616_v57 = vrot.slane %v1596_v6, 1  ;;  %v1618_v32 = vrot.slane %v1597_v48, 1  ;;  %v6062_v47 = vld [vmem:[%s8356_s21 + $0x108] ss:$2 sm:$0xff] }
 0x1ef   : >> { %v1609_v33 = vsel %vm1314_vm4, %v1607_v51, %v1608_v52  ;;  %v1611_v39 = vsel %vm1314_vm4, %v1608_v52, %v1610_v54  ;;  %v1620_v58 = vrot.slane %v1598_v50, 1  ;;  %v1644_v40 = vmul.f32 %v6051_v49, %v8433_v56  ;;  %v6073_v6 = vld [vmem:[%s10261_s3 + $0xb] ss:$0 sm:$0xff]  ;;  %v8585_v50 = vld [vmem:[%s8356_s21 + $0x118] ss:$2 sm:$0xff] }
 0x1f0   : >> { %v1613_v23 = vsel %vm1314_vm4, %v1610_v54, %v1612_v55  ;;  %v1615_v7 = vsel %vm1314_vm4, %v1612_v55, %v1614_v28  ;;  %v1617_v59 = vsel %vm1314_vm4, %v1614_v28, %v1616_v57  ;;  %v1619_v8 = vsel %vm1314_vm4, %v1616_v57, %v1618_v32  ;;  %v8590_v54 = vld [vmem:[%s8356_s21 + $0x128] ss:$2 sm:$0xff]  ;;  %v8593_v55 = vld [vmem:[%s8356_s21 + $0x138] ss:$2 sm:$0xff] }
 0x1f1   : >> { %v1621_v9 = vsel %vm1314_vm4, %v1618_v32, %v1620_v58  ;;  %v1629_v10 = vadd.f32 %v1609_v33, %v1576_v24  ;;  %v1630_v60 = vadd.f32 %v1611_v39, %v1577_v30  ;;  %v1631_v11 = vadd.f32 %v1613_v23, %v1578_v31  ;;  %v8596_v28 = vld [vmem:[%s8356_s21 + $0x148] ss:$2 sm:$0xff]  ;;  %v8603_v58 = vld [vmem:[%s8356_s21 + $0x158] ss:$2 sm:$0xff] }
 0x1f2   : >> { %v1632_v16 = vadd.f32 %v1615_v7, %v1579_v36  ;;  %v1633_v61 = vadd.f32 %v1617_v59, %v1580_v21  ;;  %v1634_v62 = vadd.f32 %v1619_v8, %v1581_v41  ;;  %v1635_v17 = vadd.f32 %v1621_v9, %v1582_v42  ;;  %v8572_v36 = vld [vmem:[%s8356_s21 + $0x147] ss:$2 sm:$0xff]  ;;  %v8575_v21 = vld [vmem:[%s8356_s21 + $0x157] ss:$2 sm:$0xff]  ;;  %v6075_v9 = vld [vmem:[%s10261_s3 + $0xc] ss:$0 sm:$0xff] }
 0x1f3   : >> { %v1645_v56 = vmul.f32 %v6051_v49, %v8442_v63  ;;  %v1646_v0 = vmul.f32 %v6051_v49, %v8453_v4  ;;  %v1647_v1 = vmul.f32 %v6051_v49, %v8456_v5  ;;  %v1648_v2 = vmul.f32 %v6051_v49, %v8459_v12  ;;  %v8578_v41 = vld [vmem:[%s8356_s21 + $0x167] ss:$2 sm:$0xff] }
 0x1f4   : >> { %v1649_v13 = vmul.f32 %v6051_v49, %v8463_v19  ;;  %v1650_v14 = vmul.f32 %v6051_v49, %v8466_v20  ;;  %v1651_v63 = vmul.f32 %v6051_v49, %v8503_v53  ;;  %v1660_v4 = vrot.slane %v1644_v40, 2  ;;  %v8606_v40 = vld [vmem:[%s8356_s21 + $0x168] ss:$2 sm:$0xff] }
 0x1f5   : >> { %v1661_v15 = vrot.slane %v1645_v56, 2  ;;  %v1663_v5 = vrot.slane %v1646_v0, 2  ;;  %v1665_v18 = vrot.slane %v1647_v1, 2  ;;  %v1667_v12 = vrot.slane %v1648_v2, 2 }
 0x1f6   : >> { %v1669_v22 = vrot.slane %v1649_v13, 2  ;;  %v1671_v25 = vrot.slane %v1650_v14, 2  ;;  %v1673_v26 = vrot.slane %v1651_v63, 2  ;;  %v1732_v19 = vmul.f32 %v6071_v46, %v8546_v3  ;;  %v8619_v13 = vld [vmem:[%s8356_s21 + $0x177] ss:$2 sm:$0x3] }
 0x1f7   : >> { %v1662_v27 = vsel %vm1421_vm5, %v1660_v4, %v1661_v15  ;;  %v1664_v20 = vsel %vm1421_vm5, %v1661_v15, %v1663_v5  ;;  %v1666_v53 = vsel %vm1421_vm5, %v1663_v5, %v1665_v18  ;;  %v1668_v34 = vsel %vm1421_vm5, %v1665_v18, %v1667_v12 }
 0x1f8   : >> { %v1670_v24 = vsel %vm1421_vm5, %v1667_v12, %v1669_v22  ;;  %v1672_v29 = vsel %vm1421_vm5, %v1669_v22, %v1671_v25  ;;  %v1674_v30 = vsel %vm1421_vm5, %v1671_v25, %v1673_v26  ;;  %v1682_v31 = vadd.f32 %v1662_v27, %v1629_v10 }
 0x1f9   : >> { %v1683_v42 = vadd.f32 %v1664_v20, %v1630_v60  ;;  %v1684_v43 = vadd.f32 %v1666_v53, %v1631_v11  ;;  %v1685_v44 = vadd.f32 %v1668_v34, %v1632_v16  ;;  %v1686_v45 = vadd.f32 %v1670_v24, %v1633_v61  ;;  %v6077_v20 = vld [vmem:[%s10261_s3 + $0xd] ss:$0 sm:$0xff] }
 0x1fa   : >> { %v1687_v48 = vadd.f32 %v1672_v29, %v1634_v62  ;;  %v1688_v49 = vadd.f32 %v1674_v30, %v1635_v17  ;;  %v1733_v51 = vmul.f32 %v6071_v46, %v8560_v35  ;;  %v1734_v52 = vmul.f32 %v6071_v46, %v8563_v37 }
 0x1fb   : >> { %v1735_v57 = vmul.f32 %v6071_v46, %v8566_v38  ;;  %v1736_v32 = vmul.f32 %v6071_v46, %v8572_v36  ;;  %v1737_v33 = vmul.f32 %v6071_v46, %v8575_v21  ;;  %v1738_v39 = vmul.f32 %v6071_v46, %v8578_v41 }
 0x1fc   : >> { %v1739_v23 = vadd.f32 %v1732_v19, %v1682_v31  ;;  %v1740_v7 = vadd.f32 %v1733_v51, %v1683_v42  ;;  %v1741_v59 = vadd.f32 %v1734_v52, %v1684_v43  ;;  %v1754_v8 = vmul.f32 %v6073_v6, %v6062_v47 }
 0x1fd   : >> { %v1742_v10 = vadd.f32 %v1735_v57, %v1685_v44  ;;  %v1743_v60 = vadd.f32 %v1736_v32, %v1686_v45  ;;  %v1744_v11 = vadd.f32 %v1737_v33, %v1687_v48  ;;  %v1745_v16 = vadd.f32 %v1738_v39, %v1688_v49  ;;  %v6069_v32 = vld [vmem:[%s8356_s21 + $0x178] ss:$2 sm:$0x1] }
 0x1fe   : >> { %v1755_v61 = vmul.f32 %v6073_v6, %v8585_v50  ;;  %v1756_v62 = vmul.f32 %v6073_v6, %v8590_v54  ;;  %v1757_v17 = vmul.f32 %v6073_v6, %v8593_v55  ;;  %v1758_v56 = vmul.f32 %v6073_v6, %v8596_v28 }
 0x1ff   : >> { %v1759_v0 = vmul.f32 %v6073_v6, %v8603_v58  ;;  %v1760_v1 = vmul.f32 %v6073_v6, %v8606_v40  ;;  %v1761_v2 = vadd.f32 %v1754_v8, %v1739_v23  ;;  %v1776_v46 = vmul.f32 %v6075_v9, %v8546_v3 }
 0x200   : >> { %v1762_v14 = vadd.f32 %v1755_v61, %v1740_v7  ;;  %v1763_v63 = vadd.f32 %v1756_v62, %v1741_v59  ;;  %v1764_v4 = vadd.f32 %v1757_v17, %v1742_v10  ;;  %v1765_v15 = vadd.f32 %v1758_v56, %v1743_v60  ;;  %v6079_v61 = vld [vmem:[%s10261_s3 + $0xe] ss:$0 sm:$0xff] }
 0x201   : >> { %v1766_v5 = vadd.f32 %v1759_v0, %v1744_v11  ;;  %v1767_v18 = vadd.f32 %v1760_v1, %v1745_v16  ;;  %v1777_v12 = vmul.f32 %v6075_v9, %v8560_v35  ;;  %v1778_v22 = vmul.f32 %v6075_v9, %v8563_v37 }
 0x202   : >> { %v1779_v25 = vmul.f32 %v6075_v9, %v8566_v38  ;;  %v1780_v26 = vmul.f32 %v6075_v9, %v8572_v36  ;;  %v1781_v19 = vmul.f32 %v6075_v9, %v8575_v21  ;;  %v1782_v27 = vmul.f32 %v6075_v9, %v8578_v41 }
 0x203   : >> { %v1783_v53 = vmul.f32 %v6075_v9, %v8619_v13  ;;  %v1792_v34 = vrot.slane %v1776_v46, 1  ;;  %v1793_v24 = vrot.slane %v1777_v12, 1  ;;  %v1795_v29 = vrot.slane %v1778_v22, 1 }
 0x204   : >> { %v1797_v30 = vrot.slane %v1779_v25, 1  ;;  %v1799_v31 = vrot.slane %v1780_v26, 1  ;;  %v1801_v42 = vrot.slane %v1781_v19, 1  ;;  %v1803_v43 = vrot.slane %v1782_v27, 1 }
 0x205   : >> { %v1794_v44 = vsel %vm1314_vm4, %v1792_v34, %v1793_v24  ;;  %v1796_v45 = vsel %vm1314_vm4, %v1793_v24, %v1795_v29  ;;  %v1805_v6 = vrot.slane %v1783_v53, 1  ;;  %v1829_v48 = vmul.f32 %v6077_v20, %v6062_v47 }
 0x206   : >> { %v1798_v49 = vsel %vm1314_vm4, %v1795_v29, %v1797_v30  ;;  %v1800_v51 = vsel %vm1314_vm4, %v1797_v30, %v1799_v31  ;;  %v1802_v52 = vsel %vm1314_vm4, %v1799_v31, %v1801_v42  ;;  %v1804_v57 = vsel %vm1314_vm4, %v1801_v42, %v1803_v43  ;;  %v8663_v31 = vld [vmem:[%s8356_s21 + $0x187] ss:$2 sm:$0xff] }
 0x207   : >> { %v1806_v33 = vsel %vm1314_vm4, %v1803_v43, %v1805_v6  ;;  %v1814_v39 = vadd.f32 %v1794_v44, %v1761_v2  ;;  %v1815_v23 = vadd.f32 %v1796_v45, %v1762_v14  ;;  %v1816_v7 = vadd.f32 %v1798_v49, %v1763_v63  ;;  %v6099_v42 = vld [vmem:[%s10261_s3 + $0xf] ss:$0 sm:$0xff]  ;;  %v8672_v49 = vld [vmem:[%s8356_s21 + $0x197] ss:$2 sm:$0xff] }
 0x208   : >> { %v1817_v59 = vadd.f32 %v1800_v51, %v1764_v4  ;;  %v1818_v8 = vadd.f32 %v1802_v52, %v1765_v15  ;;  %v1819_v9 = vadd.f32 %v1804_v57, %v1766_v5  ;;  %v1820_v10 = vadd.f32 %v1806_v33, %v1767_v18 }
 0x209   : >> { %v1830_v47 = vmul.f32 %v6077_v20, %v8585_v50  ;;  %v1831_v60 = vmul.f32 %v6077_v20, %v8590_v54  ;;  %v1832_v11 = vmul.f32 %v6077_v20, %v8593_v55  ;;  %v1833_v16 = vmul.f32 %v6077_v20, %v8596_v28 }
 0x20a   : >> { %v1834_v62 = vmul.f32 %v6077_v20, %v8603_v58  ;;  %v1835_v17 = vmul.f32 %v6077_v20, %v8606_v40  ;;  %v1836_v56 = vmul.f32 %v6077_v20, %v6069_v32  ;;  %v1845_v0 = vrot.slane %v1829_v48, 1 }
 0x20b   : >> { %v1846_v1 = vrot.slane %v1830_v47, 1  ;;  %v1848_v2 = vrot.slane %v1831_v60, 1  ;;  %v1850_v46 = vrot.slane %v1832_v11, 1  ;;  %v1852_v50 = vrot.slane %v1833_v16, 1  ;;  %v8693_v47 = vld [vmem:[%s8356_s21 + $0x1e7] ss:$2 sm:$0xff] }
 0x20c   : >> { %v1854_v14 = vrot.slane %v1834_v62, 1  ;;  %v1856_v54 = vrot.slane %v1835_v17, 1  ;;  %v1858_v63 = vrot.slane %v1836_v56, 1  ;;  %v1882_v55 = vmul.f32 %v6079_v61, %v8546_v3  ;;  %v6090_v60 = vld [vmem:[%s8356_s21 + $0x188] ss:$2 sm:$0xff] }
 0x20d   : >> { %v1847_v28 = vsel %vm1314_vm4, %v1845_v0, %v1846_v1  ;;  %v1849_v4 = vsel %vm1314_vm4, %v1846_v1, %v1848_v2  ;;  %v1851_v15 = vsel %vm1314_vm4, %v1848_v2, %v1850_v46  ;;  %v1853_v58 = vsel %vm1314_vm4, %v1850_v46, %v1852_v50  ;;  %v6101_v11 = vld [vmem:[%s10261_s3 + $0x10] ss:$0 sm:$0xff]  ;;  %v8700_v56 = vld [vmem:[%s8356_s21 + $0x198] ss:$2 sm:$0xff] }
 0x20e   : >> { %v1855_v40 = vsel %vm1314_vm4, %v1852_v50, %v1854_v14  ;;  %v1857_v5 = vsel %vm1314_vm4, %v1854_v14, %v1856_v54  ;;  %v1859_v18 = vsel %vm1314_vm4, %v1856_v54, %v1858_v63  ;;  %v1867_v12 = vadd.f32 %v1847_v28, %v1814_v39  ;;  %v8683_v39 = vld [vmem:[%s8356_s21 + $0x1b7] ss:$2 sm:$0xff]  ;;  %v8703_v0 = vld [vmem:[%s8356_s21 + $0x1a8] ss:$2 sm:$0xff]  ;;  %v8706_v1 = vld [vmem:[%s8356_s21 + $0x1b8] ss:$2 sm:$0xff] }
 0x20f   : >> { %v1868_v22 = vadd.f32 %v1849_v4, %v1815_v23  ;;  %v1869_v25 = vadd.f32 %v1851_v15, %v1816_v7  ;;  %v1870_v26 = vadd.f32 %v1853_v58, %v1817_v59  ;;  %v1871_v3 = vadd.f32 %v1855_v40, %v1818_v8  ;;  %v8686_v23 = vld [vmem:[%s8356_s21 + $0x1c7] ss:$2 sm:$0xff]  ;;  %v8689_v7 = vld [vmem:[%s8356_s21 + $0x1d7] ss:$2 sm:$0xff]  ;;  %v8713_v54 = vld [vmem:[%s8356_s21 + $0x1c8] ss:$2 sm:$0xff] }
 0x210   : >> { %v1872_v19 = vadd.f32 %v1857_v5, %v1819_v9  ;;  %v1873_v27 = vadd.f32 %v1859_v18, %v1820_v10  ;;  %v1883_v20 = vmul.f32 %v6079_v61, %v8560_v35  ;;  %v1884_v53 = vmul.f32 %v6079_v61, %v8563_v37  ;;  %v8716_v63 = vld [vmem:[%s8356_s21 + $0x1d8] ss:$2 sm:$0xff] }
 0x211   : >> { %v1885_v34 = vmul.f32 %v6079_v61, %v8566_v38  ;;  %v1886_v24 = vmul.f32 %v6079_v61, %v8572_v36  ;;  %v1887_v29 = vmul.f32 %v6079_v61, %v8575_v21  ;;  %v1888_v30 = vmul.f32 %v6079_v61, %v8578_v41 }
 0x212   : >> { %v1889_v35 = vmul.f32 %v6079_v61, %v8619_v13  ;;  %v1898_v43 = vrot.slane %v1882_v55, 2  ;;  %v1899_v37 = vrot.slane %v1883_v20, 2  ;;  %v1901_v38 = vrot.slane %v1884_v53, 2  ;;  %v8675_v13 = vld [vmem:[%s8356_s21 + $0x1a7] ss:$2 sm:$0xff] }
 0x213   : >> { %v1903_v36 = vrot.slane %v1885_v34, 2  ;;  %v1905_v44 = vrot.slane %v1886_v24, 2  ;;  %v1907_v21 = vrot.slane %v1887_v29, 2  ;;  %v1909_v45 = vrot.slane %v1888_v30, 2  ;;  %v8719_v55 = vld [vmem:[%s8356_s21 + $0x1e8] ss:$2 sm:$0xff] }
 0x214   : >> { %v1900_v41 = vsel %vm1421_vm5, %v1898_v43, %v1899_v37  ;;  %v1902_v6 = vsel %vm1421_vm5, %v1899_v37, %v1901_v38  ;;  %v1911_v48 = vrot.slane %v1889_v35, 2  ;;  %v1970_v51 = vmul.f32 %v6099_v42, %v8663_v31  ;;  %v8733_v24 = vld [vmem:[%s8356_s21 + $0x1f7] ss:$2 sm:$0x3] }
 0x215   : >> { %v1904_v52 = vsel %vm1421_vm5, %v1901_v38, %v1903_v36  ;;  %v1906_v57 = vsel %vm1421_vm5, %v1903_v36, %v1905_v44  ;;  %v1908_v32 = vsel %vm1421_vm5, %v1905_v44, %v1907_v21  ;;  %v1910_v33 = vsel %vm1421_vm5, %v1907_v21, %v1909_v45 }
 0x216   : >> { %v1912_v59 = vsel %vm1421_vm5, %v1909_v45, %v1911_v48  ;;  %v1920_v8 = vadd.f32 %v1900_v41, %v1867_v12  ;;  %v1921_v9 = vadd.f32 %v1902_v6, %v1868_v22  ;;  %v1922_v10 = vadd.f32 %v1904_v52, %v1869_v25  ;;  %v6103_v22 = vld [vmem:[%s10261_s3 + $0x11] ss:$0 sm:$0xff]  ;;  %v6105_v6 = vld [vmem:[%s10261_s3 + $0x12] ss:$0 sm:$0xff] }
 0x217   : >> { %v1923_v16 = vadd.f32 %v1906_v57, %v1870_v26  ;;  %v1924_v61 = vadd.f32 %v1908_v32, %v1871_v3  ;;  %v1925_v62 = vadd.f32 %v1910_v33, %v1872_v19  ;;  %v1926_v17 = vadd.f32 %v1912_v59, %v1873_v27 }
 0x218   : >> { %v1971_v2 = vmul.f32 %v6099_v42, %v8672_v49  ;;  %v1972_v46 = vmul.f32 %v6099_v42, %v8675_v13  ;;  %v1973_v50 = vmul.f32 %v6099_v42, %v8683_v39  ;;  %v1974_v14 = vmul.f32 %v6099_v42, %v8686_v23 }
 0x219   : >> { %v1975_v28 = vmul.f32 %v6099_v42, %v8689_v7  ;;  %v1976_v4 = vmul.f32 %v6099_v42, %v8693_v47  ;;  %v1977_v15 = vadd.f32 %v1970_v51, %v1920_v8  ;;  %v1992_v58 = vmul.f32 %v6101_v11, %v6090_v60 }
 0x21a   : >> { %v1978_v40 = vadd.f32 %v1971_v2, %v1921_v9  ;;  %v1979_v5 = vadd.f32 %v1972_v46, %v1922_v10  ;;  %v1980_v18 = vadd.f32 %v1973_v50, %v1923_v16  ;;  %v1981_v12 = vadd.f32 %v1974_v14, %v1924_v61 }
 0x21b   : >> { %v1982_v25 = vadd.f32 %v1975_v28, %v1925_v62  ;;  %v1983_v26 = vadd.f32 %v1976_v4, %v1926_v17  ;;  %v1993_v3 = vmul.f32 %v6101_v11, %v8700_v56  ;;  %v1994_v19 = vmul.f32 %v6101_v11, %v8703_v0  ;;  %v6097_v4 = vld [vmem:[%s8356_s21 + $0x1f8] ss:$2 sm:$0x1] }
 0x21c   : >> { %v1995_v27 = vmul.f32 %v6101_v11, %v8706_v1  ;;  %v1996_v20 = vmul.f32 %v6101_v11, %v8713_v54  ;;  %v1997_v53 = vmul.f32 %v6101_v11, %v8716_v63  ;;  %v1998_v34 = vmul.f32 %v6101_v11, %v8719_v55 }
 0x21d   : >> { %v1999_v29 = vadd.f32 %v1992_v58, %v1977_v15  ;;  %v2000_v30 = vadd.f32 %v1993_v3, %v1978_v40  ;;  %v2001_v42 = vadd.f32 %v1994_v19, %v1979_v5  ;;  %v2014_v35 = vmul.f32 %v6103_v22, %v8663_v31 }
 0x21e   : >> { %v2002_v43 = vadd.f32 %v1995_v27, %v1980_v18  ;;  %v2003_v37 = vadd.f32 %v1996_v20, %v1981_v12  ;;  %v2004_v38 = vadd.f32 %v1997_v53, %v1982_v25  ;;  %v2005_v36 = vadd.f32 %v1998_v34, %v1983_v26  ;;  %v6107_v27 = vld [vmem:[%s10261_s3 + $0x13] ss:$0 sm:$0xff] }
 0x21f   : >> { %v2015_v44 = vmul.f32 %v6103_v22, %v8672_v49  ;;  %v2016_v21 = vmul.f32 %v6103_v22, %v8675_v13  ;;  %v2017_v45 = vmul.f32 %v6103_v22, %v8683_v39  ;;  %v2018_v41 = vmul.f32 %v6103_v22, %v8686_v23 }
 0x220   : >> { %v2019_v48 = vmul.f32 %v6103_v22, %v8689_v7  ;;  %v2020_v51 = vmul.f32 %v6103_v22, %v8693_v47  ;;  %v2021_v52 = vmul.f32 %v6103_v22, %v8733_v24  ;;  %v2030_v57 = vrot.slane %v2014_v35, 1 }
 0x221   : >> { %v2031_v32 = vrot.slane %v2015_v44, 1  ;;  %v2033_v33 = vrot.slane %v2016_v21, 1  ;;  %v2035_v59 = vrot.slane %v2017_v45, 1  ;;  %v2037_v8 = vrot.slane %v2018_v41, 1 }
 0x222   : >> { %v2039_v9 = vrot.slane %v2019_v48, 1  ;;  %v2041_v10 = vrot.slane %v2020_v51, 1  ;;  %v2043_v11 = vrot.slane %v2021_v52, 1  ;;  %v2067_v16 = vmul.f32 %v6105_v6, %v6090_v60 }
 0x223   : >> { %v2032_v61 = vsel %vm1314_vm4, %v2030_v57, %v2031_v32  ;;  %v2034_v62 = vsel %vm1314_vm4, %v2031_v32, %v2033_v33  ;;  %v2036_v17 = vsel %vm1314_vm4, %v2033_v33, %v2035_v59  ;;  %v2038_v2 = vsel %vm1314_vm4, %v2035_v59, %v2037_v8  ;;  %v8776_v33 = vld [vmem:[%s8356_s21 + $0x207] ss:$2 sm:$0xff]  ;;  %v6127_v59 = vld [vmem:[%s10261_s3 + $0x14] ss:$0 sm:$0xff] }
 0x224   : >> { %v2040_v46 = vsel %vm1314_vm4, %v2037_v8, %v2039_v9  ;;  %v2042_v50 = vsel %vm1314_vm4, %v2039_v9, %v2041_v10  ;;  %v2044_v14 = vsel %vm1314_vm4, %v2041_v10, %v2043_v11  ;;  %v2052_v28 = vadd.f32 %v2032_v61, %v1999_v29 }
 0x225   : >> { %v2053_v15 = vadd.f32 %v2034_v62, %v2000_v30  ;;  %v2054_v58 = vadd.f32 %v2036_v17, %v2001_v42  ;;  %v2055_v40 = vadd.f32 %v2038_v2, %v2002_v43  ;;  %v2056_v60 = vadd.f32 %v2040_v46, %v2003_v37  ;;  %v8790_v46 = vld [vmem:[%s8356_s21 + $0x217] ss:$2 sm:$0xff] }
 0x226   : >> { %v2057_v5 = vadd.f32 %v2042_v50, %v2004_v38  ;;  %v2058_v18 = vadd.f32 %v2044_v14, %v2005_v36  ;;  %v2068_v12 = vmul.f32 %v6105_v6, %v8700_v56  ;;  %v2069_v22 = vmul.f32 %v6105_v6, %v8703_v0  ;;  %v8793_v50 = vld [vmem:[%s8356_s21 + $0x227] ss:$2 sm:$0xff]  ;;  %v8796_v14 = vld [vmem:[%s8356_s21 + $0x237] ss:$2 sm:$0xff] }
 0x227   : >> { %v2070_v25 = vmul.f32 %v6105_v6, %v8706_v1  ;;  %v2071_v26 = vmul.f32 %v6105_v6, %v8713_v54  ;;  %v2072_v3 = vmul.f32 %v6105_v6, %v8716_v63  ;;  %v2073_v19 = vmul.f32 %v6105_v6, %v8719_v55 }
 0x228   : >> { %v2074_v20 = vmul.f32 %v6105_v6, %v6097_v4  ;;  %v2083_v53 = vrot.slane %v2067_v16, 1  ;;  %v2084_v34 = vrot.slane %v2068_v12, 1  ;;  %v2086_v29 = vrot.slane %v2069_v22, 1 }
 0x229   : >> { %v2088_v30 = vrot.slane %v2070_v25, 1  ;;  %v2090_v56 = vrot.slane %v2071_v26, 1  ;;  %v2092_v42 = vrot.slane %v2072_v3, 1  ;;  %v2094_v0 = vrot.slane %v2073_v19, 1  ;;  %v6118_v26 = vld [vmem:[%s8356_s21 + $0x208] ss:$2 sm:$0xff] }
 0x22a   : >> { %v2085_v1 = vsel %vm1314_vm4, %v2083_v53, %v2084_v34  ;;  %v2087_v54 = vsel %vm1314_vm4, %v2084_v34, %v2086_v29  ;;  %v2096_v35 = vrot.slane %v2074_v20, 1  ;;  %v2120_v63 = vmul.f32 %v6107_v27, %v8663_v31  ;;  %v6129_v3 = vld [vmem:[%s10261_s3 + $0x15] ss:$0 sm:$0xff]  ;;  %v8815_v20 = vld [vmem:[%s8356_s21 + $0x218] ss:$2 sm:$0xff] }
 0x22b   : >> { %v2089_v55 = vsel %vm1314_vm4, %v2086_v29, %v2088_v30  ;;  %v2091_v43 = vsel %vm1314_vm4, %v2088_v30, %v2090_v56  ;;  %v2093_v37 = vsel %vm1314_vm4, %v2090_v56, %v2092_v42  ;;  %v2095_v38 = vsel %vm1314_vm4, %v2092_v42, %v2094_v0  ;;  %v8820_v29 = vld [vmem:[%s8356_s21 + $0x228] ss:$2 sm:$0xff]  ;;  %v8823_v30 = vld [vmem:[%s8356_s21 + $0x238] ss:$2 sm:$0xff] }
 0x22c   : >> { %v2097_v36 = vsel %vm1314_vm4, %v2094_v0, %v2096_v35  ;;  %v2105_v44 = vadd.f32 %v2085_v1, %v2052_v28  ;;  %v2106_v21 = vadd.f32 %v2087_v54, %v2053_v15  ;;  %v2107_v45 = vadd.f32 %v2089_v55, %v2054_v58  ;;  %v8826_v56 = vld [vmem:[%s8356_s21 + $0x248] ss:$2 sm:$0xff]  ;;  %v8833_v35 = vld [vmem:[%s8356_s21 + $0x258] ss:$2 sm:$0xff] }
 0x22d   : >> { %v2108_v41 = vadd.f32 %v2091_v43, %v2055_v40  ;;  %v2109_v6 = vadd.f32 %v2093_v37, %v2056_v60  ;;  %v2110_v48 = vadd.f32 %v2095_v38, %v2057_v5  ;;  %v2111_v51 = vadd.f32 %v2097_v36, %v2058_v18  ;;  %v8802_v40 = vld [vmem:[%s8356_s21 + $0x247] ss:$2 sm:$0xff]  ;;  %v8805_v60 = vld [vmem:[%s8356_s21 + $0x257] ss:$2 sm:$0xff]  ;;  %v6131_v36 = vld [vmem:[%s10261_s3 + $0x16] ss:$0 sm:$0xff] }
 0x22e   : >> { %v2121_v31 = vmul.f32 %v6107_v27, %v8672_v49  ;;  %v2122_v52 = vmul.f32 %v6107_v27, %v8675_v13  ;;  %v2123_v57 = vmul.f32 %v6107_v27, %v8683_v39  ;;  %v2124_v32 = vmul.f32 %v6107_v27, %v8686_v23  ;;  %v8808_v5 = vld [vmem:[%s8356_s21 + $0x267] ss:$2 sm:$0xff] }
 0x22f   : >> { %v2125_v8 = vmul.f32 %v6107_v27, %v8689_v7  ;;  %v2126_v9 = vmul.f32 %v6107_v27, %v8693_v47  ;;  %v2127_v49 = vmul.f32 %v6107_v27, %v8733_v24  ;;  %v2136_v13 = vrot.slane %v2120_v63, 2  ;;  %v8836_v63 = vld [vmem:[%s8356_s21 + $0x268] ss:$2 sm:$0xff] }
 0x230   : >> { %v2137_v10 = vrot.slane %v2121_v31, 2  ;;  %v2139_v39 = vrot.slane %v2122_v52, 2  ;;  %v2141_v11 = vrot.slane %v2123_v57, 2  ;;  %v2143_v23 = vrot.slane %v2124_v32, 2 }
 0x231   : >> { %v2145_v16 = vrot.slane %v2125_v8, 2  ;;  %v2147_v61 = vrot.slane %v2126_v9, 2  ;;  %v2149_v62 = vrot.slane %v2127_v49, 2  ;;  %v2208_v7 = vmul.f32 %v6127_v59, %v8776_v33  ;;  %v8849_v8 = vld [vmem:[%s8356_s21 + $0x277] ss:$2 sm:$0x3] }
 0x232   : >> { %v2138_v17 = vsel %vm1421_vm5, %v2136_v13, %v2137_v10  ;;  %v2140_v47 = vsel %vm1421_vm5, %v2137_v10, %v2139_v39  ;;  %v2142_v24 = vsel %vm1421_vm5, %v2139_v39, %v2141_v11  ;;  %v2144_v2 = vsel %vm1421_vm5, %v2141_v11, %v2143_v23 }
 0x233   : >> { %v2146_v28 = vsel %vm1421_vm5, %v2143_v23, %v2145_v16  ;;  %v2148_v4 = vsel %vm1421_vm5, %v2145_v16, %v2147_v61  ;;  %v2150_v15 = vsel %vm1421_vm5, %v2147_v61, %v2149_v62  ;;  %v2158_v58 = vadd.f32 %v2138_v17, %v2105_v44 }
 0x234   : >> { %v2159_v18 = vadd.f32 %v2140_v47, %v2106_v21  ;;  %v2160_v12 = vadd.f32 %v2142_v24, %v2107_v45  ;;  %v2161_v22 = vadd.f32 %v2144_v2, %v2108_v41  ;;  %v2162_v25 = vadd.f32 %v2146_v28, %v2109_v6  ;;  %v6133_v47 = vld [vmem:[%s10261_s3 + $0x17] ss:$0 sm:$0xff] }
 0x235   : >> { %v2163_v19 = vadd.f32 %v2148_v4, %v2110_v48  ;;  %v2164_v27 = vadd.f32 %v2150_v15, %v2111_v51  ;;  %v2209_v53 = vmul.f32 %v6127_v59, %v8790_v46  ;;  %v2210_v34 = vmul.f32 %v6127_v59, %v8793_v50 }
 0x236   : >> { %v2211_v42 = vmul.f32 %v6127_v59, %v8796_v14  ;;  %v2212_v0 = vmul.f32 %v6127_v59, %v8802_v40  ;;  %v2213_v1 = vmul.f32 %v6127_v59, %v8805_v60  ;;  %v2214_v54 = vmul.f32 %v6127_v59, %v8808_v5 }
 0x237   : >> { %v2215_v55 = vadd.f32 %v2208_v7, %v2158_v58  ;;  %v2216_v43 = vadd.f32 %v2209_v53, %v2159_v18  ;;  %v2217_v37 = vadd.f32 %v2210_v34, %v2160_v12  ;;  %v2230_v38 = vmul.f32 %v6129_v3, %v6118_v26 }
 0x238   : >> { %v2218_v44 = vadd.f32 %v2211_v42, %v2161_v22  ;;  %v2219_v21 = vadd.f32 %v2212_v0, %v2162_v25  ;;  %v2220_v45 = vadd.f32 %v2213_v1, %v2163_v19  ;;  %v2221_v41 = vadd.f32 %v2214_v54, %v2164_v27  ;;  %v6125_v0 = vld [vmem:[%s8356_s21 + $0x278] ss:$2 sm:$0x1]  ;;  %s2403_s21 = smul.u32 56, %s7699_s24  ;;  %s1211_s24 = sadd.s32 1, %s7699_s24  }
 0x239   : >> { %v2231_v6 = vmul.f32 %v6129_v3, %v8815_v20  ;;  %v2232_v48 = vmul.f32 %v6129_v3, %v8820_v29  ;;  %v2233_v51 = vmul.f32 %v6129_v3, %v8823_v30  ;;  %v2234_v31 = vmul.f32 %v6129_v3, %v8826_v56  ;;  %p1208_p8 = scmp.ge.s32.totalorder %s1211_s24, 56  }
 0x23a   : >> { %v2235_v52 = vmul.f32 %v6129_v3, %v8833_v35  ;;  %v2236_v57 = vmul.f32 %v6129_v3, %v8836_v63  ;;  %v2237_v32 = vadd.f32 %v2230_v38, %v2215_v55  ;;  %v2252_v59 = vmul.f32 %v6131_v36, %v8776_v33  ;;  %s2404_s18 = scalar_lea.vmem [#allocation3], %s2403_s21  ;;  %s8904_s0 = smov (%p1208_p8), 0  }
 0x23b   : >> { %v2238_v9 = vadd.f32 %v2231_v6, %v2216_v43  ;;  %v2239_v49 = vadd.f32 %v2232_v48, %v2217_v37  ;;  %v2240_v13 = vadd.f32 %v2233_v51, %v2218_v44  ;;  %v2241_v10 = vadd.f32 %v2234_v31, %v2219_v21  ;;  %v6135_v6 = vld [vmem:[%s10261_s3 + $0x18] ss:$0 sm:$0xff] }
 0x23c   : >> { %v2242_v39 = vadd.f32 %v2235_v52, %v2220_v45  ;;  %v2243_v11 = vadd.f32 %v2236_v57, %v2221_v41  ;;  %v2253_v23 = vmul.f32 %v6131_v36, %v8790_v46  ;;  %v2254_v16 = vmul.f32 %v6131_v36, %v8793_v50 }
 0x23d   : >> { %v2255_v61 = vmul.f32 %v6131_v36, %v8796_v14  ;;  %v2256_v62 = vmul.f32 %v6131_v36, %v8802_v40  ;;  %v2257_v7 = vmul.f32 %v6131_v36, %v8805_v60  ;;  %v2258_v17 = vmul.f32 %v6131_v36, %v8808_v5 }
 0x23e   : >> { %v2259_v24 = vmul.f32 %v6131_v36, %v8849_v8  ;;  %v2268_v2 = vrot.slane %v2252_v59, 1  ;;  %v2269_v28 = vrot.slane %v2253_v23, 1  ;;  %v2271_v4 = vrot.slane %v2254_v16, 1 }
 0x23f   : >> { %v2273_v15 = vrot.slane %v2255_v61, 1  ;;  %v2275_v58 = vrot.slane %v2256_v62, 1  ;;  %v2277_v18 = vrot.slane %v2257_v7, 1  ;;  %v2279_v12 = vrot.slane %v2258_v17, 1 }
 0x240   : >> { %v2270_v22 = vsel %vm1314_vm4, %v2268_v2, %v2269_v28  ;;  %v2272_v25 = vsel %vm1314_vm4, %v2269_v28, %v2271_v4  ;;  %v2281_v3 = vrot.slane %v2259_v24, 1  ;;  %v2305_v19 = vmul.f32 %v6133_v47, %v6118_v26 }
 0x241   : >> { %v2274_v27 = vsel %vm1314_vm4, %v2271_v4, %v2273_v15  ;;  %v2276_v53 = vsel %vm1314_vm4, %v2273_v15, %v2275_v58  ;;  %v2278_v34 = vsel %vm1314_vm4, %v2275_v58, %v2277_v18  ;;  %v2280_v42 = vsel %vm1314_vm4, %v2277_v18, %v2279_v12 }
 0x242   : >> { %v2282_v1 = vsel %vm1314_vm4, %v2279_v12, %v2281_v3  ;;  %v2290_v54 = vadd.f32 %v2270_v22, %v2237_v32  ;;  %v2291_v55 = vadd.f32 %v2272_v25, %v2238_v9  ;;  %v2292_v43 = vadd.f32 %v2274_v27, %v2239_v49 }
 0x243   : >> { %v2293_v37 = vadd.f32 %v2276_v53, %v2240_v13  ;;  %v2294_v38 = vadd.f32 %v2278_v34, %v2241_v10  ;;  %v2295_v36 = vadd.f32 %v2280_v42, %v2242_v39  ;;  %v2296_v44 = vadd.f32 %v2282_v1, %v2243_v11 }
 0x244   : >> { %v2306_v26 = vmul.f32 %v6133_v47, %v8815_v20  ;;  %v2307_v21 = vmul.f32 %v6133_v47, %v8820_v29  ;;  %v2308_v45 = vmul.f32 %v6133_v47, %v8823_v30  ;;  %v2309_v41 = vmul.f32 %v6133_v47, %v8826_v56 }
 0x245   : >> { %v2310_v48 = vmul.f32 %v6133_v47, %v8833_v35  ;;  %v2311_v51 = vmul.f32 %v6133_v47, %v8836_v63  ;;  %v2312_v31 = vmul.f32 %v6133_v47, %v6125_v0  ;;  %v2321_v52 = vrot.slane %v2305_v19, 1 }
 0x246   : >> { %v2322_v57 = vrot.slane %v2306_v26, 1  ;;  %v2324_v32 = vrot.slane %v2307_v21, 1  ;;  %v2326_v59 = vrot.slane %v2308_v45, 1  ;;  %v2328_v20 = vrot.slane %v2309_v41, 1 }
 0x247   : >> { %v2330_v9 = vrot.slane %v2310_v48, 1  ;;  %v2332_v29 = vrot.slane %v2311_v51, 1  ;;  %v2334_v49 = vrot.slane %v2312_v31, 1  ;;  %v2358_v30 = vmul.f32 %v6135_v6, %v8776_v33 }
 0x248   : >> { %v2323_v56 = vsel %vm1314_vm4, %v2321_v52, %v2322_v57  ;;  %v2325_v13 = vsel %vm1314_vm4, %v2322_v57, %v2324_v32  ;;  %v2327_v10 = vsel %vm1314_vm4, %v2324_v32, %v2326_v59  ;;  %v2329_v35 = vsel %vm1314_vm4, %v2326_v59, %v2328_v20 }
 0x249   : >> { %v2331_v63 = vsel %vm1314_vm4, %v2328_v20, %v2330_v9  ;;  %v2333_v39 = vsel %vm1314_vm4, %v2330_v9, %v2332_v29  ;;  %v2335_v11 = vsel %vm1314_vm4, %v2332_v29, %v2334_v49  ;;  %v2343_v23 = vadd.f32 %v2323_v56, %v2290_v54 }
 0x24a   : >> { %v2344_v16 = vadd.f32 %v2325_v13, %v2291_v55  ;;  %v2345_v61 = vadd.f32 %v2327_v10, %v2292_v43  ;;  %v2346_v62 = vadd.f32 %v2329_v35, %v2293_v37  ;;  %v2347_v33 = vadd.f32 %v2331_v63, %v2294_v38 }
 0x24b   : >> { %v2348_v7 = vadd.f32 %v2333_v39, %v2295_v36  ;;  %v2349_v17 = vadd.f32 %v2335_v11, %v2296_v44  ;;  %v2359_v47 = vmul.f32 %v6135_v6, %v8790_v46  ;;  %v2360_v24 = vmul.f32 %v6135_v6, %v8793_v50 }
 0x24c   : >> { %v2361_v2 = vmul.f32 %v6135_v6, %v8796_v14  ;;  %v2362_v28 = vmul.f32 %v6135_v6, %v8802_v40  ;;  %v2363_v4 = vmul.f32 %v6135_v6, %v8805_v60  ;;  %v2364_v15 = vmul.f32 %v6135_v6, %v8808_v5 }
 0x24d   : >> { %v2365_v58 = vmul.f32 %v6135_v6, %v8849_v8  ;;  %v2374_v18 = vrot.slane %v2358_v30, 2  ;;  %v2375_v12 = vrot.slane %v2359_v47, 2  ;;  %v2377_v22 = vrot.slane %v2360_v24, 2 }
 0x24e   : >> { %v2379_v25 = vrot.slane %v2361_v2, 2  ;;  %v2381_v3 = vrot.slane %v2362_v28, 2  ;;  %v2383_v19 = vrot.slane %v2363_v4, 2  ;;  %v2385_v46 = vrot.slane %v2364_v15, 2 }
 0x24f   : >> { %v2376_v50 = vsel %vm1421_vm5, %v2374_v18, %v2375_v12  ;;  %v2378_v14 = vsel %vm1421_vm5, %v2375_v12, %v2377_v22  ;;  %v2387_v27 = vrot.slane %v2365_v58, 2 }
 0x250   : >> { %v2380_v40 = vsel %vm1421_vm5, %v2377_v22, %v2379_v25  ;;  %v2382_v60 = vsel %vm1421_vm5, %v2379_v25, %v2381_v3  ;;  %v2384_v5 = vsel %vm1421_vm5, %v2381_v3, %v2383_v19  ;;  %v2386_v8 = vsel %vm1421_vm5, %v2383_v19, %v2385_v46  ;;  %1210 = sbr.rel (!%p1208_p8) target bundleno = 442 (0x1ba), region = 456 }
 0x251   : >> { %v2388_v53 = vsel %vm1421_vm5, %v2385_v46, %v2387_v27  ;;  %v2396_v34 = vadd.f32 %v2376_v50, %v2343_v23  ;;  %v2397_v42 = vadd.f32 %v2378_v14, %v2344_v16  ;;  %v2398_v0 = vadd.f32 %v2380_v40, %v2345_v61 }
 0x252   : >> { %v2399_v1 = vadd.f32 %v2382_v60, %v2346_v62  ;;  %v2400_v54 = vadd.f32 %v2384_v5, %v2347_v33  ;;  %v2401_v55 = vadd.f32 %v2386_v8, %v2348_v7  ;;  %v2402_v43 = vadd.f32 %v2388_v53, %v2349_v17 }
 0x253   : >> { %2405 = vst [vmem:[%s2404_s18] sm:$0xff] %v2396_v34  ;;  %2406 = vst [vmem:[%s2404_s18 + $0x8] sm:$0xff] %v2397_v42 }
 0x254   : >> { %2407 = vst [vmem:[%s2404_s18 + $0x10] sm:$0xff] %v2398_v0  ;;  %2408 = vst [vmem:[%s2404_s18 + $0x18] sm:$0xff] %v2399_v1 }
 0x255   : >> { %2409 = vst [vmem:[%s2404_s18 + $0x20] sm:$0xff] %v2400_v54  ;;  %2410 = vst [vmem:[%s2404_s18 + $0x28] sm:$0xff] %v2401_v55 }
 0x256   : >> { %2411 = vst [vmem:[%s2404_s18 + $0x30] sm:$0xff] %v2402_v43 }
 0x257 LB: >> { %v2449_v37 = vld [vmem:[%s10262_s4] sm:$0xff]  ;;  %v2450_v38 = vld [vmem:[%s10262_s4 + $0x8] sm:$0xff]  ;;  %v2451_v36 = vld [vmem:[%s10262_s4 + $0x10] sm:$0xff]  ;;  %s6137_s19 = smul.u32 224, %s7703_s0  ;;  %v7751_v57 = vmov 0.0   ;;  %s7703_s0 = sphi %s8904_s0, %s2417_s0  }
 0x258   : >> { %v7217_v44 = vpack.c.bf16 %v2450_v38, %v2449_v37  ;;  %v2452_v26 = vld [vmem:[%s10262_s4 + $0x18] sm:$0xff]  ;;  %v2453_v45 = vld [vmem:[%s10262_s4 + $0x20] sm:$0xff]  ;;  %v2454_v41 = vld [vmem:[%s10262_s4 + $0x28] sm:$0xff]  ;;  %s6140_s20 = smul.u32 288, %s7703_s0  ;;  %s2417_s0 = sadd.s32 1, %s7703_s0  }
 0x259   : >> { %v7221_v21 = vpack.c.bf16 %v2452_v26, %v2451_v36  ;;  %v7225_v6 = vpack.c.bf16 %v2454_v41, %v2453_v45  ;;  %s8929_s28 = scalar_lea.vmem [#allocation3], %s6137_s19  ;;  %v2455_v31 = vld [vmem:[%s10262_s4 + $0x30] sm:$0xff]  ;;  %v2456_v52 = vld [vmem:[%s10262_s4 + $0x38] sm:$0xff]  ;;  %v2457_v59 = vld [vmem:[%s10262_s4 + $0x40] sm:$0xff]  ;;  %p2414_p4 = scmp.ge.s32.totalorder %s2417_s0, 14  }
 0x25a   : >> { %7218 = vmatprep.subr.bf16.mxu0 %v7217_v44  ;;  %7355 = vmatprep.subr.bf16.mxu1 %v7217_v44  ;;  %s8939_s26 = scalar_lea.vmem [#allocation4], %s6140_s20  ;;  %v7229_v32 = vpack.c.bf16 %v2456_v52, %v2455_v31  ;;  %v2458_v20 = vld [vmem:[%s10262_s4 + $0x48] sm:$0xff]  ;;  %v2459_v29 = vld [vmem:[%s10262_s4 + $0x50] sm:$0xff]  ;;  %v2460_v49 = vld [vmem:[%s10262_s4 + $0x58] sm:$0xff] }
 0x25b   : >> { %7220 = vmatpush3.bf16.msra.mxu0 %v7217_v44  ;;  %7363 = vmatpush3.bf16.msra.mxu1 %v7217_v44  ;;  %6141 = vst [vmem:[%s8939_s26 + $0x48] sm:$0xff] %v7751_v57  ;;  %6149 = vst [vmem:[%s8939_s26 + $0x88] sm:$0xff] %v7751_v57  ;;  %v7233_v9 = vpack.c.bf16 %v2458_v20, %v2457_v59  ;;  %v7237_v30 = vpack.c.bf16 %v2460_v49, %v2459_v29  ;;  %v2461_v56 = vld [vmem:[%s10262_s4 + $0x60] sm:$0xff]  ;;  %v2462_v13 = vld [vmem:[%s10262_s4 + $0x68] sm:$0xff] }
 0x25c   : >> { %7222 = vmatprep.subr.bf16.mxu0 %v7221_v21  ;;  %7356 = vmatprep.subr.bf16.mxu1 %v7221_v21  ;;  %6150 = vst [vmem:[%s8939_s26 + $0x90] sm:$0xff] %v7751_v57  ;;  %6158 = vst [vmem:[%s8939_s26 + $0xd0] sm:$0xff] %v7751_v57  ;;  %v7241_v10 = vpack.c.bf16 %v2462_v13, %v2461_v56  ;;  %v2463_v35 = vld [vmem:[%s10262_s4 + $0x70] sm:$0xff]  ;;  %v2464_v63 = vld [vmem:[%s10262_s4 + $0x78] sm:$0xff] }
 0x25d   : >> { %v2421_v48 = vld [vmem:[%s8929_s28] sm:$0xff]  ;;  %v2435_v51 = vld [vmem:[%s8929_s28 + $0x70] sm:$0xff]  ;;  %6159 = vst [vmem:[%s8939_s26 + $0xd8] sm:$0xff] %v7751_v57  ;;  %6167 = vst [vmem:[%s8939_s26 + $0x118] sm:$0xff] %v7751_v57  ;;  %v7245_v39 = vpack.c.bf16 %v2464_v63, %v2463_v35 }
 0x25e   : >> { %6931 = vmatprep.mubr.f32.mxu0 %v2421_v48  ;;  %6168 = vst [vmem:[%s8939_s26 + $0x120] sm:$0xff] %v7751_v57  ;;  %6176 = vst [vmem:[%s8939_s26 + $0x160] sm:$0xff] %v7751_v57  ;;  %6952 = vmatprep.mubr.f32.mxu1 %v2435_v51  ;;  %v2422_v11 = vld [vmem:[%s8929_s28 + $0x8] sm:$0xff]  ;;  %v2436_v23 = vld [vmem:[%s8929_s28 + $0x78] sm:$0xff] }
 0x25f   : >> { %7224 = vmatpush3.bf16.msra.mxu0 %v7221_v21  ;;  %7364 = vmatpush3.bf16.msra.mxu1 %v7221_v21  ;;  %v2423_v16 = vld [vmem:[%s8929_s28 + $0x10] sm:$0xff]  ;;  %v2437_v61 = vld [vmem:[%s8929_s28 + $0x80] sm:$0xff]  ;;  %v2424_v62 = vld [vmem:[%s8929_s28 + $0x18] sm:$0xff] }
 0x260   : >> { %7226 = vmatprep.subr.bf16.mxu0 %v7225_v6  ;;  %7357 = vmatprep.subr.bf16.mxu1 %v7225_v6  ;;  %v2438_v33 = vld [vmem:[%s8929_s28 + $0x88] sm:$0xff]  ;;  %v2425_v7 = vld [vmem:[%s8929_s28 + $0x20] sm:$0xff]  ;;  %v2439_v17 = vld [vmem:[%s8929_s28 + $0x90] sm:$0xff] }
 0x261   : >> { %v2426_v47 = vld [vmem:[%s8929_s28 + $0x28] sm:$0xff]  ;;  %v2440_v24 = vld [vmem:[%s8929_s28 + $0x98] sm:$0xff]  ;;  %v2427_v2 = vld [vmem:[%s8929_s28 + $0x30] sm:$0xff] }
 0x262   : >> { %v2441_v28 = vld [vmem:[%s8929_s28 + $0xa0] sm:$0xff]  ;;  %v2428_v4 = vld [vmem:[%s8929_s28 + $0x38] sm:$0xff]  ;;  %v2442_v15 = vld [vmem:[%s8929_s28 + $0xa8] sm:$0xff] }
 0x263   : >> { %7228 = vmatpush3.bf16.msra.mxu0 %v7225_v6  ;;  %7365 = vmatpush3.bf16.msra.mxu1 %v7225_v6  ;;  %v2429_v58 = vld [vmem:[%s8929_s28 + $0x40] sm:$0xff]  ;;  %v2443_v18 = vld [vmem:[%s8929_s28 + $0xb0] sm:$0xff]  ;;  %v2430_v12 = vld [vmem:[%s8929_s28 + $0x48] sm:$0xff] }
 0x264   : >> { %7230 = vmatprep.subr.bf16.mxu0 %v7229_v32  ;;  %7358 = vmatprep.subr.bf16.mxu1 %v7229_v32  ;;  %v2444_v22 = vld [vmem:[%s8929_s28 + $0xb8] sm:$0xff]  ;;  %v2431_v25 = vld [vmem:[%s8929_s28 + $0x50] sm:$0xff]  ;;  %v2445_v3 = vld [vmem:[%s8929_s28 + $0xc0] sm:$0xff] }
 0x265   : >> { %v2432_v19 = vld [vmem:[%s8929_s28 + $0x58] sm:$0xff]  ;;  %v2446_v46 = vld [vmem:[%s8929_s28 + $0xc8] sm:$0xff]  ;;  %v2433_v50 = vld [vmem:[%s8929_s28 + $0x60] sm:$0xff] }
 0x266   : >> { %v2447_v14 = vld [vmem:[%s8929_s28 + $0xd0] sm:$0xff]  ;;  %v2434_v27 = vld [vmem:[%s8929_s28 + $0x68] sm:$0xff]  ;;  %v2448_v40 = vld [vmem:[%s8929_s28 + $0xd8] sm:$0xff]  ;;  %s9063_s28 = smov (%p2414_p4), 0  }
 0x267   : >> { %7232 = vmatpush3.bf16.msra.mxu0 %v7229_v32  ;;  %7366 = vmatpush3.bf16.msra.mxu1 %v7229_v32  ;;  %v9002_v60 = vld [vmem:[%s10263_s5] ss:$0 sm:$0xff] }
 0x268   : >> { %7234 = vmatprep.subr.bf16.mxu0 %v7233_v9  ;;  %7359 = vmatprep.subr.bf16.mxu1 %v7233_v9 }
 0x26b   : >> { %7236 = vmatpush3.bf16.msra.mxu0 %v7233_v9  ;;  %7367 = vmatpush3.bf16.msra.mxu1 %v7233_v9 }
 0x26c   : >> { %7238 = vmatprep.subr.bf16.mxu0 %v7237_v30  ;;  %7360 = vmatprep.subr.bf16.mxu1 %v7237_v30 }
 0x26f   : >> { %7240 = vmatpush3.bf16.msra.mxu0 %v7237_v30  ;;  %7368 = vmatpush3.bf16.msra.mxu1 %v7237_v30 }
 0x270   : >> { %7242 = vmatprep.subr.bf16.mxu0 %v7241_v10  ;;  %7361 = vmatprep.subr.bf16.mxu1 %v7241_v10 }
 0x273   : >> { %7244 = vmatpush3.bf16.msra.mxu0 %v7241_v10  ;;  %7369 = vmatpush3.bf16.msra.mxu1 %v7241_v10 }
 0x274   : >> { %7246 = vmatprep.subr.bf16.mxu0 %v7245_v39  ;;  %7362 = vmatprep.subr.bf16.mxu1 %v7245_v39 }
 0x277   : >> { %7248 = vmatpush3.bf16.msra.mxu0 %v7245_v39  ;;  %7370 = vmatpush3.bf16.msra.mxu1 %v7245_v39 }
 0x27a   : >> { %6932 = vmatmul.mubr.f32.vlgmr.msra.gmra.mrb[0].mxu0 %v2422_v11  ;;  %6953 = vmatmul.mubr.f32.vlgmr.msra.gmra.mrb[0].mxu1 %v2436_v23 }
 0x27b   : >> { %6934 = vmatprep.mubr.f32.mxu0 %v2423_v16  ;;  %6955 = vmatprep.mubr.f32.mxu1 %v2437_v61 }
 0x27e   : >> { %6935 = vmatmul.mubr.f32.gmra.mrb[2].mxu0 %v2424_v62  ;;  %6956 = vmatmul.mubr.f32.gmra.mrb[2].mxu1 %v2438_v33 }
 0x27f   : >> { %6937 = vmatprep.mubr.f32.mxu0 %v2425_v7  ;;  %6958 = vmatprep.mubr.f32.mxu1 %v2439_v17 }
 0x282   : >> { %6938 = vmatmul.mubr.f32.gmra.mrb[4].mxu0 %v2426_v47  ;;  %6959 = vmatmul.mubr.f32.gmra.mrb[4].mxu1 %v2440_v24 }
 0x283   : >> { %6940 = vmatprep.mubr.f32.mxu0 %v2427_v2  ;;  %6961 = vmatprep.mubr.f32.mxu1 %v2441_v28 }
 0x286   : >> { %6941 = vmatmul.mubr.f32.gmra.mrb[6].mxu0 %v2428_v4  ;;  %6962 = vmatmul.mubr.f32.gmra.mrb[6].mxu1 %v2442_v15 }
 0x287   : >> { %6943 = vmatprep.mubr.f32.mxu0 %v2429_v58  ;;  %6964 = vmatprep.mubr.f32.mxu1 %v2443_v18 }
 0x28a   : >> { %6944 = vmatmul.mubr.f32.gmra.mrb[8].mxu0 %v2430_v12  ;;  %6965 = vmatmul.mubr.f32.gmra.mrb[8].mxu1 %v2444_v22 }
 0x28b   : >> { %6946 = vmatprep.mubr.f32.mxu0 %v2431_v25  ;;  %6967 = vmatprep.mubr.f32.mxu1 %v2445_v3 }
 0x28e   : >> { %6947 = vmatmul.mubr.f32.gmra.mrb[10].mxu0 %v2432_v19  ;;  %6968 = vmatmul.mubr.f32.gmra.mrb[10].mxu1 %v2446_v46 }
 0x28f   : >> { %6949 = vmatprep.mubr.f32.mxu0 %v2433_v50  ;;  %6970 = vmatprep.mubr.f32.mxu1 %v2447_v14 }
 0x292   : >> { %6950 = vmatmul.mubr.f32.gmra.mrb[12].mxu0 %v2434_v27  ;;  %6971 = vmatmul.mubr.f32.gmra.mrb[12].mxu1 %v2448_v40 }
 0x34d   : >> { %v6933_v5 = vpop.f32.mrb[0].mxu0  ;;  %v6954_v8 = vpop.f32.mrb[0].mxu1 }
 0x34e   : >> { %v2544_v53 = vadd.f32 %v6933_v5, %v9002_v60  ;;  %v2614_v34 = vadd.f32 %v6954_v8, %v9002_v60  ;;  %v2538_v42 = vpop.f32.mrb[1].mxu0  ;;  %v2608_v0 = vpop.f32.mrb[1].mxu1 }
 0x34f   : >> { %v2539_v1 = vadd.f32 %v9002_v60, %v2538_v42  ;;  %v2609_v54 = vadd.f32 %v9002_v60, %v2608_v0 }
 0x350   : >> { %v2678_v55 = vmax.f32 %v2544_v53, 0.0  ;;  %v2692_v43 = vmax.f32 %v2614_v34, 0.0 }
 0x351   : >> { %v2677_v37 = vmax.f32 %v2539_v1, 0.0  ;;  %v2691_v38 = vmax.f32 %v2609_v54, 0.0  ;;  %v6936_v36 = vpop.f32.mrb[2].mxu0  ;;  %v6957_v44 = vpop.f32.mrb[2].mxu1 }
 0x352   : >> { %6143 = vst [vmem:[%s8939_s26 + $0x58] sm:$0xff] %v2678_v55  ;;  %6161 = vst [vmem:[%s8939_s26 + $0xe8] sm:$0xff] %v2692_v43  ;;  %v2554_v26 = vadd.f32 %v6936_v36, %v9002_v60  ;;  %v2624_v21 = vadd.f32 %v6957_v44, %v9002_v60  ;;  %v2548_v45 = vpop.f32.mrb[3].mxu0  ;;  %v2618_v41 = vpop.f32.mrb[3].mxu1 }
 0x353   : >> { %6142 = vst [vmem:[%s8939_s26 + $0x50] sm:$0xff] %v2677_v37  ;;  %6160 = vst [vmem:[%s8939_s26 + $0xe0] sm:$0xff] %v2691_v38  ;;  %v2549_v6 = vadd.f32 %v9002_v60, %v2548_v45  ;;  %v2619_v48 = vadd.f32 %v9002_v60, %v2618_v41 }
 0x354   : >> { %v2680_v51 = vmax.f32 %v2554_v26, 0.0  ;;  %v2694_v31 = vmax.f32 %v2624_v21, 0.0 }
 0x355   : >> { %v2679_v52 = vmax.f32 %v2549_v6, 0.0  ;;  %v2693_v57 = vmax.f32 %v2619_v48, 0.0  ;;  %v6939_v32 = vpop.f32.mrb[4].mxu0  ;;  %v6960_v59 = vpop.f32.mrb[4].mxu1 }
 0x356   : >> { %6145 = vst [vmem:[%s8939_s26 + $0x68] sm:$0xff] %v2680_v51  ;;  %6163 = vst [vmem:[%s8939_s26 + $0xf8] sm:$0xff] %v2694_v31  ;;  %v2564_v20 = vadd.f32 %v6939_v32, %v9002_v60  ;;  %v2634_v9 = vadd.f32 %v6960_v59, %v9002_v60  ;;  %v2558_v29 = vpop.f32.mrb[5].mxu0  ;;  %v2628_v49 = vpop.f32.mrb[5].mxu1 }
 0x357   : >> { %6144 = vst [vmem:[%s8939_s26 + $0x60] sm:$0xff] %v2679_v52  ;;  %6162 = vst [vmem:[%s8939_s26 + $0xf0] sm:$0xff] %v2693_v57  ;;  %v2559_v30 = vadd.f32 %v9002_v60, %v2558_v29  ;;  %v2629_v56 = vadd.f32 %v9002_v60, %v2628_v49 }
 0x358   : >> { %v2682_v13 = vmax.f32 %v2564_v20, 0.0  ;;  %v2696_v10 = vmax.f32 %v2634_v9, 0.0 }
 0x359   : >> { %v2681_v35 = vmax.f32 %v2559_v30, 0.0  ;;  %v2695_v63 = vmax.f32 %v2629_v56, 0.0  ;;  %v6942_v39 = vpop.f32.mrb[6].mxu0  ;;  %v6963_v11 = vpop.f32.mrb[6].mxu1 }
 0x35a   : >> { %6147 = vst [vmem:[%s8939_s26 + $0x78] sm:$0xff] %v2682_v13  ;;  %6165 = vst [vmem:[%s8939_s26 + $0x108] sm:$0xff] %v2696_v10  ;;  %v2574_v23 = vadd.f32 %v6942_v39, %v9002_v60  ;;  %v2644_v16 = vadd.f32 %v6963_v11, %v9002_v60  ;;  %v2568_v61 = vpop.f32.mrb[7].mxu0  ;;  %v2638_v62 = vpop.f32.mrb[7].mxu1 }
 0x35b   : >> { %6146 = vst [vmem:[%s8939_s26 + $0x70] sm:$0xff] %v2681_v35  ;;  %6164 = vst [vmem:[%s8939_s26 + $0x100] sm:$0xff] %v2695_v63  ;;  %v2569_v33 = vadd.f32 %v9002_v60, %v2568_v61  ;;  %v2639_v7 = vadd.f32 %v9002_v60, %v2638_v62 }
 0x35c   : >> { %v2684_v17 = vmax.f32 %v2574_v23, 0.0  ;;  %v2698_v47 = vmax.f32 %v2644_v16, 0.0 }
 0x35d   : >> { %v2683_v24 = vmax.f32 %v2569_v33, 0.0  ;;  %v2697_v2 = vmax.f32 %v2639_v7, 0.0  ;;  %v6945_v28 = vpop.f32.mrb[8].mxu0  ;;  %v6966_v4 = vpop.f32.mrb[8].mxu1 }
 0x35e   : >> { %6151 = vst [vmem:[%s8939_s26 + $0x98] sm:$0xff] %v2684_v17  ;;  %6169 = vst [vmem:[%s8939_s26 + $0x128] sm:$0xff] %v2698_v47  ;;  %v2584_v15 = vadd.f32 %v6945_v28, %v9002_v60  ;;  %v2654_v58 = vadd.f32 %v6966_v4, %v9002_v60  ;;  %v2578_v18 = vpop.f32.mrb[9].mxu0  ;;  %v2648_v12 = vpop.f32.mrb[9].mxu1 }
 0x35f   : >> { %6148 = vst [vmem:[%s8939_s26 + $0x80] sm:$0xff] %v2683_v24  ;;  %6166 = vst [vmem:[%s8939_s26 + $0x110] sm:$0xff] %v2697_v2  ;;  %v2579_v22 = vadd.f32 %v9002_v60, %v2578_v18  ;;  %v2649_v25 = vadd.f32 %v9002_v60, %v2648_v12 }
 0x360   : >> { %v2686_v3 = vmax.f32 %v2584_v15, 0.0  ;;  %v2700_v19 = vmax.f32 %v2654_v58, 0.0 }
 0x361   : >> { %v2685_v46 = vmax.f32 %v2579_v22, 0.0  ;;  %v2699_v50 = vmax.f32 %v2649_v25, 0.0  ;;  %v6948_v14 = vpop.f32.mrb[10].mxu0  ;;  %v6969_v27 = vpop.f32.mrb[10].mxu1 }
 0x362   : >> { %6153 = vst [vmem:[%s8939_s26 + $0xa8] sm:$0xff] %v2686_v3  ;;  %6171 = vst [vmem:[%s8939_s26 + $0x138] sm:$0xff] %v2700_v19  ;;  %v2594_v40 = vadd.f32 %v6948_v14, %v9002_v60  ;;  %v2664_v5 = vadd.f32 %v6969_v27, %v9002_v60  ;;  %v2588_v8 = vpop.f32.mrb[11].mxu0  ;;  %v2658_v53 = vpop.f32.mrb[11].mxu1 }
 0x363   : >> { %6152 = vst [vmem:[%s8939_s26 + $0xa0] sm:$0xff] %v2685_v46  ;;  %6170 = vst [vmem:[%s8939_s26 + $0x130] sm:$0xff] %v2699_v50  ;;  %v2589_v34 = vadd.f32 %v9002_v60, %v2588_v8  ;;  %v2659_v42 = vadd.f32 %v9002_v60, %v2658_v53 }
 0x364   : >> { %v2688_v0 = vmax.f32 %v2594_v40, 0.0  ;;  %v2702_v1 = vmax.f32 %v2664_v5, 0.0 }
 0x365   : >> { %v2687_v54 = vmax.f32 %v2589_v34, 0.0  ;;  %v2701_v55 = vmax.f32 %v2659_v42, 0.0  ;;  %v6951_v43 = vpop.f32.mrb[12].mxu0  ;;  %v6972_v37 = vpop.f32.mrb[12].mxu1  ;;  %2416 = sbr.rel (!%p2414_p4) target bundleno = 599 (0x257), region = 467 }
 0x366   : >> { %6155 = vst [vmem:[%s8939_s26 + $0xb8] sm:$0xff] %v2688_v0  ;;  %6173 = vst [vmem:[%s8939_s26 + $0x148] sm:$0xff] %v2702_v1  ;;  %v2604_v38 = vadd.f32 %v6951_v43, %v9002_v60  ;;  %v2674_v36 = vadd.f32 %v6972_v37, %v9002_v60  ;;  %v2598_v44 = vpop.f32.mrb[13].mxu0  ;;  %v2668_v26 = vpop.f32.mrb[13].mxu1 }
 0x367   : >> { %6154 = vst [vmem:[%s8939_s26 + $0xb0] sm:$0xff] %v2687_v54  ;;  %6172 = vst [vmem:[%s8939_s26 + $0x140] sm:$0xff] %v2701_v55  ;;  %v2599_v21 = vadd.f32 %v9002_v60, %v2598_v44  ;;  %v2669_v45 = vadd.f32 %v9002_v60, %v2668_v26 }
 0x368   : >> { %v2690_v41 = vmax.f32 %v2604_v38, 0.0  ;;  %v2704_v6 = vmax.f32 %v2674_v36, 0.0 }
 0x369   : >> { %v2689_v48 = vmax.f32 %v2599_v21, 0.0  ;;  %v2703_v51 = vmax.f32 %v2669_v45, 0.0 }
 0x36a   : >> { %6157 = vst [vmem:[%s8939_s26 + $0xc8] sm:$0xff] %v2690_v41  ;;  %6175 = vst [vmem:[%s8939_s26 + $0x158] sm:$0xff] %v2704_v6 }
 0x36b   : >> { %6156 = vst [vmem:[%s8939_s26 + $0xc0] sm:$0xff] %v2689_v48  ;;  %6174 = vst [vmem:[%s8939_s26 + $0x150] sm:$0xff] %v2703_v51 }
 0x36c LB: >> { %s6178_s24 = smul.u32 144, %s7707_s28  ;;  %v6187_v60 = vld [vmem:[%s10264_s6] ss:$0 sm:$0xff]  ;;  %v6191_v31 = vld [vmem:[%s10264_s6 + $0x2] ss:$0 sm:$0xff]  ;;  %s6276_s0 = sshll.u32 %s7707_s28, 5  ;;  %s7707_s28 = sphi %s9063_s28, %s2749_s28  }
 0x36d   : >> { %v6189_v52 = vld [vmem:[%s10264_s6 + $0x1] ss:$0 sm:$0xff]  ;;  %v6193_v23 = vld [vmem:[%s10264_s6 + $0x3] ss:$0 sm:$0xff]  ;;  %v6195_v3 = vld [vmem:[%s10264_s6 + $0x4] ss:$0 sm:$0xff] }
 0x36e   : >> { %s9078_s18 = scalar_lea.vmem [#allocation4], %s6178_s24  ;;  %v6207_v40 = vld [vmem:[%s10264_s6 + $0x5] ss:$0 sm:$0xff]  ;;  %s3472_s19 = scalar_lea.vmem [#allocation5], %s6276_s0 }
 0x36f   : >> { %s2749_s28 = sadd.s32 1, %s7707_s28  }
 0x370   : >> { %p2746_p5 = scmp.ge.s32.totalorder %s2749_s28, 28  }
 0x371   : > { %s9315_s20 = smov (%p2746_p5), 0  }
 0x372   : >> { %v6179_v57 = vld [vmem:[%s9078_s18 + $0x7] ss:$2 sm:$0xff]  ;;  %v6180_v32 = vld [vmem:[%s9078_s18 + $0x17] ss:$2 sm:$0xff]  ;;  %v6183_v9 = vld [vmem:[%s9078_s18 + $0x8] ss:$2 sm:$0xff] }
 0x373   : >> { %v6181_v59 = vld [vmem:[%s9078_s18 + $0x27] ss:$2 sm:$0xff]  ;;  %v6182_v20 = vld [vmem:[%s9078_s18 + $0x37] ss:$2 sm:$0x3f]  ;;  %v2776_v29 = vmul.f32 %v6187_v60, %v6179_v57  ;;  %v2777_v49 = vmul.f32 %v6187_v60, %v6180_v32  ;;  %v2808_v56 = vmul.f32 %v6191_v31, %v6179_v57  ;;  %v2792_v63 = vmul.f32 %v6189_v52, %v6183_v9 }
 0x374   : >> { %v2778_v30 = vmul.f32 %v6187_v60, %v6181_v59  ;;  %v6184_v13 = vld [vmem:[%s9078_s18 + $0x18] ss:$2 sm:$0xff]  ;;  %v6185_v10 = vld [vmem:[%s9078_s18 + $0x28] ss:$2 sm:$0xff]  ;;  %v2779_v35 = vmul.f32 %v6187_v60, %v6182_v20  ;;  %v2809_v39 = vmul.f32 %v6191_v31, %v6180_v32  ;;  %v2810_v11 = vmul.f32 %v6191_v31, %v6181_v59  ;;  %v9098_v27 = vld [vmem:[%s9078_s18 + $0x4f] ss:$2 sm:$0xff] }
 0x375   : >> { %v6186_v16 = vld [vmem:[%s9078_s18 + $0x38] ss:$2 sm:$0x1f]  ;;  %v2793_v61 = vmul.f32 %v6189_v52, %v6184_v13  ;;  %v2794_v62 = vmul.f32 %v6189_v52, %v6185_v10  ;;  %v2811_v33 = vmul.f32 %v6191_v31, %v6182_v20  ;;  %v2817_v7 = vrot.slane %v2808_v56, 1  ;;  %v9104_v38 = vld [vmem:[%s9078_s18 + $0x5f] ss:$2 sm:$0xff] }
 0x376   : >> { %v2795_v17 = vmul.f32 %v6189_v52, %v6186_v16  ;;  %v2796_v47 = vadd.f32 %v2792_v63, %v2776_v29  ;;  %v2818_v24 = vrot.slane %v2809_v39, 1  ;;  %v2820_v2 = vrot.slane %v2810_v11, 1  ;;  %v9107_v36 = vld [vmem:[%s9078_s18 + $0x6f] ss:$2 sm:$0xff]  ;;  %v6202_v52 = vld [vmem:[%s9078_s18 + $0x50] ss:$2 sm:$0xff] }
 0x377   : >> { %v2797_v28 = vadd.f32 %v2793_v61, %v2777_v49  ;;  %v2798_v4 = vadd.f32 %v2794_v62, %v2778_v30  ;;  %v2822_v15 = vrot.slane %v2811_v33, 1  ;;  %v2840_v58 = vmul.f32 %v6193_v23, %v6183_v9  ;;  %v9113_v6 = vld [vmem:[%s9078_s18 + $0x7f] ss:$2 sm:$0x3f]  ;;  %v6203_v29 = vld [vmem:[%s9078_s18 + $0x60] ss:$2 sm:$0xff] }
 0x378   : >> { %v2799_v18 = vadd.f32 %v2795_v17, %v2779_v35  ;;  %v2819_v12 = vsel %vm1314_vm4, %v2817_v7, %v2818_v24  ;;  %v2821_v22 = vsel %vm1314_vm4, %v2818_v24, %v2820_v2  ;;  %v2841_v25 = vmul.f32 %v6193_v23, %v6184_v13  ;;  %v6211_v49 = vld [vmem:[%s10264_s6 + $0x7] ss:$0 sm:$0xff]  ;;  %v6204_v56 = vld [vmem:[%s9078_s18 + $0x70] ss:$2 sm:$0xff] }
 0x379   : >> { %v2823_v19 = vsel %vm1314_vm4, %v2820_v2, %v2822_v15  ;;  %v2828_v46 = vadd.f32 %v2819_v12, %v2796_v47  ;;  %v2829_v50 = vadd.f32 %v2821_v22, %v2797_v28  ;;  %v2842_v14 = vmul.f32 %v6193_v23, %v6185_v10  ;;  %v6205_v13 = vld [vmem:[%s9078_s18 + $0x80] ss:$2 sm:$0x1f] }
 0x37a   : >> { %v2830_v5 = vadd.f32 %v2823_v19, %v2798_v4  ;;  %v2831_v8 = vadd.f32 %v2822_v15, %v2799_v18  ;;  %v2843_v53 = vmul.f32 %v6193_v23, %v6186_v16  ;;  %v2848_v34 = vrot.slane %v2840_v58, 1  ;;  %v6213_v28 = vld [vmem:[%s10264_s6 + $0x8] ss:$0 sm:$0xff]  ;;  %v6215_v19 = vld [vmem:[%s10264_s6 + $0x9] ss:$0 sm:$0xff] }
 0x37b   : >> { %v2849_v42 = vrot.slane %v2841_v25, 1  ;;  %v2851_v0 = vrot.slane %v2842_v14, 1  ;;  %v2871_v1 = vmul.f32 %v6195_v3, %v6179_v57  ;;  %v2872_v54 = vmul.f32 %v6195_v3, %v6180_v32  ;;  %v6209_v57 = vld [vmem:[%s10264_s6 + $0x6] ss:$0 sm:$0xff] }
 0x37c   : >> { %v2853_v55 = vrot.slane %v2843_v53, 1  ;;  %v2873_v43 = vmul.f32 %v6195_v3, %v6181_v59  ;;  %v2874_v37 = vmul.f32 %v6195_v3, %v6182_v20  ;;  %v2922_v44 = vmul.f32 %v6207_v40, %v9098_v27 }
 0x37d   : >> { %v2850_v26 = vsel %vm1314_vm4, %v2848_v34, %v2849_v42  ;;  %v2852_v21 = vsel %vm1314_vm4, %v2849_v42, %v2851_v0  ;;  %v2880_v45 = vrot.slane %v2871_v1, 2  ;;  %v2881_v41 = vrot.slane %v2872_v54, 2 }
 0x37e   : >> { %v2854_v48 = vsel %vm1314_vm4, %v2851_v0, %v2853_v55  ;;  %v2859_v51 = vadd.f32 %v2850_v26, %v2828_v46  ;;  %v2860_v60 = vadd.f32 %v2852_v21, %v2829_v50  ;;  %v2862_v31 = vadd.f32 %v2853_v55, %v2831_v8  ;;  %v9147_v26 = vld [vmem:[%s9078_s18 + $0x97] ss:$2 sm:$0xff]  ;;  %v6227_v21 = vld [vmem:[%s10264_s6 + $0xa] ss:$0 sm:$0xff] }
 0x37f   : >> { %v2861_v32 = vadd.f32 %v2854_v48, %v2830_v5  ;;  %v2882_v59 = vsel %vm1421_vm5, %v2880_v45, %v2881_v41  ;;  %v2883_v20 = vrot.slane %v2873_v43, 2  ;;  %v2885_v9 = vrot.slane %v2874_v37, 2 }
 0x380   : >> { %v2891_v30 = vadd.f32 %v2882_v59, %v2859_v51  ;;  %v2923_v10 = vmul.f32 %v6207_v40, %v9104_v38  ;;  %v2924_v35 = vmul.f32 %v6207_v40, %v9107_v36  ;;  %v2925_v63 = vmul.f32 %v6207_v40, %v9113_v6  ;;  %v6229_v51 = vld [vmem:[%s10264_s6 + $0xb] ss:$0 sm:$0xff]  ;;  %v9162_v59 = vld [vmem:[%s9078_s18 + $0xb7] ss:$2 sm:$0xff] }
 0x381   : >> { %v2884_v39 = vsel %vm1421_vm5, %v2881_v41, %v2883_v20  ;;  %v2886_v11 = vsel %vm1421_vm5, %v2883_v20, %v2885_v9  ;;  %v2894_v23 = vadd.f32 %v2885_v9, %v2862_v31  ;;  %v2938_v16 = vmul.f32 %v6209_v57, %v6202_v52 }
 0x382   : >> { %v2892_v61 = vadd.f32 %v2884_v39, %v2860_v60  ;;  %v2893_v62 = vadd.f32 %v2886_v11, %v2861_v32  ;;  %v2926_v33 = vadd.f32 %v2922_v44, %v2891_v30  ;;  %v2939_v7 = vmul.f32 %v6209_v57, %v6203_v29  ;;  %v9159_v32 = vld [vmem:[%s9078_s18 + $0xa7] ss:$2 sm:$0xff]  ;;  %v6222_v30 = vld [vmem:[%s9078_s18 + $0x98] ss:$2 sm:$0xff] }
 0x383   : >> { %v2929_v17 = vadd.f32 %v2925_v63, %v2894_v23  ;;  %v2940_v47 = vmul.f32 %v6209_v57, %v6204_v56  ;;  %v2941_v24 = vmul.f32 %v6209_v57, %v6205_v13  ;;  %v2954_v2 = vmul.f32 %v6211_v49, %v9098_v27  ;;  %v6223_v23 = vld [vmem:[%s9078_s18 + $0xa8] ss:$2 sm:$0xff] }
 0x384   : >> { %v2927_v4 = vadd.f32 %v2923_v10, %v2892_v61  ;;  %v2928_v15 = vadd.f32 %v2924_v35, %v2893_v62  ;;  %v2942_v58 = vadd.f32 %v2938_v16, %v2926_v33  ;;  %v2955_v18 = vmul.f32 %v6211_v49, %v9104_v38  ;;  %v6231_v10 = vld [vmem:[%s10264_s6 + $0xc] ss:$0 sm:$0xff]  ;;  %v6224_v16 = vld [vmem:[%s9078_s18 + $0xb8] ss:$2 sm:$0xff] }
 0x385   : >> { %v2945_v12 = vadd.f32 %v2941_v24, %v2929_v17  ;;  %v2956_v22 = vmul.f32 %v6211_v49, %v9107_v36  ;;  %v2957_v25 = vmul.f32 %v6211_v49, %v9113_v6  ;;  %v2962_v3 = vrot.slane %v2954_v2, 1  ;;  %v9167_v49 = vld [vmem:[%s9078_s18 + $0xc7] ss:$2 sm:$0x3f] }
 0x386   : >> { %v2943_v46 = vadd.f32 %v2939_v7, %v2927_v4  ;;  %v2944_v50 = vadd.f32 %v2940_v47, %v2928_v15  ;;  %v2963_v14 = vrot.slane %v2955_v18, 1  ;;  %v2985_v40 = vmul.f32 %v6213_v28, %v6202_v52  ;;  %v6225_v61 = vld [vmem:[%s9078_s18 + $0xc8] ss:$2 sm:$0x1f] }
 0x387   : >> { %v2965_v5 = vrot.slane %v2956_v22, 1  ;;  %v2967_v8 = vrot.slane %v2957_v25, 1  ;;  %v2986_v53 = vmul.f32 %v6213_v28, %v6203_v29  ;;  %v2987_v34 = vmul.f32 %v6213_v28, %v6204_v56 }
 0x388   : >> { %v2964_v42 = vsel %vm1314_vm4, %v2962_v3, %v2963_v14  ;;  %v2988_v0 = vmul.f32 %v6213_v28, %v6205_v13  ;;  %v2993_v1 = vrot.slane %v2985_v40, 1  ;;  %v3016_v54 = vmul.f32 %v6215_v19, %v9098_v27  ;;  %v6233_v40 = vld [vmem:[%s10264_s6 + $0xd] ss:$0 sm:$0xff] }
 0x389   : >> { %v2966_v55 = vsel %vm1314_vm4, %v2963_v14, %v2965_v5  ;;  %v2968_v43 = vsel %vm1314_vm4, %v2965_v5, %v2967_v8  ;;  %v2973_v37 = vadd.f32 %v2964_v42, %v2942_v58  ;;  %v2976_v44 = vadd.f32 %v2967_v8, %v2945_v12  ;;  %v6235_v42 = vld [vmem:[%s10264_s6 + $0xe] ss:$0 sm:$0xff] }
 0x38a   : >> { %v2974_v45 = vadd.f32 %v2966_v55, %v2943_v46  ;;  %v2975_v41 = vadd.f32 %v2968_v43, %v2944_v50  ;;  %v2994_v48 = vrot.slane %v2986_v53, 1  ;;  %v2996_v27 = vrot.slane %v2987_v34, 1 }
 0x38b   : >> { %v2998_v60 = vrot.slane %v2988_v0, 1  ;;  %v3017_v31 = vmul.f32 %v6215_v19, %v9104_v38  ;;  %v3018_v52 = vmul.f32 %v6215_v19, %v9107_v36  ;;  %v3019_v57 = vmul.f32 %v6215_v19, %v9113_v6 }
 0x38c   : >> { %v2995_v20 = vsel %vm1314_vm4, %v2993_v1, %v2994_v48  ;;  %v2997_v9 = vsel %vm1314_vm4, %v2994_v48, %v2996_v27  ;;  %v3024_v29 = vrot.slane %v3016_v54, 2  ;;  %v3066_v38 = vmul.f32 %v6227_v21, %v9147_v26 }
 0x38d   : >> { %v2999_v36 = vsel %vm1314_vm4, %v2996_v27, %v2998_v60  ;;  %v3004_v6 = vadd.f32 %v2995_v20, %v2973_v37  ;;  %v3005_v56 = vadd.f32 %v2997_v9, %v2974_v45  ;;  %v3007_v13 = vadd.f32 %v2998_v60, %v2976_v44  ;;  %v6247_v20 = vld [vmem:[%s10264_s6 + $0xf] ss:$0 sm:$0xff] }
 0x38e   : >> { %v3006_v35 = vadd.f32 %v2999_v36, %v2975_v41  ;;  %v3025_v63 = vrot.slane %v3017_v31, 2  ;;  %v3027_v39 = vrot.slane %v3018_v52, 2  ;;  %v3029_v11 = vrot.slane %v3019_v57, 2  ;;  %v9199_v57 = vld [vmem:[%s9078_s18 + $0xdf] ss:$2 sm:$0xff] }
 0x38f   : >> { %v3067_v62 = vmul.f32 %v6227_v21, %v9159_v32  ;;  %v3068_v33 = vmul.f32 %v6227_v21, %v9162_v59  ;;  %v3069_v7 = vmul.f32 %v6227_v21, %v9167_v49  ;;  %v3082_v17 = vmul.f32 %v6229_v51, %v6222_v30 }
 0x390   : >> { %v3026_v47 = vsel %vm1421_vm5, %v3024_v29, %v3025_v63  ;;  %v3028_v24 = vsel %vm1421_vm5, %v3025_v63, %v3027_v39  ;;  %v3030_v2 = vsel %vm1421_vm5, %v3027_v39, %v3029_v11  ;;  %v3038_v28 = vadd.f32 %v3029_v11, %v3007_v13  ;;  %v9207_v13 = vld [vmem:[%s9078_s18 + $0xef] ss:$2 sm:$0xff]  ;;  %v9212_v39 = vld [vmem:[%s9078_s18 + $0xff] ss:$2 sm:$0xff] }
 0x391   : >> { %v3035_v4 = vadd.f32 %v3026_v47, %v3004_v6  ;;  %v3036_v15 = vadd.f32 %v3028_v24, %v3005_v56  ;;  %v3037_v58 = vadd.f32 %v3030_v2, %v3006_v35  ;;  %v3083_v18 = vmul.f32 %v6229_v51, %v6223_v23  ;;  %v9215_v11 = vld [vmem:[%s9078_s18 + $0x10f] ss:$2 sm:$0x3f]  ;;  %v6244_v2 = vld [vmem:[%s9078_s18 + $0x100] ss:$2 sm:$0xff] }
 0x392   : >> { %v3073_v12 = vadd.f32 %v3069_v7, %v3038_v28  ;;  %v3084_v22 = vmul.f32 %v6229_v51, %v6224_v16  ;;  %v3085_v25 = vmul.f32 %v6229_v51, %v6225_v61  ;;  %v3098_v3 = vmul.f32 %v6231_v10, %v9147_v26 }
 0x393   : >> { %v3070_v19 = vadd.f32 %v3066_v38, %v3035_v4  ;;  %v3071_v46 = vadd.f32 %v3067_v62, %v3036_v15  ;;  %v3072_v50 = vadd.f32 %v3068_v33, %v3037_v58  ;;  %v3099_v14 = vmul.f32 %v6231_v10, %v9159_v32  ;;  %v6242_v62 = vld [vmem:[%s9078_s18 + $0xe0] ss:$2 sm:$0xff]  ;;  %v6243_v33 = vld [vmem:[%s9078_s18 + $0xf0] ss:$2 sm:$0xff] }
 0x394   : >> { %v3089_v5 = vadd.f32 %v3085_v25, %v3073_v12  ;;  %v3100_v8 = vmul.f32 %v6231_v10, %v9162_v59  ;;  %v3101_v53 = vmul.f32 %v6231_v10, %v9167_v49  ;;  %v3106_v34 = vrot.slane %v3098_v3, 1  ;;  %v6245_v4 = vld [vmem:[%s9078_s18 + $0x110] ss:$2 sm:$0x1f]  ;;  %v6251_v12 = vld [vmem:[%s10264_s6 + $0x11] ss:$0 sm:$0xff] }
 0x395   : >> { %v3086_v0 = vadd.f32 %v3082_v17, %v3070_v19  ;;  %v3087_v1 = vadd.f32 %v3083_v18, %v3071_v46  ;;  %v3088_v54 = vadd.f32 %v3084_v22, %v3072_v50  ;;  %v3107_v55 = vrot.slane %v3099_v14, 1 }
 0x396   : >> { %v3109_v43 = vrot.slane %v3100_v8, 1  ;;  %v3111_v37 = vrot.slane %v3101_v53, 1  ;;  %v3129_v44 = vmul.f32 %v6233_v40, %v6222_v30  ;;  %v3130_v21 = vmul.f32 %v6233_v40, %v6223_v23 }
 0x397   : >> { %v3108_v45 = vsel %vm1314_vm4, %v3106_v34, %v3107_v55  ;;  %v3131_v41 = vmul.f32 %v6233_v40, %v6224_v16  ;;  %v3132_v48 = vmul.f32 %v6233_v40, %v6225_v61  ;;  %v3160_v27 = vmul.f32 %v6235_v42, %v9147_v26 }
 0x398   : >> { %v3110_v51 = vsel %vm1314_vm4, %v3107_v55, %v3109_v43  ;;  %v3112_v60 = vsel %vm1314_vm4, %v3109_v43, %v3111_v37  ;;  %v3117_v31 = vadd.f32 %v3108_v45, %v3086_v0  ;;  %v3120_v52 = vadd.f32 %v3111_v37, %v3089_v5  ;;  %v6253_v55 = vld [vmem:[%s10264_s6 + $0x12] ss:$0 sm:$0xff] }
 0x399   : >> { %v3118_v9 = vadd.f32 %v3110_v51, %v3087_v1  ;;  %v3119_v29 = vadd.f32 %v3112_v60, %v3088_v54  ;;  %v3137_v30 = vrot.slane %v3129_v44, 1  ;;  %v3138_v38 = vrot.slane %v3130_v21, 1 }
 0x39a   : >> { %v3140_v26 = vrot.slane %v3131_v41, 1  ;;  %v3142_v36 = vrot.slane %v3132_v48, 1  ;;  %v3161_v6 = vmul.f32 %v6235_v42, %v9159_v32  ;;  %v3162_v56 = vmul.f32 %v6235_v42, %v9162_v59 }
 0x39b   : >> { %v3139_v10 = vsel %vm1314_vm4, %v3137_v30, %v3138_v38  ;;  %v3163_v35 = vmul.f32 %v6235_v42, %v9167_v49  ;;  %v3168_v63 = vrot.slane %v3160_v27, 2  ;;  %v3210_v23 = vmul.f32 %v6247_v20, %v9199_v57  ;;  %v6249_v49 = vld [vmem:[%s10264_s6 + $0x10] ss:$0 sm:$0xff] }
 0x39c   : >> { %v3141_v16 = vsel %vm1314_vm4, %v3138_v38, %v3140_v26  ;;  %v3143_v32 = vsel %vm1314_vm4, %v3140_v26, %v3142_v36  ;;  %v3148_v59 = vadd.f32 %v3139_v10, %v3117_v31  ;;  %v3151_v61 = vadd.f32 %v3142_v36, %v3120_v52  ;;  %v6255_v38 = vld [vmem:[%s10264_s6 + $0x13] ss:$0 sm:$0xff] }
 0x39d   : >> { %v3149_v7 = vadd.f32 %v3141_v16, %v3118_v9  ;;  %v3150_v17 = vadd.f32 %v3143_v32, %v3119_v29  ;;  %v3169_v47 = vrot.slane %v3161_v6, 2  ;;  %v3171_v24 = vrot.slane %v3162_v56, 2  ;;  %v9250_v10 = vld [vmem:[%s9078_s18 + $0x127] ss:$2 sm:$0xff] }
 0x39e   : >> { %v3173_v28 = vrot.slane %v3163_v35, 2  ;;  %v3211_v15 = vmul.f32 %v6247_v20, %v9207_v13  ;;  %v3212_v58 = vmul.f32 %v6247_v20, %v9212_v39  ;;  %v3213_v18 = vmul.f32 %v6247_v20, %v9215_v11  ;;  %v6267_v35 = vld [vmem:[%s10264_s6 + $0x14] ss:$0 sm:$0xff] }
 0x39f   : >> { %v3170_v22 = vsel %vm1421_vm5, %v3168_v63, %v3169_v47  ;;  %v3172_v25 = vsel %vm1421_vm5, %v3169_v47, %v3171_v24  ;;  %v3226_v3 = vmul.f32 %v6249_v49, %v6242_v62  ;;  %v3227_v19 = vmul.f32 %v6249_v49, %v6243_v33 }
 0x3a0   : >> { %v3174_v46 = vsel %vm1421_vm5, %v3171_v24, %v3173_v28  ;;  %v3179_v50 = vadd.f32 %v3170_v22, %v3148_v59  ;;  %v3180_v14 = vadd.f32 %v3172_v25, %v3149_v7  ;;  %v3182_v40 = vadd.f32 %v3173_v28, %v3151_v61  ;;  %v9264_v24 = vld [vmem:[%s9078_s18 + $0x147] ss:$2 sm:$0xff] }
 0x3a1   : >> { %v3181_v5 = vadd.f32 %v3174_v46, %v3150_v17  ;;  %v3228_v8 = vmul.f32 %v6249_v49, %v6244_v2  ;;  %v3229_v53 = vmul.f32 %v6249_v49, %v6245_v4  ;;  %v3242_v34 = vmul.f32 %v6251_v12, %v9199_v57  ;;  %v9258_v49 = vld [vmem:[%s9078_s18 + $0x137] ss:$2 sm:$0xff] }
 0x3a2   : >> { %v3214_v42 = vadd.f32 %v3210_v23, %v3179_v50  ;;  %v3215_v0 = vadd.f32 %v3211_v15, %v3180_v14  ;;  %v3217_v1 = vadd.f32 %v3213_v18, %v3182_v40  ;;  %v3243_v54 = vmul.f32 %v6251_v12, %v9207_v13  ;;  %v6263_v18 = vld [vmem:[%s9078_s18 + $0x138] ss:$2 sm:$0xff] }
 0x3a3   : >> { %v3216_v43 = vadd.f32 %v3212_v58, %v3181_v5  ;;  %v3244_v37 = vmul.f32 %v6251_v12, %v9212_v39  ;;  %v3245_v44 = vmul.f32 %v6251_v12, %v9215_v11  ;;  %v3250_v21 = vrot.slane %v3242_v34, 1  ;;  %v6262_v58 = vld [vmem:[%s9078_s18 + $0x128] ss:$2 sm:$0xff]  ;;  %v6265_v50 = vld [vmem:[%s9078_s18 + $0x158] ss:$2 sm:$0x1f] }
 0x3a4   : >> { %v3230_v45 = vadd.f32 %v3226_v3, %v3214_v42  ;;  %v3231_v41 = vadd.f32 %v3227_v19, %v3215_v0  ;;  %v3233_v48 = vadd.f32 %v3229_v53, %v3217_v1  ;;  %v3251_v27 = vrot.slane %v3243_v54, 1  ;;  %v6264_v3 = vld [vmem:[%s9078_s18 + $0x148] ss:$2 sm:$0xff] }
 0x3a5   : >> { %v3232_v51 = vadd.f32 %v3228_v8, %v3216_v43  ;;  %v3253_v60 = vrot.slane %v3244_v37, 1  ;;  %v3255_v31 = vrot.slane %v3245_v44, 1  ;;  %v3273_v52 = vmul.f32 %v6253_v55, %v6242_v62  ;;  %v6271_v42 = vld [vmem:[%s10264_s6 + $0x16] ss:$0 sm:$0xff] }
 0x3a6   : >> { %v3252_v20 = vsel %vm1314_vm4, %v3250_v21, %v3251_v27  ;;  %v3274_v9 = vmul.f32 %v6253_v55, %v6243_v33  ;;  %v3275_v29 = vmul.f32 %v6253_v55, %v6244_v2  ;;  %v3276_v30 = vmul.f32 %v6253_v55, %v6245_v4  ;;  %v9267_v2 = vld [vmem:[%s9078_s18 + $0x157] ss:$2 sm:$0x3f] }
 0x3a7   : >> { %v3254_v26 = vsel %vm1314_vm4, %v3251_v27, %v3253_v60  ;;  %v3256_v36 = vsel %vm1314_vm4, %v3253_v60, %v3255_v31  ;;  %v3261_v6 = vadd.f32 %v3252_v20, %v3230_v45  ;;  %v3264_v56 = vadd.f32 %v3255_v31, %v3233_v48  ;;  %v6273_v20 = vld [vmem:[%s10264_s6 + $0x17] ss:$0 sm:$0xff] }
 0x3a8   : >> { %v3262_v63 = vadd.f32 %v3254_v26, %v3231_v41  ;;  %v3263_v23 = vadd.f32 %v3256_v36, %v3232_v51  ;;  %v3281_v16 = vrot.slane %v3273_v52, 1  ;;  %v3282_v32 = vrot.slane %v3274_v9, 1 }
 0x3a9   : >> { %v3284_v59 = vrot.slane %v3275_v29, 1  ;;  %v3286_v61 = vrot.slane %v3276_v30, 1  ;;  %v3304_v62 = vmul.f32 %v6255_v38, %v9199_v57  ;;  %v3305_v33 = vmul.f32 %v6255_v38, %v9207_v13 }
 0x3aa   : >> { %v3283_v7 = vsel %vm1314_vm4, %v3281_v16, %v3282_v32  ;;  %v3306_v17 = vmul.f32 %v6255_v38, %v9212_v39  ;;  %v3307_v47 = vmul.f32 %v6255_v38, %v9215_v11  ;;  %v3354_v28 = vmul.f32 %v6267_v35, %v9250_v10  ;;  %v6269_v39 = vld [vmem:[%s10264_s6 + $0x15] ss:$0 sm:$0xff] }
 0x3ab   : >> { %v3285_v57 = vsel %vm1314_vm4, %v3282_v32, %v3284_v59  ;;  %v3287_v13 = vsel %vm1314_vm4, %v3284_v59, %v3286_v61  ;;  %v3292_v4 = vadd.f32 %v3283_v7, %v3261_v6  ;;  %v3295_v15 = vadd.f32 %v3286_v61, %v3264_v56  ;;  %v6275_v32 = vld [vmem:[%s10264_s6 + $0x18] ss:$0 sm:$0xff] }
 0x3ac   : >> { %v3293_v11 = vadd.f32 %v3285_v57, %v3262_v63  ;;  %v3294_v12 = vadd.f32 %v3287_v13, %v3263_v23  ;;  %v3312_v22 = vrot.slane %v3304_v62, 2  ;;  %v3313_v25 = vrot.slane %v3305_v33, 2 }
 0x3ad   : >> { %v3315_v19 = vrot.slane %v3306_v17, 2  ;;  %v3317_v46 = vrot.slane %v3307_v47, 2  ;;  %v3355_v14 = vmul.f32 %v6267_v35, %v9258_v49  ;;  %v3356_v40 = vmul.f32 %v6267_v35, %v9264_v24 }
 0x3ae   : >> { %v3314_v5 = vsel %vm1421_vm5, %v3312_v22, %v3313_v25  ;;  %v3357_v8 = vmul.f32 %v6267_v35, %v9267_v2  ;;  %v3370_v53 = vmul.f32 %v6269_v39, %v6262_v58  ;;  %v3371_v34 = vmul.f32 %v6269_v39, %v6263_v18 }
 0x3af   : >> { %v3316_v0 = vsel %vm1421_vm5, %v3313_v25, %v3315_v19  ;;  %v3318_v1 = vsel %vm1421_vm5, %v3315_v19, %v3317_v46  ;;  %v3323_v54 = vadd.f32 %v3314_v5, %v3292_v4  ;;  %v3326_v55 = vadd.f32 %v3317_v46, %v3295_v15 }
 0x3b0   : >> { %v3324_v43 = vadd.f32 %v3316_v0, %v3293_v11  ;;  %v3325_v37 = vadd.f32 %v3318_v1, %v3294_v12  ;;  %v3372_v44 = vmul.f32 %v6269_v39, %v6264_v3  ;;  %v3373_v21 = vmul.f32 %v6269_v39, %v6265_v50 }
 0x3b1   : >> { %v3358_v45 = vadd.f32 %v3354_v28, %v3323_v54  ;;  %v3361_v41 = vadd.f32 %v3357_v8, %v3326_v55  ;;  %v3386_v48 = vmul.f32 %v6271_v42, %v9250_v10  ;;  %v3387_v27 = vmul.f32 %v6271_v42, %v9258_v49 }
 0x3b2   : >> { %v3359_v51 = vadd.f32 %v3355_v14, %v3324_v43  ;;  %v3360_v60 = vadd.f32 %v3356_v40, %v3325_v37  ;;  %v3388_v31 = vmul.f32 %v6271_v42, %v9264_v24  ;;  %v3389_v52 = vmul.f32 %v6271_v42, %v9267_v2 }
 0x3b3   : >> { %v3374_v9 = vadd.f32 %v3370_v53, %v3358_v45  ;;  %v3377_v29 = vadd.f32 %v3373_v21, %v3361_v41  ;;  %v3394_v30 = vrot.slane %v3386_v48, 1  ;;  %v3395_v38 = vrot.slane %v3387_v27, 1 }
 0x3b4   : >> { %v3375_v26 = vadd.f32 %v3371_v34, %v3359_v51  ;;  %v3376_v36 = vadd.f32 %v3372_v44, %v3360_v60  ;;  %v3397_v6 = vrot.slane %v3388_v31, 1  ;;  %v3399_v56 = vrot.slane %v3389_v52, 1 }
 0x3b5   : >> { %v3396_v35 = vsel %vm1314_vm4, %v3394_v30, %v3395_v38  ;;  %v3417_v63 = vmul.f32 %v6273_v20, %v6262_v58  ;;  %v3418_v23 = vmul.f32 %v6273_v20, %v6263_v18  ;;  %v3419_v16 = vmul.f32 %v6273_v20, %v6264_v3 }
 0x3b6   : >> { %v3398_v59 = vsel %vm1314_vm4, %v3395_v38, %v3397_v6  ;;  %v3400_v61 = vsel %vm1314_vm4, %v3397_v6, %v3399_v56  ;;  %v3405_v62 = vadd.f32 %v3396_v35, %v3374_v9  ;;  %v3408_v33 = vadd.f32 %v3399_v56, %v3377_v29 }
 0x3b7   : >> { %v3406_v7 = vadd.f32 %v3398_v59, %v3375_v26  ;;  %v3407_v17 = vadd.f32 %v3400_v61, %v3376_v36  ;;  %v3420_v47 = vmul.f32 %v6273_v20, %v6265_v50  ;;  %v3425_v28 = vrot.slane %v3417_v63, 1 }
 0x3b8   : >> { %v3426_v57 = vrot.slane %v3418_v23, 1  ;;  %v3428_v13 = vrot.slane %v3419_v16, 1  ;;  %v3448_v4 = vmul.f32 %v6275_v32, %v9250_v10  ;;  %v3449_v15 = vmul.f32 %v6275_v32, %v9258_v49 }
 0x3b9   : >> { %v3430_v58 = vrot.slane %v3420_v47, 1  ;;  %v3450_v18 = vmul.f32 %v6275_v32, %v9264_v24  ;;  %v3451_v39 = vmul.f32 %v6275_v32, %v9267_v2 }
 0x3ba   : >> { %v3427_v11 = vsel %vm1314_vm4, %v3425_v28, %v3426_v57  ;;  %v3429_v12 = vsel %vm1314_vm4, %v3426_v57, %v3428_v13  ;;  %v3456_v22 = vrot.slane %v3448_v4, 2  ;;  %v3457_v25 = vrot.slane %v3449_v15, 2 }
 0x3bb   : >> { %v3431_v3 = vsel %vm1314_vm4, %v3428_v13, %v3430_v58  ;;  %v3436_v19 = vadd.f32 %v3427_v11, %v3405_v62  ;;  %v3437_v46 = vadd.f32 %v3429_v12, %v3406_v7  ;;  %v3439_v50 = vadd.f32 %v3430_v58, %v3408_v33  ;;  %2748 = sbr.rel (!%p2746_p5) target bundleno = 876 (0x36c), region = 478 }
 0x3bc   : >> { %v3438_v10 = vadd.f32 %v3431_v3, %v3407_v17  ;;  %v3458_v49 = vsel %vm1421_vm5, %v3456_v22, %v3457_v25  ;;  %v3459_v14 = vrot.slane %v3450_v18, 2  ;;  %v3461_v40 = vrot.slane %v3451_v39, 2 }
 0x3bd   : >> { %v3467_v24 = vadd.f32 %v3458_v49, %v3436_v19 }
 0x3be   : >> { %v3460_v2 = vsel %vm1421_vm5, %v3457_v25, %v3459_v14  ;;  %v3462_v5 = vsel %vm1421_vm5, %v3459_v14, %v3461_v40  ;;  %v3470_v8 = vadd.f32 %v3461_v40, %v3439_v50 }
 0x3bf   : >> { %v3468_v53 = vadd.f32 %v3460_v2, %v3437_v46  ;;  %v3469_v34 = vadd.f32 %v3462_v5, %v3438_v10  ;;  %3473 = vst [vmem:[%s3472_s19] sm:$0xff] %v3467_v24 }
 0x3c0   : >> { %3476 = vst [vmem:[%s3472_s19 + $0x18] sm:$0xf] %v3470_v8 }
 0x3c1   : >> { %3474 = vst [vmem:[%s3472_s19 + $0x8] sm:$0xff] %v3468_v53  ;;  %3475 = vst [vmem:[%s3472_s19 + $0x10] sm:$0xff] %v3469_v34 }
 0x3c2 LB: >> { %v3514_v42 = vld [vmem:[%s10265_s7] sm:$0xff]  ;;  %v3515_v0 = vld [vmem:[%s10265_s7 + $0x8] sm:$0xff]  ;;  %v3516_v1 = vld [vmem:[%s10265_s7 + $0x10] sm:$0xff]  ;;  %s6277_s29 = smul.u32 224, %s7711_s20  ;;  %v7752_v51 = vmov 0.0   ;;  %vm3770_vm6 = vcmask 1043456   ;;  %s7711_s20 = sphi %s9315_s20, %s3482_s20  }
 0x3c3   : >> { %v7249_v54 = vpack.c.bf16 %v3515_v0, %v3514_v42  ;;  %v3517_v55 = vld [vmem:[%s10265_s7 + $0x18] sm:$0xff]  ;;  %v3518_v37 = vld [vmem:[%s10265_s7 + $0x20] sm:$0xff]  ;;  %v3519_v44 = vld [vmem:[%s10265_s7 + $0x28] sm:$0xff]  ;;  %s6279_s23 = smul.u32 280, %s7711_s20  ;;  %s3482_s20 = sadd.s32 1, %s7711_s20  }
 0x3c4   : >> { %v7253_v43 = vpack.c.bf16 %v3517_v55, %v3516_v1  ;;  %v7257_v21 = vpack.c.bf16 %v3519_v44, %v3518_v37  ;;  %s9340_s24 = scalar_lea.vmem [#allocation5], %s6277_s29  ;;  %v3520_v48 = vld [vmem:[%s10265_s7 + $0x30] sm:$0xff]  ;;  %v3521_v27 = vld [vmem:[%s10265_s7 + $0x38] sm:$0xff]  ;;  %v3522_v31 = vld [vmem:[%s10265_s7 + $0x40] sm:$0xff]  ;;  %p3479_p6 = scmp.ge.s32.totalorder %s3482_s20, 4  }
 0x3c5   : >> { %7250 = vmatprep.subr.bf16.mxu0 %v7249_v54  ;;  %7371 = vmatprep.subr.bf16.mxu1 %v7249_v54  ;;  %s9350_s26 = scalar_lea.vmem [#allocation6], %s6279_s23  ;;  %v7261_v60 = vpack.c.bf16 %v3521_v27, %v3520_v48  ;;  %v3523_v52 = vld [vmem:[%s10265_s7 + $0x48] sm:$0xff]  ;;  %v3524_v9 = vld [vmem:[%s10265_s7 + $0x50] sm:$0xff]  ;;  %v3525_v29 = vld [vmem:[%s10265_s7 + $0x58] sm:$0xff] }
 0x3c6   : >> { %7252 = vmatpush3.bf16.msra.mxu0 %v7249_v54  ;;  %7379 = vmatpush3.bf16.msra.mxu1 %v7249_v54  ;;  %6280 = vst [vmem:[%s9350_s26 + $0x50] sm:$0xff] %v7752_v51  ;;  %6285 = vst [vmem:[%s9350_s26 + $0x78] sm:$0xff] %v7752_v51  ;;  %v7265_v20 = vpack.c.bf16 %v3523_v52, %v3522_v31  ;;  %v7269_v30 = vpack.c.bf16 %v3525_v29, %v3524_v9  ;;  %v3526_v38 = vld [vmem:[%s10265_s7 + $0x60] sm:$0xff]  ;;  %v3527_v26 = vld [vmem:[%s10265_s7 + $0x68] sm:$0xff] }
 0x3c7   : >> { %7254 = vmatprep.subr.bf16.mxu0 %v7253_v43  ;;  %7372 = vmatprep.subr.bf16.mxu1 %v7253_v43  ;;  %6290 = vst [vmem:[%s9350_s26 + $0xa0] sm:$0xff] %v7752_v51  ;;  %6295 = vst [vmem:[%s9350_s26 + $0xc8] sm:$0xff] %v7752_v51  ;;  %v7273_v36 = vpack.c.bf16 %v3527_v26, %v3526_v38  ;;  %v3528_v6 = vld [vmem:[%s10265_s7 + $0x70] sm:$0xff]  ;;  %v3529_v56 = vld [vmem:[%s10265_s7 + $0x78] sm:$0xff] }
 0x3c8   : >> { %v3486_v45 = vld [vmem:[%s9340_s24] sm:$0xff]  ;;  %v3500_v41 = vld [vmem:[%s9340_s24 + $0x70] sm:$0xff]  ;;  %6300 = vst [vmem:[%s9350_s26 + $0xf0] sm:$0xff] %v7752_v51  ;;  %6305 = vst [vmem:[%s9350_s26 + $0x118] sm:$0xff] %v7752_v51  ;;  %v7277_v35 = vpack.c.bf16 %v3529_v56, %v3528_v6 }
 0x3c9   : >> { %7005 = vmatprep.mubr.f32.mxu0 %v3486_v45  ;;  %6310 = vst [vmem:[%s9350_s26 + $0x140] sm:$0xff] %v7752_v51  ;;  %7026 = vmatprep.mubr.f32.mxu1 %v3500_v41  ;;  %v3487_v63 = vld [vmem:[%s9340_s24 + $0x8] sm:$0xff]  ;;  %v3501_v23 = vld [vmem:[%s9340_s24 + $0x78] sm:$0xff]  ;;  %v3488_v16 = vld [vmem:[%s9340_s24 + $0x10] sm:$0xff] }
 0x3ca   : >> { %7256 = vmatpush3.bf16.msra.mxu0 %v7253_v43  ;;  %7380 = vmatpush3.bf16.msra.mxu1 %v7253_v43  ;;  %v3502_v32 = vld [vmem:[%s9340_s24 + $0x80] sm:$0xff]  ;;  %v3489_v59 = vld [vmem:[%s9340_s24 + $0x18] sm:$0xff]  ;;  %v3503_v61 = vld [vmem:[%s9340_s24 + $0x88] sm:$0xff] }
 0x3cb   : >> { %7258 = vmatprep.subr.bf16.mxu0 %v7257_v21  ;;  %7373 = vmatprep.subr.bf16.mxu1 %v7257_v21  ;;  %v3490_v62 = vld [vmem:[%s9340_s24 + $0x20] sm:$0xff]  ;;  %v3504_v33 = vld [vmem:[%s9340_s24 + $0x90] sm:$0xff]  ;;  %v3491_v7 = vld [vmem:[%s9340_s24 + $0x28] sm:$0xff] }
 0x3cc   : >> { %v3505_v17 = vld [vmem:[%s9340_s24 + $0x98] sm:$0xff]  ;;  %v3492_v47 = vld [vmem:[%s9340_s24 + $0x30] sm:$0xff]  ;;  %v3506_v28 = vld [vmem:[%s9340_s24 + $0xa0] sm:$0xff] }
 0x3cd   : >> { %v3493_v57 = vld [vmem:[%s9340_s24 + $0x38] sm:$0xff]  ;;  %v3507_v13 = vld [vmem:[%s9340_s24 + $0xa8] sm:$0xff]  ;;  %v3494_v4 = vld [vmem:[%s9340_s24 + $0x40] sm:$0xff] }
 0x3ce   : >> { %7260 = vmatpush3.bf16.msra.mxu0 %v7257_v21  ;;  %7381 = vmatpush3.bf16.msra.mxu1 %v7257_v21  ;;  %v3508_v15 = vld [vmem:[%s9340_s24 + $0xb0] sm:$0xff]  ;;  %v3495_v58 = vld [vmem:[%s9340_s24 + $0x48] sm:$0xff]  ;;  %v3509_v18 = vld [vmem:[%s9340_s24 + $0xb8] sm:$0xff] }
 0x3cf   : >> { %7262 = vmatprep.subr.bf16.mxu0 %v7261_v60  ;;  %7374 = vmatprep.subr.bf16.mxu1 %v7261_v60  ;;  %v3496_v39 = vld [vmem:[%s9340_s24 + $0x50] sm:$0xff]  ;;  %v3510_v11 = vld [vmem:[%s9340_s24 + $0xc0] sm:$0xff]  ;;  %v3497_v12 = vld [vmem:[%s9340_s24 + $0x58] sm:$0xff] }
 0x3d0   : >> { %v3511_v22 = vld [vmem:[%s9340_s24 + $0xc8] sm:$0xff]  ;;  %v3498_v25 = vld [vmem:[%s9340_s24 + $0x60] sm:$0xff]  ;;  %v3512_v3 = vld [vmem:[%s9340_s24 + $0xd0] sm:$0xff] }
 0x3d1   : >> { %v3499_v19 = vld [vmem:[%s9340_s24 + $0x68] sm:$0xff]  ;;  %v3513_v46 = vld [vmem:[%s9340_s24 + $0xd8] sm:$0xff]  ;;  %v9412_v50 = vld [vmem:[%s10266_s8] ss:$0 sm:$0xff]  ;;  %s9480_s24 = smov (%p3479_p6), 0  }
 0x3d2   : >> { %7264 = vmatpush3.bf16.msra.mxu0 %v7261_v60  ;;  %7382 = vmatpush3.bf16.msra.mxu1 %v7261_v60 }
 0x3d3   : >> { %7266 = vmatprep.subr.bf16.mxu0 %v7265_v20  ;;  %7375 = vmatprep.subr.bf16.mxu1 %v7265_v20 }
 0x3d6   : >> { %7268 = vmatpush3.bf16.msra.mxu0 %v7265_v20  ;;  %7383 = vmatpush3.bf16.msra.mxu1 %v7265_v20 }
 0x3d7   : >> { %7270 = vmatprep.subr.bf16.mxu0 %v7269_v30  ;;  %7376 = vmatprep.subr.bf16.mxu1 %v7269_v30 }
 0x3da   : >> { %7272 = vmatpush3.bf16.msra.mxu0 %v7269_v30  ;;  %7384 = vmatpush3.bf16.msra.mxu1 %v7269_v30 }
 0x3db   : >> { %7274 = vmatprep.subr.bf16.mxu0 %v7273_v36  ;;  %7377 = vmatprep.subr.bf16.mxu1 %v7273_v36 }
 0x3de   : >> { %7276 = vmatpush3.bf16.msra.mxu0 %v7273_v36  ;;  %7385 = vmatpush3.bf16.msra.mxu1 %v7273_v36 }
 0x3df   : >> { %7278 = vmatprep.subr.bf16.mxu0 %v7277_v35  ;;  %7378 = vmatprep.subr.bf16.mxu1 %v7277_v35 }
 0x3e2   : >> { %7280 = vmatpush3.bf16.msra.mxu0 %v7277_v35  ;;  %7386 = vmatpush3.bf16.msra.mxu1 %v7277_v35 }
 0x3e5   : >> { %7006 = vmatmul.mubr.f32.vlgmr.msra.gmra.mrb[0].mxu0 %v3487_v63  ;;  %7027 = vmatmul.mubr.f32.vlgmr.msra.gmra.mrb[0].mxu1 %v3501_v23 }
 0x3e6   : >> { %7008 = vmatprep.mubr.f32.mxu0 %v3488_v16  ;;  %7029 = vmatprep.mubr.f32.mxu1 %v3502_v32 }
 0x3e9   : >> { %7009 = vmatmul.mubr.f32.gmra.mrb[2].mxu0 %v3489_v59  ;;  %7030 = vmatmul.mubr.f32.gmra.mrb[2].mxu1 %v3503_v61 }
 0x3ea   : >> { %7011 = vmatprep.mubr.f32.mxu0 %v3490_v62  ;;  %7032 = vmatprep.mubr.f32.mxu1 %v3504_v33 }
 0x3ed   : >> { %7012 = vmatmul.mubr.f32.gmra.mrb[4].mxu0 %v3491_v7  ;;  %7033 = vmatmul.mubr.f32.gmra.mrb[4].mxu1 %v3505_v17 }
 0x3ee   : >> { %7014 = vmatprep.mubr.f32.mxu0 %v3492_v47  ;;  %7035 = vmatprep.mubr.f32.mxu1 %v3506_v28 }
 0x3f1   : >> { %7015 = vmatmul.mubr.f32.gmra.mrb[6].mxu0 %v3493_v57  ;;  %7036 = vmatmul.mubr.f32.gmra.mrb[6].mxu1 %v3507_v13 }
 0x3f2   : >> { %7017 = vmatprep.mubr.f32.mxu0 %v3494_v4  ;;  %7038 = vmatprep.mubr.f32.mxu1 %v3508_v15 }
 0x3f5   : >> { %7018 = vmatmul.mubr.f32.gmra.mrb[8].mxu0 %v3495_v58  ;;  %7039 = vmatmul.mubr.f32.gmra.mrb[8].mxu1 %v3509_v18 }
 0x3f6   : >> { %7020 = vmatprep.mubr.f32.mxu0 %v3496_v39  ;;  %7041 = vmatprep.mubr.f32.mxu1 %v3510_v11 }
 0x3f9   : >> { %7021 = vmatmul.mubr.f32.gmra.mrb[10].mxu0 %v3497_v12  ;;  %7042 = vmatmul.mubr.f32.gmra.mrb[10].mxu1 %v3511_v22 }
 0x3fa   : >> { %7023 = vmatprep.mubr.f32.mxu0 %v3498_v25  ;;  %7044 = vmatprep.mubr.f32.mxu1 %v3512_v3 }
 0x3fd   : >> { %7024 = vmatmul.mubr.f32.gmra.mrb[12].mxu0 %v3499_v19  ;;  %7045 = vmatmul.mubr.f32.gmra.mrb[12].mxu1 %v3513_v46 }
 0x4b8   : >> { %v7007_v10 = vpop.f32.mrb[0].mxu0  ;;  %v7028_v49 = vpop.f32.mrb[0].mxu1 }
 0x4b9   : >> { %v3609_v14 = vadd.f32 %v7007_v10, %v9412_v50  ;;  %v3679_v40 = vadd.f32 %v7028_v49, %v9412_v50  ;;  %v3603_v24 = vpop.f32.mrb[1].mxu0  ;;  %v3673_v2 = vpop.f32.mrb[1].mxu1 }
 0x4ba   : >> { %v3604_v5 = vadd.f32 %v9412_v50, %v3603_v24  ;;  %v3674_v8 = vadd.f32 %v9412_v50, %v3673_v2 }
 0x4bb   : >> { %v3743_v53 = vmax.f32 %v3609_v14, 0.0  ;;  %v3757_v34 = vmax.f32 %v3679_v40, 0.0 }
 0x4bc   : >> { %v3742_v42 = vmax.f32 %v3604_v5, 0.0  ;;  %v3756_v0 = vmax.f32 %v3674_v8, 0.0  ;;  %v7010_v1 = vpop.f32.mrb[2].mxu0  ;;  %v7031_v54 = vpop.f32.mrb[2].mxu1 }
 0x4bd   : >> { %6282 = vst [vmem:[%s9350_s26 + $0x60] sm:$0xff] %v3743_v53  ;;  %v3774_v55 = vsel %vm3770_vm6, %v3757_v34, 0.0  ;;  %v3619_v43 = vadd.f32 %v7010_v1, %v9412_v50  ;;  %v3689_v37 = vadd.f32 %v7031_v54, %v9412_v50  ;;  %v3613_v44 = vpop.f32.mrb[3].mxu0  ;;  %v3683_v21 = vpop.f32.mrb[3].mxu1 }
 0x4be   : >> { %6299 = vst [vmem:[%s9350_s26 + $0xe8] sm:$0xff] %v3774_v55  ;;  %6281 = vst [vmem:[%s9350_s26 + $0x58] sm:$0xff] %v3742_v42  ;;  %v3614_v45 = vadd.f32 %v9412_v50, %v3613_v44  ;;  %v3684_v41 = vadd.f32 %v9412_v50, %v3683_v21 }
 0x4bf   : >> { %6298 = vst [vmem:[%s9350_s26 + $0xe0] sm:$0xff] %v3756_v0  ;;  %v3745_v48 = vmax.f32 %v3619_v43, 0.0  ;;  %v3759_v27 = vmax.f32 %v3689_v37, 0.0 }
 0x4c0   : >> { %v3744_v51 = vmax.f32 %v3614_v45, 0.0  ;;  %v3758_v60 = vmax.f32 %v3684_v41, 0.0  ;;  %v7013_v31 = vpop.f32.mrb[4].mxu0  ;;  %v7034_v52 = vpop.f32.mrb[4].mxu1 }
 0x4c1   : >> { %v3771_v20 = vsel %vm3770_vm6, %v3745_v48, 0.0  ;;  %6302 = vst [vmem:[%s9350_s26 + $0x100] sm:$0xff] %v3759_v27  ;;  %v3629_v9 = vadd.f32 %v7013_v31, %v9412_v50  ;;  %v3699_v29 = vadd.f32 %v7034_v52, %v9412_v50  ;;  %v3623_v30 = vpop.f32.mrb[5].mxu0  ;;  %v3693_v38 = vpop.f32.mrb[5].mxu1 }
 0x4c2   : >> { %6284 = vst [vmem:[%s9350_s26 + $0x70] sm:$0xff] %v3771_v20  ;;  %6283 = vst [vmem:[%s9350_s26 + $0x68] sm:$0xff] %v3744_v51  ;;  %v3624_v26 = vadd.f32 %v9412_v50, %v3623_v30  ;;  %v3694_v36 = vadd.f32 %v9412_v50, %v3693_v38 }
 0x4c3   : >> { %6301 = vst [vmem:[%s9350_s26 + $0xf8] sm:$0xff] %v3758_v60  ;;  %v3747_v6 = vmax.f32 %v3629_v9, 0.0  ;;  %v3761_v56 = vmax.f32 %v3699_v29, 0.0 }
 0x4c4   : >> { %v3746_v35 = vmax.f32 %v3624_v26, 0.0  ;;  %v3760_v63 = vmax.f32 %v3694_v36, 0.0  ;;  %v7016_v23 = vpop.f32.mrb[6].mxu0  ;;  %v7037_v16 = vpop.f32.mrb[6].mxu1 }
 0x4c5   : >> { %6287 = vst [vmem:[%s9350_s26 + $0x88] sm:$0xff] %v3747_v6  ;;  %v3775_v32 = vsel %vm3770_vm6, %v3761_v56, 0.0  ;;  %v3639_v59 = vadd.f32 %v7016_v23, %v9412_v50  ;;  %v3709_v61 = vadd.f32 %v7037_v16, %v9412_v50  ;;  %v3633_v62 = vpop.f32.mrb[7].mxu0  ;;  %v3703_v33 = vpop.f32.mrb[7].mxu1 }
 0x4c6   : >> { %6304 = vst [vmem:[%s9350_s26 + $0x110] sm:$0xff] %v3775_v32  ;;  %6286 = vst [vmem:[%s9350_s26 + $0x80] sm:$0xff] %v3746_v35  ;;  %v3634_v7 = vadd.f32 %v9412_v50, %v3633_v62  ;;  %v3704_v17 = vadd.f32 %v9412_v50, %v3703_v33 }
 0x4c7   : >> { %6303 = vst [vmem:[%s9350_s26 + $0x108] sm:$0xff] %v3760_v63  ;;  %v3749_v47 = vmax.f32 %v3639_v59, 0.0  ;;  %v3763_v28 = vmax.f32 %v3709_v61, 0.0 }
 0x4c8   : >> { %v3748_v57 = vmax.f32 %v3634_v7, 0.0  ;;  %v3762_v13 = vmax.f32 %v3704_v17, 0.0  ;;  %v7019_v4 = vpop.f32.mrb[8].mxu0  ;;  %v7040_v15 = vpop.f32.mrb[8].mxu1 }
 0x4c9   : >> { %v3772_v58 = vsel %vm3770_vm6, %v3749_v47, 0.0  ;;  %6307 = vst [vmem:[%s9350_s26 + $0x128] sm:$0xff] %v3763_v28  ;;  %v3649_v18 = vadd.f32 %v7019_v4, %v9412_v50  ;;  %v3719_v39 = vadd.f32 %v7040_v15, %v9412_v50  ;;  %v3643_v11 = vpop.f32.mrb[9].mxu0  ;;  %v3713_v12 = vpop.f32.mrb[9].mxu1 }
 0x4ca   : >> { %6289 = vst [vmem:[%s9350_s26 + $0x98] sm:$0xff] %v3772_v58  ;;  %6288 = vst [vmem:[%s9350_s26 + $0x90] sm:$0xff] %v3748_v57  ;;  %v3644_v22 = vadd.f32 %v9412_v50, %v3643_v11  ;;  %v3714_v25 = vadd.f32 %v9412_v50, %v3713_v12 }
 0x4cb   : >> { %6306 = vst [vmem:[%s9350_s26 + $0x120] sm:$0xff] %v3762_v13  ;;  %v3751_v3 = vmax.f32 %v3649_v18, 0.0  ;;  %v3765_v19 = vmax.f32 %v3719_v39, 0.0 }
 0x4cc   : >> { %v3750_v46 = vmax.f32 %v3644_v22, 0.0  ;;  %v3764_v10 = vmax.f32 %v3714_v25, 0.0  ;;  %v7022_v49 = vpop.f32.mrb[10].mxu0  ;;  %v7043_v14 = vpop.f32.mrb[10].mxu1 }
 0x4cd   : >> { %6292 = vst [vmem:[%s9350_s26 + $0xb0] sm:$0xff] %v3751_v3  ;;  %v3776_v40 = vsel %vm3770_vm6, %v3765_v19, 0.0  ;;  %v3659_v24 = vadd.f32 %v7022_v49, %v9412_v50  ;;  %v3729_v2 = vadd.f32 %v7043_v14, %v9412_v50  ;;  %v3653_v5 = vpop.f32.mrb[11].mxu0  ;;  %v3723_v8 = vpop.f32.mrb[11].mxu1 }
 0x4ce   : >> { %6309 = vst [vmem:[%s9350_s26 + $0x138] sm:$0xff] %v3776_v40  ;;  %6291 = vst [vmem:[%s9350_s26 + $0xa8] sm:$0xff] %v3750_v46  ;;  %v3654_v53 = vadd.f32 %v9412_v50, %v3653_v5  ;;  %v3724_v34 = vadd.f32 %v9412_v50, %v3723_v8 }
 0x4cf   : >> { %6308 = vst [vmem:[%s9350_s26 + $0x130] sm:$0xff] %v3764_v10  ;;  %v3753_v42 = vmax.f32 %v3659_v24, 0.0  ;;  %v3767_v0 = vmax.f32 %v3729_v2, 0.0 }
 0x4d0   : >> { %v3752_v1 = vmax.f32 %v3654_v53, 0.0  ;;  %v3766_v54 = vmax.f32 %v3724_v34, 0.0  ;;  %v7025_v55 = vpop.f32.mrb[12].mxu0  ;;  %v7046_v43 = vpop.f32.mrb[12].mxu1 }
 0x4d1   : >> { %v3773_v37 = vsel %vm3770_vm6, %v3753_v42, 0.0  ;;  %6312 = vst [vmem:[%s9350_s26 + $0x150] sm:$0xff] %v3767_v0  ;;  %v3669_v44 = vadd.f32 %v7025_v55, %v9412_v50  ;;  %v3739_v21 = vadd.f32 %v7046_v43, %v9412_v50  ;;  %v3663_v45 = vpop.f32.mrb[13].mxu0  ;;  %v3733_v41 = vpop.f32.mrb[13].mxu1  ;;  %3481 = sbr.rel (!%p3479_p6) target bundleno = 962 (0x3c2), region = 489 }
 0x4d2   : >> { %6294 = vst [vmem:[%s9350_s26 + $0xc0] sm:$0xff] %v3773_v37  ;;  %6293 = vst [vmem:[%s9350_s26 + $0xb8] sm:$0xff] %v3752_v1  ;;  %v3664_v48 = vadd.f32 %v9412_v50, %v3663_v45  ;;  %v3734_v27 = vadd.f32 %v9412_v50, %v3733_v41 }
 0x4d3   : >> { %6311 = vst [vmem:[%s9350_s26 + $0x148] sm:$0xff] %v3766_v54  ;;  %v3755_v51 = vmax.f32 %v3669_v44, 0.0  ;;  %v3769_v60 = vmax.f32 %v3739_v21, 0.0 }
 0x4d4   : >> { %v3754_v31 = vmax.f32 %v3664_v48, 0.0  ;;  %v3768_v52 = vmax.f32 %v3734_v27, 0.0 }
 0x4d5   : >> { %6297 = vst [vmem:[%s9350_s26 + $0xd8] sm:$0xff] %v3755_v51  ;;  %v3777_v20 = vsel %vm3770_vm6, %v3769_v60, 0.0 }
 0x4d6   : >> { %6314 = vst [vmem:[%s9350_s26 + $0x160] sm:$0xff] %v3777_v20  ;;  %6296 = vst [vmem:[%s9350_s26 + $0xd0] sm:$0xff] %v3754_v31 }
 0x4d7   : >> { %6313 = vst [vmem:[%s9350_s26 + $0x158] sm:$0xff] %v3768_v52 }
 0x4d8 LB: >> { %s3822_s28 = smul.u32 40, %s7715_s24  ;;  %v6315_v50 = vld [vmem:[%s10267_s9] ss:$0 sm:$0xff]  ;;  %v6317_v9 = vld [vmem:[%s10267_s9 + $0x1] ss:$0 sm:$0xff]  ;;  %s6444_s29 = sshll.u32 %s7715_s24, 5  ;;  %s7715_s24 = sphi %s9480_s24, %s3821_s24  }
 0x4d9   : >> { %v6319_v29 = vld [vmem:[%s10267_s9 + $0x2] ss:$0 sm:$0xff]  ;;  %v6321_v36 = vld [vmem:[%s10267_s9 + $0x3] ss:$0 sm:$0xff]  ;;  %v6323_v17 = vld [vmem:[%s10267_s9 + $0x4] ss:$0 sm:$0xff] }
 0x4da   : >> { %s9495_s19 = scalar_lea.vmem [#allocation6], %s3822_s28  ;;  %v6329_v3 = vld [vmem:[%s10267_s9 + $0x5] ss:$0 sm:$0xff]  ;;  %v6335_v60 = vld [vmem:[%s10267_s9 + $0x6] ss:$0 sm:$0xff]  ;;  %s4336_s23 = scalar_lea.vmem [#allocation7], %s6444_s29 }
 0x4db   : >> { %s3821_s24 = sadd.s32 1, %s7715_s24  }
 0x4dc   : >> { %p3818_p10 = scmp.ge.s32.totalorder %s3821_s24, 28  }
 0x4de   : >> { %v3824_v30 = vld [vmem:[%s9495_s19 + $0x6] sm:$0xff]  ;;  %v3825_v38 = vld [vmem:[%s9495_s19 + $0xe] sm:$0xff]  ;;  %v3826_v26 = vld [vmem:[%s9495_s19 + $0x16] sm:$0xff] }
 0x4df   : >> { %v3827_v6 = vld [vmem:[%s9495_s19 + $0x1e] sm:$0xf]  ;;  %v3835_v56 = vmul.f32 %v6315_v50, %v3824_v30  ;;  %v3836_v35 = vmul.f32 %v6315_v50, %v3825_v38  ;;  %v3837_v63 = vmul.f32 %v6315_v50, %v3826_v26  ;;  %v3843_v23 = vld [vmem:[%s9495_s19 + $0x7] sm:$0xff]  ;;  %v3844_v16 = vld [vmem:[%s9495_s19 + $0xf] sm:$0xff] }
 0x4e0   : >> { %v3838_v32 = vmul.f32 %v6315_v50, %v3827_v6  ;;  %v3845_v59 = vld [vmem:[%s9495_s19 + $0x17] sm:$0xff]  ;;  %v3846_v61 = vld [vmem:[%s9495_s19 + $0x1f] sm:$0xf]  ;;  %v3855_v62 = vmul.f32 %v6317_v9, %v3843_v23  ;;  %v3856_v33 = vmul.f32 %v6317_v9, %v3844_v16  ;;  %v3863_v7 = vld [vmem:[%s9495_s19 + $0x8] sm:$0xff] }
 0x4e1   : >> { %v3857_v47 = vmul.f32 %v6317_v9, %v3845_v59  ;;  %v3858_v28 = vmul.f32 %v6317_v9, %v3846_v61  ;;  %v3864_v57 = vld [vmem:[%s9495_s19 + $0x10] sm:$0xff]  ;;  %v3865_v13 = vld [vmem:[%s9495_s19 + $0x18] sm:$0xff]  ;;  %v3866_v4 = vld [vmem:[%s9495_s19 + $0x20] sm:$0xf]  ;;  %v3875_v15 = vmul.f32 %v6319_v29, %v3863_v7 }
 0x4e2   : >> { %v3859_v58 = vadd.f32 %v3855_v62, %v3835_v56  ;;  %v3860_v18 = vadd.f32 %v3856_v33, %v3836_v35  ;;  %v3876_v39 = vmul.f32 %v6319_v29, %v3864_v57  ;;  %v3877_v11 = vmul.f32 %v6319_v29, %v3865_v13  ;;  %v3883_v12 = vld [vmem:[%s9495_s19 + $0x9] sm:$0xff]  ;;  %v3884_v22 = vld [vmem:[%s9495_s19 + $0x11] sm:$0xff]  ;;  %v3885_v25 = vld [vmem:[%s9495_s19 + $0x19] sm:$0xff] }
 0x4e3   : >> { %v3861_v19 = vadd.f32 %v3857_v47, %v3837_v63  ;;  %v3862_v46 = vadd.f32 %v3858_v28, %v3838_v32  ;;  %v3878_v10 = vmul.f32 %v6319_v29, %v3866_v4  ;;  %v3886_v49 = vld [vmem:[%s9495_s19 + $0x21] sm:$0xf]  ;;  %v3895_v14 = vmul.f32 %v6321_v36, %v3883_v12  ;;  %v3903_v40 = vld [vmem:[%s9495_s19 + $0xa] sm:$0xff]  ;;  %v3904_v24 = vld [vmem:[%s9495_s19 + $0x12] sm:$0xff] }
 0x4e4   : >> { %v3879_v2 = vadd.f32 %v3875_v15, %v3859_v58  ;;  %v3880_v5 = vadd.f32 %v3876_v39, %v3860_v18  ;;  %v3896_v8 = vmul.f32 %v6321_v36, %v3884_v22  ;;  %v3897_v53 = vmul.f32 %v6321_v36, %v3885_v25  ;;  %v3905_v34 = vld [vmem:[%s9495_s19 + $0x1a] sm:$0xff]  ;;  %v3906_v42 = vld [vmem:[%s9495_s19 + $0x22] sm:$0xf]  ;;  %v6324_v0 = vld [vmem:[%s9495_s19 + $0x2e] sm:$0xff] }
 0x4e5   : >> { %v3881_v1 = vadd.f32 %v3877_v11, %v3861_v19  ;;  %v3882_v54 = vadd.f32 %v3878_v10, %v3862_v46  ;;  %v3898_v55 = vmul.f32 %v6321_v36, %v3886_v49  ;;  %v3915_v43 = vmul.f32 %v6323_v17, %v3903_v40  ;;  %v6325_v37 = vld [vmem:[%s9495_s19 + $0x36] sm:$0xff]  ;;  %v6326_v44 = vld [vmem:[%s9495_s19 + $0x3e] sm:$0xff]  ;;  %v6327_v27 = vld [vmem:[%s9495_s19 + $0x46] sm:$0xf] }
 0x4e6   : >> { %v3899_v21 = vadd.f32 %v3895_v14, %v3879_v2  ;;  %v3900_v45 = vadd.f32 %v3896_v8, %v3880_v5  ;;  %v3916_v41 = vmul.f32 %v6323_v17, %v3904_v24  ;;  %v3917_v48 = vmul.f32 %v6323_v17, %v3905_v34  ;;  %v6330_v51 = vld [vmem:[%s9495_s19 + $0x2f] sm:$0xff]  ;;  %v6331_v9 = vld [vmem:[%s9495_s19 + $0x37] sm:$0xff]  ;;  %v6332_v29 = vld [vmem:[%s9495_s19 + $0x3f] sm:$0xff] }
 0x4e7   : >> { %v3901_v31 = vadd.f32 %v3897_v53, %v3881_v1  ;;  %v3902_v52 = vadd.f32 %v3898_v55, %v3882_v54  ;;  %v3918_v20 = vmul.f32 %v6323_v17, %v3906_v42  ;;  %v3938_v50 = vmul.f32 %v6329_v3, %v6324_v0  ;;  %v6333_v6 = vld [vmem:[%s9495_s19 + $0x47] sm:$0xf]  ;;  %v6336_v56 = vld [vmem:[%s9495_s19 + $0x30] sm:$0xff]  ;;  %v6337_v59 = vld [vmem:[%s9495_s19 + $0x38] sm:$0xff] }
 0x4e8   : >> { %v3919_v30 = vadd.f32 %v3915_v43, %v3899_v21  ;;  %v3920_v38 = vadd.f32 %v3916_v41, %v3900_v45  ;;  %v3939_v26 = vmul.f32 %v6329_v3, %v6325_v37  ;;  %v3940_v36 = vmul.f32 %v6329_v3, %v6326_v44  ;;  %v6341_v35 = vld [vmem:[%s10267_s9 + $0x7] ss:$0 sm:$0xff]  ;;  %v6339_v47 = vld [vmem:[%s9495_s19 + $0x48] sm:$0xf]  ;;  %v6342_v28 = vld [vmem:[%s9495_s19 + $0x31] sm:$0xff] }
 0x4e9   : >> { %v3921_v63 = vadd.f32 %v3917_v48, %v3901_v31  ;;  %v3922_v23 = vadd.f32 %v3918_v20, %v3902_v52  ;;  %v3941_v16 = vmul.f32 %v6329_v3, %v6327_v27  ;;  %v3958_v32 = vmul.f32 %v6335_v60, %v6330_v51  ;;  %v6338_v61 = vld [vmem:[%s9495_s19 + $0x40] sm:$0xff]  ;;  %v6347_v57 = vld [vmem:[%s10267_s9 + $0x8] ss:$0 sm:$0xff]  ;;  %v6345_v3 = vld [vmem:[%s9495_s19 + $0x49] sm:$0xf] }
 0x4ea   : >> { %v3942_v62 = vadd.f32 %v3938_v50, %v3919_v30  ;;  %v3943_v33 = vadd.f32 %v3939_v26, %v3920_v38  ;;  %v3959_v7 = vmul.f32 %v6335_v60, %v6331_v9  ;;  %v3960_v17 = vmul.f32 %v6335_v60, %v6332_v29  ;;  %v6343_v18 = vld [vmem:[%s9495_s19 + $0x39] sm:$0xff]  ;;  %v6344_v39 = vld [vmem:[%s9495_s19 + $0x41] sm:$0xff]  ;;  %v6353_v46 = vld [vmem:[%s10267_s9 + $0x9] ss:$0 sm:$0xff] }
 0x4eb   : >> { %v3944_v13 = vadd.f32 %v3940_v36, %v3921_v63  ;;  %v3945_v4 = vadd.f32 %v3941_v16, %v3922_v23  ;;  %v3961_v15 = vmul.f32 %v6335_v60, %v6333_v6  ;;  %v3978_v58 = vmul.f32 %v6341_v35, %v6336_v56  ;;  %v6348_v19 = vld [vmem:[%s9495_s19 + $0x32] sm:$0xff]  ;;  %v6349_v24 = vld [vmem:[%s9495_s19 + $0x3a] sm:$0xff]  ;;  %v6350_v2 = vld [vmem:[%s9495_s19 + $0x42] sm:$0xff] }
 0x4ec   : >> { %v3962_v11 = vadd.f32 %v3958_v32, %v3942_v62  ;;  %v3963_v12 = vadd.f32 %v3959_v7, %v3943_v33  ;;  %v3979_v22 = vmul.f32 %v6341_v35, %v6337_v59  ;;  %v3980_v25 = vmul.f32 %v6341_v35, %v6338_v61  ;;  %v6351_v42 = vld [vmem:[%s9495_s19 + $0x4a] sm:$0xf]  ;;  %v6354_v0 = vld [vmem:[%s9495_s19 + $0x56] sm:$0xff]  ;;  %v6355_v44 = vld [vmem:[%s9495_s19 + $0x5e] sm:$0xff] }
 0x4ed   : >> { %v3964_v10 = vadd.f32 %v3960_v17, %v3944_v13  ;;  %v3965_v49 = vadd.f32 %v3961_v15, %v3945_v4  ;;  %v3981_v14 = vmul.f32 %v6341_v35, %v6339_v47  ;;  %v3998_v40 = vmul.f32 %v6347_v57, %v6342_v28  ;;  %v6359_v1 = vld [vmem:[%s10267_s9 + $0xa] ss:$0 sm:$0xff]  ;;  %v6357_v51 = vld [vmem:[%s9495_s19 + $0x6e] sm:$0xf]  ;;  %v6360_v60 = vld [vmem:[%s9495_s19 + $0x57] sm:$0xff] }
 0x4ee   : >> { %v3982_v5 = vadd.f32 %v3978_v58, %v3962_v11  ;;  %v3983_v8 = vadd.f32 %v3979_v22, %v3963_v12  ;;  %v3999_v53 = vmul.f32 %v6347_v57, %v6343_v18  ;;  %v4000_v34 = vmul.f32 %v6347_v57, %v6344_v39  ;;  %v6356_v21 = vld [vmem:[%s9495_s19 + $0x66] sm:$0xff]  ;;  %v6363_v56 = vld [vmem:[%s9495_s19 + $0x6f] sm:$0xf]  ;;  %v6366_v35 = vld [vmem:[%s9495_s19 + $0x58] sm:$0xff] }
 0x4ef   : >> { %v3984_v54 = vadd.f32 %v3980_v25, %v3964_v10  ;;  %v3985_v55 = vadd.f32 %v3981_v14, %v3965_v49  ;;  %v4001_v43 = vmul.f32 %v6347_v57, %v6345_v3  ;;  %v4018_v37 = vmul.f32 %v6353_v46, %v6348_v19  ;;  %v6365_v31 = vld [vmem:[%s10267_s9 + $0xb] ss:$0 sm:$0xff]  ;;  %v6361_v29 = vld [vmem:[%s9495_s19 + $0x5f] sm:$0xff]  ;;  %v6371_v63 = vld [vmem:[%s10267_s9 + $0xc] ss:$0 sm:$0xff] }
 0x4f0   : >> { %v4002_v45 = vadd.f32 %v3998_v40, %v3982_v5  ;;  %v4003_v41 = vadd.f32 %v3999_v53, %v3983_v8  ;;  %v4019_v48 = vmul.f32 %v6353_v46, %v6349_v24  ;;  %v4020_v27 = vmul.f32 %v6353_v46, %v6350_v2  ;;  %v6362_v30 = vld [vmem:[%s9495_s19 + $0x67] sm:$0xff]  ;;  %v6369_v28 = vld [vmem:[%s9495_s19 + $0x70] sm:$0xf]  ;;  %v6372_v57 = vld [vmem:[%s9495_s19 + $0x59] sm:$0xff] }
 0x4f1   : >> { %v4004_v52 = vadd.f32 %v4000_v34, %v3984_v54  ;;  %v4005_v20 = vadd.f32 %v4001_v43, %v3985_v55  ;;  %v4021_v50 = vmul.f32 %v6353_v46, %v6351_v42  ;;  %v4041_v9 = vmul.f32 %v6359_v1, %v6354_v0  ;;  %v6367_v61 = vld [vmem:[%s9495_s19 + $0x60] sm:$0xff]  ;;  %v6368_v62 = vld [vmem:[%s9495_s19 + $0x68] sm:$0xff]  ;;  %v6375_v19 = vld [vmem:[%s9495_s19 + $0x71] sm:$0xf] }
 0x4f2   : >> { %v4022_v38 = vadd.f32 %v4018_v37, %v4002_v45  ;;  %v4023_v26 = vadd.f32 %v4019_v48, %v4003_v41  ;;  %v4042_v36 = vmul.f32 %v6359_v1, %v6355_v44  ;;  %v4043_v6 = vmul.f32 %v6359_v1, %v6356_v21  ;;  %v6377_v13 = vld [vmem:[%s10267_s9 + $0xd] ss:$0 sm:$0xff]  ;;  %v6373_v39 = vld [vmem:[%s9495_s19 + $0x61] sm:$0xff]  ;;  %v6383_v10 = vld [vmem:[%s10267_s9 + $0xe] ss:$0 sm:$0xff] }
 0x4f3   : >> { %v4024_v23 = vadd.f32 %v4020_v27, %v4004_v52  ;;  %v4025_v16 = vadd.f32 %v4021_v50, %v4005_v20  ;;  %v4044_v32 = vmul.f32 %v6359_v1, %v6357_v51  ;;  %v4061_v59 = vmul.f32 %v6365_v31, %v6360_v60  ;;  %v6374_v11 = vld [vmem:[%s9495_s19 + $0x69] sm:$0xff]  ;;  %v6378_v46 = vld [vmem:[%s9495_s19 + $0x5a] sm:$0xff]  ;;  %v6381_v0 = vld [vmem:[%s9495_s19 + $0x72] sm:$0xf] }
 0x4f4   : >> { %v4045_v33 = vadd.f32 %v4041_v9, %v4022_v38  ;;  %v4046_v7 = vadd.f32 %v4042_v36, %v4023_v26  ;;  %v4062_v17 = vmul.f32 %v6365_v31, %v6361_v29  ;;  %v4063_v47 = vmul.f32 %v6365_v31, %v6362_v30  ;;  %v6379_v2 = vld [vmem:[%s9495_s19 + $0x62] sm:$0xff]  ;;  %v6380_v5 = vld [vmem:[%s9495_s19 + $0x6a] sm:$0xff]  ;;  %v6387_v60 = vld [vmem:[%s9495_s19 + $0x96] sm:$0xf] }
 0x4f5   : >> { %v4047_v4 = vadd.f32 %v4043_v6, %v4024_v23  ;;  %v4048_v15 = vadd.f32 %v4044_v32, %v4025_v16  ;;  %v4064_v58 = vmul.f32 %v6365_v31, %v6363_v56  ;;  %v4081_v18 = vmul.f32 %v6371_v63, %v6366_v35  ;;  %v6384_v1 = vld [vmem:[%s9495_s19 + $0x7e] sm:$0xff]  ;;  %v6389_v54 = vld [vmem:[%s10267_s9 + $0xf] ss:$0 sm:$0xff]  ;;  %v6385_v21 = vld [vmem:[%s9495_s19 + $0x86] sm:$0xff] }
 0x4f6   : >> { %v4065_v12 = vadd.f32 %v4061_v59, %v4045_v33  ;;  %v4066_v22 = vadd.f32 %v4062_v17, %v4046_v7  ;;  %v4082_v25 = vmul.f32 %v6371_v63, %v6367_v61  ;;  %v4083_v3 = vmul.f32 %v6371_v63, %v6368_v62  ;;  %v6386_v45 = vld [vmem:[%s9495_s19 + $0x8e] sm:$0xff]  ;;  %v6390_v31 = vld [vmem:[%s9495_s19 + $0x7f] sm:$0xff]  ;;  %v6393_v35 = vld [vmem:[%s9495_s19 + $0x97] sm:$0xf] }
 0x4f7   : >> { %v4067_v49 = vadd.f32 %v4063_v47, %v4047_v4  ;;  %v4068_v14 = vadd.f32 %v4064_v58, %v4048_v15  ;;  %v4084_v40 = vmul.f32 %v6371_v63, %v6369_v28  ;;  %v4101_v24 = vmul.f32 %v6377_v13, %v6372_v57  ;;  %v6395_v52 = vld [vmem:[%s10267_s9 + $0x10] ss:$0 sm:$0xff]  ;;  %v6391_v30 = vld [vmem:[%s9495_s19 + $0x87] sm:$0xff]  ;;  %v6401_v23 = vld [vmem:[%s10267_s9 + $0x11] ss:$0 sm:$0xff] }
 0x4f8   : >> { %v4085_v8 = vadd.f32 %v4081_v18, %v4065_v12  ;;  %v4086_v53 = vadd.f32 %v4082_v25, %v4066_v22  ;;  %v4102_v34 = vmul.f32 %v6377_v13, %v6373_v39  ;;  %v4103_v42 = vmul.f32 %v6377_v13, %v6374_v11  ;;  %v6392_v38 = vld [vmem:[%s9495_s19 + $0x8f] sm:$0xff]  ;;  %v6396_v63 = vld [vmem:[%s9495_s19 + $0x80] sm:$0xff]  ;;  %v6399_v57 = vld [vmem:[%s9495_s19 + $0x98] sm:$0xf] }
 0x4f9   : >> { %v4087_v55 = vadd.f32 %v4083_v3, %v4067_v49  ;;  %v4088_v43 = vadd.f32 %v4084_v40, %v4068_v14  ;;  %v4104_v37 = vmul.f32 %v6377_v13, %v6375_v19  ;;  %v4121_v44 = vmul.f32 %v6383_v10, %v6378_v46  ;;  %v6397_v62 = vld [vmem:[%s9495_s19 + $0x88] sm:$0xff]  ;;  %v6398_v33 = vld [vmem:[%s9495_s19 + $0x90] sm:$0xff]  ;;  %v6405_v46 = vld [vmem:[%s9495_s19 + $0x99] sm:$0xf] }
 0x4fa   : >> { %v4105_v41 = vadd.f32 %v4101_v24, %v4085_v8  ;;  %v4106_v48 = vadd.f32 %v4102_v34, %v4086_v53  ;;  %v4122_v27 = vmul.f32 %v6383_v10, %v6379_v2  ;;  %v4123_v51 = vmul.f32 %v6383_v10, %v6380_v5  ;;  %v6402_v13 = vld [vmem:[%s9495_s19 + $0x81] sm:$0xff]  ;;  %v6407_v4 = vld [vmem:[%s10267_s9 + $0x12] ss:$0 sm:$0xff]  ;;  %v6403_v11 = vld [vmem:[%s9495_s19 + $0x89] sm:$0xff] }
 0x4fb   : >> { %v4107_v20 = vadd.f32 %v4103_v42, %v4087_v55  ;;  %v4108_v50 = vadd.f32 %v4104_v37, %v4088_v43  ;;  %v4124_v9 = vmul.f32 %v6383_v10, %v6381_v0  ;;  %v4144_v29 = vmul.f32 %v6389_v54, %v6384_v1  ;;  %v6404_v12 = vld [vmem:[%s9495_s19 + $0x91] sm:$0xff]  ;;  %v6408_v10 = vld [vmem:[%s9495_s19 + $0x82] sm:$0xff]  ;;  %v6411_v1 = vld [vmem:[%s9495_s19 + $0x9a] sm:$0xf] }
 0x4fc   : >> { %v4125_v26 = vadd.f32 %v4121_v44, %v4105_v41  ;;  %v4126_v36 = vadd.f32 %v4122_v27, %v4106_v48  ;;  %v4145_v6 = vmul.f32 %v6389_v54, %v6385_v21  ;;  %v4146_v56 = vmul.f32 %v6389_v54, %v6386_v45  ;;  %v6413_v49 = vld [vmem:[%s10267_s9 + $0x13] ss:$0 sm:$0xff]  ;;  %v6409_v5 = vld [vmem:[%s9495_s19 + $0x8a] sm:$0xff]  ;;  %v6419_v55 = vld [vmem:[%s10267_s9 + $0x14] ss:$0 sm:$0xff] }
 0x4fd   : >> { %v4127_v16 = vadd.f32 %v4123_v51, %v4107_v20  ;;  %v4128_v32 = vadd.f32 %v4124_v9, %v4108_v50  ;;  %v4147_v59 = vmul.f32 %v6389_v54, %v6387_v60  ;;  %v4164_v61 = vmul.f32 %v6395_v52, %v6390_v31  ;;  %v6410_v8 = vld [vmem:[%s9495_s19 + $0x92] sm:$0xff]  ;;  %v6414_v54 = vld [vmem:[%s9495_s19 + $0xa6] sm:$0xff]  ;;  %v6417_v31 = vld [vmem:[%s9495_s19 + $0xbe] sm:$0xf] }
 0x4fe   : >> { %v4148_v7 = vadd.f32 %v4144_v29, %v4125_v26  ;;  %v4149_v17 = vadd.f32 %v4145_v6, %v4126_v36  ;;  %v4165_v47 = vmul.f32 %v6395_v52, %v6391_v30  ;;  %v4166_v28 = vmul.f32 %v6395_v52, %v6392_v38  ;;  %v6415_v45 = vld [vmem:[%s9495_s19 + $0xae] sm:$0xff]  ;;  %v6416_v41 = vld [vmem:[%s9495_s19 + $0xb6] sm:$0xff] }
 0x4ff   : >> { %v4150_v15 = vadd.f32 %v4146_v56, %v4127_v16  ;;  %v4151_v58 = vadd.f32 %v4147_v59, %v4128_v32  ;;  %v4167_v18 = vmul.f32 %v6395_v52, %v6393_v35  ;;  %v4184_v39 = vmul.f32 %v6401_v23, %v6396_v63  ;;  %v6420_v52 = vld [vmem:[%s9495_s19 + $0xa7] sm:$0xff]  ;;  %v6425_v20 = vld [vmem:[%s10267_s9 + $0x15] ss:$0 sm:$0xff]  ;;  %v6422_v26 = vld [vmem:[%s9495_s19 + $0xb7] sm:$0xff] }
 0x500   : >> { %v4168_v22 = vadd.f32 %v4164_v61, %v4148_v7  ;;  %v4169_v25 = vadd.f32 %v4165_v47, %v4149_v17  ;;  %v4185_v3 = vmul.f32 %v6401_v23, %v6397_v62  ;;  %v4186_v19 = vmul.f32 %v6401_v23, %v6398_v33  ;;  %v6421_v38 = vld [vmem:[%s9495_s19 + $0xaf] sm:$0xff]  ;;  %v6423_v63 = vld [vmem:[%s9495_s19 + $0xbf] sm:$0xf] }
 0x501   : >> { %v4170_v14 = vadd.f32 %v4166_v28, %v4150_v15  ;;  %v4171_v40 = vadd.f32 %v4167_v18, %v4151_v58  ;;  %v4187_v24 = vmul.f32 %v6401_v23, %v6399_v57  ;;  %v4204_v2 = vmul.f32 %v6407_v4, %v6402_v13  ;;  %v6426_v23 = vld [vmem:[%s9495_s19 + $0xa8] sm:$0xff]  ;;  %v6431_v16 = vld [vmem:[%s10267_s9 + $0x16] ss:$0 sm:$0xff]  ;;  %v6428_v7 = vld [vmem:[%s9495_s19 + $0xb8] sm:$0xff] }
 0x502   : >> { %v4188_v53 = vadd.f32 %v4184_v39, %v4168_v22  ;;  %v4189_v34 = vadd.f32 %v4185_v3, %v4169_v25  ;;  %v4205_v42 = vmul.f32 %v6407_v4, %v6403_v11  ;;  %v4206_v0 = vmul.f32 %v6407_v4, %v6404_v12  ;;  %v6427_v33 = vld [vmem:[%s9495_s19 + $0xb0] sm:$0xff]  ;;  %v6429_v13 = vld [vmem:[%s9495_s19 + $0xc0] sm:$0xf] }
 0x503   : >> { %v4190_v43 = vadd.f32 %v4186_v19, %v4170_v14  ;;  %v4191_v37 = vadd.f32 %v4187_v24, %v4171_v40  ;;  %v4207_v44 = vmul.f32 %v6407_v4, %v6405_v46  ;;  %v4224_v21 = vmul.f32 %v6413_v49, %v6408_v10  ;;  %v6432_v4 = vld [vmem:[%s9495_s19 + $0xa9] sm:$0xff]  ;;  %v6437_v15 = vld [vmem:[%s10267_s9 + $0x17] ss:$0 sm:$0xff]  ;;  %v6434_v22 = vld [vmem:[%s9495_s19 + $0xb9] sm:$0xff] }
 0x504   : >> { %v4208_v48 = vadd.f32 %v4204_v2, %v4188_v53  ;;  %v4209_v27 = vadd.f32 %v4205_v42, %v4189_v34  ;;  %v4225_v51 = vmul.f32 %v6413_v49, %v6409_v5  ;;  %v4226_v60 = vmul.f32 %v6413_v49, %v6410_v8  ;;  %v6433_v12 = vld [vmem:[%s9495_s19 + $0xb1] sm:$0xff]  ;;  %v6435_v10 = vld [vmem:[%s9495_s19 + $0xc1] sm:$0xf] }
 0x505   : >> { %v4210_v50 = vadd.f32 %v4206_v0, %v4190_v43  ;;  %v4211_v9 = vadd.f32 %v4207_v44, %v4191_v37  ;;  %v4227_v29 = vmul.f32 %v6413_v49, %v6411_v1  ;;  %v4247_v30 = vmul.f32 %v6419_v55, %v6414_v54  ;;  %v6438_v49 = vld [vmem:[%s9495_s19 + $0xaa] sm:$0xff]  ;;  %v6443_v14 = vld [vmem:[%s10267_s9 + $0x18] ss:$0 sm:$0xff]  ;;  %v6440_v53 = vld [vmem:[%s9495_s19 + $0xba] sm:$0xff] }
 0x506   : >> { %v4228_v36 = vadd.f32 %v4224_v21, %v4208_v48  ;;  %v4229_v6 = vadd.f32 %v4225_v51, %v4209_v27  ;;  %v4248_v56 = vmul.f32 %v6419_v55, %v6415_v45  ;;  %v4249_v35 = vmul.f32 %v6419_v55, %v6416_v41  ;;  %v6439_v8 = vld [vmem:[%s9495_s19 + $0xb2] sm:$0xff]  ;;  %v6441_v54 = vld [vmem:[%s9495_s19 + $0xc2] sm:$0xf]  ;;  %s9667_s19 = smov (%p3818_p10), 0  }
 0x507   : >> { %v4230_v32 = vadd.f32 %v4226_v60, %v4210_v50  ;;  %v4231_v59 = vadd.f32 %v4227_v29, %v4211_v9  ;;  %v4250_v61 = vmul.f32 %v6419_v55, %v6417_v31  ;;  %v4267_v62 = vmul.f32 %v6425_v20, %v6420_v52 }
 0x508   : >> { %v4251_v17 = vadd.f32 %v4247_v30, %v4228_v36  ;;  %v4252_v47 = vadd.f32 %v4248_v56, %v4229_v6  ;;  %v4268_v28 = vmul.f32 %v6425_v20, %v6421_v38  ;;  %v4269_v57 = vmul.f32 %v6425_v20, %v6422_v26 }
 0x509   : >> { %v4253_v58 = vadd.f32 %v4249_v35, %v4230_v32  ;;  %v4254_v18 = vadd.f32 %v4250_v61, %v4231_v59  ;;  %v4270_v39 = vmul.f32 %v6425_v20, %v6423_v63  ;;  %v4287_v11 = vmul.f32 %v6431_v16, %v6426_v23 }
 0x50a   : >> { %v4271_v25 = vadd.f32 %v4267_v62, %v4251_v17  ;;  %v4272_v3 = vadd.f32 %v4268_v28, %v4252_v47  ;;  %v4288_v19 = vmul.f32 %v6431_v16, %v6427_v33  ;;  %v4289_v46 = vmul.f32 %v6431_v16, %v6428_v7 }
 0x50b   : >> { %v4273_v40 = vadd.f32 %v4269_v57, %v4253_v58  ;;  %v4274_v24 = vadd.f32 %v4270_v39, %v4254_v18  ;;  %v4290_v2 = vmul.f32 %v6431_v16, %v6429_v13  ;;  %v4307_v5 = vmul.f32 %v6437_v15, %v6432_v4 }
 0x50c   : >> { %v4291_v34 = vadd.f32 %v4287_v11, %v4271_v25  ;;  %v4292_v42 = vadd.f32 %v4288_v19, %v4272_v3  ;;  %v4308_v0 = vmul.f32 %v6437_v15, %v6433_v12  ;;  %v4309_v1 = vmul.f32 %v6437_v15, %v6434_v22 }
 0x50d   : >> { %v4293_v55 = vadd.f32 %v4289_v46, %v4273_v40  ;;  %v4294_v43 = vadd.f32 %v4290_v2, %v4274_v24  ;;  %v4310_v37 = vmul.f32 %v6437_v15, %v6435_v10  ;;  %v4327_v44 = vmul.f32 %v6443_v14, %v6438_v49  ;;  %3820 = sbr.rel (!%p3818_p10) target bundleno = 1240 (0x4d8), region = 500 }
 0x50e   : >> { %v4311_v21 = vadd.f32 %v4307_v5, %v4291_v34  ;;  %v4312_v45 = vadd.f32 %v4308_v0, %v4292_v42  ;;  %v4328_v41 = vmul.f32 %v6443_v14, %v6439_v8  ;;  %v4329_v48 = vmul.f32 %v6443_v14, %v6440_v53 }
 0x50f   : >> { %v4313_v27 = vadd.f32 %v4309_v1, %v4293_v55  ;;  %v4314_v51 = vadd.f32 %v4310_v37, %v4294_v43  ;;  %v4330_v60 = vmul.f32 %v6443_v14, %v6441_v54 }
 0x510   : >> { %v4331_v31 = vadd.f32 %v4327_v44, %v4311_v21  ;;  %v4332_v52 = vadd.f32 %v4328_v41, %v4312_v45 }
 0x511   : >> { %v4333_v20 = vadd.f32 %v4329_v48, %v4313_v27  ;;  %v4334_v50 = vadd.f32 %v4330_v60, %v4314_v51 }
 0x512   : >> { %4337 = vst [vmem:[%s4336_s23] sm:$0xff] %v4331_v31  ;;  %4338 = vst [vmem:[%s4336_s23 + $0x8] sm:$0xff] %v4332_v52 }
 0x513   : >> { %4339 = vst [vmem:[%s4336_s23 + $0x10] sm:$0xff] %v4333_v20  ;;  %4340 = vst [vmem:[%s4336_s23 + $0x18] sm:$0xf] %v4334_v50 }
 0x514 LB: >> { %v4378_v9 = vld [vmem:[%s10268_s10] sm:$0xff]  ;;  %v4379_v29 = vld [vmem:[%s10268_s10 + $0x8] sm:$0xff]  ;;  %v4380_v30 = vld [vmem:[%s10268_s10 + $0x10] sm:$0xff]  ;;  %s6445_s25 = smul.u32 224, %s7719_s19  ;;  %v7753_v59 = vmov 0.0   ;;  %s7719_s19 = sphi %s9667_s19, %s4346_s19  }
 0x515   : >> { %v7281_v38 = vpack.c.bf16 %v4379_v29, %v4378_v9  ;;  %v4381_v26 = vld [vmem:[%s10268_s10 + $0x18] sm:$0xff]  ;;  %v4382_v6 = vld [vmem:[%s10268_s10 + $0x20] sm:$0xff]  ;;  %v4383_v56 = vld [vmem:[%s10268_s10 + $0x28] sm:$0xff]  ;;  %s6447_s15 = smul.u32 280, %s7719_s19  ;;  %s4346_s19 = sadd.s32 1, %s7719_s19  }
 0x516   : >> { %v7285_v36 = vpack.c.bf16 %v4381_v26, %v4380_v30  ;;  %v7289_v35 = vpack.c.bf16 %v4383_v56, %v4382_v6  ;;  %s9692_s28 = scalar_lea.vmem [#allocation7], %s6445_s25  ;;  %v4384_v16 = vld [vmem:[%s10268_s10 + $0x30] sm:$0xff]  ;;  %v4385_v32 = vld [vmem:[%s10268_s10 + $0x38] sm:$0xff]  ;;  %v4386_v62 = vld [vmem:[%s10268_s10 + $0x40] sm:$0xff]  ;;  %p4343_p12 = scmp.ge.s32.totalorder %s4346_s19, 4  }
 0x517   : >> { %7282 = vmatprep.subr.bf16.mxu0 %v7281_v38  ;;  %7387 = vmatprep.subr.bf16.mxu1 %v7281_v38  ;;  %s9702_s21 = scalar_lea.vmem [#allocation8], %s6447_s15  ;;  %v7293_v61 = vpack.c.bf16 %v4385_v32, %v4384_v16  ;;  %v4387_v33 = vld [vmem:[%s10268_s10 + $0x48] sm:$0xff]  ;;  %v4388_v17 = vld [vmem:[%s10268_s10 + $0x50] sm:$0xff]  ;;  %v4389_v47 = vld [vmem:[%s10268_s10 + $0x58] sm:$0xff] }
 0x518   : >> { %7284 = vmatpush3.bf16.msra.mxu0 %v7281_v38  ;;  %7395 = vmatpush3.bf16.msra.mxu1 %v7281_v38  ;;  %6448 = vst [vmem:[%s9702_s21 + $0x50] sm:$0xff] %v7753_v59  ;;  %6453 = vst [vmem:[%s9702_s21 + $0x78] sm:$0xff] %v7753_v59  ;;  %v7297_v7 = vpack.c.bf16 %v4387_v33, %v4386_v62  ;;  %v7301_v28 = vpack.c.bf16 %v4389_v47, %v4388_v17  ;;  %v4390_v57 = vld [vmem:[%s10268_s10 + $0x60] sm:$0xff]  ;;  %v4391_v13 = vld [vmem:[%s10268_s10 + $0x68] sm:$0xff] }
 0x519   : >> { %7286 = vmatprep.subr.bf16.mxu0 %v7285_v36  ;;  %7388 = vmatprep.subr.bf16.mxu1 %v7285_v36  ;;  %6458 = vst [vmem:[%s9702_s21 + $0xa0] sm:$0xff] %v7753_v59  ;;  %6463 = vst [vmem:[%s9702_s21 + $0xc8] sm:$0xff] %v7753_v59  ;;  %v7305_v4 = vpack.c.bf16 %v4391_v13, %v4390_v57  ;;  %v4392_v15 = vld [vmem:[%s10268_s10 + $0x70] sm:$0xff]  ;;  %v4393_v58 = vld [vmem:[%s10268_s10 + $0x78] sm:$0xff] }
 0x51a   : >> { %v4350_v63 = vld [vmem:[%s9692_s28] sm:$0xff]  ;;  %v4364_v23 = vld [vmem:[%s9692_s28 + $0x70] sm:$0xff]  ;;  %6468 = vst [vmem:[%s9702_s21 + $0xf0] sm:$0xff] %v7753_v59  ;;  %6473 = vst [vmem:[%s9702_s21 + $0x118] sm:$0xff] %v7753_v59  ;;  %v7309_v18 = vpack.c.bf16 %v4393_v58, %v4392_v15 }
 0x51b   : >> { %7079 = vmatprep.mubr.f32.mxu0 %v4350_v63  ;;  %6478 = vst [vmem:[%s9702_s21 + $0x140] sm:$0xff] %v7753_v59  ;;  %7100 = vmatprep.mubr.f32.mxu1 %v4364_v23  ;;  %v4351_v39 = vld [vmem:[%s9692_s28 + $0x8] sm:$0xff]  ;;  %v4365_v11 = vld [vmem:[%s9692_s28 + $0x78] sm:$0xff]  ;;  %v4352_v12 = vld [vmem:[%s9692_s28 + $0x10] sm:$0xff] }
 0x51c   : >> { %7288 = vmatpush3.bf16.msra.mxu0 %v7285_v36  ;;  %7396 = vmatpush3.bf16.msra.mxu1 %v7285_v36  ;;  %v4366_v22 = vld [vmem:[%s9692_s28 + $0x80] sm:$0xff]  ;;  %v4353_v25 = vld [vmem:[%s9692_s28 + $0x18] sm:$0xff]  ;;  %v4367_v3 = vld [vmem:[%s9692_s28 + $0x88] sm:$0xff] }
 0x51d   : >> { %7290 = vmatprep.subr.bf16.mxu0 %v7289_v35  ;;  %7389 = vmatprep.subr.bf16.mxu1 %v7289_v35  ;;  %v4354_v19 = vld [vmem:[%s9692_s28 + $0x20] sm:$0xff]  ;;  %v4368_v46 = vld [vmem:[%s9692_s28 + $0x90] sm:$0xff]  ;;  %v4355_v10 = vld [vmem:[%s9692_s28 + $0x28] sm:$0xff] }
 0x51e   : >> { %v4369_v49 = vld [vmem:[%s9692_s28 + $0x98] sm:$0xff]  ;;  %v4356_v14 = vld [vmem:[%s9692_s28 + $0x30] sm:$0xff]  ;;  %v4370_v40 = vld [vmem:[%s9692_s28 + $0xa0] sm:$0xff] }
 0x51f   : >> { %v4357_v24 = vld [vmem:[%s9692_s28 + $0x38] sm:$0xff]  ;;  %v4371_v2 = vld [vmem:[%s9692_s28 + $0xa8] sm:$0xff]  ;;  %v4358_v5 = vld [vmem:[%s9692_s28 + $0x40] sm:$0xff] }
 0x520   : >> { %7292 = vmatpush3.bf16.msra.mxu0 %v7289_v35  ;;  %7397 = vmatpush3.bf16.msra.mxu1 %v7289_v35  ;;  %v4372_v8 = vld [vmem:[%s9692_s28 + $0xb0] sm:$0xff]  ;;  %v4359_v53 = vld [vmem:[%s9692_s28 + $0x48] sm:$0xff]  ;;  %v4373_v34 = vld [vmem:[%s9692_s28 + $0xb8] sm:$0xff] }
 0x521   : >> { %7294 = vmatprep.subr.bf16.mxu0 %v7293_v61  ;;  %7390 = vmatprep.subr.bf16.mxu1 %v7293_v61  ;;  %v4360_v42 = vld [vmem:[%s9692_s28 + $0x50] sm:$0xff]  ;;  %v4374_v0 = vld [vmem:[%s9692_s28 + $0xc0] sm:$0xff]  ;;  %v4361_v1 = vld [vmem:[%s9692_s28 + $0x58] sm:$0xff] }
 0x522   : >> { %v4375_v54 = vld [vmem:[%s9692_s28 + $0xc8] sm:$0xff]  ;;  %v4362_v55 = vld [vmem:[%s9692_s28 + $0x60] sm:$0xff]  ;;  %v4376_v43 = vld [vmem:[%s9692_s28 + $0xd0] sm:$0xff] }
 0x523   : >> { %v4363_v37 = vld [vmem:[%s9692_s28 + $0x68] sm:$0xff]  ;;  %v4377_v44 = vld [vmem:[%s9692_s28 + $0xd8] sm:$0xff]  ;;  %v9764_v21 = vld [vmem:[%s10269_s11] ss:$0 sm:$0xff]  ;;  %s9832_s28 = smov (%p4343_p12), 0  }
 0x524   : >> { %7296 = vmatpush3.bf16.msra.mxu0 %v7293_v61  ;;  %7398 = vmatpush3.bf16.msra.mxu1 %v7293_v61 }
 0x525   : >> { %7298 = vmatprep.subr.bf16.mxu0 %v7297_v7  ;;  %7391 = vmatprep.subr.bf16.mxu1 %v7297_v7 }
 0x528   : >> { %7300 = vmatpush3.bf16.msra.mxu0 %v7297_v7  ;;  %7399 = vmatpush3.bf16.msra.mxu1 %v7297_v7 }
 0x529   : >> { %7302 = vmatprep.subr.bf16.mxu0 %v7301_v28  ;;  %7392 = vmatprep.subr.bf16.mxu1 %v7301_v28 }
 0x52c   : >> { %7304 = vmatpush3.bf16.msra.mxu0 %v7301_v28  ;;  %7400 = vmatpush3.bf16.msra.mxu1 %v7301_v28 }
 0x52d   : >> { %7306 = vmatprep.subr.bf16.mxu0 %v7305_v4  ;;  %7393 = vmatprep.subr.bf16.mxu1 %v7305_v4 }
 0x530   : >> { %7308 = vmatpush3.bf16.msra.mxu0 %v7305_v4  ;;  %7401 = vmatpush3.bf16.msra.mxu1 %v7305_v4 }
 0x531   : >> { %7310 = vmatprep.subr.bf16.mxu0 %v7309_v18  ;;  %7394 = vmatprep.subr.bf16.mxu1 %v7309_v18 }
 0x534   : >> { %7312 = vmatpush3.bf16.msra.mxu0 %v7309_v18  ;;  %7402 = vmatpush3.bf16.msra.mxu1 %v7309_v18 }
 0x537   : >> { %7080 = vmatmul.mubr.f32.vlgmr.msra.gmra.mrb[0].mxu0 %v4351_v39  ;;  %7101 = vmatmul.mubr.f32.vlgmr.msra.gmra.mrb[0].mxu1 %v4365_v11 }
 0x538   : >> { %7082 = vmatprep.mubr.f32.mxu0 %v4352_v12  ;;  %7103 = vmatprep.mubr.f32.mxu1 %v4366_v22 }
 0x53b   : >> { %7083 = vmatmul.mubr.f32.gmra.mrb[2].mxu0 %v4353_v25  ;;  %7104 = vmatmul.mubr.f32.gmra.mrb[2].mxu1 %v4367_v3 }
 0x53c   : >> { %7085 = vmatprep.mubr.f32.mxu0 %v4354_v19  ;;  %7106 = vmatprep.mubr.f32.mxu1 %v4368_v46 }
 0x53f   : >> { %7086 = vmatmul.mubr.f32.gmra.mrb[4].mxu0 %v4355_v10  ;;  %7107 = vmatmul.mubr.f32.gmra.mrb[4].mxu1 %v4369_v49 }
 0x540   : >> { %7088 = vmatprep.mubr.f32.mxu0 %v4356_v14  ;;  %7109 = vmatprep.mubr.f32.mxu1 %v4370_v40 }
 0x543   : >> { %7089 = vmatmul.mubr.f32.gmra.mrb[6].mxu0 %v4357_v24  ;;  %7110 = vmatmul.mubr.f32.gmra.mrb[6].mxu1 %v4371_v2 }
 0x544   : >> { %7091 = vmatprep.mubr.f32.mxu0 %v4358_v5  ;;  %7112 = vmatprep.mubr.f32.mxu1 %v4372_v8 }
 0x547   : >> { %7092 = vmatmul.mubr.f32.gmra.mrb[8].mxu0 %v4359_v53  ;;  %7113 = vmatmul.mubr.f32.gmra.mrb[8].mxu1 %v4373_v34 }
 0x548   : >> { %7094 = vmatprep.mubr.f32.mxu0 %v4360_v42  ;;  %7115 = vmatprep.mubr.f32.mxu1 %v4374_v0 }
 0x54b   : >> { %7095 = vmatmul.mubr.f32.gmra.mrb[10].mxu0 %v4361_v1  ;;  %7116 = vmatmul.mubr.f32.gmra.mrb[10].mxu1 %v4375_v54 }
 0x54c   : >> { %7097 = vmatprep.mubr.f32.mxu0 %v4362_v55  ;;  %7118 = vmatprep.mubr.f32.mxu1 %v4376_v43 }
 0x54f   : >> { %7098 = vmatmul.mubr.f32.gmra.mrb[12].mxu0 %v4363_v37  ;;  %7119 = vmatmul.mubr.f32.gmra.mrb[12].mxu1 %v4377_v44 }
 0x60a   : >> { %v7081_v45 = vpop.f32.mrb[0].mxu0  ;;  %v7102_v41 = vpop.f32.mrb[0].mxu1 }
 0x60b   : >> { %v4473_v48 = vadd.f32 %v7081_v45, %v9764_v21  ;;  %v4543_v27 = vadd.f32 %v7102_v41, %v9764_v21  ;;  %v4467_v51 = vpop.f32.mrb[1].mxu0  ;;  %v4537_v60 = vpop.f32.mrb[1].mxu1 }
 0x60c   : >> { %v4468_v31 = vadd.f32 %v9764_v21, %v4467_v51  ;;  %v4538_v52 = vadd.f32 %v9764_v21, %v4537_v60 }
 0x60d   : >> { %v4607_v20 = vmax.f32 %v4473_v48, 0.0  ;;  %v4621_v50 = vmax.f32 %v4543_v27, 0.0 }
 0x60e   : >> { %v4606_v9 = vmax.f32 %v4468_v31, 0.0  ;;  %v4620_v29 = vmax.f32 %v4538_v52, 0.0  ;;  %v7084_v30 = vpop.f32.mrb[2].mxu0  ;;  %v7105_v38 = vpop.f32.mrb[2].mxu1 }
 0x60f   : >> { %6450 = vst [vmem:[%s9702_s21 + $0x60] sm:$0xff] %v4607_v20  ;;  %v4638_v26 = vsel %vm3770_vm6, %v4621_v50, 0.0  ;;  %v4483_v36 = vadd.f32 %v7084_v30, %v9764_v21  ;;  %v4553_v6 = vadd.f32 %v7105_v38, %v9764_v21  ;;  %v4477_v56 = vpop.f32.mrb[3].mxu0  ;;  %v4547_v35 = vpop.f32.mrb[3].mxu1 }
 0x610   : >> { %6467 = vst [vmem:[%s9702_s21 + $0xe8] sm:$0xff] %v4638_v26  ;;  %6449 = vst [vmem:[%s9702_s21 + $0x58] sm:$0xff] %v4606_v9  ;;  %v4478_v63 = vadd.f32 %v9764_v21, %v4477_v56  ;;  %v4548_v23 = vadd.f32 %v9764_v21, %v4547_v35 }
 0x611   : >> { %6466 = vst [vmem:[%s9702_s21 + $0xe0] sm:$0xff] %v4620_v29  ;;  %v4609_v16 = vmax.f32 %v4483_v36, 0.0  ;;  %v4623_v32 = vmax.f32 %v4553_v6, 0.0 }
 0x612   : >> { %v4608_v59 = vmax.f32 %v4478_v63, 0.0  ;;  %v4622_v61 = vmax.f32 %v4548_v23, 0.0  ;;  %v7087_v62 = vpop.f32.mrb[4].mxu0  ;;  %v7108_v33 = vpop.f32.mrb[4].mxu1 }
 0x613   : >> { %v4635_v7 = vsel %vm3770_vm6, %v4609_v16, 0.0  ;;  %6470 = vst [vmem:[%s9702_s21 + $0x100] sm:$0xff] %v4623_v32  ;;  %v4493_v17 = vadd.f32 %v7087_v62, %v9764_v21  ;;  %v4563_v47 = vadd.f32 %v7108_v33, %v9764_v21  ;;  %v4487_v28 = vpop.f32.mrb[5].mxu0  ;;  %v4557_v57 = vpop.f32.mrb[5].mxu1 }
 0x614   : >> { %6452 = vst [vmem:[%s9702_s21 + $0x70] sm:$0xff] %v4635_v7  ;;  %6451 = vst [vmem:[%s9702_s21 + $0x68] sm:$0xff] %v4608_v59  ;;  %v4488_v13 = vadd.f32 %v9764_v21, %v4487_v28  ;;  %v4558_v4 = vadd.f32 %v9764_v21, %v4557_v57 }
 0x615   : >> { %6469 = vst [vmem:[%s9702_s21 + $0xf8] sm:$0xff] %v4622_v61  ;;  %v4611_v15 = vmax.f32 %v4493_v17, 0.0  ;;  %v4625_v58 = vmax.f32 %v4563_v47, 0.0 }
 0x616   : >> { %v4610_v18 = vmax.f32 %v4488_v13, 0.0  ;;  %v4624_v39 = vmax.f32 %v4558_v4, 0.0  ;;  %v7090_v11 = vpop.f32.mrb[6].mxu0  ;;  %v7111_v12 = vpop.f32.mrb[6].mxu1 }
 0x617   : >> { %6455 = vst [vmem:[%s9702_s21 + $0x88] sm:$0xff] %v4611_v15  ;;  %v4639_v22 = vsel %vm3770_vm6, %v4625_v58, 0.0  ;;  %v4503_v25 = vadd.f32 %v7090_v11, %v9764_v21  ;;  %v4573_v3 = vadd.f32 %v7111_v12, %v9764_v21  ;;  %v4497_v19 = vpop.f32.mrb[7].mxu0  ;;  %v4567_v46 = vpop.f32.mrb[7].mxu1 }
 0x618   : >> { %6472 = vst [vmem:[%s9702_s21 + $0x110] sm:$0xff] %v4639_v22  ;;  %6454 = vst [vmem:[%s9702_s21 + $0x80] sm:$0xff] %v4610_v18  ;;  %v4498_v10 = vadd.f32 %v9764_v21, %v4497_v19  ;;  %v4568_v49 = vadd.f32 %v9764_v21, %v4567_v46 }
 0x619   : >> { %6471 = vst [vmem:[%s9702_s21 + $0x108] sm:$0xff] %v4624_v39  ;;  %v4613_v14 = vmax.f32 %v4503_v25, 0.0  ;;  %v4627_v40 = vmax.f32 %v4573_v3, 0.0 }
 0x61a   : >> { %v4612_v24 = vmax.f32 %v4498_v10, 0.0  ;;  %v4626_v2 = vmax.f32 %v4568_v49, 0.0  ;;  %v7093_v5 = vpop.f32.mrb[8].mxu0  ;;  %v7114_v8 = vpop.f32.mrb[8].mxu1 }
 0x61b   : >> { %v4636_v53 = vsel %vm3770_vm6, %v4613_v14, 0.0  ;;  %6475 = vst [vmem:[%s9702_s21 + $0x128] sm:$0xff] %v4627_v40  ;;  %v4513_v34 = vadd.f32 %v7093_v5, %v9764_v21  ;;  %v4583_v42 = vadd.f32 %v7114_v8, %v9764_v21  ;;  %v4507_v0 = vpop.f32.mrb[9].mxu0  ;;  %v4577_v1 = vpop.f32.mrb[9].mxu1 }
 0x61c   : >> { %6457 = vst [vmem:[%s9702_s21 + $0x98] sm:$0xff] %v4636_v53  ;;  %6456 = vst [vmem:[%s9702_s21 + $0x90] sm:$0xff] %v4612_v24  ;;  %v4508_v54 = vadd.f32 %v9764_v21, %v4507_v0  ;;  %v4578_v55 = vadd.f32 %v9764_v21, %v4577_v1 }
 0x61d   : >> { %6474 = vst [vmem:[%s9702_s21 + $0x120] sm:$0xff] %v4626_v2  ;;  %v4615_v43 = vmax.f32 %v4513_v34, 0.0  ;;  %v4629_v37 = vmax.f32 %v4583_v42, 0.0 }
 0x61e   : >> { %v4614_v44 = vmax.f32 %v4508_v54, 0.0  ;;  %v4628_v45 = vmax.f32 %v4578_v55, 0.0  ;;  %v7096_v41 = vpop.f32.mrb[10].mxu0  ;;  %v7117_v48 = vpop.f32.mrb[10].mxu1 }
 0x61f   : >> { %6460 = vst [vmem:[%s9702_s21 + $0xb0] sm:$0xff] %v4615_v43  ;;  %v4640_v27 = vsel %vm3770_vm6, %v4629_v37, 0.0  ;;  %v4523_v51 = vadd.f32 %v7096_v41, %v9764_v21  ;;  %v4593_v60 = vadd.f32 %v7117_v48, %v9764_v21  ;;  %v4517_v31 = vpop.f32.mrb[11].mxu0  ;;  %v4587_v52 = vpop.f32.mrb[11].mxu1 }
 0x620   : >> { %6477 = vst [vmem:[%s9702_s21 + $0x138] sm:$0xff] %v4640_v27  ;;  %6459 = vst [vmem:[%s9702_s21 + $0xa8] sm:$0xff] %v4614_v44  ;;  %v4518_v20 = vadd.f32 %v9764_v21, %v4517_v31  ;;  %v4588_v50 = vadd.f32 %v9764_v21, %v4587_v52 }
 0x621   : >> { %6476 = vst [vmem:[%s9702_s21 + $0x130] sm:$0xff] %v4628_v45  ;;  %v4617_v9 = vmax.f32 %v4523_v51, 0.0  ;;  %v4631_v29 = vmax.f32 %v4593_v60, 0.0 }
 0x622   : >> { %v4616_v30 = vmax.f32 %v4518_v20, 0.0  ;;  %v4630_v38 = vmax.f32 %v4588_v50, 0.0  ;;  %v7099_v26 = vpop.f32.mrb[12].mxu0  ;;  %v7120_v36 = vpop.f32.mrb[12].mxu1 }
 0x623   : >> { %v4637_v6 = vsel %vm3770_vm6, %v4617_v9, 0.0  ;;  %6480 = vst [vmem:[%s9702_s21 + $0x150] sm:$0xff] %v4631_v29  ;;  %v4533_v56 = vadd.f32 %v7099_v26, %v9764_v21  ;;  %v4603_v35 = vadd.f32 %v7120_v36, %v9764_v21  ;;  %v4527_v63 = vpop.f32.mrb[13].mxu0  ;;  %v4597_v23 = vpop.f32.mrb[13].mxu1  ;;  %4345 = sbr.rel (!%p4343_p12) target bundleno = 1300 (0x514), region = 511 }
 0x624   : >> { %6462 = vst [vmem:[%s9702_s21 + $0xc0] sm:$0xff] %v4637_v6  ;;  %6461 = vst [vmem:[%s9702_s21 + $0xb8] sm:$0xff] %v4616_v30  ;;  %v4528_v16 = vadd.f32 %v9764_v21, %v4527_v63  ;;  %v4598_v32 = vadd.f32 %v9764_v21, %v4597_v23 }
 0x625   : >> { %6479 = vst [vmem:[%s9702_s21 + $0x148] sm:$0xff] %v4630_v38  ;;  %v4619_v59 = vmax.f32 %v4533_v56, 0.0  ;;  %v4633_v61 = vmax.f32 %v4603_v35, 0.0 }
 0x626   : >> { %v4618_v62 = vmax.f32 %v4528_v16, 0.0  ;;  %v4632_v33 = vmax.f32 %v4598_v32, 0.0 }
 0x627   : >> { %6465 = vst [vmem:[%s9702_s21 + $0xd8] sm:$0xff] %v4619_v59  ;;  %v4641_v7 = vsel %vm3770_vm6, %v4633_v61, 0.0 }
 0x628   : >> { %6482 = vst [vmem:[%s9702_s21 + $0x160] sm:$0xff] %v4641_v7  ;;  %6464 = vst [vmem:[%s9702_s21 + $0xd0] sm:$0xff] %v4618_v62 }
 0x629   : >> { %6481 = vst [vmem:[%s9702_s21 + $0x158] sm:$0xff] %v4632_v33 }
 0x62a LB: >> { %s4686_s24 = smul.u32 40, %s7723_s28  ;;  %v6483_v21 = vld [vmem:[%s10270_s12] ss:$0 sm:$0xff]  ;;  %v6485_v17 = vld [vmem:[%s10270_s12 + $0x1] ss:$0 sm:$0xff]  ;;  %s6612_s25 = sshll.u32 %s7723_s28, 5  ;;  %s7723_s28 = sphi %s9832_s28, %s4685_s28  }
 0x62b   : >> { %v6487_v47 = vld [vmem:[%s10270_s12 + $0x2] ss:$0 sm:$0xff]  ;;  %v6489_v4 = vld [vmem:[%s10270_s12 + $0x3] ss:$0 sm:$0xff]  ;;  %v6491_v49 = vld [vmem:[%s10270_s12 + $0x4] ss:$0 sm:$0xff] }
 0x62c   : >> { %s9847_s23 = scalar_lea.vmem [#allocation8], %s4686_s24  ;;  %v6497_v43 = vld [vmem:[%s10270_s12 + $0x5] ss:$0 sm:$0xff]  ;;  %v6503_v61 = vld [vmem:[%s10270_s12 + $0x6] ss:$0 sm:$0xff]  ;;  %s5200_s15 = scalar_lea.vmem [#allocation9], %s6612_s25 }
 0x62d   : >> { %s4685_s28 = sadd.s32 1, %s7723_s28  }
 0x62e   : >> { %p4682_p0 = scmp.ge.s32.totalorder %s4685_s28, 28  }
 0x630   : >> { %v4688_v28 = vld [vmem:[%s9847_s23 + $0x6] sm:$0xff]  ;;  %v4689_v57 = vld [vmem:[%s9847_s23 + $0xe] sm:$0xff]  ;;  %v4690_v13 = vld [vmem:[%s9847_s23 + $0x16] sm:$0xff] }
 0x631   : >> { %v4691_v15 = vld [vmem:[%s9847_s23 + $0x1e] sm:$0xf]  ;;  %v4699_v58 = vmul.f32 %v6483_v21, %v4688_v28  ;;  %v4700_v18 = vmul.f32 %v6483_v21, %v4689_v57  ;;  %v4701_v39 = vmul.f32 %v6483_v21, %v4690_v13  ;;  %v4707_v11 = vld [vmem:[%s9847_s23 + $0x7] sm:$0xff]  ;;  %v4708_v12 = vld [vmem:[%s9847_s23 + $0xf] sm:$0xff] }
 0x632   : >> { %v4702_v22 = vmul.f32 %v6483_v21, %v4691_v15  ;;  %v4709_v25 = vld [vmem:[%s9847_s23 + $0x17] sm:$0xff]  ;;  %v4710_v3 = vld [vmem:[%s9847_s23 + $0x1f] sm:$0xf]  ;;  %v4719_v19 = vmul.f32 %v6485_v17, %v4707_v11  ;;  %v4720_v46 = vmul.f32 %v6485_v17, %v4708_v12  ;;  %v4727_v10 = vld [vmem:[%s9847_s23 + $0x8] sm:$0xff] }
 0x633   : >> { %v4721_v14 = vmul.f32 %v6485_v17, %v4709_v25  ;;  %v4722_v40 = vmul.f32 %v6485_v17, %v4710_v3  ;;  %v4728_v24 = vld [vmem:[%s9847_s23 + $0x10] sm:$0xff]  ;;  %v4729_v2 = vld [vmem:[%s9847_s23 + $0x18] sm:$0xff]  ;;  %v4730_v5 = vld [vmem:[%s9847_s23 + $0x20] sm:$0xf]  ;;  %v4739_v8 = vmul.f32 %v6487_v47, %v4727_v10 }
 0x634   : >> { %v4723_v53 = vadd.f32 %v4719_v19, %v4699_v58  ;;  %v4724_v34 = vadd.f32 %v4720_v46, %v4700_v18  ;;  %v4740_v42 = vmul.f32 %v6487_v47, %v4728_v24  ;;  %v4741_v0 = vmul.f32 %v6487_v47, %v4729_v2  ;;  %v4747_v1 = vld [vmem:[%s9847_s23 + $0x9] sm:$0xff]  ;;  %v4748_v54 = vld [vmem:[%s9847_s23 + $0x11] sm:$0xff]  ;;  %v4749_v55 = vld [vmem:[%s9847_s23 + $0x19] sm:$0xff] }
 0x635   : >> { %v4725_v37 = vadd.f32 %v4721_v14, %v4701_v39  ;;  %v4726_v44 = vadd.f32 %v4722_v40, %v4702_v22  ;;  %v4742_v45 = vmul.f32 %v6487_v47, %v4730_v5  ;;  %v4750_v41 = vld [vmem:[%s9847_s23 + $0x21] sm:$0xf]  ;;  %v4759_v48 = vmul.f32 %v6489_v4, %v4747_v1  ;;  %v4767_v27 = vld [vmem:[%s9847_s23 + $0xa] sm:$0xff]  ;;  %v4768_v51 = vld [vmem:[%s9847_s23 + $0x12] sm:$0xff] }
 0x636   : >> { %v4743_v60 = vadd.f32 %v4739_v8, %v4723_v53  ;;  %v4744_v31 = vadd.f32 %v4740_v42, %v4724_v34  ;;  %v4760_v52 = vmul.f32 %v6489_v4, %v4748_v54  ;;  %v4761_v20 = vmul.f32 %v6489_v4, %v4749_v55  ;;  %v4769_v50 = vld [vmem:[%s9847_s23 + $0x1a] sm:$0xff]  ;;  %v4770_v9 = vld [vmem:[%s9847_s23 + $0x22] sm:$0xf]  ;;  %v6492_v29 = vld [vmem:[%s9847_s23 + $0x2e] sm:$0xff] }
 0x637   : >> { %v4745_v30 = vadd.f32 %v4741_v0, %v4725_v37  ;;  %v4746_v38 = vadd.f32 %v4742_v45, %v4726_v44  ;;  %v4762_v26 = vmul.f32 %v6489_v4, %v4750_v41  ;;  %v4779_v36 = vmul.f32 %v6491_v49, %v4767_v27  ;;  %v6493_v6 = vld [vmem:[%s9847_s23 + $0x36] sm:$0xff]  ;;  %v6494_v56 = vld [vmem:[%s9847_s23 + $0x3e] sm:$0xff]  ;;  %v6495_v32 = vld [vmem:[%s9847_s23 + $0x46] sm:$0xf] }
 0x638   : >> { %v4763_v35 = vadd.f32 %v4759_v48, %v4743_v60  ;;  %v4764_v63 = vadd.f32 %v4760_v52, %v4744_v31  ;;  %v4780_v23 = vmul.f32 %v6491_v49, %v4768_v51  ;;  %v4781_v16 = vmul.f32 %v6491_v49, %v4769_v50  ;;  %v6498_v59 = vld [vmem:[%s9847_s23 + $0x2f] sm:$0xff]  ;;  %v6499_v17 = vld [vmem:[%s9847_s23 + $0x37] sm:$0xff]  ;;  %v6500_v47 = vld [vmem:[%s9847_s23 + $0x3f] sm:$0xff] }
 0x639   : >> { %v4765_v62 = vadd.f32 %v4761_v20, %v4745_v30  ;;  %v4766_v33 = vadd.f32 %v4762_v26, %v4746_v38  ;;  %v4782_v7 = vmul.f32 %v6491_v49, %v4770_v9  ;;  %v4802_v21 = vmul.f32 %v6497_v43, %v6492_v29  ;;  %v6501_v15 = vld [vmem:[%s9847_s23 + $0x47] sm:$0xf]  ;;  %v6504_v58 = vld [vmem:[%s9847_s23 + $0x30] sm:$0xff]  ;;  %v6505_v25 = vld [vmem:[%s9847_s23 + $0x38] sm:$0xff] }
 0x63a   : >> { %v4783_v28 = vadd.f32 %v4779_v36, %v4763_v35  ;;  %v4784_v57 = vadd.f32 %v4780_v23, %v4764_v63  ;;  %v4803_v13 = vmul.f32 %v6497_v43, %v6493_v6  ;;  %v4804_v4 = vmul.f32 %v6497_v43, %v6494_v56  ;;  %v6509_v18 = vld [vmem:[%s10270_s12 + $0x7] ss:$0 sm:$0xff]  ;;  %v6507_v14 = vld [vmem:[%s9847_s23 + $0x48] sm:$0xf]  ;;  %v6510_v40 = vld [vmem:[%s9847_s23 + $0x31] sm:$0xff] }
 0x63b   : >> { %v4785_v39 = vadd.f32 %v4781_v16, %v4765_v62  ;;  %v4786_v11 = vadd.f32 %v4782_v7, %v4766_v33  ;;  %v4805_v12 = vmul.f32 %v6497_v43, %v6495_v32  ;;  %v4822_v22 = vmul.f32 %v6503_v61, %v6498_v59  ;;  %v6506_v3 = vld [vmem:[%s9847_s23 + $0x40] sm:$0xff]  ;;  %v6515_v24 = vld [vmem:[%s10270_s12 + $0x8] ss:$0 sm:$0xff]  ;;  %v6513_v43 = vld [vmem:[%s9847_s23 + $0x49] sm:$0xf] }
 0x63c   : >> { %v4806_v19 = vadd.f32 %v4802_v21, %v4783_v28  ;;  %v4807_v46 = vadd.f32 %v4803_v13, %v4784_v57  ;;  %v4823_v10 = vmul.f32 %v6503_v61, %v6499_v17  ;;  %v4824_v49 = vmul.f32 %v6503_v61, %v6500_v47  ;;  %v6511_v34 = vld [vmem:[%s9847_s23 + $0x39] sm:$0xff]  ;;  %v6512_v42 = vld [vmem:[%s9847_s23 + $0x41] sm:$0xff]  ;;  %v6521_v44 = vld [vmem:[%s10270_s12 + $0x9] ss:$0 sm:$0xff] }
 0x63d   : >> { %v4808_v2 = vadd.f32 %v4804_v4, %v4785_v39  ;;  %v4809_v5 = vadd.f32 %v4805_v12, %v4786_v11  ;;  %v4825_v8 = vmul.f32 %v6503_v61, %v6501_v15  ;;  %v4842_v53 = vmul.f32 %v6509_v18, %v6504_v58  ;;  %v6516_v37 = vld [vmem:[%s9847_s23 + $0x32] sm:$0xff]  ;;  %v6517_v51 = vld [vmem:[%s9847_s23 + $0x3a] sm:$0xff]  ;;  %v6518_v60 = vld [vmem:[%s9847_s23 + $0x42] sm:$0xff] }
 0x63e   : >> { %v4826_v0 = vadd.f32 %v4822_v22, %v4806_v19  ;;  %v4827_v1 = vadd.f32 %v4823_v10, %v4807_v46  ;;  %v4843_v54 = vmul.f32 %v6509_v18, %v6505_v25  ;;  %v4844_v55 = vmul.f32 %v6509_v18, %v6506_v3  ;;  %v6519_v9 = vld [vmem:[%s9847_s23 + $0x4a] sm:$0xf]  ;;  %v6522_v29 = vld [vmem:[%s9847_s23 + $0x56] sm:$0xff]  ;;  %v6523_v56 = vld [vmem:[%s9847_s23 + $0x5e] sm:$0xff] }
 0x63f   : >> { %v4828_v45 = vadd.f32 %v4824_v49, %v4808_v2  ;;  %v4829_v41 = vadd.f32 %v4825_v8, %v4809_v5  ;;  %v4845_v48 = vmul.f32 %v6509_v18, %v6507_v14  ;;  %v4862_v27 = vmul.f32 %v6515_v24, %v6510_v40  ;;  %v6527_v30 = vld [vmem:[%s10270_s12 + $0xa] ss:$0 sm:$0xff]  ;;  %v6525_v59 = vld [vmem:[%s9847_s23 + $0x6e] sm:$0xf]  ;;  %v6528_v61 = vld [vmem:[%s9847_s23 + $0x57] sm:$0xff] }
 0x640   : >> { %v4846_v31 = vadd.f32 %v4842_v53, %v4826_v0  ;;  %v4847_v52 = vadd.f32 %v4843_v54, %v4827_v1  ;;  %v4863_v20 = vmul.f32 %v6515_v24, %v6511_v34  ;;  %v4864_v50 = vmul.f32 %v6515_v24, %v6512_v42  ;;  %v6524_v35 = vld [vmem:[%s9847_s23 + $0x66] sm:$0xff]  ;;  %v6531_v58 = vld [vmem:[%s9847_s23 + $0x6f] sm:$0xf]  ;;  %v6534_v18 = vld [vmem:[%s9847_s23 + $0x58] sm:$0xff] }
 0x641   : >> { %v4848_v38 = vadd.f32 %v4844_v55, %v4828_v45  ;;  %v4849_v26 = vadd.f32 %v4845_v48, %v4829_v41  ;;  %v4865_v36 = vmul.f32 %v6515_v24, %v6513_v43  ;;  %v4882_v6 = vmul.f32 %v6521_v44, %v6516_v37  ;;  %v6533_v62 = vld [vmem:[%s10270_s12 + $0xb] ss:$0 sm:$0xff]  ;;  %v6529_v47 = vld [vmem:[%s9847_s23 + $0x5f] sm:$0xff]  ;;  %v6539_v39 = vld [vmem:[%s10270_s12 + $0xc] ss:$0 sm:$0xff] }
 0x642   : >> { %v4866_v63 = vadd.f32 %v4862_v27, %v4846_v31  ;;  %v4867_v23 = vadd.f32 %v4863_v20, %v4847_v52  ;;  %v4883_v16 = vmul.f32 %v6521_v44, %v6517_v51  ;;  %v4884_v32 = vmul.f32 %v6521_v44, %v6518_v60  ;;  %v6530_v28 = vld [vmem:[%s9847_s23 + $0x67] sm:$0xff]  ;;  %v6537_v40 = vld [vmem:[%s9847_s23 + $0x70] sm:$0xf]  ;;  %v6540_v24 = vld [vmem:[%s9847_s23 + $0x59] sm:$0xff] }
 0x643   : >> { %v4868_v33 = vadd.f32 %v4864_v50, %v4848_v38  ;;  %v4869_v7 = vadd.f32 %v4865_v36, %v4849_v26  ;;  %v4885_v21 = vmul.f32 %v6521_v44, %v6519_v9  ;;  %v4905_v17 = vmul.f32 %v6527_v30, %v6522_v29  ;;  %v6535_v3 = vld [vmem:[%s9847_s23 + $0x60] sm:$0xff]  ;;  %v6536_v19 = vld [vmem:[%s9847_s23 + $0x68] sm:$0xff]  ;;  %v6543_v37 = vld [vmem:[%s9847_s23 + $0x71] sm:$0xf] }
 0x644   : >> { %v4886_v57 = vadd.f32 %v4882_v6, %v4866_v63  ;;  %v4887_v13 = vadd.f32 %v4883_v16, %v4867_v23  ;;  %v4906_v4 = vmul.f32 %v6527_v30, %v6523_v56  ;;  %v4907_v15 = vmul.f32 %v6527_v30, %v6524_v35  ;;  %v6545_v2 = vld [vmem:[%s10270_s12 + $0xd] ss:$0 sm:$0xff]  ;;  %v6541_v42 = vld [vmem:[%s9847_s23 + $0x61] sm:$0xff]  ;;  %v6551_v45 = vld [vmem:[%s10270_s12 + $0xe] ss:$0 sm:$0xff] }
 0x645   : >> { %v4888_v11 = vadd.f32 %v4884_v32, %v4868_v33  ;;  %v4889_v12 = vadd.f32 %v4885_v21, %v4869_v7  ;;  %v4908_v22 = vmul.f32 %v6527_v30, %v6525_v59  ;;  %v4925_v25 = vmul.f32 %v6533_v62, %v6528_v61  ;;  %v6542_v0 = vld [vmem:[%s9847_s23 + $0x69] sm:$0xff]  ;;  %v6546_v44 = vld [vmem:[%s9847_s23 + $0x5a] sm:$0xff]  ;;  %v6549_v29 = vld [vmem:[%s9847_s23 + $0x72] sm:$0xf] }
 0x646   : >> { %v4909_v46 = vadd.f32 %v4905_v17, %v4886_v57  ;;  %v4910_v10 = vadd.f32 %v4906_v4, %v4887_v13  ;;  %v4926_v49 = vmul.f32 %v6533_v62, %v6529_v47  ;;  %v4927_v14 = vmul.f32 %v6533_v62, %v6530_v28  ;;  %v6547_v60 = vld [vmem:[%s9847_s23 + $0x62] sm:$0xff]  ;;  %v6548_v31 = vld [vmem:[%s9847_s23 + $0x6a] sm:$0xff]  ;;  %v6555_v61 = vld [vmem:[%s9847_s23 + $0x96] sm:$0xf] }
 0x647   : >> { %v4911_v5 = vadd.f32 %v4907_v15, %v4888_v11  ;;  %v4912_v8 = vadd.f32 %v4908_v22, %v4889_v12  ;;  %v4928_v53 = vmul.f32 %v6533_v62, %v6531_v58  ;;  %v4945_v34 = vmul.f32 %v6539_v39, %v6534_v18  ;;  %v6552_v30 = vld [vmem:[%s9847_s23 + $0x7e] sm:$0xff]  ;;  %v6557_v38 = vld [vmem:[%s10270_s12 + $0xf] ss:$0 sm:$0xff]  ;;  %v6553_v35 = vld [vmem:[%s9847_s23 + $0x86] sm:$0xff] }
 0x648   : >> { %v4929_v1 = vadd.f32 %v4925_v25, %v4909_v46  ;;  %v4930_v54 = vadd.f32 %v4926_v49, %v4910_v10  ;;  %v4946_v55 = vmul.f32 %v6539_v39, %v6535_v3  ;;  %v4947_v43 = vmul.f32 %v6539_v39, %v6536_v19  ;;  %v6554_v63 = vld [vmem:[%s9847_s23 + $0x8e] sm:$0xff]  ;;  %v6558_v62 = vld [vmem:[%s9847_s23 + $0x7f] sm:$0xff]  ;;  %v6561_v18 = vld [vmem:[%s9847_s23 + $0x97] sm:$0xf] }
 0x649   : >> { %v4931_v41 = vadd.f32 %v4927_v14, %v4911_v5  ;;  %v4932_v48 = vadd.f32 %v4928_v53, %v4912_v8  ;;  %v4948_v27 = vmul.f32 %v6539_v39, %v6537_v40  ;;  %v4965_v51 = vmul.f32 %v6545_v2, %v6540_v24  ;;  %v6563_v33 = vld [vmem:[%s10270_s12 + $0x10] ss:$0 sm:$0xff]  ;;  %v6559_v28 = vld [vmem:[%s9847_s23 + $0x87] sm:$0xff]  ;;  %v6569_v11 = vld [vmem:[%s10270_s12 + $0x11] ss:$0 sm:$0xff] }
 0x64a   : >> { %v4949_v52 = vadd.f32 %v4945_v34, %v4929_v1  ;;  %v4950_v20 = vadd.f32 %v4946_v55, %v4930_v54  ;;  %v4966_v50 = vmul.f32 %v6545_v2, %v6541_v42  ;;  %v4967_v9 = vmul.f32 %v6545_v2, %v6542_v0  ;;  %v6560_v57 = vld [vmem:[%s9847_s23 + $0x8f] sm:$0xff]  ;;  %v6564_v39 = vld [vmem:[%s9847_s23 + $0x80] sm:$0xff]  ;;  %v6567_v24 = vld [vmem:[%s9847_s23 + $0x98] sm:$0xf] }
 0x64b   : >> { %v4951_v26 = vadd.f32 %v4947_v43, %v4931_v41  ;;  %v4952_v36 = vadd.f32 %v4948_v27, %v4932_v48  ;;  %v4968_v6 = vmul.f32 %v6545_v2, %v6543_v37  ;;  %v4985_v56 = vmul.f32 %v6551_v45, %v6546_v44  ;;  %v6565_v19 = vld [vmem:[%s9847_s23 + $0x88] sm:$0xff]  ;;  %v6566_v46 = vld [vmem:[%s9847_s23 + $0x90] sm:$0xff]  ;;  %v6573_v44 = vld [vmem:[%s9847_s23 + $0x99] sm:$0xf] }
 0x64c   : >> { %v4969_v23 = vadd.f32 %v4965_v51, %v4949_v52  ;;  %v4970_v16 = vadd.f32 %v4966_v50, %v4950_v20  ;;  %v4986_v32 = vmul.f32 %v6551_v45, %v6547_v60  ;;  %v4987_v59 = vmul.f32 %v6551_v45, %v6548_v31  ;;  %v6570_v2 = vld [vmem:[%s9847_s23 + $0x81] sm:$0xff]  ;;  %v6575_v5 = vld [vmem:[%s10270_s12 + $0x12] ss:$0 sm:$0xff]  ;;  %v6571_v0 = vld [vmem:[%s9847_s23 + $0x89] sm:$0xff] }
 0x64d   : >> { %v4971_v7 = vadd.f32 %v4967_v9, %v4951_v26  ;;  %v4972_v21 = vadd.f32 %v4968_v6, %v4952_v36  ;;  %v4988_v17 = vmul.f32 %v6551_v45, %v6549_v29  ;;  %v5008_v47 = vmul.f32 %v6557_v38, %v6552_v30  ;;  %v6572_v1 = vld [vmem:[%s9847_s23 + $0x91] sm:$0xff]  ;;  %v6576_v45 = vld [vmem:[%s9847_s23 + $0x82] sm:$0xff]  ;;  %v6579_v30 = vld [vmem:[%s9847_s23 + $0x9a] sm:$0xf] }
 0x64e   : >> { %v4989_v13 = vadd.f32 %v4985_v56, %v4969_v23  ;;  %v4990_v4 = vadd.f32 %v4986_v32, %v4970_v16  ;;  %v5009_v15 = vmul.f32 %v6557_v38, %v6553_v35  ;;  %v5010_v58 = vmul.f32 %v6557_v38, %v6554_v63  ;;  %v6581_v41 = vld [vmem:[%s10270_s12 + $0x13] ss:$0 sm:$0xff]  ;;  %v6577_v31 = vld [vmem:[%s9847_s23 + $0x8a] sm:$0xff]  ;;  %v6587_v26 = vld [vmem:[%s10270_s12 + $0x14] ss:$0 sm:$0xff] }
 0x64f   : >> { %v4991_v12 = vadd.f32 %v4987_v59, %v4971_v7  ;;  %v4992_v22 = vadd.f32 %v4988_v17, %v4972_v21  ;;  %v5011_v25 = vmul.f32 %v6557_v38, %v6555_v61  ;;  %v5028_v3 = vmul.f32 %v6563_v33, %v6558_v62  ;;  %v6578_v52 = vld [vmem:[%s9847_s23 + $0x92] sm:$0xff]  ;;  %v6582_v38 = vld [vmem:[%s9847_s23 + $0xa6] sm:$0xff]  ;;  %v6585_v62 = vld [vmem:[%s9847_s23 + $0xbe] sm:$0xf] }
 0x650   : >> { %v5012_v10 = vadd.f32 %v5008_v47, %v4989_v13  ;;  %v5013_v49 = vadd.f32 %v5009_v15, %v4990_v4  ;;  %v5029_v14 = vmul.f32 %v6563_v33, %v6559_v28  ;;  %v5030_v40 = vmul.f32 %v6563_v33, %v6560_v57  ;;  %v6583_v63 = vld [vmem:[%s9847_s23 + $0xae] sm:$0xff]  ;;  %v6584_v23 = vld [vmem:[%s9847_s23 + $0xb6] sm:$0xff] }
 0x651   : >> { %v5014_v8 = vadd.f32 %v5010_v58, %v4991_v12  ;;  %v5015_v53 = vadd.f32 %v5011_v25, %v4992_v22  ;;  %v5031_v34 = vmul.f32 %v6563_v33, %v6561_v18  ;;  %v5048_v42 = vmul.f32 %v6569_v11, %v6564_v39  ;;  %v6588_v33 = vld [vmem:[%s9847_s23 + $0xa7] sm:$0xff]  ;;  %v6593_v7 = vld [vmem:[%s10270_s12 + $0x15] ss:$0 sm:$0xff]  ;;  %v6590_v13 = vld [vmem:[%s9847_s23 + $0xb7] sm:$0xff] }
 0x652   : >> { %v5032_v54 = vadd.f32 %v5028_v3, %v5012_v10  ;;  %v5033_v55 = vadd.f32 %v5029_v14, %v5013_v49  ;;  %v5049_v43 = vmul.f32 %v6569_v11, %v6565_v19  ;;  %v5050_v37 = vmul.f32 %v6569_v11, %v6566_v46  ;;  %v6589_v57 = vld [vmem:[%s9847_s23 + $0xaf] sm:$0xff]  ;;  %v6591_v39 = vld [vmem:[%s9847_s23 + $0xbf] sm:$0xf] }
 0x653   : >> { %v5034_v48 = vadd.f32 %v5030_v40, %v5014_v8  ;;  %v5035_v27 = vadd.f32 %v5031_v34, %v5015_v53  ;;  %v5051_v51 = vmul.f32 %v6569_v11, %v6567_v24  ;;  %v5068_v60 = vmul.f32 %v6575_v5, %v6570_v2  ;;  %v6594_v11 = vld [vmem:[%s9847_s23 + $0xa8] sm:$0xff]  ;;  %v6599_v12 = vld [vmem:[%s10270_s12 + $0x16] ss:$0 sm:$0xff]  ;;  %v6596_v10 = vld [vmem:[%s9847_s23 + $0xb8] sm:$0xff] }
 0x654   : >> { %v5052_v20 = vadd.f32 %v5048_v42, %v5032_v54  ;;  %v5053_v50 = vadd.f32 %v5049_v43, %v5033_v55  ;;  %v5069_v9 = vmul.f32 %v6575_v5, %v6571_v0  ;;  %v5070_v29 = vmul.f32 %v6575_v5, %v6572_v1  ;;  %v6595_v46 = vld [vmem:[%s9847_s23 + $0xb0] sm:$0xff]  ;;  %v6597_v2 = vld [vmem:[%s9847_s23 + $0xc0] sm:$0xf] }
 0x655   : >> { %v5054_v36 = vadd.f32 %v5050_v37, %v5034_v48  ;;  %v5055_v6 = vadd.f32 %v5051_v51, %v5035_v27  ;;  %v5071_v56 = vmul.f32 %v6575_v5, %v6573_v44  ;;  %v5088_v35 = vmul.f32 %v6581_v41, %v6576_v45  ;;  %v6600_v5 = vld [vmem:[%s9847_s23 + $0xa9] sm:$0xff]  ;;  %v6605_v8 = vld [vmem:[%s10270_s12 + $0x17] ss:$0 sm:$0xff]  ;;  %v6602_v54 = vld [vmem:[%s9847_s23 + $0xb9] sm:$0xff] }
 0x656   : >> { %v5072_v16 = vadd.f32 %v5068_v60, %v5052_v20  ;;  %v5073_v32 = vadd.f32 %v5069_v9, %v5053_v50  ;;  %v5089_v59 = vmul.f32 %v6581_v41, %v6577_v31  ;;  %v5090_v61 = vmul.f32 %v6581_v41, %v6578_v52  ;;  %v6601_v1 = vld [vmem:[%s9847_s23 + $0xb1] sm:$0xff]  ;;  %v6603_v45 = vld [vmem:[%s9847_s23 + $0xc1] sm:$0xf] }
 0x657   : >> { %v5074_v21 = vadd.f32 %v5070_v29, %v5054_v36  ;;  %v5075_v17 = vadd.f32 %v5071_v56, %v5055_v6  ;;  %v5091_v47 = vmul.f32 %v6581_v41, %v6579_v30  ;;  %v5111_v28 = vmul.f32 %v6587_v26, %v6582_v38  ;;  %v6606_v41 = vld [vmem:[%s9847_s23 + $0xaa] sm:$0xff]  ;;  %v6611_v48 = vld [vmem:[%s10270_s12 + $0x18] ss:$0 sm:$0xff]  ;;  %v6608_v20 = vld [vmem:[%s9847_s23 + $0xba] sm:$0xff] }
 0x658   : >> { %v5092_v4 = vadd.f32 %v5088_v35, %v5072_v16  ;;  %v5093_v15 = vadd.f32 %v5089_v59, %v5073_v32  ;;  %v5112_v58 = vmul.f32 %v6587_v26, %v6583_v63  ;;  %v5113_v18 = vmul.f32 %v6587_v26, %v6584_v23  ;;  %v6607_v52 = vld [vmem:[%s9847_s23 + $0xb2] sm:$0xff]  ;;  %v6609_v38 = vld [vmem:[%s9847_s23 + $0xc2] sm:$0xf]  ;;  %s10027_s23 = smov (%p4682_p0), 0  }
 0x659   : >> { %v5094_v22 = vadd.f32 %v5090_v61, %v5074_v21  ;;  %v5095_v25 = vadd.f32 %v5091_v47, %v5075_v17  ;;  %v5114_v3 = vmul.f32 %v6587_v26, %v6585_v62  ;;  %v5131_v19 = vmul.f32 %v6593_v7, %v6588_v33 }
 0x65a   : >> { %v5115_v49 = vadd.f32 %v5111_v28, %v5092_v4  ;;  %v5116_v14 = vadd.f32 %v5112_v58, %v5093_v15  ;;  %v5132_v40 = vmul.f32 %v6593_v7, %v6589_v57  ;;  %v5133_v24 = vmul.f32 %v6593_v7, %v6590_v13 }
 0x65b   : >> { %v5117_v53 = vadd.f32 %v5113_v18, %v5094_v22  ;;  %v5118_v34 = vadd.f32 %v5114_v3, %v5095_v25  ;;  %v5134_v42 = vmul.f32 %v6593_v7, %v6591_v39  ;;  %v5151_v0 = vmul.f32 %v6599_v12, %v6594_v11 }
 0x65c   : >> { %v5135_v55 = vadd.f32 %v5131_v19, %v5115_v49  ;;  %v5136_v43 = vadd.f32 %v5132_v40, %v5116_v14  ;;  %v5152_v37 = vmul.f32 %v6599_v12, %v6595_v46  ;;  %v5153_v44 = vmul.f32 %v6599_v12, %v6596_v10 }
 0x65d   : >> { %v5137_v27 = vadd.f32 %v5133_v24, %v5117_v53  ;;  %v5138_v51 = vadd.f32 %v5134_v42, %v5118_v34  ;;  %v5154_v60 = vmul.f32 %v6599_v12, %v6597_v2  ;;  %v5171_v31 = vmul.f32 %v6605_v8, %v6600_v5 }
 0x65e   : >> { %v5155_v50 = vadd.f32 %v5151_v0, %v5135_v55  ;;  %v5156_v9 = vadd.f32 %v5152_v37, %v5136_v43  ;;  %v5172_v29 = vmul.f32 %v6605_v8, %v6601_v1  ;;  %v5173_v30 = vmul.f32 %v6605_v8, %v6602_v54 }
 0x65f   : >> { %v5157_v26 = vadd.f32 %v5153_v44, %v5137_v27  ;;  %v5158_v36 = vadd.f32 %v5154_v60, %v5138_v51  ;;  %v5174_v6 = vmul.f32 %v6605_v8, %v6603_v45  ;;  %v5191_v56 = vmul.f32 %v6611_v48, %v6606_v41  ;;  %4684 = sbr.rel (!%p4682_p0) target bundleno = 1578 (0x62a), region = 522 }
 0x660   : >> { %v5175_v35 = vadd.f32 %v5171_v31, %v5155_v50  ;;  %v5176_v63 = vadd.f32 %v5172_v29, %v5156_v9  ;;  %v5192_v23 = vmul.f32 %v6611_v48, %v6607_v52  ;;  %v5193_v16 = vmul.f32 %v6611_v48, %v6608_v20 }
 0x661   : >> { %v5177_v32 = vadd.f32 %v5173_v30, %v5157_v26  ;;  %v5178_v59 = vadd.f32 %v5174_v6, %v5158_v36  ;;  %v5194_v61 = vmul.f32 %v6611_v48, %v6609_v38  ;;  %v10019_v17 = vmov (%p4682_p0), 0.0  }
 0x662   : >> { %v5195_v62 = vadd.f32 %v5191_v56, %v5175_v35  ;;  %v5196_v33 = vadd.f32 %v5192_v23, %v5176_v63  ;;  %v10021_v47 = vmov (%p4682_p0), 0.0   ;;  %v10023_v28 = vmov (%p4682_p0), 0.0  }
 0x663   : >> { %v5197_v7 = vadd.f32 %v5193_v16, %v5177_v32  ;;  %v5198_v21 = vadd.f32 %v5194_v61, %v5178_v59  ;;  %v10025_v57 = vmov (%p4682_p0), 0.0  }
 0x664   : >> { %5201 = vst [vmem:[%s5200_s15] sm:$0xff] %v5195_v62  ;;  %5202 = vst [vmem:[%s5200_s15 + $0x8] sm:$0xff] %v5196_v33 }
 0x665   : >> { %5203 = vst [vmem:[%s5200_s15 + $0x10] sm:$0xff] %v5197_v7  ;;  %5204 = vst [vmem:[%s5200_s15 + $0x18] sm:$0xf] %v5198_v21 }
 0x666 LB: >> { %v5246_v13 = vld [vmem:[%s10271_s13] sm:$0xff]  ;;  %v5247_v4 = vld [vmem:[%s10271_s13 + $0x8] sm:$0xff]  ;;  %v5248_v15 = vld [vmem:[%s10271_s13 + $0x10] sm:$0xff]  ;;  %s6613_s28 = smul.u32 224, %s7743_s23  ;;  %s10292_s21 = sld [smem:[#allocation19_spill]]  ;;  %s7743_s23 = sphi %s10027_s23, %s5210_s23   ;;  %v7739_v57 = vphi %v10025_v57, %v10296_v57   ;;  %v7735_v28 = vphi %v10023_v28, %v10295_v28   ;;  %v7731_v47 = vphi %v10021_v47, %v10294_v47   ;;  %v7727_v17 = vphi %v10019_v17, %v10293_v17  }
 0x667   : >> { %v7313_v58 = vpack.c.bf16 %v5247_v4, %v5246_v13  ;;  %v5249_v18 = vld [vmem:[%s10271_s13 + $0x18] sm:$0xff]  ;;  %v5250_v11 = vld [vmem:[%s10271_s13 + $0x20] sm:$0xff]  ;;  %v5251_v12 = vld [vmem:[%s10271_s13 + $0x28] sm:$0xff]  ;;  %s5210_s23 = sadd.s32 1, %s7743_s23  }
 0x668   : >> { %v7317_v39 = vpack.c.bf16 %v5249_v18, %v5248_v15  ;;  %v7321_v22 = vpack.c.bf16 %v5251_v12, %v5250_v11  ;;  %s10065_s18 = scalar_lea.vmem [#allocation9], %s6613_s28  ;;  %v5252_v3 = vld [vmem:[%s10271_s13 + $0x30] sm:$0xff]  ;;  %v5253_v19 = vld [vmem:[%s10271_s13 + $0x38] sm:$0xff]  ;;  %v5254_v49 = vld [vmem:[%s10271_s13 + $0x40] sm:$0xff]  ;;  %p5207_p1 = scmp.ge.s32.totalorder %s5210_s23, 4  }
 0x669   : >> { %7314 = vmatprep.subr.bf16.mxu0 %v7313_v58  ;;  %7403 = vmatprep.subr.bf16.mxu1 %v7313_v58  ;;  %v7325_v10 = vpack.c.bf16 %v5253_v19, %v5252_v3  ;;  %v5255_v14 = vld [vmem:[%s10271_s13 + $0x48] sm:$0xff]  ;;  %v5256_v24 = vld [vmem:[%s10271_s13 + $0x50] sm:$0xff]  ;;  %v5257_v2 = vld [vmem:[%s10271_s13 + $0x58] sm:$0xff]  ;;  %vm5612_vm7 = vcmask (%p5207_p1), 0   ;;  %s10297_s29 = scalar_lea.vmem (%p5207_p1), %s10275_s17, %s10304_s16 }
 0x66a   : >> { %7316 = vmatpush3.bf16.msra.mxu0 %v7313_v58  ;;  %7411 = vmatpush3.bf16.msra.mxu1 %v7313_v58  ;;  %v7329_v40 = vpack.c.bf16 %v5255_v14, %v5254_v49  ;;  %v7333_v5 = vpack.c.bf16 %v5257_v2, %v5256_v24  ;;  %v5258_v8 = vld [vmem:[%s10271_s13 + $0x60] sm:$0xff]  ;;  %v5259_v53 = vld [vmem:[%s10271_s13 + $0x68] sm:$0xff]  ;;  %v5260_v42 = vld [vmem:[%s10271_s13 + $0x70] sm:$0xff] }
 0x66b   : >> { %7318 = vmatprep.subr.bf16.mxu0 %v7317_v39  ;;  %7404 = vmatprep.subr.bf16.mxu1 %v7317_v39  ;;  %v7337_v34 = vpack.c.bf16 %v5259_v53, %v5258_v8  ;;  %v5261_v0 = vld [vmem:[%s10271_s13 + $0x78] sm:$0xff]  ;;  %v10128_v16 = vld [vmem:[%s10272_s14] ss:$0 sm:$0xff] }
 0x66c   : >> { %v5218_v25 = vld [vmem:[%s10065_s18] sm:$0xff]  ;;  %v5232_v46 = vld [vmem:[%s10065_s18 + $0x70] sm:$0xff]  ;;  %v7341_v1 = vpack.c.bf16 %v5261_v0, %v5260_v42  ;;  %v5219_v54 = vld [vmem:[%s10065_s18 + $0x8] sm:$0xff]  ;;  %s10135_s20 = scalar_lea.vmem %s10292_s21, %s6613_s28 }
 0x66d   : >> { %7153 = vmatprep.mubr.f32.mxu0 %v5218_v25  ;;  %7174 = vmatprep.mubr.f32.mxu1 %v5232_v46  ;;  %v5233_v55 = vld [vmem:[%s10065_s18 + $0x78] sm:$0xff]  ;;  %v5220_v43 = vld [vmem:[%s10065_s18 + $0x10] sm:$0xff]  ;;  %v5234_v37 = vld [vmem:[%s10065_s18 + $0x80] sm:$0xff] }
 0x66e   : >> { %7320 = vmatpush3.bf16.msra.mxu0 %v7317_v39  ;;  %7412 = vmatpush3.bf16.msra.mxu1 %v7317_v39  ;;  %v5221_v44 = vld [vmem:[%s10065_s18 + $0x18] sm:$0xff]  ;;  %v5235_v45 = vld [vmem:[%s10065_s18 + $0x88] sm:$0xff]  ;;  %v5222_v41 = vld [vmem:[%s10065_s18 + $0x20] sm:$0xff] }
 0x66f   : >> { %7322 = vmatprep.subr.bf16.mxu0 %v7321_v22  ;;  %7405 = vmatprep.subr.bf16.mxu1 %v7321_v22  ;;  %v5236_v48 = vld [vmem:[%s10065_s18 + $0x90] sm:$0xff]  ;;  %v5223_v27 = vld [vmem:[%s10065_s18 + $0x28] sm:$0xff]  ;;  %v5237_v51 = vld [vmem:[%s10065_s18 + $0x98] sm:$0xff] }
 0x670   : >> { %v5224_v60 = vld [vmem:[%s10065_s18 + $0x30] sm:$0xff]  ;;  %v5238_v31 = vld [vmem:[%s10065_s18 + $0xa0] sm:$0xff]  ;;  %v5225_v52 = vld [vmem:[%s10065_s18 + $0x38] sm:$0xff] }
 0x671   : >> { %v5239_v20 = vld [vmem:[%s10065_s18 + $0xa8] sm:$0xff]  ;;  %v5226_v50 = vld [vmem:[%s10065_s18 + $0x40] sm:$0xff]  ;;  %v5240_v9 = vld [vmem:[%s10065_s18 + $0xb0] sm:$0xff] }
 0x672   : >> { %7324 = vmatpush3.bf16.msra.mxu0 %v7321_v22  ;;  %7413 = vmatpush3.bf16.msra.mxu1 %v7321_v22  ;;  %v5227_v29 = vld [vmem:[%s10065_s18 + $0x48] sm:$0xff]  ;;  %v5241_v30 = vld [vmem:[%s10065_s18 + $0xb8] sm:$0xff]  ;;  %v5228_v38 = vld [vmem:[%s10065_s18 + $0x50] sm:$0xff] }
 0x673   : >> { %7326 = vmatprep.subr.bf16.mxu0 %v7325_v10  ;;  %7406 = vmatprep.subr.bf16.mxu1 %v7325_v10  ;;  %v5242_v26 = vld [vmem:[%s10065_s18 + $0xc0] sm:$0xff]  ;;  %v5229_v36 = vld [vmem:[%s10065_s18 + $0x58] sm:$0xff]  ;;  %v5243_v6 = vld [vmem:[%s10065_s18 + $0xc8] sm:$0xff] }
 0x674   : >> { %v5230_v56 = vld [vmem:[%s10065_s18 + $0x60] sm:$0xff]  ;;  %v5244_v35 = vld [vmem:[%s10065_s18 + $0xd0] sm:$0xff]  ;;  %v5231_v63 = vld [vmem:[%s10065_s18 + $0x68] sm:$0xff] }
 0x675   : >> { %v5245_v23 = vld [vmem:[%s10065_s18 + $0xd8] sm:$0xff]  ;;  %v5504_v21 = vld [vmem:[%s10135_s20 + $0x8] sm:$0xff]  ;;  %v5503_v18 = vld [vmem:[%s10135_s20] sm:$0xff] }
 0x676   : >> { %7328 = vmatpush3.bf16.msra.mxu0 %v7325_v10  ;;  %7414 = vmatpush3.bf16.msra.mxu1 %v7325_v10  ;;  %v5518_v4 = vld [vmem:[%s10135_s20 + $0x78] sm:$0xf]  ;;  %v5517_v11 = vld [vmem:[%s10135_s20 + $0x70] sm:$0xff]  ;;  %v5520_v53 = vld [vmem:[%s10135_s20 + $0x88] sm:$0xff] }
 0x677   : >> { %7330 = vmatprep.subr.bf16.mxu0 %v7329_v40  ;;  %7407 = vmatprep.subr.bf16.mxu1 %v7329_v40  ;;  %v5506_v2 = vld [vmem:[%s10135_s20 + $0x18] sm:$0xf]  ;;  %v5505_v0 = vld [vmem:[%s10135_s20 + $0x10] sm:$0xff] }
 0x67a   : >> { %7332 = vmatpush3.bf16.msra.mxu0 %v7329_v40  ;;  %7415 = vmatpush3.bf16.msra.mxu1 %v7329_v40 }
 0x67b   : >> { %7334 = vmatprep.subr.bf16.mxu0 %v7333_v5  ;;  %7408 = vmatprep.subr.bf16.mxu1 %v7333_v5 }
 0x67e   : >> { %7336 = vmatpush3.bf16.msra.mxu0 %v7333_v5  ;;  %7416 = vmatpush3.bf16.msra.mxu1 %v7333_v5 }
 0x67f   : >> { %7338 = vmatprep.subr.bf16.mxu0 %v7337_v34  ;;  %7409 = vmatprep.subr.bf16.mxu1 %v7337_v34 }
 0x682   : >> { %7340 = vmatpush3.bf16.msra.mxu0 %v7337_v34  ;;  %7417 = vmatpush3.bf16.msra.mxu1 %v7337_v34 }
 0x683   : >> { %7342 = vmatprep.subr.bf16.mxu0 %v7341_v1  ;;  %7410 = vmatprep.subr.bf16.mxu1 %v7341_v1 }
 0x686   : >> { %7344 = vmatpush3.bf16.msra.mxu0 %v7341_v1  ;;  %7418 = vmatpush3.bf16.msra.mxu1 %v7341_v1 }
 0x689   : >> { %7154 = vmatmul.mubr.f32.vlgmr.msra.gmra.mrb[0].mxu0 %v5219_v54  ;;  %7175 = vmatmul.mubr.f32.vlgmr.msra.gmra.mrb[0].mxu1 %v5233_v55  ;;  %v5519_v54 = vld [vmem:[%s10135_s20 + $0x80] sm:$0xff] }
 0x68a   : >> { %7156 = vmatprep.mubr.f32.mxu0 %v5220_v43  ;;  %7177 = vmatprep.mubr.f32.mxu1 %v5234_v37 }
 0x68d   : >> { %7157 = vmatmul.mubr.f32.gmra.mrb[2].mxu0 %v5221_v44  ;;  %7178 = vmatmul.mubr.f32.gmra.mrb[2].mxu1 %v5235_v45 }
 0x68e   : >> { %7159 = vmatprep.mubr.f32.mxu0 %v5222_v41  ;;  %7180 = vmatprep.mubr.f32.mxu1 %v5236_v48 }
 0x691   : >> { %7160 = vmatmul.mubr.f32.gmra.mrb[4].mxu0 %v5223_v27  ;;  %7181 = vmatmul.mubr.f32.gmra.mrb[4].mxu1 %v5237_v51 }
 0x692   : >> { %7162 = vmatprep.mubr.f32.mxu0 %v5224_v60  ;;  %7183 = vmatprep.mubr.f32.mxu1 %v5238_v31 }
 0x695   : >> { %7163 = vmatmul.mubr.f32.gmra.mrb[6].mxu0 %v5225_v52  ;;  %7184 = vmatmul.mubr.f32.gmra.mrb[6].mxu1 %v5239_v20  ;;  %v5508_v52 = vld [vmem:[%s10135_s20 + $0x28] sm:$0xff] }
 0x696   : >> { %7165 = vmatprep.mubr.f32.mxu0 %v5226_v50  ;;  %7186 = vmatprep.mubr.f32.mxu1 %v5240_v9  ;;  %v5522_v9 = vld [vmem:[%s10135_s20 + $0x98] sm:$0xf] }
 0x699   : >> { %7166 = vmatmul.mubr.f32.gmra.mrb[8].mxu0 %v5227_v29  ;;  %7187 = vmatmul.mubr.f32.gmra.mrb[8].mxu1 %v5241_v30 }
 0x69a   : >> { %7168 = vmatprep.mubr.f32.mxu0 %v5228_v38  ;;  %7189 = vmatprep.mubr.f32.mxu1 %v5242_v26  ;;  %v5507_v38 = vld [vmem:[%s10135_s20 + $0x20] sm:$0xff] }
 0x69d   : >> { %7169 = vmatmul.mubr.f32.gmra.mrb[10].mxu0 %v5229_v36  ;;  %7190 = vmatmul.mubr.f32.gmra.mrb[10].mxu1 %v5243_v6  ;;  %v5521_v36 = vld [vmem:[%s10135_s20 + $0x90] sm:$0xff] }
 0x69e   : >> { %7171 = vmatprep.mubr.f32.mxu0 %v5230_v56  ;;  %7192 = vmatprep.mubr.f32.mxu1 %v5244_v35 }
 0x6a1   : >> { %7172 = vmatmul.mubr.f32.gmra.mrb[12].mxu0 %v5231_v63  ;;  %7193 = vmatmul.mubr.f32.gmra.mrb[12].mxu1 %v5245_v23 }
 0x75c   : >> { %v7155_v32 = vpop.f32.mrb[0].mxu0  ;;  %v7176_v59 = vpop.f32.mrb[0].mxu1 }
 0x75d   : >> { %v5341_v61 = vadd.f32 %v7155_v32, %v10128_v16  ;;  %v5335_v62 = vpop.f32.mrb[1].mxu0  ;;  %v5411_v33 = vadd.f32 %v7176_v59, %v10128_v16  ;;  %v5405_v7 = vpop.f32.mrb[1].mxu1 }
 0x75e   : >> { %v5336_v13 = vadd.f32 %v10128_v16, %v5335_v62  ;;  %v5406_v15 = vadd.f32 %v10128_v16, %v5405_v7 }
 0x75f   : >> { %v5475_v58 = vmax.f32 %v5341_v61, 0.0  ;;  %v5489_v39 = vmax.f32 %v5411_v33, 0.0 }
 0x760   : >> { %v5474_v12 = vmax.f32 %v5336_v13, 0.0  ;;  %v7158_v22 = vpop.f32.mrb[2].mxu0  ;;  %v5488_v25 = vmax.f32 %v5406_v15, 0.0  ;;  %v7179_v3 = vpop.f32.mrb[2].mxu1  ;;  %v5524_v15 = vld [vmem:[%s10135_s20 + $0xa8] sm:$0xff] }
 0x761   : >> { %v5532_v19 = vmul.f32 %v5504_v21, %v5475_v58  ;;  %v5351_v46 = vadd.f32 %v7158_v22, %v10128_v16  ;;  %v5345_v10 = vpop.f32.mrb[3].mxu0  ;;  %v10146_v49 = vmul.f32 %v5518_v4, %v5489_v39  ;;  %v5421_v14 = vadd.f32 %v7179_v3, %v10128_v16  ;;  %v5415_v40 = vpop.f32.mrb[3].mxu1  ;;  %v5510_v21 = vld [vmem:[%s10135_s20 + $0x38] sm:$0xf]  ;;  %v5523_v22 = vld [vmem:[%s10135_s20 + $0xa0] sm:$0xff] }
 0x762   : >> { %v5531_v24 = vmul.f32 %v5503_v18, %v5474_v12  ;;  %v5346_v5 = vadd.f32 %v10128_v16, %v5345_v10  ;;  %v10151_v8 = vmul.f32 %v5517_v11, %v5488_v25  ;;  %v5416_v34 = vadd.f32 %v10128_v16, %v5415_v40  ;;  %v5509_v11 = vld [vmem:[%s10135_s20 + $0x30] sm:$0xff] }
 0x763   : >> { %v5477_v42 = vmax.f32 %v5351_v46, 0.0  ;;  %v5491_v1 = vmax.f32 %v5421_v14, 0.0 }
 0x764   : >> { %v5476_v55 = vmax.f32 %v5346_v5, 0.0  ;;  %v7161_v43 = vpop.f32.mrb[4].mxu0  ;;  %v5490_v37 = vmax.f32 %v5416_v34, 0.0  ;;  %v7182_v44 = vpop.f32.mrb[4].mxu1 }
 0x765   : >> { %v5534_v45 = vmul.f32 %v5506_v2, %v5477_v42  ;;  %v5361_v41 = vadd.f32 %v7161_v43, %v10128_v16  ;;  %v5355_v48 = vpop.f32.mrb[5].mxu0  ;;  %v10158_v27 = vmul.f32 %v5520_v53, %v5491_v1  ;;  %v5431_v51 = vadd.f32 %v7182_v44, %v10128_v16  ;;  %v5425_v60 = vpop.f32.mrb[5].mxu1 }
 0x766   : >> { %v5533_v31 = vmul.f32 %v5505_v0, %v5476_v55  ;;  %v5356_v20 = vadd.f32 %v10128_v16, %v5355_v48  ;;  %v10163_v50 = vmul.f32 %v5519_v54, %v5490_v37  ;;  %v5426_v29 = vadd.f32 %v10128_v16, %v5425_v60  ;;  %v5512_v0 = vld [vmem:[%s10135_s20 + $0x48] sm:$0xff]  ;;  %v5526_v54 = vld [vmem:[%s10135_s20 + $0xb8] sm:$0xf] }
 0x767   : >> { %v5479_v30 = vmax.f32 %v5361_v41, 0.0  ;;  %v5493_v26 = vmax.f32 %v5431_v51, 0.0  ;;  %v5578_v43 = vsel %vm3770_vm6, %v5534_v45, 0.0  ;;  %v5511_v41 = vld [vmem:[%s10135_s20 + $0x40] sm:$0xff]  ;;  %v5525_v51 = vld [vmem:[%s10135_s20 + $0xb0] sm:$0xff] }
 0x768   : >> { %v5478_v6 = vmax.f32 %v5356_v20, 0.0  ;;  %v7164_v56 = vpop.f32.mrb[6].mxu0  ;;  %v5492_v35 = vmax.f32 %v5426_v29, 0.0  ;;  %v7185_v63 = vpop.f32.mrb[6].mxu1 }
 0x769   : >> { %v5536_v23 = vmul.f32 %v5508_v52, %v5479_v30  ;;  %v5371_v32 = vadd.f32 %v7164_v56, %v10128_v16  ;;  %v5365_v59 = vpop.f32.mrb[7].mxu0  ;;  %v10170_v61 = vmul.f32 %v5522_v9, %v5493_v26  ;;  %v5441_v62 = vadd.f32 %v7185_v63, %v10128_v16  ;;  %v5435_v33 = vpop.f32.mrb[7].mxu1  ;;  %v5514_v63 = vld [vmem:[%s10135_s20 + $0x58] sm:$0xf] }
 0x76a   : >> { %v5535_v7 = vmul.f32 %v5507_v38, %v5478_v6  ;;  %v5366_v13 = vadd.f32 %v10128_v16, %v5365_v59  ;;  %v10175_v4 = vmul.f32 %v5521_v36, %v5492_v35  ;;  %v5436_v58 = vadd.f32 %v10128_v16, %v5435_v33 }
 0x76b   : >> { %v5565_v18 = vadd.f32 %v5536_v23, %v5532_v19  ;;  %v5481_v39 = vmax.f32 %v5371_v32, 0.0  ;;  %v5495_v12 = vmax.f32 %v5441_v62, 0.0 }
 0x76c   : >> { %v5559_v25 = vadd.f32 %v5535_v7, %v5531_v24  ;;  %v5480_v3 = vmax.f32 %v5366_v13, 0.0  ;;  %v7167_v46 = vpop.f32.mrb[8].mxu0  ;;  %v5494_v10 = vmax.f32 %v5436_v58, 0.0  ;;  %v7188_v14 = vpop.f32.mrb[8].mxu1  ;;  %v5513_v7 = vld [vmem:[%s10135_s20 + $0x50] sm:$0xff]  ;;  %v5527_v13 = vld [vmem:[%s10135_s20 + $0xc0] sm:$0xff] }
 0x76d   : >> { %v5538_v40 = vmul.f32 %v5510_v21, %v5481_v39  ;;  %v5381_v2 = vadd.f32 %v7167_v46, %v10128_v16  ;;  %v5375_v5 = vpop.f32.mrb[9].mxu0  ;;  %v10182_v53 = vmul.f32 %v5524_v15, %v5495_v12  ;;  %v5451_v19 = vadd.f32 %v7188_v14, %v10128_v16  ;;  %v5445_v34 = vpop.f32.mrb[9].mxu1 }
 0x76e   : >> { %v5537_v42 = vmul.f32 %v5509_v11, %v5480_v3  ;;  %v5376_v1 = vadd.f32 %v10128_v16, %v5375_v5  ;;  %v10187_v24 = vmul.f32 %v5523_v22, %v5494_v10  ;;  %v5446_v55 = vadd.f32 %v10128_v16, %v5445_v34 }
 0x76f   : >> { %v5579_v37 = vsel %vm3770_vm6, %v5538_v40, 0.0  ;;  %v5483_v44 = vmax.f32 %v5381_v2, 0.0  ;;  %v5497_v48 = vmax.f32 %v5451_v19, 0.0  ;;  %v5516_v2 = vld [vmem:[%s10135_s20 + $0x68] sm:$0xff] }
 0x770   : >> { %v5580_v60 = vadd.f32 %v5579_v37, %v5578_v43  ;;  %v5571_v52 = vadd.f32 %v5537_v42, %v5533_v31  ;;  %v5482_v20 = vmax.f32 %v5376_v1, 0.0  ;;  %v7170_v9 = vpop.f32.mrb[10].mxu0  ;;  %v5496_v29 = vmax.f32 %v5446_v55, 0.0  ;;  %v7191_v30 = vpop.f32.mrb[10].mxu1  ;;  %v5528_v31 = vld [vmem:[%s10135_s20 + $0xc8] sm:$0xff]  ;;  %v5515_v1 = vld [vmem:[%s10135_s20 + $0x60] sm:$0xff] }
 0x771   : >> { %v5540_v38 = vmul.f32 %v5512_v0, %v5483_v44  ;;  %v5391_v26 = vadd.f32 %v7170_v9, %v10128_v16  ;;  %v5385_v45 = vpop.f32.mrb[11].mxu0  ;;  %v5554_v36 = vmul.f32 %v5526_v54, %v5497_v48  ;;  %v5461_v6 = vadd.f32 %v7191_v30, %v10128_v16  ;;  %v5455_v56 = vpop.f32.mrb[11].mxu1  ;;  %v5529_v55 = vld [vmem:[%s10135_s20 + $0xd0] sm:$0xff] }
 0x772   : >> { %v5539_v35 = vmul.f32 %v5511_v41, %v5482_v20  ;;  %v5386_v23 = vadd.f32 %v10128_v16, %v5385_v45  ;;  %v5553_v32 = vmul.f32 %v5525_v51, %v5496_v29  ;;  %v5456_v59 = vadd.f32 %v10128_v16, %v5455_v56 }
 0x773   : >> { %v5566_v62 = vadd.f32 %v5565_v18, %v5540_v38  ;;  %v5485_v33 = vmax.f32 %v5391_v26, 0.0  ;;  %v5499_v21 = vmax.f32 %v5461_v6, 0.0  ;;  %v5583_v48 = vsel %vm3770_vm6, %v10146_v49, 0.0 }
 0x774   : >> { %v5560_v15 = vadd.f32 %v5559_v25, %v5539_v35  ;;  %v5484_v58 = vmax.f32 %v5386_v23, 0.0  ;;  %v7173_v39 = vpop.f32.mrb[12].mxu0  ;;  %v5498_v11 = vmax.f32 %v5456_v59, 0.0  ;;  %v7194_v12 = vpop.f32.mrb[12].mxu1  ;;  %v5530_v25 = vld [vmem:[%s10135_s20 + $0xd8] sm:$0xf] }
 0x775   : >> { %v5542_v22 = vmul.f32 %v5514_v63, %v5485_v33  ;;  %v5401_v3 = vadd.f32 %v7173_v39, %v10128_v16  ;;  %v5395_v46 = vpop.f32.mrb[13].mxu0  ;;  %v5556_v10 = vmul.f32 %v5528_v31, %v5499_v21  ;;  %v5471_v18 = vadd.f32 %v7194_v12, %v10128_v16  ;;  %v5465_v14 = vpop.f32.mrb[13].mxu1  ;;  %v5610_v12 = vld [vmem:[#allocation10] sm:$0x1] (%p5207_p1) }
 0x776   : >> { %v5541_v40 = vmul.f32 %v5513_v7, %v5484_v58  ;;  %v5396_v5 = vadd.f32 %v10128_v16, %v5395_v46  ;;  %v5555_v19 = vmul.f32 %v5527_v13, %v5498_v11  ;;  %v5466_v34 = vadd.f32 %v10128_v16, %v5465_v14 }
 0x777   : >> { %v5581_v42 = vsel %vm3770_vm6, %v5542_v22, 0.0  ;;  %v5487_v0 = vmax.f32 %v5401_v3, 0.0  ;;  %v5501_v54 = vmax.f32 %v5471_v18, 0.0  ;;  %v5585_v38 = vsel %vm3770_vm6, %v10170_v61, 0.0 }
 0x778   : >> { %v5582_v43 = vadd.f32 %v5581_v42, %v5580_v60  ;;  %v5572_v37 = vadd.f32 %v5571_v52, %v5541_v40  ;;  %v5486_v44 = vmax.f32 %v5396_v5, 0.0  ;;  %v5500_v41 = vmax.f32 %v5466_v34, 0.0 }
 0x779   : >> { %v5544_v51 = vmul.f32 %v5516_v2, %v5487_v0  ;;  %v5558_v20 = vmul.f32 %v5530_v25, %v5501_v54  ;;  %v5587_v6 = vsel %vm3770_vm6, %v5554_v36, 0.0 }
 0x77a   : >> { %v5584_v9 = vadd.f32 %v5583_v48, %v5582_v43  ;;  %v5573_v29 = vadd.f32 %v5572_v37, %v10151_v8  ;;  %v5543_v30 = vmul.f32 %v5515_v1, %v5486_v44  ;;  %v5557_v16 = vmul.f32 %v5529_v55, %v5500_v41 }
 0x77b   : >> { %v5567_v26 = vadd.f32 %v5566_v62, %v5544_v51  ;;  %v5589_v49 = vsel %vm3770_vm6, %v5558_v20, 0.0 }
 0x77c   : >> { %v5586_v45 = vadd.f32 %v5585_v38, %v5584_v9  ;;  %v5574_v60 = vadd.f32 %v5573_v29, %v10175_v4  ;;  %v5561_v52 = vadd.f32 %v5560_v15, %v5543_v30 }
 0x77d   : >> { %v5568_v56 = vadd.f32 %v5567_v26, %v10158_v27 }
 0x77e   : >> { %v5588_v35 = vadd.f32 %v5587_v6, %v5586_v45  ;;  %v5575_v63 = vadd.f32 %v5574_v60, %v5553_v32  ;;  %v5562_v8 = vadd.f32 %v5561_v52, %v10163_v50 }
 0x77f   : >> { %v5569_v23 = vadd.f32 %v5568_v56, %v10182_v53 }
 0x780   : >> { %v5563_v31 = vadd.f32 %v5562_v8, %v10187_v24  ;;  %v5590_v61 = vadd.f32 %v5589_v49, %v5588_v35  ;;  %v5576_v59 = vadd.f32 %v5575_v63, %v5557_v16  ;;  %5209 = sbr.rel (!%p5207_p1) target bundleno = 1638 (0x666), region = 533 }
 0x781   : >> { %v5570_v62 = vadd.f32 %v5569_v23, %v5556_v10 }
 0x782   : >> { %v5564_v33 = vadd.f32 %v5563_v31, %v5555_v19  ;;  %v5594_v4 = vadd.f32 %v7727_v17, %v5590_v61   ;;  %v5593_v36 = vadd.f32 %v7731_v47, %v5576_v59  }
 0x783   : >> { %v5592_v27 = vadd.f32 %v7735_v28, %v5570_v62  }
 0x784   : >> { %v5591_v7 = vadd.f32 %v7739_v57, %v5564_v33   ;;  %v10293_v17 = vmov %v5594_v4  ;;  %v10294_v47 = vmov %v5593_v36  ;;  %v5598_v53 = vsel (%p5207_p1), %vm3770_vm6, %v5594_v4, 0.0 }
 0x785   : >> { %v10295_v28 = vmov %v5592_v27 }
 0x786   : >> { %v10296_v57 = vmov %v5591_v7  ;;  %v5595_v50 = vadd.f32 (%p5207_p1), %v5592_v27, %v5591_v7 }
 0x788   : > { %v5596_v24 = vadd.f32 %v5595_v50, %v5593_v36 }
 0x78a   : > { %v5599_v57 = vadd.f32 %v5598_v53, %v5596_v24 }
 0x78c   : > { %5600 = vadd.xlane.f32.xlu0 %v5599_v57 }
 0x819   : > { %v5601_v32 = vpop.xlane.xlu0 %5600 }
 0x81a   : > { %v5602_v21 = vrot.slane %v5601_v32, 4 }
 0x81c   : > { %v5603_v13 = vadd.f32 %v5602_v21, %v5601_v32 }
 0x81e   : > { %v5604_v15 = vrot.slane %v5603_v13, 2 }
 0x820   : > { %v5605_v58 = vadd.f32 %v5604_v15, %v5603_v13 }
 0x822   : > { %v5606_v39 = vrot.slane %v5605_v58, 1 }
 0x824   : > { %v5607_v11 = vadd.f32 %v5606_v39, %v5605_v58 }
 0x826   : > { %7422 = vpush %v5607_v11 }
 0x857   : > { %s7423_s28 = spop %7422 }
 0x858   : > { %v5609_v22 = vstv %s7423_s28 }
 0x859   : > { %v5611_v3 = vadd.f32 %v5610_v12, %v5609_v22 }
 0x85b   : > { %5613 = vst.msk [vmem:[%s10297_s29] sm:$0x1] %vm5612_vm7, %v5611_v3 }
 0x85c PF: > { %s10298_s29 = sld [smem:[#allocation15_spill]]  ;;  %s10299_s19 = sld [smem:[#allocation14_spill]] }
 0x85d   : > { %s10300_s28 = sld [smem:[#allocation16_spill]]  ;;  %s10301_s26 = smov %s7683_s27 }
 0x862   : > { %p29_p2 = scmp.ge.s32.totalorder %s10298_s29, 4   ;;  %s10302_s27 = smov %s10299_s19 }
 0x864   :  { %31 = sbr.rel (!%p29_p2) target bundleno = 7 (0x7), region = 544 }
 0x86b   :  { %5631 = vsyncpa [#allocation12], 1 }
 0x86c   :  { %5633 = vsyncpa [#allocation12 + $0x1], 1 }

</bundles_post_ra>
